<compile_context>
chip_gen: v7x
topology: tpu7x:2x2x1
jax: 0.10.0
libtpu: 0.0.40
codegen_flags: <defaults>
</compile_context>

<pallas_src>
import jax
import jax.numpy as jnp
from jax.experimental import pallas as pl
from jax.experimental.pallas import tpu as pltpu


_CONV_CIN = 128                 # padded input-channel count shared by all 3x3 convs
_MATMUL_DTYPE = jnp.bfloat16    # MXU operand dtype (f32 accumulate, f32 epilogue)


# ----------------------------------------------------------------------------
# Fused whole-network kernel (TB batch samples per grid step)
# ----------------------------------------------------------------------------
def _make_alphanet_kernel(H, W, n_res, action_size, tb):
    HW = H * W
    C = _CONV_CIN
    M = tb * HW                  # rows of every conv / head matmul

    def kernel(x_ref,
               convw_ref, convs_ref, convb_ref,
               whead_ref, shead_ref, bhead_ref,
               fc1w_ref, fc1b_ref, fc2w_ref, fc2b_ref,
               fcw_ref, fcb_ref,
               p_ref, v_ref,
               pad_ref, patch_ref):
        # Zero only the halo border ring each step; every conv rewrites the
        # whole interior before the patch matrix is rebuilt.  Per-step (not
        # program_id==0-gated) so each TensorCore's private scratch is valid.
        zdt = pad_ref.dtype
        pad_ref[0:1, :, :, :] = jnp.zeros((1, W + 2, tb, C), zdt)
        pad_ref[H + 1:H + 2, :, :, :] = jnp.zeros((1, W + 2, tb, C), zdt)
        pad_ref[:, 0:1, :, :] = jnp.zeros((H + 2, 1, tb, C), zdt)
        pad_ref[:, W + 1:W + 2, :, :] = jnp.zeros((H + 2, 1, tb, C), zdt)

        def conv3x3(src_hwbc, idx, relu):
            """3x3 conv (pad=1) + folded BN affine (+ optional ReLU), TB samples.

            src_hwbc: (H, W, TB, 128).  Returns (H*W*TB, 128) f32, rows ordered
            (hw-major, batch-minor) — matching the input layout.
            """
            pad_ref[1:H + 1, 1:W + 1, :, :] = src_hwbc.astype(pad_ref.dtype)
            # im2col: 9 shifted windows -> (M, 9*128) bf16 patch matrix in VMEM.
            for kh in range(3):
                for kw in range(3):
                    t = (kh * 3 + kw) * C
                    patch_ref[:, t:t + C] = (
                        pad_ref[kh:kh + H, kw:kw + W, :, :].reshape(M, C))
            y = jnp.dot(patch_ref[...], convw_ref[idx],
                        preferred_element_type=jnp.float32)
            y = y * convs_ref[idx] + convb_ref[idx]
            return jnp.maximum(y, 0.0) if relu else y

        # ---- ConvBlock (layer 0) --------------------------------------------
        # (the torch .view(*reshape_size) is an identity: input already NCHW)
        s = conv3x3(x_ref[...], 0, relu=True)                     # (M, 128) f32

        # ---- ResBlocks (layers 1 .. 2*n_res) ---------------------------------
        # TODO(synk): for n_res >~ 10 switch to lax.fori_loop with dynamic
        # convw_ref indexing to bound code size / vreg pressure.
        for r in range(n_res):
            res_in = s
            h = conv3x3(s.reshape(H, W, tb, C), 1 + 2 * r, relu=True)
            s = conv3x3(h.reshape(H, W, tb, C), 2 + 2 * r, relu=False)
            s = jnp.maximum(s + res_in, 0.0)                      # residual + ReLU

        # ---- OutBlock: fused value(3)+policy(32) 1x1 convs + BN + ReLU -------
        heads = jnp.dot(s.astype(whead_ref.dtype), whead_ref[...],
                        preferred_element_type=jnp.float32)       # (M, 35)
        heads = jnp.maximum(heads * shead_ref[...] + bhead_ref[...], 0.0)

        # ---- value head: fc1 + ReLU -> fc2 + tanh ----------------------------
        # torch's NCHW c-major flatten is folded into fc1_w's (HW, 3, 32)
        # per-pixel layout; the hw reduction is one batched einsum + vreg sum.
        v3 = heads[:, 0:3].reshape(HW, tb, 3)
        qv = jnp.einsum('hbc,hcd->hbd', v3.astype(fc1w_ref.dtype), fc1w_ref[...],
                        preferred_element_type=jnp.float32)        # (HW, TB, 32)
        v1 = jnp.maximum(jnp.sum(qv, axis=0) + fc1b_ref[...], 0.0)  # (TB, 32)
        v2 = jnp.dot(v1.astype(fc2w_ref.dtype), fc2w_ref[...],
                     preferred_element_type=jnp.float32) + fc2b_ref[...]
        v_ref[...] = jnp.tanh(v2)                                   # (TB, 1)

        # ---- policy head: fc -> softmax --------------------------------------
        p3 = heads[:, 3:3 + 32].reshape(HW, tb, 32)
        qp = jnp.einsum('hbc,hca->hba', p3.astype(fcw_ref.dtype), fcw_ref[...],
                        preferred_element_type=jnp.float32)        # (HW, TB, A)
        logits = jnp.sum(qp, axis=0) + fcb_ref[...]                # (TB, A)
        # logsoftmax(dim=1).exp() == numerically-stable softmax
        logits = logits - jnp.max(logits, axis=-1, keepdims=True)
        e = jnp.exp(logits)
        p_ref[...] = e / jnp.sum(e, axis=-1, keepdims=True)        # (TB, A)

    return kernel


# ----------------------------------------------------------------------------
# Parameter init (deterministic, synthetic) with BN / conv-bias / layout folding
# ----------------------------------------------------------------------------
def init_params(key, n_res_blocks, H, W, action_size, matmul_dtype=_MATMUL_DTYPE):
    HW = H * W
    eps = 1e-5
    keys = iter(jax.random.split(key, 64))

    def normal(shape, s=0.05):
        return s * jax.random.normal(next(keys), shape, dtype=jnp.float32)

    def bn_fold(c):
        gamma = 1.0 + 0.1 * jax.random.normal(next(keys), (c,), jnp.float32)
        beta = 0.1 * jax.random.normal(next(keys), (c,), jnp.float32)
        mean = 0.1 * jax.random.normal(next(keys), (c,), jnp.float32)
        var = 1.0 + 0.1 * jnp.abs(jax.random.normal(next(keys), (c,), jnp.float32))
        scale = gamma / jnp.sqrt(var + eps)
        return scale, beta - mean * scale

    def im2col_w(w_hwio):
        # (3, 3, cin, cout) -> zero-pad cin to 128 -> (9*128, cout) im2col layout
        _, _, cin, cout = w_hwio.shape
        w = jnp.pad(w_hwio, ((0, 0), (0, 0), (0, _CONV_CIN - cin), (0, 0)))
        return w.reshape(9 * _CONV_CIN, cout)

    conv_w, conv_s, conv_b = [], [], []

    # ConvBlock: Conv2d(3, 128, 3, pad=1) (with bias) + BN(128) + ReLU
    w0 = normal((3, 3, 3, 128))
    b0 = normal((128,))
    sc, bi = bn_fold(128)
    conv_w.append(im2col_w(w0))
    conv_s.append(sc)
    conv_b.append(bi + sc * b0)

    # ResBlocks: 2 x [Conv2d(128,128,3,pad=1,bias=False) + BN(128)] each
    for _ in range(n_res_blocks):
        for _ in range(2):
            w = normal((3, 3, 128, 128))
            sc, bi = bn_fold(128)
            conv_w.append(im2col_w(w))
            conv_s.append(sc)
            conv_b.append(bi)

    params = {
        "conv_w": jnp.stack(conv_w).astype(matmul_dtype),   # (1+2R, 1152, 128)
        "conv_scale": jnp.stack(conv_s)[:, None, :],        # (1+2R, 1, 128) f32
        "conv_bias": jnp.stack(conv_b)[:, None, :],         # (1+2R, 1, 128) f32
    }

    # OutBlock: value conv(128->3)+BN(3) and policy conv(128->32)+BN(32) fused
    # into a single (128, 35) head matmul with a per-column affine.
    wv = normal((128, 3)); bv = normal((3,)); sv, biv = bn_fold(3)
    wp = normal((128, 32)); bp = normal((32,)); sp, bip = bn_fold(32)
    params["w_heads"] = jnp.concatenate([wv, wp], axis=1).astype(matmul_dtype)
    params["s_heads"] = jnp.concatenate([sv, sp])[None, :]                 # (1, 35)
    params["b_heads"] = jnp.concatenate([biv + sv * bv,
                                         bip + sp * bp])[None, :]          # (1, 35)

    # FC heads.  torch flattens NCHW c-major (row j = c*HW + hw); fold that
    # permutation into per-pixel weight blocks so the kernel contracts
    # (hw-batched) without any lane-reshuffling reshape:
    #   W_fold[hw, c, :] = W_torch^T[c*HW + hw, :]
    fc1_w_t = normal((3 * HW, 32)); fc1_b = normal((32,))     # torch-layout W^T
    fc2_w = normal((32, 1)); fc2_b = normal((1,))
    fc_w_t = normal((32 * HW, action_size)); fc_b = normal((action_size,))

    fc1_w = fc1_w_t.reshape(3, HW, 32).transpose(1, 0, 2)                 # (HW, 3, 32)
    fc_w = fc_w_t.reshape(32, HW, action_size).transpose(1, 0, 2)         # (HW, 32, A)

    params.update({
        "fc1_w": fc1_w.astype(matmul_dtype), "fc1_b": fc1_b[None, :],
        "fc2_w": fc2_w.astype(matmul_dtype), "fc2_b": fc2_b[None, :],
        "fc_w": fc_w.astype(matmul_dtype), "fc_b": fc_b[None, :],
    })
    return params


# ----------------------------------------------------------------------------
# Full forward pass: one fused pallas_call, TB samples per grid step
# ----------------------------------------------------------------------------
def alphanet_forward(x_nchw, params, tb=8):
    """tb*H*W ~ 128 fills v5e's MXU (tb=8 on a 4x4 board); use tb=16 on v6e/v7x."""
    N, cin, H, W = x_nchw.shape
    C = _CONV_CIN
    action_size = params["fc_b"].shape[-1]
    n_res = (params["conv_w"].shape[0] - 1) // 2

    # NCHW -> (H, W, N, C): channels on lanes, batch on sublanes (hw-major row
    # order inside the kernel).  Cast to the bf16 MXU operand dtype and zero-pad
    # channels 3 -> 128 once so the ConvBlock reuses the res-conv im2col path
    # (padded channels multiply zero weight rows -> numerics unchanged).
    # TODO(synk): pad only to 8 channels + dedicated first-layer matmul if the
    # input DMA ever shows in a profile.
    x = jnp.transpose(x_nchw, (2, 3, 0, 1)).astype(_MATMUL_DTYPE)   # (H, W, N, 3)
    x = jnp.pad(x, ((0, 0), (0, 0), (0, 0), (0, C - cin)))

    # Pad the batch to a multiple of TB (padded samples computed, then dropped).
    n_pad = ((N + tb - 1) // tb) * tb
    if n_pad != N:
        x = jnp.pad(x, ((0, 0), (0, 0), (0, n_pad - N), (0, 0)))

    args = (x,
            params["conv_w"], params["conv_scale"], params["conv_bias"],
            params["w_heads"], params["s_heads"], params["b_heads"],
            params["fc1_w"], params["fc1_b"], params["fc2_w"], params["fc2_b"],
            params["fc_w"], params["fc_b"])

    def resident_spec(a):
        # whole-array block + constant block index -> fetched once per core,
        # stays VMEM-resident for all grid steps.
        nd = a.ndim
        return pl.BlockSpec(a.shape, lambda n, _nd=nd: (0,) * _nd)

    in_specs = [pl.BlockSpec((H, W, tb, C), lambda n: (0, 0, n, 0))]
    in_specs += [resident_spec(a) for a in args[1:]]
    out_specs = (pl.BlockSpec((tb, action_size), lambda n: (n, 0)),
                 pl.BlockSpec((tb, 1), lambda n: (n, 0)))
    out_shape = (jax.ShapeDtypeStruct((n_pad, action_size), jnp.float32),
                 jax.ShapeDtypeStruct((n_pad, 1), jnp.float32))

    kernel = _make_alphanet_kernel(H, W, n_res, action_size, tb)
    p, v = pl.pallas_call(
        kernel,
        grid=(n_pad // tb,),               # TB samples per grid step
        in_specs=in_specs,
        out_specs=out_specs,
        out_shape=out_shape,
        scratch_shapes=[
            pltpu.VMEM((H + 2, W + 2, tb, C), _MATMUL_DTYPE),   # zero-border halo
            pltpu.VMEM((tb * H * W, 9 * C), _MATMUL_DTYPE),     # im2col patch
        ],
        compiler_params=pltpu.CompilerParams(
            # batch axis "parallel": shards across v7x's 2 TCs, no-op v5e/v6e
            dimension_semantics=("parallel",),
            vmem_limit_bytes=32 * 1024 * 1024,
        ),
    )(*args)
    return p[:N], v[:N]


if __name__ == "__main__":
    key = jax.random.PRNGKey(0)
    kx, kp = jax.random.split(key)

    # small game: 4x4 board, 3 input planes, game_dim = 16, action_size = 16,
    # 2 res blocks; batch 16 -> 2 grid steps of TB=8 samples (TB*HW = 128 rows).
    N, H, W = 16, 4, 4
    action_size = 16
    n_res_blocks = 2

    x = jax.random.normal(kx, (N, 3, H, W), dtype=jnp.float32)
    params = init_params(kp, n_res_blocks, H, W, action_size)

    fwd = jax.jit(alphanet_forward)
    p, v = fwd(x, params)
    jax.block_until_ready((p, v))

    assert p.shape == (N, action_size), p.shape
    assert v.shape == (N, 1), v.shape
    assert bool(jnp.all(jnp.isfinite(p))) and bool(jnp.all(jnp.isfinite(v)))
    assert bool(jnp.allclose(jnp.sum(p, axis=-1), 1.0, atol=1e-4))  # softmax rows
    assert bool(jnp.all(jnp.abs(v) <= 1.0 + 1e-6))                  # tanh range

    print("KERNEL_OK")
</pallas_src>

<mosaic_0001>
module attributes {stable_mosaic.version = 11 : i64} {
  func.func @kernel(%arg0: i32, %arg1: memref<4x4x8x128xbf16, #tpu.memory_space<vmem>>, %arg2: memref<5x1152x128xbf16, #tpu.memory_space<vmem>>, %arg3: memref<5x1x128xf32, #tpu.memory_space<vmem>>, %arg4: memref<5x1x128xf32, #tpu.memory_space<vmem>>, %arg5: memref<128x35xbf16, #tpu.memory_space<vmem>>, %arg6: memref<1x35xf32, #tpu.memory_space<vmem>>, %arg7: memref<1x35xf32, #tpu.memory_space<vmem>>, %arg8: memref<16x3x32xbf16, #tpu.memory_space<vmem>>, %arg9: memref<1x32xf32, #tpu.memory_space<vmem>>, %arg10: memref<32x1xbf16, #tpu.memory_space<vmem>>, %arg11: memref<1x1xf32, #tpu.memory_space<vmem>>, %arg12: memref<16x32x16xbf16, #tpu.memory_space<vmem>>, %arg13: memref<1x16xf32, #tpu.memory_space<vmem>>, %arg14: memref<8x16xf32, #tpu.memory_space<vmem>>, %arg15: memref<8x1xf32, #tpu.memory_space<vmem>>, %arg16: memref<6x6x8x128xbf16, #tpu.memory_space<vmem>>, %arg17: memref<128x1152xbf16, #tpu.memory_space<vmem>>) attributes {dimension_semantics = [#tpu.dimension_semantics<parallel>], iteration_bounds = array<i64: 2>, scalar_prefetch = 0 : i64, scratch_operands = 2 : i64, tpu.core_type = #tpu.core_type<tc>, window_params = [{transform_indices = @transform_0, window_bounds = array<i64: 4, 4, 8, 128>}, {pipeline_mode = #tpu.pipeline_mode<synchronous>, transform_indices = @transform_1, window_bounds = array<i64: 5, 1152, 128>}, {pipeline_mode = #tpu.pipeline_mode<synchronous>, transform_indices = @transform_2, window_bounds = array<i64: 5, 1, 128>}, {pipeline_mode = #tpu.pipeline_mode<synchronous>, transform_indices = @transform_3, window_bounds = array<i64: 5, 1, 128>}, {pipeline_mode = #tpu.pipeline_mode<synchronous>, transform_indices = @transform_4, window_bounds = array<i64: 128, 35>}, {pipeline_mode = #tpu.pipeline_mode<synchronous>, transform_indices = @transform_5, window_bounds = array<i64: 1, 35>}, {pipeline_mode = #tpu.pipeline_mode<synchronous>, transform_indices = @transform_6, window_bounds = array<i64: 1, 35>}, {pipeline_mode = #tpu.pipeline_mode<synchronous>, transform_indices = @transform_7, window_bounds = array<i64: 16, 3, 32>}, {pipeline_mode = #tpu.pipeline_mode<synchronous>, transform_indices = @transform_8, window_bounds = array<i64: 1, 32>}, {pipeline_mode = #tpu.pipeline_mode<synchronous>, transform_indices = @transform_9, window_bounds = array<i64: 32, 1>}, {pipeline_mode = #tpu.pipeline_mode<synchronous>, transform_indices = @transform_10, window_bounds = array<i64: 1, 1>}, {pipeline_mode = #tpu.pipeline_mode<synchronous>, transform_indices = @transform_11, window_bounds = array<i64: 16, 32, 16>}, {pipeline_mode = #tpu.pipeline_mode<synchronous>, transform_indices = @transform_12, window_bounds = array<i64: 1, 16>}, {transform_indices = @transform_13, window_bounds = array<i64: 8, 16>}, {transform_indices = @transform_14, window_bounds = array<i64: 8, 1>}]} {
    %cst = arith.constant 0.000000e+00 : bf16
    %0 = vector.broadcast %cst : bf16 to vector<1x6x8x128xbf16>
    %c0 = arith.constant 0 : index
    %c0_0 = arith.constant 0 : index
    %c0_1 = arith.constant 0 : index
    %c0_2 = arith.constant 0 : index
    %1 = vector.load %arg16[%c0, %c0_0, %c0_1, %c0_2] : memref<6x6x8x128xbf16, #tpu.memory_space<vmem>>, vector<1x6x8x128xbf16>
    tpu.vector_store %arg16[%c0, %c0_0, %c0_1, %c0_2], %0 {strides = array<i32>} : memref<6x6x8x128xbf16, #tpu.memory_space<vmem>>, vector<1x6x8x128xbf16>,
    %cst_3 = arith.constant 0.000000e+00 : bf16
    %2 = vector.broadcast %cst_3 : bf16 to vector<1x6x8x128xbf16>
    %c5 = arith.constant 5 : index
    %c0_4 = arith.constant 0 : index
    %c0_5 = arith.constant 0 : index
    %c0_6 = arith.constant 0 : index
    %3 = vector.load %arg16[%c5, %c0_4, %c0_5, %c0_6] : memref<6x6x8x128xbf16, #tpu.memory_space<vmem>>, vector<1x6x8x128xbf16>
    tpu.vector_store %arg16[%c5, %c0_4, %c0_5, %c0_6], %2 {strides = array<i32>} : memref<6x6x8x128xbf16, #tpu.memory_space<vmem>>, vector<1x6x8x128xbf16>,
    %cst_7 = arith.constant 0.000000e+00 : bf16
    %4 = vector.broadcast %cst_7 : bf16 to vector<6x1x8x128xbf16>
    %c0_8 = arith.constant 0 : index
    %c0_9 = arith.constant 0 : index
    %c0_10 = arith.constant 0 : index
    %c0_11 = arith.constant 0 : index
    %5 = vector.load %arg16[%c0_8, %c0_9, %c0_10, %c0_11] : memref<6x6x8x128xbf16, #tpu.memory_space<vmem>>, vector<6x1x8x128xbf16>
    tpu.vector_store %arg16[%c0_8, %c0_9, %c0_10, %c0_11], %4 {strides = array<i32>} : memref<6x6x8x128xbf16, #tpu.memory_space<vmem>>, vector<6x1x8x128xbf16>,
    %cst_12 = arith.constant 0.000000e+00 : bf16
    %6 = vector.broadcast %cst_12 : bf16 to vector<6x1x8x128xbf16>
    %c0_13 = arith.constant 0 : index
    %c5_14 = arith.constant 5 : index
    %c0_15 = arith.constant 0 : index
    %c0_16 = arith.constant 0 : index
    %7 = vector.load %arg16[%c0_13, %c5_14, %c0_15, %c0_16] : memref<6x6x8x128xbf16, #tpu.memory_space<vmem>>, vector<6x1x8x128xbf16>
    tpu.vector_store %arg16[%c0_13, %c5_14, %c0_15, %c0_16], %6 {strides = array<i32>} : memref<6x6x8x128xbf16, #tpu.memory_space<vmem>>, vector<6x1x8x128xbf16>,
    %c0_17 = arith.constant 0 : index
    %c0_18 = arith.constant 0 : index
    %c0_19 = arith.constant 0 : index
    %c0_20 = arith.constant 0 : index
    %8 = vector.load %arg1[%c0_17, %c0_18, %c0_19, %c0_20] : memref<4x4x8x128xbf16, #tpu.memory_space<vmem>>, vector<4x4x8x128xbf16>
    %c1 = arith.constant 1 : index
    %c1_21 = arith.constant 1 : index
    %c0_22 = arith.constant 0 : index
    %c0_23 = arith.constant 0 : index
    %9 = vector.load %arg16[%c1, %c1_21, %c0_22, %c0_23] : memref<6x6x8x128xbf16, #tpu.memory_space<vmem>>, vector<4x4x8x128xbf16>
    tpu.vector_store %arg16[%c1, %c1_21, %c0_22, %c0_23], %8 {strides = array<i32>} : memref<6x6x8x128xbf16, #tpu.memory_space<vmem>>, vector<4x4x8x128xbf16>,
    %c0_24 = arith.constant 0 : index
    %c0_25 = arith.constant 0 : index
    %c0_26 = arith.constant 0 : index
    %c0_27 = arith.constant 0 : index
    %10 = vector.load %arg16[%c0_24, %c0_25, %c0_26, %c0_27] : memref<6x6x8x128xbf16, #tpu.memory_space<vmem>>, vector<4x4x8x128xbf16>
    %11 = vector.shape_cast %10 : vector<4x4x8x128xbf16> to vector<128x128xbf16>
    %c0_28 = arith.constant 0 : index
    %c0_29 = arith.constant 0 : index
    %12 = vector.load %arg17[%c0_28, %c0_29] : memref<128x1152xbf16, #tpu.memory_space<vmem>>, vector<128x128xbf16>
    tpu.vector_store %arg17[%c0_28, %c0_29], %11 {strides = array<i32>} : memref<128x1152xbf16, #tpu.memory_space<vmem>>, vector<128x128xbf16>,
    %c0_30 = arith.constant 0 : index
    %c1_31 = arith.constant 1 : index
    %c0_32 = arith.constant 0 : index
    %c0_33 = arith.constant 0 : index
    %13 = vector.load %arg16[%c0_30, %c1_31, %c0_32, %c0_33] : memref<6x6x8x128xbf16, #tpu.memory_space<vmem>>, vector<4x4x8x128xbf16>
    %14 = vector.shape_cast %13 : vector<4x4x8x128xbf16> to vector<128x128xbf16>
    %c0_34 = arith.constant 0 : index
    %c128 = arith.constant 128 : index
    %15 = vector.load %arg17[%c0_34, %c128] : memref<128x1152xbf16, #tpu.memory_space<vmem>>, vector<128x128xbf16>
    tpu.vector_store %arg17[%c0_34, %c128], %14 {strides = array<i32>} : memref<128x1152xbf16, #tpu.memory_space<vmem>>, vector<128x128xbf16>,
    %c0_35 = arith.constant 0 : index
    %c2 = arith.constant 2 : index
    %c0_36 = arith.constant 0 : index
    %c0_37 = arith.constant 0 : index
    %16 = vector.load %arg16[%c0_35, %c2, %c0_36, %c0_37] : memref<6x6x8x128xbf16, #tpu.memory_space<vmem>>, vector<4x4x8x128xbf16>
    %17 = vector.shape_cast %16 : vector<4x4x8x128xbf16> to vector<128x128xbf16>
    %c0_38 = arith.constant 0 : index
    %c256 = arith.constant 256 : index
    %18 = vector.load %arg17[%c0_38, %c256] : memref<128x1152xbf16, #tpu.memory_space<vmem>>, vector<128x128xbf16>
    tpu.vector_store %arg17[%c0_38, %c256], %17 {strides = array<i32>} : memref<128x1152xbf16, #tpu.memory_space<vmem>>, vector<128x128xbf16>,
    %c1_39 = arith.constant 1 : index
    %c0_40 = arith.constant 0 : index
    %c0_41 = arith.constant 0 : index
    %c0_42 = arith.constant 0 : index
    %19 = vector.load %arg16[%c1_39, %c0_40, %c0_41, %c0_42] : memref<6x6x8x128xbf16, #tpu.memory_space<vmem>>, vector<4x4x8x128xbf16>
    %20 = vector.shape_cast %19 : vector<4x4x8x128xbf16> to vector<128x128xbf16>
    %c0_43 = arith.constant 0 : index
    %c384 = arith.constant 384 : index
    %21 = vector.load %arg17[%c0_43, %c384] : memref<128x1152xbf16, #tpu.memory_space<vmem>>, vector<128x128xbf16>
    tpu.vector_store %arg17[%c0_43, %c384], %20 {strides = array<i32>} : memref<128x1152xbf16, #tpu.memory_space<vmem>>, vector<128x128xbf16>,
    %c1_44 = arith.constant 1 : index
    %c1_45 = arith.constant 1 : index
    %c0_46 = arith.constant 0 : index
    %c0_47 = arith.constant 0 : index
    %22 = vector.load %arg16[%c1_44, %c1_45, %c0_46, %c0_47] : memref<6x6x8x128xbf16, #tpu.memory_space<vmem>>, vector<4x4x8x128xbf16>
    %23 = vector.shape_cast %22 : vector<4x4x8x128xbf16> to vector<128x128xbf16>
    %c0_48 = arith.constant 0 : index
    %c512 = arith.constant 512 : index
    %24 = vector.load %arg17[%c0_48, %c512] : memref<128x1152xbf16, #tpu.memory_space<vmem>>, vector<128x128xbf16>
    tpu.vector_store %arg17[%c0_48, %c512], %23 {strides = array<i32>} : memref<128x1152xbf16, #tpu.memory_space<vmem>>, vector<128x128xbf16>,
    %c1_49 = arith.constant 1 : index
    %c2_50 = arith.constant 2 : index
    %c0_51 = arith.constant 0 : index
    %c0_52 = arith.constant 0 : index
    %25 = vector.load %arg16[%c1_49, %c2_50, %c0_51, %c0_52] : memref<6x6x8x128xbf16, #tpu.memory_space<vmem>>, vector<4x4x8x128xbf16>
    %26 = vector.shape_cast %25 : vector<4x4x8x128xbf16> to vector<128x128xbf16>
    %c0_53 = arith.constant 0 : index
    %c640 = arith.constant 640 : index
    %27 = vector.load %arg17[%c0_53, %c640] : memref<128x1152xbf16, #tpu.memory_space<vmem>>, vector<128x128xbf16>
    tpu.vector_store %arg17[%c0_53, %c640], %26 {strides = array<i32>} : memref<128x1152xbf16, #tpu.memory_space<vmem>>, vector<128x128xbf16>,
    %c2_54 = arith.constant 2 : index
    %c0_55 = arith.constant 0 : index
    %c0_56 = arith.constant 0 : index
    %c0_57 = arith.constant 0 : index
    %28 = vector.load %arg16[%c2_54, %c0_55, %c0_56, %c0_57] : memref<6x6x8x128xbf16, #tpu.memory_space<vmem>>, vector<4x4x8x128xbf16>
    %29 = vector.shape_cast %28 : vector<4x4x8x128xbf16> to vector<128x128xbf16>
    %c0_58 = arith.constant 0 : index
    %c768 = arith.constant 768 : index
    %30 = vector.load %arg17[%c0_58, %c768] : memref<128x1152xbf16, #tpu.memory_space<vmem>>, vector<128x128xbf16>
    tpu.vector_store %arg17[%c0_58, %c768], %29 {strides = array<i32>} : memref<128x1152xbf16, #tpu.memory_space<vmem>>, vector<128x128xbf16>,
    %c2_59 = arith.constant 2 : index
    %c1_60 = arith.constant 1 : index
    %c0_61 = arith.constant 0 : index
    %c0_62 = arith.constant 0 : index
    %31 = vector.load %arg16[%c2_59, %c1_60, %c0_61, %c0_62] : memref<6x6x8x128xbf16, #tpu.memory_space<vmem>>, vector<4x4x8x128xbf16>
    %32 = vector.shape_cast %31 : vector<4x4x8x128xbf16> to vector<128x128xbf16>
    %c0_63 = arith.constant 0 : index
    %c896 = arith.constant 896 : index
    %33 = vector.load %arg17[%c0_63, %c896] : memref<128x1152xbf16, #tpu.memory_space<vmem>>, vector<128x128xbf16>
    tpu.vector_store %arg17[%c0_63, %c896], %32 {strides = array<i32>} : memref<128x1152xbf16, #tpu.memory_space<vmem>>, vector<128x128xbf16>,
    %c2_64 = arith.constant 2 : index
    %c2_65 = arith.constant 2 : index
    %c0_66 = arith.constant 0 : index
    %c0_67 = arith.constant 0 : index
    %34 = vector.load %arg16[%c2_64, %c2_65, %c0_66, %c0_67] : memref<6x6x8x128xbf16, #tpu.memory_space<vmem>>, vector<4x4x8x128xbf16>
    %35 = vector.shape_cast %34 : vector<4x4x8x128xbf16> to vector<128x128xbf16>
    %c0_68 = arith.constant 0 : index
    %c1024 = arith.constant 1024 : index
    %36 = vector.load %arg17[%c0_68, %c1024] : memref<128x1152xbf16, #tpu.memory_space<vmem>>, vector<128x128xbf16>
    tpu.vector_store %arg17[%c0_68, %c1024], %35 {strides = array<i32>} : memref<128x1152xbf16, #tpu.memory_space<vmem>>, vector<128x128xbf16>,
    %c0_69 = arith.constant 0 : index
    %c0_70 = arith.constant 0 : index
    %37 = vector.load %arg17[%c0_69, %c0_70] : memref<128x1152xbf16, #tpu.memory_space<vmem>>, vector<128x1152xbf16>
    %c0_71 = arith.constant 0 : index
    %c0_72 = arith.constant 0 : index
    %c0_73 = arith.constant 0 : index
    %38 = vector.load %arg2[%c0_71, %c0_72, %c0_73] : memref<5x1152x128xbf16, #tpu.memory_space<vmem>>, vector<1x1152x128xbf16>
    %39 = vector.shape_cast %38 : vector<1x1152x128xbf16> to vector<1152x128xbf16>
    %cst_74 = arith.constant dense<0.000000e+00> : vector<128x128xf32>
    %40 = tpu.matmul %37, %39, %cst_74 {dimension_numbers = #tpu.dot_dimension_numbers<[1], [0], [0], [1], [0, 0, 1, 1], [], []>} : vector<128x1152xbf16>, vector<1152x128xbf16>, vector<128x128xf32> -> vector<128x128xf32>
    %c0_75 = arith.constant 0 : index
    %c0_76 = arith.constant 0 : index
    %c0_77 = arith.constant 0 : index
    %41 = vector.load %arg3[%c0_75, %c0_76, %c0_77] : memref<5x1x128xf32, #tpu.memory_space<vmem>>, vector<1x1x128xf32>
    %42 = vector.shape_cast %41 : vector<1x1x128xf32> to vector<1x128xf32>
    %43 = vector.broadcast %42 : vector<1x128xf32> to vector<128x128xf32>
    %44 = arith.mulf %40, %43 : vector<128x128xf32>
    %c0_78 = arith.constant 0 : index
    %c0_79 = arith.constant 0 : index
    %c0_80 = arith.constant 0 : index
    %45 = vector.load %arg4[%c0_78, %c0_79, %c0_80] : memref<5x1x128xf32, #tpu.memory_space<vmem>>, vector<1x1x128xf32>
    %46 = vector.shape_cast %45 : vector<1x1x128xf32> to vector<1x128xf32>
    %47 = vector.broadcast %46 : vector<1x128xf32> to vector<128x128xf32>
    %48 = arith.addf %44, %47 : vector<128x128xf32>
    %cst_81 = arith.constant 0.000000e+00 : f32
    %49 = vector.broadcast %cst_81 : f32 to vector<128x128xf32>
    %50 = arith.maximumf %48, %49 : vector<128x128xf32>
    %51 = vector.shape_cast %50 : vector<128x128xf32> to vector<4x4x8x128xf32>
    %52 = arith.truncf %51 : vector<4x4x8x128xf32> to vector<4x4x8x128xbf16>
    %c1_82 = arith.constant 1 : index
    %c1_83 = arith.constant 1 : index
    %c0_84 = arith.constant 0 : index
    %c0_85 = arith.constant 0 : index
    %53 = vector.load %arg16[%c1_82, %c1_83, %c0_84, %c0_85] : memref<6x6x8x128xbf16, #tpu.memory_space<vmem>>, vector<4x4x8x128xbf16>
    tpu.vector_store %arg16[%c1_82, %c1_83, %c0_84, %c0_85], %52 {strides = array<i32>} : memref<6x6x8x128xbf16, #tpu.memory_space<vmem>>, vector<4x4x8x128xbf16>,
    %c0_86 = arith.constant 0 : index
    %c0_87 = arith.constant 0 : index
    %c0_88 = arith.constant 0 : index
    %c0_89 = arith.constant 0 : index
    %54 = vector.load %arg16[%c0_86, %c0_87, %c0_88, %c0_89] : memref<6x6x8x128xbf16, #tpu.memory_space<vmem>>, vector<4x4x8x128xbf16>
    %55 = vector.shape_cast %54 : vector<4x4x8x128xbf16> to vector<128x128xbf16>
    %c0_90 = arith.constant 0 : index
    %c0_91 = arith.constant 0 : index
    %56 = vector.load %arg17[%c0_90, %c0_91] : memref<128x1152xbf16, #tpu.memory_space<vmem>>, vector<128x128xbf16>
    tpu.vector_store %arg17[%c0_90, %c0_91], %55 {strides = array<i32>} : memref<128x1152xbf16, #tpu.memory_space<vmem>>, vector<128x128xbf16>,
    %c0_92 = arith.constant 0 : index
    %c1_93 = arith.constant 1 : index
    %c0_94 = arith.constant 0 : index
    %c0_95 = arith.constant 0 : index
    %57 = vector.load %arg16[%c0_92, %c1_93, %c0_94, %c0_95] : memref<6x6x8x128xbf16, #tpu.memory_space<vmem>>, vector<4x4x8x128xbf16>
    %58 = vector.shape_cast %57 : vector<4x4x8x128xbf16> to vector<128x128xbf16>
    %c0_96 = arith.constant 0 : index
    %c128_97 = arith.constant 128 : index
    %59 = vector.load %arg17[%c0_96, %c128_97] : memref<128x1152xbf16, #tpu.memory_space<vmem>>, vector<128x128xbf16>
    tpu.vector_store %arg17[%c0_96, %c128_97], %58 {strides = array<i32>} : memref<128x1152xbf16, #tpu.memory_space<vmem>>, vector<128x128xbf16>,
    %c0_98 = arith.constant 0 : index
    %c2_99 = arith.constant 2 : index
    %c0_100 = arith.constant 0 : index
    %c0_101 = arith.constant 0 : index
    %60 = vector.load %arg16[%c0_98, %c2_99, %c0_100, %c0_101] : memref<6x6x8x128xbf16, #tpu.memory_space<vmem>>, vector<4x4x8x128xbf16>
    %61 = vector.shape_cast %60 : vector<4x4x8x128xbf16> to vector<128x128xbf16>
    %c0_102 = arith.constant 0 : index
    %c256_103 = arith.constant 256 : index
    %62 = vector.load %arg17[%c0_102, %c256_103] : memref<128x1152xbf16, #tpu.memory_space<vmem>>, vector<128x128xbf16>
    tpu.vector_store %arg17[%c0_102, %c256_103], %61 {strides = array<i32>} : memref<128x1152xbf16, #tpu.memory_space<vmem>>, vector<128x128xbf16>,
    %c1_104 = arith.constant 1 : index
    %c0_105 = arith.constant 0 : index
    %c0_106 = arith.constant 0 : index
    %c0_107 = arith.constant 0 : index
    %63 = vector.load %arg16[%c1_104, %c0_105, %c0_106, %c0_107] : memref<6x6x8x128xbf16, #tpu.memory_space<vmem>>, vector<4x4x8x128xbf16>
    %64 = vector.shape_cast %63 : vector<4x4x8x128xbf16> to vector<128x128xbf16>
    %c0_108 = arith.constant 0 : index
    %c384_109 = arith.constant 384 : index
    %65 = vector.load %arg17[%c0_108, %c384_109] : memref<128x1152xbf16, #tpu.memory_space<vmem>>, vector<128x128xbf16>
    tpu.vector_store %arg17[%c0_108, %c384_109], %64 {strides = array<i32>} : memref<128x1152xbf16, #tpu.memory_space<vmem>>, vector<128x128xbf16>,
    %c1_110 = arith.constant 1 : index
    %c1_111 = arith.constant 1 : index
    %c0_112 = arith.constant 0 : index
    %c0_113 = arith.constant 0 : index
    %66 = vector.load %arg16[%c1_110, %c1_111, %c0_112, %c0_113] : memref<6x6x8x128xbf16, #tpu.memory_space<vmem>>, vector<4x4x8x128xbf16>
    %67 = vector.shape_cast %66 : vector<4x4x8x128xbf16> to vector<128x128xbf16>
    %c0_114 = arith.constant 0 : index
    %c512_115 = arith.constant 512 : index
    %68 = vector.load %arg17[%c0_114, %c512_115] : memref<128x1152xbf16, #tpu.memory_space<vmem>>, vector<128x128xbf16>
    tpu.vector_store %arg17[%c0_114, %c512_115], %67 {strides = array<i32>} : memref<128x1152xbf16, #tpu.memory_space<vmem>>, vector<128x128xbf16>,
    %c1_116 = arith.constant 1 : index
    %c2_117 = arith.constant 2 : index
    %c0_118 = arith.constant 0 : index
    %c0_119 = arith.constant 0 : index
    %69 = vector.load %arg16[%c1_116, %c2_117, %c0_118, %c0_119] : memref<6x6x8x128xbf16, #tpu.memory_space<vmem>>, vector<4x4x8x128xbf16>
    %70 = vector.shape_cast %69 : vector<4x4x8x128xbf16> to vector<128x128xbf16>
    %c0_120 = arith.constant 0 : index
    %c640_121 = arith.constant 640 : index
    %71 = vector.load %arg17[%c0_120, %c640_121] : memref<128x1152xbf16, #tpu.memory_space<vmem>>, vector<128x128xbf16>
    tpu.vector_store %arg17[%c0_120, %c640_121], %70 {strides = array<i32>} : memref<128x1152xbf16, #tpu.memory_space<vmem>>, vector<128x128xbf16>,
    %c2_122 = arith.constant 2 : index
    %c0_123 = arith.constant 0 : index
    %c0_124 = arith.constant 0 : index
    %c0_125 = arith.constant 0 : index
    %72 = vector.load %arg16[%c2_122, %c0_123, %c0_124, %c0_125] : memref<6x6x8x128xbf16, #tpu.memory_space<vmem>>, vector<4x4x8x128xbf16>
    %73 = vector.shape_cast %72 : vector<4x4x8x128xbf16> to vector<128x128xbf16>
    %c0_126 = arith.constant 0 : index
    %c768_127 = arith.constant 768 : index
    %74 = vector.load %arg17[%c0_126, %c768_127] : memref<128x1152xbf16, #tpu.memory_space<vmem>>, vector<128x128xbf16>
    tpu.vector_store %arg17[%c0_126, %c768_127], %73 {strides = array<i32>} : memref<128x1152xbf16, #tpu.memory_space<vmem>>, vector<128x128xbf16>,
    %c2_128 = arith.constant 2 : index
    %c1_129 = arith.constant 1 : index
    %c0_130 = arith.constant 0 : index
    %c0_131 = arith.constant 0 : index
    %75 = vector.load %arg16[%c2_128, %c1_129, %c0_130, %c0_131] : memref<6x6x8x128xbf16, #tpu.memory_space<vmem>>, vector<4x4x8x128xbf16>
    %76 = vector.shape_cast %75 : vector<4x4x8x128xbf16> to vector<128x128xbf16>
    %c0_132 = arith.constant 0 : index
    %c896_133 = arith.constant 896 : index
    %77 = vector.load %arg17[%c0_132, %c896_133] : memref<128x1152xbf16, #tpu.memory_space<vmem>>, vector<128x128xbf16>
    tpu.vector_store %arg17[%c0_132, %c896_133], %76 {strides = array<i32>} : memref<128x1152xbf16, #tpu.memory_space<vmem>>, vector<128x128xbf16>,
    %c2_134 = arith.constant 2 : index
    %c2_135 = arith.constant 2 : index
    %c0_136 = arith.constant 0 : index
    %c0_137 = arith.constant 0 : index
    %78 = vector.load %arg16[%c2_134, %c2_135, %c0_136, %c0_137] : memref<6x6x8x128xbf16, #tpu.memory_space<vmem>>, vector<4x4x8x128xbf16>
    %79 = vector.shape_cast %78 : vector<4x4x8x128xbf16> to vector<128x128xbf16>
    %c0_138 = arith.constant 0 : index
    %c1024_139 = arith.constant 1024 : index
    %80 = vector.load %arg17[%c0_138, %c1024_139] : memref<128x1152xbf16, #tpu.memory_space<vmem>>, vector<128x128xbf16>
    tpu.vector_store %arg17[%c0_138, %c1024_139], %79 {strides = array<i32>} : memref<128x1152xbf16, #tpu.memory_space<vmem>>, vector<128x128xbf16>,
    %c0_140 = arith.constant 0 : index
    %c0_141 = arith.constant 0 : index
    %81 = vector.load %arg17[%c0_140, %c0_141] : memref<128x1152xbf16, #tpu.memory_space<vmem>>, vector<128x1152xbf16>
    %c1_142 = arith.constant 1 : index
    %c0_143 = arith.constant 0 : index
    %c0_144 = arith.constant 0 : index
    %82 = vector.load %arg2[%c1_142, %c0_143, %c0_144] : memref<5x1152x128xbf16, #tpu.memory_space<vmem>>, vector<1x1152x128xbf16>
    %83 = vector.shape_cast %82 : vector<1x1152x128xbf16> to vector<1152x128xbf16>
    %cst_145 = arith.constant dense<0.000000e+00> : vector<128x128xf32>
    %84 = tpu.matmul %81, %83, %cst_145 {dimension_numbers = #tpu.dot_dimension_numbers<[1], [0], [0], [1], [0, 0, 1, 1], [], []>} : vector<128x1152xbf16>, vector<1152x128xbf16>, vector<128x128xf32> -> vector<128x128xf32>
    %c1_146 = arith.constant 1 : index
    %c0_147 = arith.constant 0 : index
    %c0_148 = arith.constant 0 : index
    %85 = vector.load %arg3[%c1_146, %c0_147, %c0_148] : memref<5x1x128xf32, #tpu.memory_space<vmem>>, vector<1x1x128xf32>
    %86 = vector.shape_cast %85 : vector<1x1x128xf32> to vector<1x128xf32>
    %87 = vector.broadcast %86 : vector<1x128xf32> to vector<128x128xf32>
    %88 = arith.mulf %84, %87 : vector<128x128xf32>
    %c1_149 = arith.constant 1 : index
    %c0_150 = arith.constant 0 : index
    %c0_151 = arith.constant 0 : index
    %89 = vector.load %arg4[%c1_149, %c0_150, %c0_151] : memref<5x1x128xf32, #tpu.memory_space<vmem>>, vector<1x1x128xf32>
    %90 = vector.shape_cast %89 : vector<1x1x128xf32> to vector<1x128xf32>
    %91 = vector.broadcast %90 : vector<1x128xf32> to vector<128x128xf32>
    %92 = arith.addf %88, %91 : vector<128x128xf32>
    %cst_152 = arith.constant 0.000000e+00 : f32
    %93 = vector.broadcast %cst_152 : f32 to vector<128x128xf32>
    %94 = arith.maximumf %92, %93 : vector<128x128xf32>
    %95 = vector.shape_cast %94 : vector<128x128xf32> to vector<4x4x8x128xf32>
    %96 = arith.truncf %95 : vector<4x4x8x128xf32> to vector<4x4x8x128xbf16>
    %c1_153 = arith.constant 1 : index
    %c1_154 = arith.constant 1 : index
    %c0_155 = arith.constant 0 : index
    %c0_156 = arith.constant 0 : index
    %97 = vector.load %arg16[%c1_153, %c1_154, %c0_155, %c0_156] : memref<6x6x8x128xbf16, #tpu.memory_space<vmem>>, vector<4x4x8x128xbf16>
    tpu.vector_store %arg16[%c1_153, %c1_154, %c0_155, %c0_156], %96 {strides = array<i32>} : memref<6x6x8x128xbf16, #tpu.memory_space<vmem>>, vector<4x4x8x128xbf16>,
    %c0_157 = arith.constant 0 : index
    %c0_158 = arith.constant 0 : index
    %c0_159 = arith.constant 0 : index
    %c0_160 = arith.constant 0 : index
    %98 = vector.load %arg16[%c0_157, %c0_158, %c0_159, %c0_160] : memref<6x6x8x128xbf16, #tpu.memory_space<vmem>>, vector<4x4x8x128xbf16>
    %99 = vector.shape_cast %98 : vector<4x4x8x128xbf16> to vector<128x128xbf16>
    %c0_161 = arith.constant 0 : index
    %c0_162 = arith.constant 0 : index
    %100 = vector.load %arg17[%c0_161, %c0_162] : memref<128x1152xbf16, #tpu.memory_space<vmem>>, vector<128x128xbf16>
    tpu.vector_store %arg17[%c0_161, %c0_162], %99 {strides = array<i32>} : memref<128x1152xbf16, #tpu.memory_space<vmem>>, vector<128x128xbf16>,
    %c0_163 = arith.constant 0 : index
    %c1_164 = arith.constant 1 : index
    %c0_165 = arith.constant 0 : index
    %c0_166 = arith.constant 0 : index
    %101 = vector.load %arg16[%c0_163, %c1_164, %c0_165, %c0_166] : memref<6x6x8x128xbf16, #tpu.memory_space<vmem>>, vector<4x4x8x128xbf16>
    %102 = vector.shape_cast %101 : vector<4x4x8x128xbf16> to vector<128x128xbf16>
    %c0_167 = arith.constant 0 : index
    %c128_168 = arith.constant 128 : index
    %103 = vector.load %arg17[%c0_167, %c128_168] : memref<128x1152xbf16, #tpu.memory_space<vmem>>, vector<128x128xbf16>
    tpu.vector_store %arg17[%c0_167, %c128_168], %102 {strides = array<i32>} : memref<128x1152xbf16, #tpu.memory_space<vmem>>, vector<128x128xbf16>,
    %c0_169 = arith.constant 0 : index
    %c2_170 = arith.constant 2 : index
    %c0_171 = arith.constant 0 : index
    %c0_172 = arith.constant 0 : index
    %104 = vector.load %arg16[%c0_169, %c2_170, %c0_171, %c0_172] : memref<6x6x8x128xbf16, #tpu.memory_space<vmem>>, vector<4x4x8x128xbf16>
    %105 = vector.shape_cast %104 : vector<4x4x8x128xbf16> to vector<128x128xbf16>
    %c0_173 = arith.constant 0 : index
    %c256_174 = arith.constant 256 : index
    %106 = vector.load %arg17[%c0_173, %c256_174] : memref<128x1152xbf16, #tpu.memory_space<vmem>>, vector<128x128xbf16>
    tpu.vector_store %arg17[%c0_173, %c256_174], %105 {strides = array<i32>} : memref<128x1152xbf16, #tpu.memory_space<vmem>>, vector<128x128xbf16>,
    %c1_175 = arith.constant 1 : index
    %c0_176 = arith.constant 0 : index
    %c0_177 = arith.constant 0 : index
    %c0_178 = arith.constant 0 : index
    %107 = vector.load %arg16[%c1_175, %c0_176, %c0_177, %c0_178] : memref<6x6x8x128xbf16, #tpu.memory_space<vmem>>, vector<4x4x8x128xbf16>
    %108 = vector.shape_cast %107 : vector<4x4x8x128xbf16> to vector<128x128xbf16>
    %c0_179 = arith.constant 0 : index
    %c384_180 = arith.constant 384 : index
    %109 = vector.load %arg17[%c0_179, %c384_180] : memref<128x1152xbf16, #tpu.memory_space<vmem>>, vector<128x128xbf16>
    tpu.vector_store %arg17[%c0_179, %c384_180], %108 {strides = array<i32>} : memref<128x1152xbf16, #tpu.memory_space<vmem>>, vector<128x128xbf16>,
    %c1_181 = arith.constant 1 : index
    %c1_182 = arith.constant 1 : index
    %c0_183 = arith.constant 0 : index
    %c0_184 = arith.constant 0 : index
    %110 = vector.load %arg16[%c1_181, %c1_182, %c0_183, %c0_184] : memref<6x6x8x128xbf16, #tpu.memory_space<vmem>>, vector<4x4x8x128xbf16>
    %111 = vector.shape_cast %110 : vector<4x4x8x128xbf16> to vector<128x128xbf16>
    %c0_185 = arith.constant 0 : index
    %c512_186 = arith.constant 512 : index
    %112 = vector.load %arg17[%c0_185, %c512_186] : memref<128x1152xbf16, #tpu.memory_space<vmem>>, vector<128x128xbf16>
    tpu.vector_store %arg17[%c0_185, %c512_186], %111 {strides = array<i32>} : memref<128x1152xbf16, #tpu.memory_space<vmem>>, vector<128x128xbf16>,
    %c1_187 = arith.constant 1 : index
    %c2_188 = arith.constant 2 : index
    %c0_189 = arith.constant 0 : index
    %c0_190 = arith.constant 0 : index
    %113 = vector.load %arg16[%c1_187, %c2_188, %c0_189, %c0_190] : memref<6x6x8x128xbf16, #tpu.memory_space<vmem>>, vector<4x4x8x128xbf16>
    %114 = vector.shape_cast %113 : vector<4x4x8x128xbf16> to vector<128x128xbf16>
    %c0_191 = arith.constant 0 : index
    %c640_192 = arith.constant 640 : index
    %115 = vector.load %arg17[%c0_191, %c640_192] : memref<128x1152xbf16, #tpu.memory_space<vmem>>, vector<128x128xbf16>
    tpu.vector_store %arg17[%c0_191, %c640_192], %114 {strides = array<i32>} : memref<128x1152xbf16, #tpu.memory_space<vmem>>, vector<128x128xbf16>,
    %c2_193 = arith.constant 2 : index
    %c0_194 = arith.constant 0 : index
    %c0_195 = arith.constant 0 : index
    %c0_196 = arith.constant 0 : index
    %116 = vector.load %arg16[%c2_193, %c0_194, %c0_195, %c0_196] : memref<6x6x8x128xbf16, #tpu.memory_space<vmem>>, vector<4x4x8x128xbf16>
    %117 = vector.shape_cast %116 : vector<4x4x8x128xbf16> to vector<128x128xbf16>
    %c0_197 = arith.constant 0 : index
    %c768_198 = arith.constant 768 : index
    %118 = vector.load %arg17[%c0_197, %c768_198] : memref<128x1152xbf16, #tpu.memory_space<vmem>>, vector<128x128xbf16>
    tpu.vector_store %arg17[%c0_197, %c768_198], %117 {strides = array<i32>} : memref<128x1152xbf16, #tpu.memory_space<vmem>>, vector<128x128xbf16>,
    %c2_199 = arith.constant 2 : index
    %c1_200 = arith.constant 1 : index
    %c0_201 = arith.constant 0 : index
    %c0_202 = arith.constant 0 : index
    %119 = vector.load %arg16[%c2_199, %c1_200, %c0_201, %c0_202] : memref<6x6x8x128xbf16, #tpu.memory_space<vmem>>, vector<4x4x8x128xbf16>
    %120 = vector.shape_cast %119 : vector<4x4x8x128xbf16> to vector<128x128xbf16>
    %c0_203 = arith.constant 0 : index
    %c896_204 = arith.constant 896 : index
    %121 = vector.load %arg17[%c0_203, %c896_204] : memref<128x1152xbf16, #tpu.memory_space<vmem>>, vector<128x128xbf16>
    tpu.vector_store %arg17[%c0_203, %c896_204], %120 {strides = array<i32>} : memref<128x1152xbf16, #tpu.memory_space<vmem>>, vector<128x128xbf16>,
    %c2_205 = arith.constant 2 : index
    %c2_206 = arith.constant 2 : index
    %c0_207 = arith.constant 0 : index
    %c0_208 = arith.constant 0 : index
    %122 = vector.load %arg16[%c2_205, %c2_206, %c0_207, %c0_208] : memref<6x6x8x128xbf16, #tpu.memory_space<vmem>>, vector<4x4x8x128xbf16>
    %123 = vector.shape_cast %122 : vector<4x4x8x128xbf16> to vector<128x128xbf16>
    %c0_209 = arith.constant 0 : index
    %c1024_210 = arith.constant 1024 : index
    %124 = vector.load %arg17[%c0_209, %c1024_210] : memref<128x1152xbf16, #tpu.memory_space<vmem>>, vector<128x128xbf16>
    tpu.vector_store %arg17[%c0_209, %c1024_210], %123 {strides = array<i32>} : memref<128x1152xbf16, #tpu.memory_space<vmem>>, vector<128x128xbf16>,
    %c0_211 = arith.constant 0 : index
    %c0_212 = arith.constant 0 : index
    %125 = vector.load %arg17[%c0_211, %c0_212] : memref<128x1152xbf16, #tpu.memory_space<vmem>>, vector<128x1152xbf16>
    %c2_213 = arith.constant 2 : index
    %c0_214 = arith.constant 0 : index
    %c0_215 = arith.constant 0 : index
    %126 = vector.load %arg2[%c2_213, %c0_214, %c0_215] : memref<5x1152x128xbf16, #tpu.memory_space<vmem>>, vector<1x1152x128xbf16>
    %127 = vector.shape_cast %126 : vector<1x1152x128xbf16> to vector<1152x128xbf16>
    %cst_216 = arith.constant dense<0.000000e+00> : vector<128x128xf32>
    %128 = tpu.matmul %125, %127, %cst_216 {dimension_numbers = #tpu.dot_dimension_numbers<[1], [0], [0], [1], [0, 0, 1, 1], [], []>} : vector<128x1152xbf16>, vector<1152x128xbf16>, vector<128x128xf32> -> vector<128x128xf32>
    %c2_217 = arith.constant 2 : index
    %c0_218 = arith.constant 0 : index
    %c0_219 = arith.constant 0 : index
    %129 = vector.load %arg3[%c2_217, %c0_218, %c0_219] : memref<5x1x128xf32, #tpu.memory_space<vmem>>, vector<1x1x128xf32>
    %130 = vector.shape_cast %129 : vector<1x1x128xf32> to vector<1x128xf32>
    %131 = vector.broadcast %130 : vector<1x128xf32> to vector<128x128xf32>
    %132 = arith.mulf %128, %131 : vector<128x128xf32>
    %c2_220 = arith.constant 2 : index
    %c0_221 = arith.constant 0 : index
    %c0_222 = arith.constant 0 : index
    %133 = vector.load %arg4[%c2_220, %c0_221, %c0_222] : memref<5x1x128xf32, #tpu.memory_space<vmem>>, vector<1x1x128xf32>
    %134 = vector.shape_cast %133 : vector<1x1x128xf32> to vector<1x128xf32>
    %135 = vector.broadcast %134 : vector<1x128xf32> to vector<128x128xf32>
    %136 = arith.addf %132, %135 : vector<128x128xf32>
    %137 = arith.addf %136, %50 : vector<128x128xf32>
    %cst_223 = arith.constant 0.000000e+00 : f32
    %138 = vector.broadcast %cst_223 : f32 to vector<128x128xf32>
    %139 = arith.maximumf %137, %138 : vector<128x128xf32>
    %140 = vector.shape_cast %139 : vector<128x128xf32> to vector<4x4x8x128xf32>
    %141 = arith.truncf %140 : vector<4x4x8x128xf32> to vector<4x4x8x128xbf16>
    %c1_224 = arith.constant 1 : index
    %c1_225 = arith.constant 1 : index
    %c0_226 = arith.constant 0 : index
    %c0_227 = arith.constant 0 : index
    %142 = vector.load %arg16[%c1_224, %c1_225, %c0_226, %c0_227] : memref<6x6x8x128xbf16, #tpu.memory_space<vmem>>, vector<4x4x8x128xbf16>
    tpu.vector_store %arg16[%c1_224, %c1_225, %c0_226, %c0_227], %141 {strides = array<i32>} : memref<6x6x8x128xbf16, #tpu.memory_space<vmem>>, vector<4x4x8x128xbf16>,
    %c0_228 = arith.constant 0 : index
    %c0_229 = arith.constant 0 : index
    %c0_230 = arith.constant 0 : index
    %c0_231 = arith.constant 0 : index
    %143 = vector.load %arg16[%c0_228, %c0_229, %c0_230, %c0_231] : memref<6x6x8x128xbf16, #tpu.memory_space<vmem>>, vector<4x4x8x128xbf16>
    %144 = vector.shape_cast %143 : vector<4x4x8x128xbf16> to vector<128x128xbf16>
    %c0_232 = arith.constant 0 : index
    %c0_233 = arith.constant 0 : index
    %145 = vector.load %arg17[%c0_232, %c0_233] : memref<128x1152xbf16, #tpu.memory_space<vmem>>, vector<128x128xbf16>
    tpu.vector_store %arg17[%c0_232, %c0_233], %144 {strides = array<i32>} : memref<128x1152xbf16, #tpu.memory_space<vmem>>, vector<128x128xbf16>,
    %c0_234 = arith.constant 0 : index
    %c1_235 = arith.constant 1 : index
    %c0_236 = arith.constant 0 : index
    %c0_237 = arith.constant 0 : index
    %146 = vector.load %arg16[%c0_234, %c1_235, %c0_236, %c0_237] : memref<6x6x8x128xbf16, #tpu.memory_space<vmem>>, vector<4x4x8x128xbf16>
    %147 = vector.shape_cast %146 : vector<4x4x8x128xbf16> to vector<128x128xbf16>
    %c0_238 = arith.constant 0 : index
    %c128_239 = arith.constant 128 : index
    %148 = vector.load %arg17[%c0_238, %c128_239] : memref<128x1152xbf16, #tpu.memory_space<vmem>>, vector<128x128xbf16>
    tpu.vector_store %arg17[%c0_238, %c128_239], %147 {strides = array<i32>} : memref<128x1152xbf16, #tpu.memory_space<vmem>>, vector<128x128xbf16>,
    %c0_240 = arith.constant 0 : index
    %c2_241 = arith.constant 2 : index
    %c0_242 = arith.constant 0 : index
    %c0_243 = arith.constant 0 : index
    %149 = vector.load %arg16[%c0_240, %c2_241, %c0_242, %c0_243] : memref<6x6x8x128xbf16, #tpu.memory_space<vmem>>, vector<4x4x8x128xbf16>
    %150 = vector.shape_cast %149 : vector<4x4x8x128xbf16> to vector<128x128xbf16>
    %c0_244 = arith.constant 0 : index
    %c256_245 = arith.constant 256 : index
    %151 = vector.load %arg17[%c0_244, %c256_245] : memref<128x1152xbf16, #tpu.memory_space<vmem>>, vector<128x128xbf16>
    tpu.vector_store %arg17[%c0_244, %c256_245], %150 {strides = array<i32>} : memref<128x1152xbf16, #tpu.memory_space<vmem>>, vector<128x128xbf16>,
    %c1_246 = arith.constant 1 : index
    %c0_247 = arith.constant 0 : index
    %c0_248 = arith.constant 0 : index
    %c0_249 = arith.constant 0 : index
    %152 = vector.load %arg16[%c1_246, %c0_247, %c0_248, %c0_249] : memref<6x6x8x128xbf16, #tpu.memory_space<vmem>>, vector<4x4x8x128xbf16>
    %153 = vector.shape_cast %152 : vector<4x4x8x128xbf16> to vector<128x128xbf16>
    %c0_250 = arith.constant 0 : index
    %c384_251 = arith.constant 384 : index
    %154 = vector.load %arg17[%c0_250, %c384_251] : memref<128x1152xbf16, #tpu.memory_space<vmem>>, vector<128x128xbf16>
    tpu.vector_store %arg17[%c0_250, %c384_251], %153 {strides = array<i32>} : memref<128x1152xbf16, #tpu.memory_space<vmem>>, vector<128x128xbf16>,
    %c1_252 = arith.constant 1 : index
    %c1_253 = arith.constant 1 : index
    %c0_254 = arith.constant 0 : index
    %c0_255 = arith.constant 0 : index
    %155 = vector.load %arg16[%c1_252, %c1_253, %c0_254, %c0_255] : memref<6x6x8x128xbf16, #tpu.memory_space<vmem>>, vector<4x4x8x128xbf16>
    %156 = vector.shape_cast %155 : vector<4x4x8x128xbf16> to vector<128x128xbf16>
    %c0_256 = arith.constant 0 : index
    %c512_257 = arith.constant 512 : index
    %157 = vector.load %arg17[%c0_256, %c512_257] : memref<128x1152xbf16, #tpu.memory_space<vmem>>, vector<128x128xbf16>
    tpu.vector_store %arg17[%c0_256, %c512_257], %156 {strides = array<i32>} : memref<128x1152xbf16, #tpu.memory_space<vmem>>, vector<128x128xbf16>,
    %c1_258 = arith.constant 1 : index
    %c2_259 = arith.constant 2 : index
    %c0_260 = arith.constant 0 : index
    %c0_261 = arith.constant 0 : index
    %158 = vector.load %arg16[%c1_258, %c2_259, %c0_260, %c0_261] : memref<6x6x8x128xbf16, #tpu.memory_space<vmem>>, vector<4x4x8x128xbf16>
    %159 = vector.shape_cast %158 : vector<4x4x8x128xbf16> to vector<128x128xbf16>
    %c0_262 = arith.constant 0 : index
    %c640_263 = arith.constant 640 : index
    %160 = vector.load %arg17[%c0_262, %c640_263] : memref<128x1152xbf16, #tpu.memory_space<vmem>>, vector<128x128xbf16>
    tpu.vector_store %arg17[%c0_262, %c640_263], %159 {strides = array<i32>} : memref<128x1152xbf16, #tpu.memory_space<vmem>>, vector<128x128xbf16>,
    %c2_264 = arith.constant 2 : index
    %c0_265 = arith.constant 0 : index
    %c0_266 = arith.constant 0 : index
    %c0_267 = arith.constant 0 : index
    %161 = vector.load %arg16[%c2_264, %c0_265, %c0_266, %c0_267] : memref<6x6x8x128xbf16, #tpu.memory_space<vmem>>, vector<4x4x8x128xbf16>
    %162 = vector.shape_cast %161 : vector<4x4x8x128xbf16> to vector<128x128xbf16>
    %c0_268 = arith.constant 0 : index
    %c768_269 = arith.constant 768 : index
    %163 = vector.load %arg17[%c0_268, %c768_269] : memref<128x1152xbf16, #tpu.memory_space<vmem>>, vector<128x128xbf16>
    tpu.vector_store %arg17[%c0_268, %c768_269], %162 {strides = array<i32>} : memref<128x1152xbf16, #tpu.memory_space<vmem>>, vector<128x128xbf16>,
    %c2_270 = arith.constant 2 : index
    %c1_271 = arith.constant 1 : index
    %c0_272 = arith.constant 0 : index
    %c0_273 = arith.constant 0 : index
    %164 = vector.load %arg16[%c2_270, %c1_271, %c0_272, %c0_273] : memref<6x6x8x128xbf16, #tpu.memory_space<vmem>>, vector<4x4x8x128xbf16>
    %165 = vector.shape_cast %164 : vector<4x4x8x128xbf16> to vector<128x128xbf16>
    %c0_274 = arith.constant 0 : index
    %c896_275 = arith.constant 896 : index
    %166 = vector.load %arg17[%c0_274, %c896_275] : memref<128x1152xbf16, #tpu.memory_space<vmem>>, vector<128x128xbf16>
    tpu.vector_store %arg17[%c0_274, %c896_275], %165 {strides = array<i32>} : memref<128x1152xbf16, #tpu.memory_space<vmem>>, vector<128x128xbf16>,
    %c2_276 = arith.constant 2 : index
    %c2_277 = arith.constant 2 : index
    %c0_278 = arith.constant 0 : index
    %c0_279 = arith.constant 0 : index
    %167 = vector.load %arg16[%c2_276, %c2_277, %c0_278, %c0_279] : memref<6x6x8x128xbf16, #tpu.memory_space<vmem>>, vector<4x4x8x128xbf16>
    %168 = vector.shape_cast %167 : vector<4x4x8x128xbf16> to vector<128x128xbf16>
    %c0_280 = arith.constant 0 : index
    %c1024_281 = arith.constant 1024 : index
    %169 = vector.load %arg17[%c0_280, %c1024_281] : memref<128x1152xbf16, #tpu.memory_space<vmem>>, vector<128x128xbf16>
    tpu.vector_store %arg17[%c0_280, %c1024_281], %168 {strides = array<i32>} : memref<128x1152xbf16, #tpu.memory_space<vmem>>, vector<128x128xbf16>,
    %c0_282 = arith.constant 0 : index
    %c0_283 = arith.constant 0 : index
    %170 = vector.load %arg17[%c0_282, %c0_283] : memref<128x1152xbf16, #tpu.memory_space<vmem>>, vector<128x1152xbf16>
    %c3 = arith.constant 3 : index
    %c0_284 = arith.constant 0 : index
    %c0_285 = arith.constant 0 : index
    %171 = vector.load %arg2[%c3, %c0_284, %c0_285] : memref<5x1152x128xbf16, #tpu.memory_space<vmem>>, vector<1x1152x128xbf16>
    %172 = vector.shape_cast %171 : vector<1x1152x128xbf16> to vector<1152x128xbf16>
    %cst_286 = arith.constant dense<0.000000e+00> : vector<128x128xf32>
    %173 = tpu.matmul %170, %172, %cst_286 {dimension_numbers = #tpu.dot_dimension_numbers<[1], [0], [0], [1], [0, 0, 1, 1], [], []>} : vector<128x1152xbf16>, vector<1152x128xbf16>, vector<128x128xf32> -> vector<128x128xf32>
    %c3_287 = arith.constant 3 : index
    %c0_288 = arith.constant 0 : index
    %c0_289 = arith.constant 0 : index
    %174 = vector.load %arg3[%c3_287, %c0_288, %c0_289] : memref<5x1x128xf32, #tpu.memory_space<vmem>>, vector<1x1x128xf32>
    %175 = vector.shape_cast %174 : vector<1x1x128xf32> to vector<1x128xf32>
    %176 = vector.broadcast %175 : vector<1x128xf32> to vector<128x128xf32>
    %177 = arith.mulf %173, %176 : vector<128x128xf32>
    %c3_290 = arith.constant 3 : index
    %c0_291 = arith.constant 0 : index
    %c0_292 = arith.constant 0 : index
    %178 = vector.load %arg4[%c3_290, %c0_291, %c0_292] : memref<5x1x128xf32, #tpu.memory_space<vmem>>, vector<1x1x128xf32>
    %179 = vector.shape_cast %178 : vector<1x1x128xf32> to vector<1x128xf32>
    %180 = vector.broadcast %179 : vector<1x128xf32> to vector<128x128xf32>
    %181 = arith.addf %177, %180 : vector<128x128xf32>
    %cst_293 = arith.constant 0.000000e+00 : f32
    %182 = vector.broadcast %cst_293 : f32 to vector<128x128xf32>
    %183 = arith.maximumf %181, %182 : vector<128x128xf32>
    %184 = vector.shape_cast %183 : vector<128x128xf32> to vector<4x4x8x128xf32>
    %185 = arith.truncf %184 : vector<4x4x8x128xf32> to vector<4x4x8x128xbf16>
    %c1_294 = arith.constant 1 : index
    %c1_295 = arith.constant 1 : index
    %c0_296 = arith.constant 0 : index
    %c0_297 = arith.constant 0 : index
    %186 = vector.load %arg16[%c1_294, %c1_295, %c0_296, %c0_297] : memref<6x6x8x128xbf16, #tpu.memory_space<vmem>>, vector<4x4x8x128xbf16>
    tpu.vector_store %arg16[%c1_294, %c1_295, %c0_296, %c0_297], %185 {strides = array<i32>} : memref<6x6x8x128xbf16, #tpu.memory_space<vmem>>, vector<4x4x8x128xbf16>,
    %c0_298 = arith.constant 0 : index
    %c0_299 = arith.constant 0 : index
    %c0_300 = arith.constant 0 : index
    %c0_301 = arith.constant 0 : index
    %187 = vector.load %arg16[%c0_298, %c0_299, %c0_300, %c0_301] : memref<6x6x8x128xbf16, #tpu.memory_space<vmem>>, vector<4x4x8x128xbf16>
    %188 = vector.shape_cast %187 : vector<4x4x8x128xbf16> to vector<128x128xbf16>
    %c0_302 = arith.constant 0 : index
    %c0_303 = arith.constant 0 : index
    %189 = vector.load %arg17[%c0_302, %c0_303] : memref<128x1152xbf16, #tpu.memory_space<vmem>>, vector<128x128xbf16>
    tpu.vector_store %arg17[%c0_302, %c0_303], %188 {strides = array<i32>} : memref<128x1152xbf16, #tpu.memory_space<vmem>>, vector<128x128xbf16>,
    %c0_304 = arith.constant 0 : index
    %c1_305 = arith.constant 1 : index
    %c0_306 = arith.constant 0 : index
    %c0_307 = arith.constant 0 : index
    %190 = vector.load %arg16[%c0_304, %c1_305, %c0_306, %c0_307] : memref<6x6x8x128xbf16, #tpu.memory_space<vmem>>, vector<4x4x8x128xbf16>
    %191 = vector.shape_cast %190 : vector<4x4x8x128xbf16> to vector<128x128xbf16>
    %c0_308 = arith.constant 0 : index
    %c128_309 = arith.constant 128 : index
    %192 = vector.load %arg17[%c0_308, %c128_309] : memref<128x1152xbf16, #tpu.memory_space<vmem>>, vector<128x128xbf16>
    tpu.vector_store %arg17[%c0_308, %c128_309], %191 {strides = array<i32>} : memref<128x1152xbf16, #tpu.memory_space<vmem>>, vector<128x128xbf16>,
    %c0_310 = arith.constant 0 : index
    %c2_311 = arith.constant 2 : index
    %c0_312 = arith.constant 0 : index
    %c0_313 = arith.constant 0 : index
    %193 = vector.load %arg16[%c0_310, %c2_311, %c0_312, %c0_313] : memref<6x6x8x128xbf16, #tpu.memory_space<vmem>>, vector<4x4x8x128xbf16>
    %194 = vector.shape_cast %193 : vector<4x4x8x128xbf16> to vector<128x128xbf16>
    %c0_314 = arith.constant 0 : index
    %c256_315 = arith.constant 256 : index
    %195 = vector.load %arg17[%c0_314, %c256_315] : memref<128x1152xbf16, #tpu.memory_space<vmem>>, vector<128x128xbf16>
    tpu.vector_store %arg17[%c0_314, %c256_315], %194 {strides = array<i32>} : memref<128x1152xbf16, #tpu.memory_space<vmem>>, vector<128x128xbf16>,
    %c1_316 = arith.constant 1 : index
    %c0_317 = arith.constant 0 : index
    %c0_318 = arith.constant 0 : index
    %c0_319 = arith.constant 0 : index
    %196 = vector.load %arg16[%c1_316, %c0_317, %c0_318, %c0_319] : memref<6x6x8x128xbf16, #tpu.memory_space<vmem>>, vector<4x4x8x128xbf16>
    %197 = vector.shape_cast %196 : vector<4x4x8x128xbf16> to vector<128x128xbf16>
    %c0_320 = arith.constant 0 : index
    %c384_321 = arith.constant 384 : index
    %198 = vector.load %arg17[%c0_320, %c384_321] : memref<128x1152xbf16, #tpu.memory_space<vmem>>, vector<128x128xbf16>
    tpu.vector_store %arg17[%c0_320, %c384_321], %197 {strides = array<i32>} : memref<128x1152xbf16, #tpu.memory_space<vmem>>, vector<128x128xbf16>,
    %c1_322 = arith.constant 1 : index
    %c1_323 = arith.constant 1 : index
    %c0_324 = arith.constant 0 : index
    %c0_325 = arith.constant 0 : index
    %199 = vector.load %arg16[%c1_322, %c1_323, %c0_324, %c0_325] : memref<6x6x8x128xbf16, #tpu.memory_space<vmem>>, vector<4x4x8x128xbf16>
    %200 = vector.shape_cast %199 : vector<4x4x8x128xbf16> to vector<128x128xbf16>
    %c0_326 = arith.constant 0 : index
    %c512_327 = arith.constant 512 : index
    %201 = vector.load %arg17[%c0_326, %c512_327] : memref<128x1152xbf16, #tpu.memory_space<vmem>>, vector<128x128xbf16>
    tpu.vector_store %arg17[%c0_326, %c512_327], %200 {strides = array<i32>} : memref<128x1152xbf16, #tpu.memory_space<vmem>>, vector<128x128xbf16>,
    %c1_328 = arith.constant 1 : index
    %c2_329 = arith.constant 2 : index
    %c0_330 = arith.constant 0 : index
    %c0_331 = arith.constant 0 : index
    %202 = vector.load %arg16[%c1_328, %c2_329, %c0_330, %c0_331] : memref<6x6x8x128xbf16, #tpu.memory_space<vmem>>, vector<4x4x8x128xbf16>
    %203 = vector.shape_cast %202 : vector<4x4x8x128xbf16> to vector<128x128xbf16>
    %c0_332 = arith.constant 0 : index
    %c640_333 = arith.constant 640 : index
    %204 = vector.load %arg17[%c0_332, %c640_333] : memref<128x1152xbf16, #tpu.memory_space<vmem>>, vector<128x128xbf16>
    tpu.vector_store %arg17[%c0_332, %c640_333], %203 {strides = array<i32>} : memref<128x1152xbf16, #tpu.memory_space<vmem>>, vector<128x128xbf16>,
    %c2_334 = arith.constant 2 : index
    %c0_335 = arith.constant 0 : index
    %c0_336 = arith.constant 0 : index
    %c0_337 = arith.constant 0 : index
    %205 = vector.load %arg16[%c2_334, %c0_335, %c0_336, %c0_337] : memref<6x6x8x128xbf16, #tpu.memory_space<vmem>>, vector<4x4x8x128xbf16>
    %206 = vector.shape_cast %205 : vector<4x4x8x128xbf16> to vector<128x128xbf16>
    %c0_338 = arith.constant 0 : index
    %c768_339 = arith.constant 768 : index
    %207 = vector.load %arg17[%c0_338, %c768_339] : memref<128x1152xbf16, #tpu.memory_space<vmem>>, vector<128x128xbf16>
    tpu.vector_store %arg17[%c0_338, %c768_339], %206 {strides = array<i32>} : memref<128x1152xbf16, #tpu.memory_space<vmem>>, vector<128x128xbf16>,
    %c2_340 = arith.constant 2 : index
    %c1_341 = arith.constant 1 : index
    %c0_342 = arith.constant 0 : index
    %c0_343 = arith.constant 0 : index
    %208 = vector.load %arg16[%c2_340, %c1_341, %c0_342, %c0_343] : memref<6x6x8x128xbf16, #tpu.memory_space<vmem>>, vector<4x4x8x128xbf16>
    %209 = vector.shape_cast %208 : vector<4x4x8x128xbf16> to vector<128x128xbf16>
    %c0_344 = arith.constant 0 : index
    %c896_345 = arith.constant 896 : index
    %210 = vector.load %arg17[%c0_344, %c896_345] : memref<128x1152xbf16, #tpu.memory_space<vmem>>, vector<128x128xbf16>
    tpu.vector_store %arg17[%c0_344, %c896_345], %209 {strides = array<i32>} : memref<128x1152xbf16, #tpu.memory_space<vmem>>, vector<128x128xbf16>,
    %c2_346 = arith.constant 2 : index
    %c2_347 = arith.constant 2 : index
    %c0_348 = arith.constant 0 : index
    %c0_349 = arith.constant 0 : index
    %211 = vector.load %arg16[%c2_346, %c2_347, %c0_348, %c0_349] : memref<6x6x8x128xbf16, #tpu.memory_space<vmem>>, vector<4x4x8x128xbf16>
    %212 = vector.shape_cast %211 : vector<4x4x8x128xbf16> to vector<128x128xbf16>
    %c0_350 = arith.constant 0 : index
    %c1024_351 = arith.constant 1024 : index
    %213 = vector.load %arg17[%c0_350, %c1024_351] : memref<128x1152xbf16, #tpu.memory_space<vmem>>, vector<128x128xbf16>
    tpu.vector_store %arg17[%c0_350, %c1024_351], %212 {strides = array<i32>} : memref<128x1152xbf16, #tpu.memory_space<vmem>>, vector<128x128xbf16>,
    %c0_352 = arith.constant 0 : index
    %c0_353 = arith.constant 0 : index
    %214 = vector.load %arg17[%c0_352, %c0_353] : memref<128x1152xbf16, #tpu.memory_space<vmem>>, vector<128x1152xbf16>
    %c4 = arith.constant 4 : index
    %c0_354 = arith.constant 0 : index
    %c0_355 = arith.constant 0 : index
    %215 = vector.load %arg2[%c4, %c0_354, %c0_355] : memref<5x1152x128xbf16, #tpu.memory_space<vmem>>, vector<1x1152x128xbf16>
    %216 = vector.shape_cast %215 : vector<1x1152x128xbf16> to vector<1152x128xbf16>
    %cst_356 = arith.constant dense<0.000000e+00> : vector<128x128xf32>
    %217 = tpu.matmul %214, %216, %cst_356 {dimension_numbers = #tpu.dot_dimension_numbers<[1], [0], [0], [1], [0, 0, 1, 1], [], []>} : vector<128x1152xbf16>, vector<1152x128xbf16>, vector<128x128xf32> -> vector<128x128xf32>
    %c4_357 = arith.constant 4 : index
    %c0_358 = arith.constant 0 : index
    %c0_359 = arith.constant 0 : index
    %218 = vector.load %arg3[%c4_357, %c0_358, %c0_359] : memref<5x1x128xf32, #tpu.memory_space<vmem>>, vector<1x1x128xf32>
    %219 = vector.shape_cast %218 : vector<1x1x128xf32> to vector<1x128xf32>
    %220 = vector.broadcast %219 : vector<1x128xf32> to vector<128x128xf32>
    %221 = arith.mulf %217, %220 : vector<128x128xf32>
    %c4_360 = arith.constant 4 : index
    %c0_361 = arith.constant 0 : index
    %c0_362 = arith.constant 0 : index
    %222 = vector.load %arg4[%c4_360, %c0_361, %c0_362] : memref<5x1x128xf32, #tpu.memory_space<vmem>>, vector<1x1x128xf32>
    %223 = vector.shape_cast %222 : vector<1x1x128xf32> to vector<1x128xf32>
    %224 = vector.broadcast %223 : vector<1x128xf32> to vector<128x128xf32>
    %225 = arith.addf %221, %224 : vector<128x128xf32>
    %226 = arith.addf %225, %139 : vector<128x128xf32>
    %cst_363 = arith.constant 0.000000e+00 : f32
    %227 = vector.broadcast %cst_363 : f32 to vector<128x128xf32>
    %228 = arith.maximumf %226, %227 : vector<128x128xf32>
    %229 = arith.truncf %228 : vector<128x128xf32> to vector<128x128xbf16>
    %c0_364 = arith.constant 0 : index
    %c0_365 = arith.constant 0 : index
    %230 = vector.load %arg5[%c0_364, %c0_365] : memref<128x35xbf16, #tpu.memory_space<vmem>>, vector<128x35xbf16>
    %cst_366 = arith.constant dense<0.000000e+00> : vector<128x35xf32>
    %231 = tpu.matmul %229, %230, %cst_366 {dimension_numbers = #tpu.dot_dimension_numbers<[1], [0], [0], [1], [0, 0, 1, 1], [], []>} : vector<128x128xbf16>, vector<128x35xbf16>, vector<128x35xf32> -> vector<128x35xf32>
    %c0_367 = arith.constant 0 : index
    %c0_368 = arith.constant 0 : index
    %232 = vector.load %arg6[%c0_367, %c0_368] : memref<1x35xf32, #tpu.memory_space<vmem>>, vector<1x35xf32>
    %233 = vector.broadcast %232 : vector<1x35xf32> to vector<128x35xf32>
    %234 = arith.mulf %231, %233 : vector<128x35xf32>
    %c0_369 = arith.constant 0 : index
    %c0_370 = arith.constant 0 : index
    %235 = vector.load %arg7[%c0_369, %c0_370] : memref<1x35xf32, #tpu.memory_space<vmem>>, vector<1x35xf32>
    %236 = vector.broadcast %235 : vector<1x35xf32> to vector<128x35xf32>
    %237 = arith.addf %234, %236 : vector<128x35xf32>
    %cst_371 = arith.constant 0.000000e+00 : f32
    %238 = vector.broadcast %cst_371 : f32 to vector<128x35xf32>
    %239 = arith.maximumf %237, %238 : vector<128x35xf32>
    %240 = vector.extract_strided_slice %239 {offsets = [0, 0], sizes = [128, 3], strides = [1, 1]} : vector<128x35xf32> to vector<128x3xf32>
    %241 = vector.shape_cast %240 : vector<128x3xf32> to vector<16x8x3xf32>
    %242 = arith.truncf %241 : vector<16x8x3xf32> to vector<16x8x3xbf16>
    %c0_372 = arith.constant 0 : index
    %c0_373 = arith.constant 0 : index
    %c0_374 = arith.constant 0 : index
    %243 = vector.load %arg8[%c0_372, %c0_373, %c0_374] : memref<16x3x32xbf16, #tpu.memory_space<vmem>>, vector<16x3x32xbf16>
    "tpu.trace_start"() <{level = 10 : i32, message = "hbc,hcd->hbd"}> : () -> ()
    %cst_375 = arith.constant dense<0.000000e+00> : vector<16x8x32xf32>
    %244 = tpu.matmul %242, %243, %cst_375 {dimension_numbers = #tpu.dot_dimension_numbers<[2], [1], [1], [2], [0, 0, 0, 1, 1, 2], [0], [0]>} : vector<16x8x3xbf16>, vector<16x3x32xbf16>, vector<16x8x32xf32> -> vector<16x8x32xf32>
    "tpu.trace_stop"() : () -> ()
    %cst_376 = arith.constant dense<0.000000e+00> : vector<8x32xf32>
    %245 = vector.multi_reduction <add>, %244, %cst_376 [0] : vector<16x8x32xf32> to vector<8x32xf32>
    %c0_377 = arith.constant 0 : index
    %c0_378 = arith.constant 0 : index
    %246 = vector.load %arg9[%c0_377, %c0_378] : memref<1x32xf32, #tpu.memory_space<vmem>>, vector<1x32xf32>
    %247 = vector.broadcast %246 : vector<1x32xf32> to vector<8x32xf32>
    %248 = arith.addf %245, %247 : vector<8x32xf32>
    %cst_379 = arith.constant 0.000000e+00 : f32
    %249 = vector.broadcast %cst_379 : f32 to vector<8x32xf32>
    %250 = arith.maximumf %248, %249 : vector<8x32xf32>
    %251 = arith.truncf %250 : vector<8x32xf32> to vector<8x32xbf16>
    %c0_380 = arith.constant 0 : index
    %c0_381 = arith.constant 0 : index
    %252 = vector.load %arg10[%c0_380, %c0_381] : memref<32x1xbf16, #tpu.memory_space<vmem>>, vector<32x1xbf16>
    %cst_382 = arith.constant dense<0.000000e+00> : vector<8x1xf32>
    %253 = tpu.matmul %251, %252, %cst_382 {dimension_numbers = #tpu.dot_dimension_numbers<[1], [0], [0], [1], [0, 0, 1, 1], [], []>} : vector<8x32xbf16>, vector<32x1xbf16>, vector<8x1xf32> -> vector<8x1xf32>
    %c0_383 = arith.constant 0 : index
    %c0_384 = arith.constant 0 : index
    %254 = vector.load %arg11[%c0_383, %c0_384] : memref<1x1xf32, #tpu.memory_space<vmem>>, vector<1x1xf32>
    %255 = vector.broadcast %254 : vector<1x1xf32> to vector<8x1xf32>
    %256 = arith.addf %253, %255 : vector<8x1xf32>
    %257 = math.tanh %256 : vector<8x1xf32>
    %c0_385 = arith.constant 0 : index
    %c0_386 = arith.constant 0 : index
    %258 = vector.load %arg15[%c0_385, %c0_386] : memref<8x1xf32, #tpu.memory_space<vmem>>, vector<8x1xf32>
    tpu.vector_store %arg15[%c0_385, %c0_386], %257 {strides = array<i32>} : memref<8x1xf32, #tpu.memory_space<vmem>>, vector<8x1xf32>,
    %259 = vector.extract_strided_slice %239 {offsets = [0, 3], sizes = [128, 32], strides = [1, 1]} : vector<128x35xf32> to vector<128x32xf32>
    %260 = vector.shape_cast %259 : vector<128x32xf32> to vector<16x8x32xf32>
    %261 = arith.truncf %260 : vector<16x8x32xf32> to vector<16x8x32xbf16>
    %c0_387 = arith.constant 0 : index
    %c0_388 = arith.constant 0 : index
    %c0_389 = arith.constant 0 : index
    %262 = vector.load %arg12[%c0_387, %c0_388, %c0_389] : memref<16x32x16xbf16, #tpu.memory_space<vmem>>, vector<16x32x16xbf16>
    "tpu.trace_start"() <{level = 10 : i32, message = "hbc,hca->hba"}> : () -> ()
    %cst_390 = arith.constant dense<0.000000e+00> : vector<16x8x16xf32>
    %263 = tpu.matmul %261, %262, %cst_390 {dimension_numbers = #tpu.dot_dimension_numbers<[2], [1], [1], [2], [0, 0, 0, 1, 1, 2], [0], [0]>} : vector<16x8x32xbf16>, vector<16x32x16xbf16>, vector<16x8x16xf32> -> vector<16x8x16xf32>
    "tpu.trace_stop"() : () -> ()
    %cst_391 = arith.constant dense<0.000000e+00> : vector<8x16xf32>
    %264 = vector.multi_reduction <add>, %263, %cst_391 [0] : vector<16x8x16xf32> to vector<8x16xf32>
    %c0_392 = arith.constant 0 : index
    %c0_393 = arith.constant 0 : index
    %265 = vector.load %arg13[%c0_392, %c0_393] : memref<1x16xf32, #tpu.memory_space<vmem>>, vector<1x16xf32>
    %266 = vector.broadcast %265 : vector<1x16xf32> to vector<8x16xf32>
    %267 = arith.addf %264, %266 : vector<8x16xf32>
    %cst_394 = arith.constant dense<0xFF800000> : vector<8xf32>
    %268 = vector.multi_reduction <maximumf>, %267, %cst_394 [1] : vector<8x16xf32> to vector<8xf32>
    %269 = vector.shape_cast %268 : vector<8xf32> to vector<8x1xf32>
    %270 = vector.broadcast %269 : vector<8x1xf32> to vector<8x16xf32>
    %271 = arith.subf %267, %270 : vector<8x16xf32>
    %272 = math.exp %271 : vector<8x16xf32>
    %cst_395 = arith.constant dense<0.000000e+00> : vector<8xf32>
    %273 = vector.multi_reduction <add>, %272, %cst_395 [1] : vector<8x16xf32> to vector<8xf32>
    %274 = vector.shape_cast %273 : vector<8xf32> to vector<8x1xf32>
    %275 = vector.broadcast %274 : vector<8x1xf32> to vector<8x16xf32>
    %276 = arith.divf %272, %275 : vector<8x16xf32>
    %c0_396 = arith.constant 0 : index
    %c0_397 = arith.constant 0 : index
    %277 = vector.load %arg14[%c0_396, %c0_397] : memref<8x16xf32, #tpu.memory_space<vmem>>, vector<8x16xf32>
    tpu.vector_store %arg14[%c0_396, %c0_397], %276 {strides = array<i32>} : memref<8x16xf32, #tpu.memory_space<vmem>>, vector<8x16xf32>,
    return
  }
  func.func @transform_0(%arg0: i32) -> (i32, i32, i32, i32) {
    %c0_i32 = arith.constant 0 : i32
    %c0_i32_0 = arith.constant 0 : i32
    %c0_i32_1 = arith.constant 0 : i32
    %c0_i32_2 = arith.constant 0 : i32
    return %c0_i32, %c0_i32_0, %arg0, %c0_i32_1 : i32, i32, i32, i32
  }
  func.func @transform_1(%arg0: i32) -> (i32, i32, i32) {
    %c0_i32 = arith.constant 0 : i32
    %c0_i32_0 = arith.constant 0 : i32
    %c0_i32_1 = arith.constant 0 : i32
    %c0_i32_2 = arith.constant 0 : i32
    return %c0_i32, %c0_i32_0, %c0_i32_1 : i32, i32, i32
  }
  func.func @transform_2(%arg0: i32) -> (i32, i32, i32) {
    %c0_i32 = arith.constant 0 : i32
    %c0_i32_0 = arith.constant 0 : i32
    %c0_i32_1 = arith.constant 0 : i32
    %c0_i32_2 = arith.constant 0 : i32
    return %c0_i32, %c0_i32_0, %c0_i32_1 : i32, i32, i32
  }
  func.func @transform_3(%arg0: i32) -> (i32, i32, i32) {
    %c0_i32 = arith.constant 0 : i32
    %c0_i32_0 = arith.constant 0 : i32
    %c0_i32_1 = arith.constant 0 : i32
    %c0_i32_2 = arith.constant 0 : i32
    return %c0_i32, %c0_i32_0, %c0_i32_1 : i32, i32, i32
  }
  func.func @transform_4(%arg0: i32) -> (i32, i32) {
    %c0_i32 = arith.constant 0 : i32
    %c0_i32_0 = arith.constant 0 : i32
    %c0_i32_1 = arith.constant 0 : i32
    return %c0_i32, %c0_i32_0 : i32, i32
  }
  func.func @transform_5(%arg0: i32) -> (i32, i32) {
    %c0_i32 = arith.constant 0 : i32
    %c0_i32_0 = arith.constant 0 : i32
    %c0_i32_1 = arith.constant 0 : i32
    return %c0_i32, %c0_i32_0 : i32, i32
  }
  func.func @transform_6(%arg0: i32) -> (i32, i32) {
    %c0_i32 = arith.constant 0 : i32
    %c0_i32_0 = arith.constant 0 : i32
    %c0_i32_1 = arith.constant 0 : i32
    return %c0_i32, %c0_i32_0 : i32, i32
  }
  func.func @transform_7(%arg0: i32) -> (i32, i32, i32) {
    %c0_i32 = arith.constant 0 : i32
    %c0_i32_0 = arith.constant 0 : i32
    %c0_i32_1 = arith.constant 0 : i32
    %c0_i32_2 = arith.constant 0 : i32
    return %c0_i32, %c0_i32_0, %c0_i32_1 : i32, i32, i32
  }
  func.func @transform_8(%arg0: i32) -> (i32, i32) {
    %c0_i32 = arith.constant 0 : i32
    %c0_i32_0 = arith.constant 0 : i32
    %c0_i32_1 = arith.constant 0 : i32
    return %c0_i32, %c0_i32_0 : i32, i32
  }
  func.func @transform_9(%arg0: i32) -> (i32, i32) {
    %c0_i32 = arith.constant 0 : i32
    %c0_i32_0 = arith.constant 0 : i32
    %c0_i32_1 = arith.constant 0 : i32
    return %c0_i32, %c0_i32_0 : i32, i32
  }
  func.func @transform_10(%arg0: i32) -> (i32, i32) {
    %c0_i32 = arith.constant 0 : i32
    %c0_i32_0 = arith.constant 0 : i32
    %c0_i32_1 = arith.constant 0 : i32
    return %c0_i32, %c0_i32_0 : i32, i32
  }
  func.func @transform_11(%arg0: i32) -> (i32, i32, i32) {
    %c0_i32 = arith.constant 0 : i32
    %c0_i32_0 = arith.constant 0 : i32
    %c0_i32_1 = arith.constant 0 : i32
    %c0_i32_2 = arith.constant 0 : i32
    return %c0_i32, %c0_i32_0, %c0_i32_1 : i32, i32, i32
  }
  func.func @transform_12(%arg0: i32) -> (i32, i32) {
    %c0_i32 = arith.constant 0 : i32
    %c0_i32_0 = arith.constant 0 : i32
    %c0_i32_1 = arith.constant 0 : i32
    return %c0_i32, %c0_i32_0 : i32, i32
  }
  func.func @transform_13(%arg0: i32) -> (i32, i32) {
    %c0_i32 = arith.constant 0 : i32
    %c0_i32_0 = arith.constant 0 : i32
    return %arg0, %c0_i32 : i32, i32
  }
  func.func @transform_14(%arg0: i32) -> (i32, i32) {
    %c0_i32 = arith.constant 0 : i32
    %c0_i32_0 = arith.constant 0 : i32
    return %arg0, %c0_i32 : i32, i32
  }
}

</mosaic_0001>

<bundles_post_ra>
// kernel: alphanet_forward.1
= control target key start
LH: loop header
LB: loop body
LE: loop exit
PB: predicated region body
PF: predicated region fallthrough
CT: control target
= control target key end

     0   :  { %s18223_s0 = inlined_call_operand.vmem [shape: bf16[4,4,16,128], index: 0, kind: input, shape index: {}]   ;;  %s18224_s1 = inlined_call_operand.hbm [shape: bf16[5,1152,128], index: 1, kind: input, shape index: {}]   ;;  %s18225_s2 = inlined_call_operand.hbm [shape: f32[5,1,128], index: 2, kind: input, shape index: {}]   ;;  %s18226_s3 = inlined_call_operand.hbm [shape: f32[5,1,128], index: 3, kind: input, shape index: {}]   ;;  %s18227_s4 = inlined_call_operand.vmem [shape: bf16[128,35], index: 4, kind: input, shape index: {}]   ;;  %s18228_s5 = inlined_call_operand.hbm [shape: f32[1,35], index: 5, kind: input, shape index: {}]   ;;  %s18229_s6 = inlined_call_operand.hbm [shape: f32[1,35], index: 6, kind: input, shape index: {}]   ;;  %s18230_s7 = inlined_call_operand.vmem [shape: bf16[16,3,32], index: 7, kind: input, shape index: {}]   ;;  %s18231_s8 = inlined_call_operand.hbm [shape: f32[1,32], index: 8, kind: input, shape index: {}]   ;;  %s18232_s9 = inlined_call_operand.vmem [shape: bf16[32,1], index: 9, kind: input, shape index: {}]   ;;  %s18233_s10 = inlined_call_operand.<no memory space> [shape: f32[1,1], index: 10, kind: input, shape index: {}]   ;;  %s18234_s11 = inlined_call_operand.vmem [shape: bf16[16,32,16], index: 11, kind: input, shape index: {}]   ;;  %s18235_s12 = inlined_call_operand.hbm [shape: f32[1,16], index: 12, kind: input, shape index: {}]   ;;  %s18236_s13 = inlined_call_operand.hbm [shape: f32[16,16], index: 13, kind: output, shape index: {0}]   ;;  %s18237_s14 = inlined_call_operand.vmem [shape: f32[16,1], index: 14, kind: output, shape index: {1}]  }
   0x1   :  { %18253 = sst [smem:[#allocation29_spill]] %s18230_s7  ;;  %v20_v0 = vstv %s18233_s10 }
   0x2   :  { %18254 = sst [smem:[#allocation30_spill]] %s18232_s9  ;;  %21 = vst [vmem:[#allocation4] sm:$0x1] %v20_v0 }
   0x3   :  { %18255 = sst [smem:[#allocation31_spill]] %s18234_s11 }
   0x4   :  { %18256 = sst [smem:[#allocation32_spill]] %s18236_s13 }
   0x5   :  { %18257 = sst [smem:[#allocation33_spill]] %s18237_s14 }
   0x6   :  { %22 = vsyncpa [#allocation7], 0 }
   0x7   :  { %23 = vsyncpa [#allocation10], 0 }
   0x8   :  { %24 = vsyncpa [#allocation13], 0 }
   0x9   :  { %25 = vsyncpa [#allocation16], 0 }
   0xa   :  { %26 = vsyncpa [#allocation8], 0 }
   0xb   :  { %28 = vsyncpa [#allocation8 + $0x1], 0  ;;  %s16541_s15 = smov 0   ;;  %s16543_s16 = smov 0  }
   0xc   :  { %s16545_s17 = smov 0   ;;  %s16547_s18 = smov 0  }
   0xd LB: > { %18258 = sst [smem:[#allocation24_spill]] %s16432_s15  ;;  %s16562_s10 = sadd.s32 4294967295, %s16444_s18   ;;  %s16444_s18 = sphi %s16547_s18, %s18291_s18   ;;  %s16440_s17 = sphi %s16545_s17, %s18295_s17   ;;  %s16436_s16 = sphi %s16543_s16, %s18294_s16   ;;  %s16432_s15 = sphi %s16541_s15, %s18293_s15  }
   0xe   : > { %s12466_s19 = sadd.s32 4294967294, %s16444_s18   ;;  %s16566_s20 = sadd.s32 1, %s16444_s18  }
   0xf   : > { %18259 = sst [smem:[#allocation25_spill]] %s16566_s20  ;;  %s41_s21 = sadd.s32 1, %s16440_s17 }
  0x10   : > { %s38_s22 = ssub.s32 %s16444_s18, %s16566_s20  ;;  %p48_p0 = scmp.ne.s32.totalorder %s16440_s17, %s16436_s16 }
  0x11   : > { %p39_p1 = scmp.eq.s32.totalorder %s38_s22, 0  ;;  %p49_p2 = scmp.eq.s32.totalorder %s16444_s18, 0 }
  0x12   : > { %p330_p3 = scmp.eq.s32.totalorder %s16562_s10, 1  ;;  %p335_p4 = scmp.ne.s32.totalorder %s16436_s16, %s16432_s15 }
  0x13   : > { %s16578_s23 = scalar_select %p39_p1, %s16440_s17, %s41_s21  }
  0x14   : > { %p16580_p5 = por %p49_p2, %p48_p0  ;;  %p16584_p6 = por %p330_p3, %p48_p0 }
  0x15   : > { %18260 = sst [smem:[#allocation26_spill]] %s16578_s23  ;;  %p336_p7 = scmp.eq.s32.totalorder %s12466_s19, 1 }
  0x16   : > { %s18261_s24 = scalar_select %p16580_p5, 1, 0 }
  0x17   : > { %s18262_s25 = scalar_select %p16584_p6, 1, 0 }
  0x18   : > { %p12467_p8 = scmp.ge.s32.totalorder %s16444_s18, 1  ;;  %p369_p9 = scmp.lt.s32.totalorder %s16444_s18, 3 }
  0x19   : > { %18263 = sst [smem:[#allocation27_spill]] %s18262_s25  ;;  %p16590_p10 = por %p336_p7, %p335_p4 }
  0x1a   : > { %p18245_p11 = scmp.eq.s32.totalorder %s16562_s10, 0  ;;  %p16595_p12 = pnand %p12467_p8, %p369_p9 }
  0x1b   : > { %s18264_s26 = scalar_select %p16590_p10, 1, 0 }
  0x1c   : > { %s18266_s27 = scalar_select %p16595_p12, 1, 0 }
  0x1d   : > { %18265 = sst [smem:[#allocation28_spill]] %s18264_s26  ;;  %s16446_s28 = smov [#allocation9]  }
  0x1e   : > { %s394_s29 = sshll.u32 %s16446_s28, 4  ;;  %p15312_p13 = pneg %p16595_p12  ;;  %s16601_s29 = int_to_ptr.vmem [resolvable:$true] %s394_s29 }
  0x1f   : > { %s16447_s19 = smov [#allocation12]   ;;  %s16448_s22 = smov [#allocation15]  }
  0x20   : > { %p16605_p0 = pnand %p18245_p11, %p15312_p13  ;;  %s424_s21 = sshll.u32 %s16447_s19, 4  ;;  %s16609_s21 = int_to_ptr.vmem [resolvable:$true] %s424_s21 }
  0x21   : > { %s16611_s23 = sshll.u32 %s16448_s22, 4  ;;  %s16170_s28 = scalar_lea.hbm %s18225_s2, 80  ;;  %s450_s23 = int_to_ptr.vmem [resolvable:$true] %s16611_s23 }
  0x22   : > { %p16171_p1 = scmp.ne.s32.totalorder %s18225_s2, %s16170_s28  ;;  %p16621_p2 = pneg %p16605_p0 }
  0x23   : > { %p16177_p7 = scmp.lt.u32.totalorder %s16170_s28, %s18225_s2 }
  0x24   : > { %p16173_p3 = pnand %p16621_p2, %p16171_p1 }
  0x26   : > { %p16174_p4 = pneg %p16173_p3 }
  0x28   : > { %p16179_p8 = pnand %p16177_p7, %p16174_p4 }
  0x2a   : > { %16182 = shalt.err (!%p16179_p8)
}
  0x2b   : > { %s16183_s13 = scalar_lea.vmem %s16601_s29, 80  ;;  %s16190_s15 = scalar_lea.vmem %s16601_s29, 96 }
  0x2c   : > { %p16184_p9 = scmp.ne.s32.totalorder %s16601_s29, %s16183_s13  ;;  %p16191_p1 = scmp.lt.s32.totalorder %s16601_s29, %s16601_s29 }
  0x2d   : > { %p16192_p3 = scmp.lt.s32.totalorder %s16190_s15, %s16183_s13 }
  0x2e   : > { %p16186_p13 = pnand %p16184_p9, %p16621_p2 }
  0x2f   : > { %p16193_p10 = por %p16192_p3, %p16191_p1 }
  0x30   : > { %p16187_p11 = pneg %p16186_p13 }
  0x32   : > { %p16194_p6 = pnand %p16193_p10, %p16187_p11 }
  0x34   : > { %16197 = shalt.err (!%p16194_p6)
}
  0x35   : > { %s18251_s20 = smov 16   ;;  %s18252_s26 = smov 1  }
  0x36   : > { %15318 = dma.hbm_to_vmem [thread:$0]  (!%p16605_p0), %s18225_s2, 80, %s16601_s29, [#allocation10], %s18251_s20, %s18251_s20, %s18252_s26  }
  0x37   : > { %s16198_s13 = scalar_lea.hbm %s18228_s5, 16 }
  0x38   : > { %p16199_p6 = scmp.ne.s32.totalorder %s18228_s5, %s16198_s13  ;;  %p16205_p4 = scmp.lt.u32.totalorder %s16198_s13, %s18228_s5 }
  0x3a   : > { %p16201_p10 = pnand %p16199_p6, %p16621_p2 }
  0x3c   : > { %p16202_p11 = pneg %p16201_p10 }
  0x3e   : > { %p16207_p7 = pnand %p16205_p4, %p16202_p11 }
  0x40   : > { %16210 = shalt.err (!%p16207_p7)
}
  0x41   : > { %s16211_s14 = scalar_lea.vmem %s16609_s21, 16  ;;  %s16218_s9 = scalar_lea.vmem %s16609_s21, 32 }
  0x42   : > { %p16212_p8 = scmp.ne.s32.totalorder %s16609_s21, %s16211_s14  ;;  %p16219_p1 = scmp.lt.s32.totalorder %s16609_s21, %s16609_s21 }
  0x43   : > { %p16220_p3 = scmp.lt.s32.totalorder %s16218_s9, %s16211_s14 }
  0x44   : > { %p16214_p9 = pnand %p16212_p8, %p16621_p2 }
  0x45   : > { %p16221_p6 = por %p16220_p3, %p16219_p1 }
  0x46   : > { %p16215_p13 = pneg %p16214_p9 }
  0x48   : > { %p16222_p10 = pnand %p16221_p6, %p16215_p13 }
  0x4a   : > { %16225 = shalt.err (!%p16222_p10)
}
  0x4b   : > { %15324 = dma.hbm_to_vmem [thread:$0]  (!%p16605_p0), %s18228_s5, 16, %s16609_s21, [#allocation13]  }
  0x4c   : > { %s16226_s19 = scalar_lea.hbm %s18231_s8, 16 }
  0x4d   : > { %p16227_p11 = scmp.ne.s32.totalorder %s18231_s8, %s16226_s19  ;;  %p16233_p8 = scmp.lt.u32.totalorder %s16226_s19, %s18231_s8 }
  0x4f   : > { %p16229_p4 = pnand %p16227_p11, %p16621_p2 }
  0x51   : > { %p16230_p7 = pneg %p16229_p4 }
  0x53   : > { %p16235_p9 = pnand %p16233_p8, %p16230_p7 }
  0x55   : > { %16238 = shalt.err (!%p16235_p9)
}
  0x56   : > { %s16239_s9 = scalar_lea.vmem %s450_s23, 16  ;;  %s16246_s21 = scalar_lea.vmem %s450_s23, 32 }
  0x57   : > { %p16240_p13 = scmp.ne.s32.totalorder %s450_s23, %s16239_s9  ;;  %p16247_p6 = scmp.lt.s32.totalorder %s450_s23, %s450_s23 }
  0x58   : > { %p16248_p10 = scmp.lt.s32.totalorder %s16246_s21, %s16239_s9 }
  0x59   : > { %p16242_p1 = pnand %p16240_p13, %p16621_p2 }
  0x5a   : > { %p16249_p12 = por %p16248_p10, %p16247_p6 }
  0x5b   : > { %p16243_p3 = pneg %p16242_p1 }
  0x5d   : > { %p16250_p5 = pnand %p16249_p12, %p16243_p3 }
  0x5f   : > { %16253 = shalt.err (!%p16250_p5)
}
  0x60   : > { %15330 = dma.hbm_to_vmem [thread:$0]  (!%p16605_p0), %s18231_s8, 16, %s450_s23, [#allocation16]  }
  0x61   : > { %s16451_s29 = smov [#allocation6]   ;;  %s16254_s13 = scalar_lea.hbm %s18224_s1, 46080 }
  0x62   : > { %s381_s28 = sshll.u32 %s16451_s29, 4  ;;  %p16255_p11 = scmp.ne.s32.totalorder %s18224_s1, %s16254_s13  ;;  %s382_s28 = int_to_ptr.vmem [resolvable:$true] %s381_s28 }
  0x63   : > { %p16261_p4 = scmp.lt.u32.totalorder %s16254_s13, %s18224_s1 }
  0x64   : > { %p16257_p5 = pnand %p16255_p11, %p16621_p2 }
  0x66   : > { %p16258_p12 = pneg %p16257_p5 }
  0x68   : > { %p16263_p7 = pnand %p16261_p4, %p16258_p12 }
  0x6a   : > { %16266 = shalt.err (!%p16263_p7)
}
  0x6b   : > { %s16267_s23 = scalar_lea.vmem %s382_s28, 46080  ;;  %p16275_p1 = scmp.lt.s32.totalorder %s382_s28, %s382_s28 }
  0x6c   : > { %p16268_p8 = scmp.ne.s32.totalorder %s382_s28, %s16267_s23  ;;  %p16276_p3 = scmp.lt.s32.totalorder %s16267_s23, %s16267_s23 }
  0x6e   : > { %p16270_p9 = pnand %p16268_p8, %p16621_p2  ;;  %p16277_p6 = por %p16276_p3, %p16275_p1 }
  0x70   : > { %p16271_p13 = pneg %p16270_p9 }
  0x72   : > { %p16278_p10 = pnand %p16277_p6, %p16271_p13 }
  0x74   : > { %16281 = shalt.err (!%p16278_p10)
}
  0x75   : > { %s16452_s7 = smov 64   ;;  %s16453_s11 = smov 4  }
  0x76   : > { %15315 = dma.hbm_to_vmem [thread:$0]  (!%p16605_p0), %s18224_s1, 46080, %s382_s28, [#allocation7], %s16452_s7, %s16452_s7, %s16453_s11  }
  0x77   : > { %s16454_s22 = smov [#allocation11]   ;;  %s16455_s15 = smov [#allocation14]  }
  0x78   : > { %s407_s13 = sshll.u32 %s16454_s22, 4  ;;  %s435_s14 = sshll.u32 %s16455_s15, 4  ;;  %s408_s13 = int_to_ptr.vmem [resolvable:$true] %s407_s13  ;;  %s16707_s14 = int_to_ptr.vmem [resolvable:$true] %s435_s14 }
  0x79   : > { %s16282_s23 = scalar_lea.hbm %s18226_s3, 80 }
  0x7a   : > { %p16283_p11 = scmp.ne.s32.totalorder %s18226_s3, %s16282_s23  ;;  %p16289_p4 = scmp.lt.u32.totalorder %s16282_s23, %s18226_s3 }
  0x7c   : > { %p16285_p5 = pnand %p16283_p11, %p16621_p2 }
  0x7e   : > { %p16286_p12 = pneg %p16285_p5 }
  0x80   : > { %p16291_p7 = pnand %p16289_p4, %p16286_p12 }
  0x82   : > { %16294 = shalt.err (!%p16291_p7)
}
  0x83   : > { %s16295_s7 = scalar_lea.vmem %s408_s13, 80  ;;  %s16302_s11 = scalar_lea.vmem %s408_s13, 96 }
  0x84   : > { %p16296_p8 = scmp.ne.s32.totalorder %s408_s13, %s16295_s7  ;;  %p16303_p1 = scmp.lt.s32.totalorder %s408_s13, %s408_s13 }
  0x85   : > { %p16304_p3 = scmp.lt.s32.totalorder %s16302_s11, %s16295_s7 }
  0x86   : > { %p16298_p9 = pnand %p16296_p8, %p16621_p2 }
  0x87   : > { %p16305_p6 = por %p16304_p3, %p16303_p1 }
  0x88   : > { %p16299_p13 = pneg %p16298_p9 }
  0x8a   : > { %p16306_p10 = pnand %p16305_p6, %p16299_p13 }
  0x8c   : > { %16309 = shalt.err (!%p16306_p10)
}
  0x8d   : > { %s18269_s20 = smov 1   ;;  %s18270_s26 = smov 16  }
  0x8e   : > { %15321 = dma.hbm_to_vmem [thread:$0]  (!%p16605_p0), %s18226_s3, 80, %s408_s13, [#allocation10], %s18270_s26, %s18270_s26, %s18269_s20  }
  0x8f   : > { %s16310_s21 = scalar_lea.hbm %s18229_s6, 16 }
  0x90   : > { %p16311_p11 = scmp.ne.s32.totalorder %s18229_s6, %s16310_s21  ;;  %p16317_p4 = scmp.lt.u32.totalorder %s16310_s21, %s18229_s6 }
  0x92   : > { %p16313_p5 = pnand %p16311_p11, %p16621_p2 }
  0x94   : > { %p16314_p12 = pneg %p16313_p5 }
  0x96   : > { %p16319_p7 = pnand %p16317_p4, %p16314_p12 }
  0x98   : > { %16322 = shalt.err (!%p16319_p7)
}
  0x99   : > { %s16323_s13 = scalar_lea.vmem %s16707_s14, 16  ;;  %s16330_s11 = scalar_lea.vmem %s16707_s14, 32 }
  0x9a   : > { %p16324_p8 = scmp.ne.s32.totalorder %s16707_s14, %s16323_s13  ;;  %p16331_p1 = scmp.lt.s32.totalorder %s16707_s14, %s16707_s14 }
  0x9b   : > { %p16332_p3 = scmp.lt.s32.totalorder %s16330_s11, %s16323_s13 }
  0x9c   : > { %p16326_p9 = pnand %p16324_p8, %p16621_p2 }
  0x9d   : > { %p16333_p6 = por %p16332_p3, %p16331_p1 }
  0x9e   : > { %p16327_p13 = pneg %p16326_p9 }
  0xa0   : > { %p16334_p10 = pnand %p16333_p6, %p16327_p13 }
  0xa2   : > { %16337 = shalt.err (!%p16334_p10)
}
  0xa3   : > { %15327 = dma.hbm_to_vmem [thread:$0]  (!%p16605_p0), %s18229_s6, 16, %s16707_s14, [#allocation13]  }
  0xa4   : > { %s16456_s19 = smov [#allocation17]   ;;  %s16338_s21 = scalar_lea.hbm %s18235_s12, 16 }
  0xa5   : > { %s469_s22 = sshll.u32 %s16456_s19, 4  ;;  %p16339_p11 = scmp.ne.s32.totalorder %s18235_s12, %s16338_s21  ;;  %s470_s22 = int_to_ptr.vmem [resolvable:$true] %s469_s22 }
  0xa6   : > { %p16345_p4 = scmp.lt.u32.totalorder %s16338_s21, %s18235_s12 }
  0xa7   : > { %p16341_p5 = pnand %p16339_p11, %p16621_p2 }
  0xa9   : > { %p16342_p12 = pneg %p16341_p5 }
  0xab   : > { %p16347_p7 = pnand %p16345_p4, %p16342_p12 }
  0xad   : > { %16350 = shalt.err (!%p16347_p7)
}
  0xae   : > { %s16351_s14 = scalar_lea.vmem %s470_s22, 16  ;;  %s16358_s13 = scalar_lea.vmem %s470_s22, 32 }
  0xaf   : > { %p16352_p8 = scmp.ne.s32.totalorder %s470_s22, %s16351_s14  ;;  %p16359_p1 = scmp.lt.s32.totalorder %s470_s22, %s470_s22 }
  0xb0   : > { %p16360_p3 = scmp.lt.s32.totalorder %s16358_s13, %s16351_s14 }
  0xb1   : > { %p16354_p9 = pnand %p16352_p8, %p16621_p2 }
  0xb2   : > { %p16361_p6 = por %p16360_p3, %p16359_p1 }
  0xb3   : > { %p16355_p13 = pneg %p16354_p9 }
  0xb5   : > { %p16362_p10 = pnand %p16361_p6, %p16355_p13 }
  0xb7   : > { %16365 = shalt.err (!%p16362_p10)
}
  0xb8   : > { %15333 = dma.hbm_to_vmem [thread:$0]  (!%p16605_p0), %s18235_s12, 16, %s470_s22, [#allocation16]  }
  0xb9   : > { %p12475_p11 = scmp.ge.s32.totalorder %s16444_s18, 2 }
  0xba   : > { %p18271_p2 = scmp.ne.s32.totalorder (!%p12475_p11), %s18261_s24, 0 }
  0xbb   : > { %476 = sbr.rel (%p12475_p11) target bundleno = 208 (0xd0), region = 64 }
  0xc2   : > { %479 = sbr.rel (!%p18271_p2) target bundleno = 208 (0xd0), region = 68  ;;  %s481_s25 = sand.u32 (%p18271_p2), 1, %s16440_s17  }
  0xc3   : > { %s12477_s26 = sshll.u32 (%p18271_p2), %s16444_s18, 2  ;;  %s12476_s19 = sshll.u32 (%p18271_p2), %s481_s25, 6 }
  0xc4   : > { %s16782_s30 = scalar_lea.vmem (%p18271_p2), %s18223_s0, %s12477_s26  ;;  %s483_s24 = scalar_lea.vmem (%p18271_p2), [#allocation5], %s12476_s19 }
  0xc5   : > { %v501_v1 = vld [vmem:[%s16782_s30] sm:$0xf] (%p18271_p2)  ;;  %v503_v2 = vld [vmem:[%s16782_s30 + $0x8] sm:$0xf] (%p18271_p2)  ;;  %v505_v3 = vld [vmem:[%s16782_s30 + $0x10] sm:$0xf] (%p18271_p2) }
  0xc6   : > { %502 = vst [vmem:[%s483_s24] sm:$0xf] (%p18271_p2), %v501_v1  ;;  %504 = vst [vmem:[%s483_s24 + $0x4] sm:$0xf] (%p18271_p2), %v503_v2  ;;  %v507_v4 = vld [vmem:[%s16782_s30 + $0x18] sm:$0xf] (%p18271_p2) }
  0xc7   : > { %v509_v5 = vld [vmem:[%s16782_s30 + $0x20] sm:$0xf] (%p18271_p2)  ;;  %506 = vst [vmem:[%s483_s24 + $0x8] sm:$0xf] (%p18271_p2), %v505_v3  ;;  %508 = vst [vmem:[%s483_s24 + $0xc] sm:$0xf] (%p18271_p2), %v507_v4 }
  0xc8   : > { %510 = vst [vmem:[%s483_s24 + $0x10] sm:$0xf] (%p18271_p2), %v509_v5  ;;  %v511_v6 = vld [vmem:[%s16782_s30 + $0x28] sm:$0xf] (%p18271_p2)  ;;  %v513_v7 = vld [vmem:[%s16782_s30 + $0x30] sm:$0xf] (%p18271_p2) }
  0xc9   : > { %v515_v8 = vld [vmem:[%s16782_s30 + $0x38] sm:$0xf]  ;;  %512 = vst [vmem:[%s483_s24 + $0x14] sm:$0xf] %v511_v6  ;;  %514 = vst [vmem:[%s483_s24 + $0x18] sm:$0xf] %v513_v7 }
  0xca   : > { %516 = vst [vmem:[%s483_s24 + $0x1c] sm:$0xf] %v515_v8  ;;  %v517_v9 = vld [vmem:[%s16782_s30 + $0x40] sm:$0xf]  ;;  %v519_v10 = vld [vmem:[%s16782_s30 + $0x48] sm:$0xf] }
  0xcb   : > { %v521_v11 = vld [vmem:[%s16782_s30 + $0x50] sm:$0xf]  ;;  %518 = vst [vmem:[%s483_s24 + $0x20] sm:$0xf] %v517_v9  ;;  %520 = vst [vmem:[%s483_s24 + $0x24] sm:$0xf] %v519_v10 }
  0xcc   : > { %522 = vst [vmem:[%s483_s24 + $0x28] sm:$0xf] %v521_v11  ;;  %v523_v12 = vld [vmem:[%s16782_s30 + $0x58] sm:$0xf]  ;;  %v525_v13 = vld [vmem:[%s16782_s30 + $0x60] sm:$0xf] }
  0xcd   : > { %v527_v14 = vld [vmem:[%s16782_s30 + $0x68] sm:$0xf]  ;;  %524 = vst [vmem:[%s483_s24 + $0x2c] sm:$0xf] %v523_v12  ;;  %526 = vst [vmem:[%s483_s24 + $0x30] sm:$0xf] %v525_v13 }
  0xce   : > { %528 = vst [vmem:[%s483_s24 + $0x34] sm:$0xf] %v527_v14  ;;  %v529_v15 = vld [vmem:[%s16782_s30 + $0x70] sm:$0xf]  ;;  %v531_v16 = vld [vmem:[%s16782_s30 + $0x78] sm:$0xf] }
  0xcf   : > { %530 = vst [vmem:[%s483_s24 + $0x38] sm:$0xf] %v529_v15  ;;  %532 = vst [vmem:[%s483_s24 + $0x3c] sm:$0xf] %v531_v16 }
  0xd0 PF: > { %p18272_p0 = scmp.ne.s32.totalorder %s18266_s27, 0 }
  0xd1   : > { %s16803_s22 = sand.u32 (!%p18272_p0), 1, %s16436_s16   ;;  %p18273_p5 = scmp.eq.s32.totalorder (!%p18272_p0), %s16562_s10, 0 }
  0xd2   : > { %590 = sbr.rel (%p18272_p0) target bundleno = 3112 (0xc28), region = 109  ;;  %s12479_s21 = sshll.u32 (!%p18272_p0), %s16803_s22, 6 }
  0xd3   : > { %s16806_s23 = scalar_lea.vmem (!%p18272_p0), [#allocation5], %s12479_s21 }
  0xd9   : > { %16411 = dma.done.wait (%p18273_p5), [#allocation7], 46080   ;;  %p18274_p12 = pmov %p18273_p5 }
  0xda   : > { %p18275_p4 = pmov %p18273_p5 }
  0xdb   : > { %16413 = vsyncadd (%p18274_p12), [#allocation7], 4294921216 }
  0xdc   : > { %16415 = dma.done.wait (%p18275_p4), [#allocation10], 160   ;;  %p18276_p7 = pmov %p18275_p4 }
  0xdd   : > { %p18277_p8 = pmov %p18275_p4 }
  0xde   : > { %16417 = vsyncadd (%p18276_p7), [#allocation10], 4294967136 }
  0xdf   : > { %16419 = dma.done.wait (%p18277_p8), [#allocation13], 32   ;;  %p18278_p9 = pmov %p18275_p4 }
  0xe0   : > { %p18279_p13 = pmov %p18275_p4 }
  0xe1   : > { %16421 = vsyncadd (%p18278_p9), [#allocation13], 4294967264 }
  0xe2   : > { %16423 = dma.done.wait (%p18279_p13), [#allocation16], 32   ;;  %p18280_p1 = pmov %p18275_p4 }
  0xe3   : > { %v16457_v17 = vmov 0   ;;  %v15401_v18 = vld [vmem:[#allocation6 + $0x40] sm:$0xff]   ;;  %v15405_v22 = vld [vmem:[#allocation6 + $0x48] sm:$0xff]   ;;  %v15409_v26 = vld [vmem:[#allocation6 + $0x50] sm:$0xff]   ;;  %vm10395_vm0 = vcmask 1040384   ;;  %vm10396_vm1 = vcmask 1041408  }
  0xe4   : > { %16425 = vsyncadd (%p18280_p1), [#allocation16], 4294967264  ;;  %676 = vst [vmem:[#allocation2 + $0x4] sm:$0xf] %v16457_v17  ;;  %v15402_v19 = vld [vmem:[#allocation6 + $0xc0] sm:$0xff]   ;;  %13399 = vmatprep.subr.bf16.mxu0 %v15401_v18  ;;  %v15406_v23 = vld [vmem:[#allocation6 + $0xc8] sm:$0xff]  }
  0xe5   : > { %677 = vst [vmem:[#allocation2 + $0x8] sm:$0xf] %v16457_v17  ;;  %675 = vst [vmem:[#allocation2] sm:$0xf] %v16457_v17  ;;  %v15403_v20 = vld [vmem:[#allocation6] sm:$0xff]   ;;  %13463 = vmatprep.subr.bf16.mxu1 %v15402_v19  ;;  %v15407_v24 = vld [vmem:[#allocation6 + $0x8] sm:$0xff]  }
  0xe6   : > { %678 = vst [vmem:[#allocation2 + $0xc] sm:$0xf] %v16457_v17  ;;  %679 = vst [vmem:[#allocation2 + $0x10] sm:$0xf] %v16457_v17  ;;  %v15404_v21 = vld [vmem:[#allocation6 + $0x80] sm:$0xff]   ;;  %13400 = vmatpush3.bf16.msra.mxu0 %v15403_v20  ;;  %v15408_v25 = vld [vmem:[#allocation6 + $0x88] sm:$0xff]  }
  0xe7   : > { %680 = vst [vmem:[#allocation2 + $0x14] sm:$0xf] %v16457_v17  ;;  %682 = vst [vmem:[#allocation2 + $0x78] sm:$0xf] %v16457_v17  ;;  %13464 = vmatpush3.bf16.msra.mxu1 %v15404_v21  ;;  %13401 = vmatprep.subr.bf16.mxu0 %v15405_v22  ;;  %v15410_v27 = vld [vmem:[#allocation6 + $0xd0] sm:$0xff]   ;;  %v15413_v30 = vld [vmem:[#allocation6 + $0x58] sm:$0xff]  }
  0xe8   : > { %683 = vst [vmem:[#allocation2 + $0x7c] sm:$0xf] %v16457_v17  ;;  %684 = vst [vmem:[#allocation2 + $0x80] sm:$0xf] %v16457_v17  ;;  %13465 = vmatprep.subr.bf16.mxu1 %v15406_v23  ;;  %v15411_v28 = vld [vmem:[#allocation6 + $0x10] sm:$0xff]   ;;  %v15414_v31 = vld [vmem:[#allocation6 + $0xd8] sm:$0xff]  }
  0xe9   : > { %685 = vst [vmem:[#allocation2 + $0x84] sm:$0xf] %v16457_v17  ;;  %686 = vst [vmem:[#allocation2 + $0x88] sm:$0xf] %v16457_v17  ;;  %v15412_v29 = vld [vmem:[#allocation6 + $0x90] sm:$0xff]   ;;  %v15415_v32 = vld [vmem:[#allocation6 + $0x18] sm:$0xff]  }
  0xea   : > { %687 = vst [vmem:[#allocation2 + $0x8c] sm:$0xf] %v16457_v17  ;;  %689 = vst [vmem:[#allocation2 + $0x18] sm:$0xf] %v16457_v17  ;;  %13402 = vmatpush3.bf16.msra.mxu0 %v15407_v24  ;;  %v15416_v33 = vld [vmem:[#allocation6 + $0x98] sm:$0xff]   ;;  %v15417_v34 = vld [vmem:[#allocation6 + $0x60] sm:$0xff]  }
  0xeb   : > { %690 = vst [vmem:[#allocation2 + $0x30] sm:$0xf] %v16457_v17  ;;  %691 = vst [vmem:[#allocation2 + $0x48] sm:$0xf] %v16457_v17  ;;  %13466 = vmatpush3.bf16.msra.mxu1 %v15408_v25  ;;  %13403 = vmatprep.subr.bf16.mxu0 %v15409_v26  ;;  %v15418_v35 = vld [vmem:[#allocation6 + $0xe0] sm:$0xff]   ;;  %v15421_v38 = vld [vmem:[#allocation6 + $0x68] sm:$0xff]  }
  0xec   : > { %692 = vst [vmem:[#allocation2 + $0x60] sm:$0xf] %v16457_v17  ;;  %696 = vst [vmem:[#allocation2 + $0x2c] sm:$0xf] %v16457_v17  ;;  %13467 = vmatprep.subr.bf16.mxu1 %v15410_v27  ;;  %v15419_v36 = vld [vmem:[#allocation6 + $0x20] sm:$0xff]   ;;  %v15422_v39 = vld [vmem:[#allocation6 + $0xe8] sm:$0xff]  }
  0xed   : > { %697 = vst [vmem:[#allocation2 + $0x44] sm:$0xf] %v16457_v17  ;;  %698 = vst [vmem:[#allocation2 + $0x5c] sm:$0xf] %v16457_v17  ;;  %v15420_v37 = vld [vmem:[#allocation6 + $0xa0] sm:$0xff]   ;;  %v15423_v40 = vld [vmem:[#allocation6 + $0x28] sm:$0xff]  }
  0xee   : > { %699 = vst [vmem:[#allocation2 + $0x74] sm:$0xf] %v16457_v17  ;;  %688 = vst [vmem:[#allocation2] sm:$0xf] %v16457_v17  ;;  %13404 = vmatpush3.bf16.msra.mxu0 %v15411_v28  ;;  %v15424_v41 = vld [vmem:[#allocation6 + $0xa8] sm:$0xff]   ;;  %v15425_v42 = vld [vmem:[#allocation6 + $0x70] sm:$0xff]  }
  0xef   : > { %693 = vst [vmem:[#allocation2 + $0x78] sm:$0xf] %v16457_v17  ;;  %695 = vst [vmem:[#allocation2 + $0x14] sm:$0xf] %v16457_v17  ;;  %13468 = vmatpush3.bf16.msra.mxu1 %v15412_v29  ;;  %13405 = vmatprep.subr.bf16.mxu0 %v15413_v30  ;;  %v15426_v43 = vld [vmem:[#allocation6 + $0xf0] sm:$0xff]   ;;  %v15429_v46 = vld [vmem:[#allocation6 + $0x78] sm:$0xff]  }
  0xf0   : > { %700 = vst [vmem:[#allocation2 + $0x8c] sm:$0xf] %v16457_v17  ;;  %13469 = vmatprep.subr.bf16.mxu1 %v15414_v31  ;;  %v15427_v44 = vld [vmem:[#allocation6 + $0x30] sm:$0xff]   ;;  %v15430_v47 = vld [vmem:[#allocation6 + $0xf8] sm:$0xff]   ;;  %v701_v51 = vld [vmem:[%s16806_s23] sm:$0xff]   ;;  %s18281_s29 = sld [smem:[#allocation29_spill]] }
  0xf1   : > { %v15428_v45 = vld [vmem:[#allocation6 + $0xb0] sm:$0xff]   ;;  %v15431_v48 = vld [vmem:[#allocation6 + $0x38] sm:$0xff]   ;;  %718 = vst [vmem:[#allocation2 + $0x1c] sm:$0xff] %v701_v51   ;;  %v15437_v53 = vld [vmem:[#allocation6 + $0x140] sm:$0xff]   ;;  %vm16460_vm2 = vmmov 0   ;;  %vm10391_vm3 = vcmask 23552  }
  0xf2   : > { %13406 = vmatpush3.bf16.msra.mxu0 %v15415_v32  ;;  %v15432_v49 = vld [vmem:[#allocation6 + $0xb8] sm:$0xff]   ;;  %v15438_v54 = vld [vmem:[#allocation6 + $0x100] sm:$0xff]   ;;  %v703_v56 = vld [vmem:[%s16806_s23 + $0x8] sm:$0xff]   ;;  %s16461_s25 = smov 125   ;;  %s18282_s7 = sld [smem:[#allocation31_spill]]  ;;  %vm11132_vm4 = vcmask 261120  }
  0xf3   : > { %13470 = vmatpush3.bf16.msra.mxu1 %v15416_v33  ;;  %13407 = vmatprep.subr.bf16.mxu0 %v15417_v34  ;;  %v15433_v50 = vld [vmem:[#allocation2 + $0x4] sm:$0xff]   ;;  %v15439_v55 = vld [vmem:[#allocation2 + $0xc] sm:$0xff]   ;;  %720 = vst [vmem:[#allocation2 + $0x24] sm:$0xff] %v703_v56   ;;  %v15443_v60 = vld [vmem:[#allocation6 + $0x148] sm:$0xff]   ;;  %s18283_s30 = sld [smem:[#allocation30_spill]]  ;;  %p670_p3 = scmp.lt.s32.totalorder %s16562_s10, 1 }
  0xf4   : > { %13471 = vmatprep.subr.bf16.mxu1 %v15418_v35  ;;  %2069 = vmatprep.mubr.bf16.mxu0 %v15433_v50  ;;  %v15436_v57 = vld [vmem:[#allocation2 + $0x8] sm:$0xff]   ;;  %v15444_v61 = vld [vmem:[#allocation6 + $0x108] sm:$0xff]   ;;  %v709_v13 = vld [vmem:[%s16806_s23 + $0x20] sm:$0xff]   ;;  %vm12235_vm5 = vcmask 130048   ;;  %s18284_s28 = sld [smem:[#allocation33_spill]]  ;;  %vm11241_vm6 = vcmask 7168  }
  0xf5   : > { %v15435_v52 = vld [vmem:[#allocation2] sm:$0xff]   ;;  %v15441_v58 = vld [vmem:[#allocation2 + $0x8] sm:$0xff]   ;;  %726 = vst [vmem:[#allocation2 + $0x4c] sm:$0xff] %v709_v13   ;;  %v15461_v15 = vld [vmem:[#allocation6 + $0x160] sm:$0xff]   ;;  %s671_s24 = scalar_select %p670_p3, %s16562_s10, 1 }
  0xf6   : > { %13408 = vmatpush3.bf16.msra.mxu0 %v15419_v36  ;;  %v705_v63 = vld [vmem:[%s16806_s23 + $0x10] sm:$0xff]   ;;  %v15442_v1 = vld [vmem:[#allocation2 + $0x10] sm:$0xff]   ;;  %v15465_v22 = vld [vmem:[#allocation6 + $0x1c8] sm:$0xff]   ;;  %s18285_s13 = sld [smem:[#allocation27_spill]]  ;;  %s12487_s11 = sshll.u32 %s16803_s22, 3 }
  0xf7   : > { %13472 = vmatpush3.bf16.msra.mxu1 %v15420_v37  ;;  %13409 = vmatprep.subr.bf16.mxu0 %v15421_v38  ;;  %722 = vst [vmem:[#allocation2 + $0x34] sm:$0xff] %v705_v63   ;;  %v15449_v3 = vld [vmem:[#allocation6 + $0x150] sm:$0xff]   ;;  %v707_v6 = vld [vmem:[%s16806_s23 + $0x18] sm:$0xff]   ;;  %v15462_v18 = vld [vmem:[#allocation6 + $0x120] sm:$0xff]   ;;  %s12488_s21 = sshll.u32 %s671_s24, 3  ;;  %s13300_s20 = sshll.u32 %s16562_s10, 7 }
  0xf8   : > { %13473 = vmatprep.subr.bf16.mxu1 %v15422_v39  ;;  %v15434_v59 = vld [vmem:[#allocation2 + $0x18] sm:$0xff]   ;;  %v15450_v4 = vld [vmem:[#allocation6 + $0x110] sm:$0xff]   ;;  %724 = vst [vmem:[#allocation2 + $0x3c] sm:$0xff] %v707_v6   ;;  %v15455_v10 = vld [vmem:[#allocation6 + $0x158] sm:$0xff]   ;;  %s663_s26 = scalar_lea.vmem [#allocation18], %s12487_s11  ;;  %s18286_s9 = sld [smem:[#allocation32_spill]] }
  0xf9   : > { %2166 = vmatprep.mubr.bf16.mxu1 %v15434_v59  ;;  %v15445_v62 = vld [vmem:[#allocation2 + $0x1c] sm:$0xff]   ;;  %v15456_v11 = vld [vmem:[#allocation6 + $0x118] sm:$0xff]   ;;  %v15463_v19 = vld [vmem:[#allocation6 + $0x1c0] sm:$0xff]   ;;  %s12305_s19 = sshll.u32 %s663_s26, 4  ;;  %s16462_s10 = smov [#allocation18]   ;;  %s18180_s19 = int_to_ptr.vmem [resolvable:$true] %s12305_s19 }
  0xfa   : > { %13410 = vmatpush3.bf16.msra.mxu0 %v15423_v40  ;;  %v15440_v0 = vld [vmem:[#allocation2 + $0x20] sm:$0xff]   ;;  %v15447_v2 = vld [vmem:[#allocation2 + $0x18] sm:$0xff]   ;;  %v15454_v16 = vld [vmem:[#allocation2 + $0x28] sm:$0xff]   ;;  %s673_s14 = scalar_lea.vmem %s18284_s28, %s12488_s21  ;;  %s12288_s21 = scalar_lea.sflag [#allocation8], %s16803_s22 }
  0xfb   : > { %13474 = vmatpush3.bf16.msra.mxu1 %v15424_v41  ;;  %13411 = vmatprep.subr.bf16.mxu0 %v15425_v42  ;;  %v15451_v5 = vld [vmem:[#allocation2 + $0x24] sm:$0xff]   ;;  %v15464_v20 = vld [vmem:[#allocation6 + $0x180] sm:$0xff]   ;;  %v711_v24 = vld [vmem:[%s16806_s23 + $0x28] sm:$0xff]   ;;  %s16370_s27 = sshll.u32 %s16462_s10, 4  ;;  %s16371_s27 = int_to_ptr.vmem [resolvable:$false] %s16370_s27 }
  0xfc   : > { %13475 = vmatprep.subr.bf16.mxu1 %v15426_v43  ;;  %v15448_v8 = vld [vmem:[#allocation2 + $0x20] sm:$0xff]   ;;  %v15458_v21 = vld [vmem:[#allocation2 + $0x48] sm:$0xff]   ;;  %728 = vst [vmem:[#allocation2 + $0x54] sm:$0xff] %v711_v24   ;;  %v15483_v41 = vld [vmem:[#allocation6 + $0x1e0] sm:$0xff]   ;;  %p18287_p10 = scmp.ne.s32.totalorder %s18285_s13, 0  ;;  %s16372_s28 = scalar_lea.vmem %s16371_s27, 256 }
  0xfd   : > { %v15453_v9 = vld [vmem:[#allocation2 + $0x20] sm:$0xff]   ;;  %v15475_v33 = vld [vmem:[#allocation6 + $0x1d8] sm:$0xff]   ;;  %v15484_v42 = vld [vmem:[#allocation6 + $0x1a0] sm:$0xff]   ;;  %p16373_p5 = scmp.lt.s32.totalorder %s18180_s19, %s16371_s27 }
  0xfe   : > { %13412 = vmatpush3.bf16.msra.mxu0 %v15427_v44  ;;  %v15446_v7 = vld [vmem:[#allocation2 + $0x30] sm:$0xff]   ;;  %v15468_v25 = vld [vmem:[#allocation6 + $0x188] sm:$0xff]   ;;  %v15473_v30 = vld [vmem:[#allocation6 + $0x1d0] sm:$0xff]   ;;  %s18178_s24 = scalar_lea.hbm %s18286_s9, %s13300_s20 }
  0xff   : > { %13476 = vmatpush3.bf16.msra.mxu1 %v15428_v45  ;;  %13413 = vmatprep.subr.bf16.mxu0 %v15429_v46  ;;  %v15457_v12 = vld [vmem:[#allocation2 + $0x34] sm:$0xff]   ;;  %v15466_v23 = vld [vmem:[#allocation2 + $0x3c] sm:$0xff]   ;;  %v15476_v34 = vld [vmem:[#allocation2 + $0x4c] sm:$0xff]  }
 0x100   : > { %13477 = vmatprep.subr.bf16.mxu1 %v15430_v47  ;;  %v15452_v14 = vld [vmem:[#allocation2 + $0x38] sm:$0xff]   ;;  %v15459_v17 = vld [vmem:[#allocation2 + $0x30] sm:$0xff]   ;;  %v15474_v32 = vld [vmem:[#allocation6 + $0x190] sm:$0xff]  }
 0x101   : > { %v15460_v26 = vld [vmem:[#allocation2 + $0x38] sm:$0xff]   ;;  %v15470_v35 = vld [vmem:[#allocation2 + $0x40] sm:$0xff]   ;;  %v15478_v37 = vld [vmem:[#allocation6 + $0x198] sm:$0xff]  }
 0x102   : > { %13414 = vmatpush3.bf16.msra.mxu0 %v15431_v48  ;;  %v15469_v27 = vld [vmem:[#allocation2 + $0x38] sm:$0xff]   ;;  %v713_v36 = vld [vmem:[%s16806_s23 + $0x30] sm:$0xff]   ;;  %v715_v47 = vld [vmem:[%s16806_s23 + $0x38] sm:$0xff]   ;;  %s16366_s23 = scalar_lea.vmem %s18180_s19, 128 }
 0x103   : > { %13478 = vmatpush3.bf16.msra.mxu1 %v15432_v49  ;;  %13527 = vmatprep.subr.bf16.mxu0 %v15437_v53  ;;  %v15471_v28 = vld [vmem:[#allocation6 + $0x168] sm:$0xff]   ;;  %v15467_v31 = vld [vmem:[#allocation2 + $0x50] sm:$0xff]   ;;  %730 = vst [vmem:[#allocation2 + $0x64] sm:$0xff] %v713_v36   ;;  %v15479_v38 = vld [vmem:[#allocation2 + $0x48] sm:$0xff]   ;;  %p16367_p6 = scmp.ne.s32.totalorder %s18180_s19, %s16366_s23  ;;  %p16374_p12 = scmp.lt.s32.totalorder %s16372_s28, %s16366_s23 }
 0x104   : > { %13591 = vmatprep.subr.bf16.mxu1 %v15463_v19  ;;  %v15472_v29 = vld [vmem:[#allocation6 + $0x128] sm:$0xff]   ;;  %v15481_v39 = vld [vmem:[#allocation6 + $0x170] sm:$0xff]   ;;  %v15480_v44 = vld [vmem:[#allocation2 + $0x50] sm:$0xff]   ;;  %732 = vst [vmem:[#allocation2 + $0x6c] sm:$0xff] %v715_v47  }
 0x105   : > { %2070 = vmatmul.mubr.bf16.vlgmr.msra.gmra.mrb[0].mxu0 %v15435_v52  ;;  %v15482_v40 = vld [vmem:[#allocation6 + $0x130] sm:$0xff]   ;;  %v15485_v45 = vld [vmem:[#allocation6 + $0x1e8] sm:$0xff]   ;;  %v15489_v49 = vld [vmem:[#allocation2 + $0x50] sm:$0xff]   ;;  %p16368_p2 = pnand %p16367_p6, %p18287_p10  ;;  %p16375_p4 = por %p16374_p12, %p16373_p5 }
 0x106   : > { %13528 = vmatpush3.bf16.msra.mxu0 %v15438_v54  ;;  %2077 = vmatprep.mubr.bf16.mxu0 %v15439_v55  ;;  %v15486_v46 = vld [vmem:[#allocation2 + $0x54] sm:$0xff]   ;;  %v15491_v50 = vld [vmem:[#allocation6 + $0x178] sm:$0xff]   ;;  %v15493_v53 = vld [vmem:[#allocation6 + $0x1f0] sm:$0xff]  }
 0x107   : > { %2167 = vmatmul.mubr.bf16.vlgmr.msra.gmra.mrb[0].mxu1 %v15436_v57  ;;  %13529 = vmatprep.subr.bf16.mxu0 %v15443_v60  ;;  %v15488_v48 = vld [vmem:[#allocation6 + $0x1a8] sm:$0xff]   ;;  %v15492_v51 = vld [vmem:[#allocation6 + $0x138] sm:$0xff]   ;;  %v15494_v54 = vld [vmem:[#allocation6 + $0x1b0] sm:$0xff]   ;;  %p16369_p0 = pneg %p16368_p2 }
 0x108   : > { %2174 = vmatprep.mubr.bf16.mxu1 %v15440_v0  ;;  %13592 = vmatpush3.bf16.msra.mxu1 %v15464_v20  ;;  %v15490_v52 = vld [vmem:[#allocation2 + $0x58] sm:$0xff]   ;;  %v15495_v56 = vld [vmem:[#allocation6 + $0x1f8] sm:$0xff]   ;;  %v15496_v57 = vld [vmem:[#allocation2 + $0x20] sm:$0xff]  }
 0x109   : > { %13593 = vmatprep.subr.bf16.mxu1 %v15465_v22  ;;  %v15498_v59 = vld [vmem:[#allocation2 + $0x1c] sm:$0xff]   ;;  %v15499_v60 = vld [vmem:[#allocation6 + $0x200] sm:$0xff]   ;;  %v15502_v63 = vld [vmem:[#allocation2 + $0x28] sm:$0xff]   ;;  %p16376_p7 = pnand %p16375_p4, %p16369_p0 }
 0x10a   : > { %13530 = vmatpush3.bf16.msra.mxu0 %v15444_v61  ;;  %v15477_v43 = vld [vmem:[#allocation2 + $0x60] sm:$0xff]   ;;  %v15500_v61 = vld [vmem:[#allocation2 + $0x34] sm:$0xff]   ;;  %v15510_v6 = vld [vmem:[#allocation2 + $0x4c] sm:$0xff]  }
 0x10b   : > { %13531 = vmatprep.subr.bf16.mxu0 %v15449_v3  ;;  %v15487_v55 = vld [vmem:[#allocation2 + $0x68] sm:$0xff]   ;;  %v15507_v3 = vld [vmem:[#allocation2 + $0x38] sm:$0xff]   ;;  %v15539_v36 = vld [vmem:[#allocation2 + $0x50] sm:$0xff]  }
 0x10c   : > { %13594 = vmatpush3.bf16.msra.mxu1 %v15468_v25  ;;  %v15503_v0 = vld [vmem:[#allocation2 + $0x24] sm:$0xff]   ;;  %v15513_v13 = vld [vmem:[#allocation2 + $0x3c] sm:$0xff]   ;;  %v15523_v24 = vld [vmem:[#allocation2 + $0x54] sm:$0xff]  }
 0x10d   : > { %2078 = vmatmul.mubr.bf16.gmra.mrb[4].mxu0 %v15441_v58  ;;  %13595 = vmatprep.subr.bf16.mxu1 %v15473_v30  ;;  %v15497_v58 = vld [vmem:[#allocation6 + $0x1b8] sm:$0xff]   ;;  %v15522_v19 = vld [vmem:[#allocation2 + $0x58] sm:$0xff]   ;;  %v15529_v20 = vld [vmem:[#allocation6 + $0x230] sm:$0xff]  }
 0x10e   : > { %2085 = vmatprep.mubr.bf16.mxu0 %v15445_v62  ;;  %13532 = vmatpush3.bf16.msra.mxu0 %v15450_v4  ;;  %v15501_v62 = vld [vmem:[#allocation2 + $0x30] sm:$0xff]   ;;  %v15509_v4 = vld [vmem:[#allocation6 + $0x210] sm:$0xff]   ;;  %v15531_v30 = vld [vmem:[#allocation2 + $0x78] sm:$0xff]  }
 0x10f   : > { %2175 = vmatmul.mubr.bf16.gmra.mrb[4].mxu1 %v15442_v1  ;;  %13533 = vmatprep.subr.bf16.mxu0 %v15455_v10  ;;  %v15504_v1 = vld [vmem:[#allocation6 + $0x208] sm:$0xff]   ;;  %v15511_v10 = vld [vmem:[#allocation2 + $0x48] sm:$0xff]  }
 0x110   : > { %2182 = vmatprep.mubr.bf16.mxu1 %v15446_v7  ;;  %13596 = vmatpush3.bf16.msra.mxu1 %v15474_v32  ;;  %v15508_v7 = vld [vmem:[#allocation2 + $0x34] sm:$0xff]   ;;  %v15534_v22 = vld [vmem:[#allocation6 + $0x238] sm:$0xff]   ;;  %v15550_v47 = vld [vmem:[#allocation6 + $0x250] sm:$0xff]  }
 0x111   : > { %13597 = vmatprep.subr.bf16.mxu1 %v15475_v33  ;;  %v15527_v25 = vld [vmem:[#allocation2 + $0x68] sm:$0xff]   ;;  %v15537_v33 = vld [vmem:[#allocation2 + $0x38] sm:$0xff]  }
 0x112   : > { %13534 = vmatpush3.bf16.msra.mxu0 %v15456_v11  ;;  %v15515_v11 = vld [vmem:[#allocation2 + $0x54] sm:$0xff]   ;;  %v15533_v32 = vld [vmem:[#allocation2 + $0x6c] sm:$0xff]  }
 0x113   : > { %13535 = vmatprep.subr.bf16.mxu0 %v15461_v15  ;;  %v15524_v15 = vld [vmem:[#allocation6 + $0x228] sm:$0xff]  }
 0x114   : > { %13598 = vmatpush3.bf16.msra.mxu1 %v15478_v37  ;;  %v15540_v37 = vld [vmem:[#allocation2 + $0x58] sm:$0xff]  }
 0x115   : > { %2086 = vmatmul.mubr.bf16.gmra.mrb[8].mxu0 %v15447_v2  ;;  %13599 = vmatprep.subr.bf16.mxu1 %v15483_v41  ;;  %v15505_v2 = vld [vmem:[#allocation2 + $0x3c] sm:$0xff]   ;;  %v15544_v41 = vld [vmem:[#allocation2 + $0x88] sm:$0xff]  }
 0x116   : > { %2093 = vmatprep.mubr.bf16.mxu0 %v15451_v5  ;;  %13536 = vmatpush3.bf16.msra.mxu0 %v15462_v18  ;;  %v15506_v5 = vld [vmem:[#allocation2 + $0x38] sm:$0xff]   ;;  %v15520_v18 = vld [vmem:[#allocation2 + $0x64] sm:$0xff]  }
 0x117   : > { %2183 = vmatmul.mubr.bf16.gmra.mrb[8].mxu1 %v15448_v8  ;;  %13537 = vmatprep.subr.bf16.mxu0 %v15471_v28  ;;  %v15512_v8 = vld [vmem:[#allocation2 + $0x40] sm:$0xff]  }
 0x118   : > { %2190 = vmatprep.mubr.bf16.mxu1 %v15452_v14  ;;  %13600 = vmatpush3.bf16.msra.mxu1 %v15484_v42  ;;  %v15517_v14 = vld [vmem:[#allocation2 + $0x50] sm:$0xff]   ;;  %v15530_v28 = vld [vmem:[#allocation2 + $0x7c] sm:$0xff]  }
 0x119   : > { %13601 = vmatprep.subr.bf16.mxu1 %v15485_v45  ;;  %v15545_v42 = vld [vmem:[#allocation6 + $0x280] sm:$0xff]   ;;  %v15548_v45 = vld [vmem:[#allocation6 + $0x248] sm:$0xff]  }
 0x11a   : > { %13538 = vmatpush3.bf16.msra.mxu0 %v15472_v29  ;;  %v15532_v29 = vld [vmem:[#allocation2 + $0x70] sm:$0xff]  }
 0x11b   : > { %13539 = vmatprep.subr.bf16.mxu0 %v15481_v39  ;;  %v15542_v39 = vld [vmem:[#allocation2 + $0x70] sm:$0xff]  }
 0x11c   : > { %13602 = vmatpush3.bf16.msra.mxu1 %v15488_v48  ;;  %v15551_v48 = vld [vmem:[#allocation6 + $0x298] sm:$0xff]  }
 0x11d   : > { %2094 = vmatmul.mubr.bf16.gmra.mrb[12].mxu0 %v15453_v9  ;;  %13603 = vmatprep.subr.bf16.mxu1 %v15493_v53  ;;  %v15514_v9 = vld [vmem:[#allocation6 + $0x218] sm:$0xff]   ;;  %v15556_v53 = vld [vmem:[#allocation6 + $0x268] sm:$0xff]  }
 0x11e   : > { %2101 = vmatprep.mubr.bf16.mxu0 %v15457_v12  ;;  %13540 = vmatpush3.bf16.msra.mxu0 %v15482_v40  ;;  %v15519_v12 = vld [vmem:[#allocation6 + $0x220] sm:$0xff]   ;;  %v15543_v40 = vld [vmem:[#allocation2 + $0x80] sm:$0xff]  }
 0x11f   : > { %2191 = vmatmul.mubr.bf16.gmra.mrb[12].mxu1 %v15454_v16  ;;  %13541 = vmatprep.subr.bf16.mxu0 %v15491_v50  ;;  %v15516_v16 = vld [vmem:[#allocation2 + $0x50] sm:$0xff]  }
 0x120   : > { %2198 = vmatprep.mubr.bf16.mxu1 %v15458_v21  ;;  %13604 = vmatpush3.bf16.msra.mxu1 %v15494_v54  ;;  %v15521_v21 = vld [vmem:[#allocation2 + $0x60] sm:$0xff]   ;;  %v15553_v50 = vld [vmem:[#allocation6 + $0x2a0] sm:$0xff]  }
 0x121   : > { %13605 = vmatprep.subr.bf16.mxu1 %v15495_v56  ;;  %v15557_v54 = vld [vmem:[#allocation6 + $0x300] sm:$0xff]   ;;  %v15559_v56 = vld [vmem:[#allocation6 + $0x2b0] sm:$0xff]  }
 0x122   : > { %13542 = vmatpush3.bf16.msra.mxu0 %v15492_v51  ;;  %v15554_v51 = vld [vmem:[#allocation6 + $0x260] sm:$0xff]  }
 0x123   : > { %14858 = vmatprep.subr.bf16.mxu0 %v15499_v60 }
 0x124   : > { %13606 = vmatpush3.bf16.msra.mxu1 %v15497_v58  ;;  %v15560_v58 = vld [vmem:[#allocation6 + $0x270] sm:$0xff]  }
 0x125   : > { %2102 = vmatmul.mubr.bf16.gmra.mrb[16].mxu0 %v15459_v17  ;;  %v15518_v17 = vld [vmem:[#allocation2 + $0x4c] sm:$0xff]   ;;  %13671 = vmatprep.subr.bf16.mxu1 %v15545_v42 }
 0x126   : > { %2109 = vmatprep.mubr.bf16.mxu0 %v15466_v23  ;;  %v15525_v23 = vld [vmem:[#allocation2 + $0x6c] sm:$0xff]  }
 0x127   : > { %2199 = vmatmul.mubr.bf16.gmra.mrb[16].mxu1 %v15460_v26  ;;  %v15526_v26 = vld [vmem:[#allocation2 + $0x68] sm:$0xff]  }
 0x128   : > { %2206 = vmatprep.mubr.bf16.mxu1 %v15467_v31  ;;  %v15535_v31 = vld [vmem:[#allocation2 + $0x84] sm:$0xff]  }
 0x12d   : > { %2110 = vmatmul.mubr.bf16.gmra.mrb[20].mxu0 %v15469_v27  ;;  %v15528_v27 = vld [vmem:[#allocation2 + $0x64] sm:$0xff]  }
 0x12e   : > { %2117 = vmatprep.mubr.bf16.mxu0 %v15476_v34  ;;  %v15536_v34 = vld [vmem:[#allocation2 + $0x80] sm:$0xff]  }
 0x12f   : > { %2207 = vmatmul.mubr.bf16.gmra.mrb[20].mxu1 %v15470_v35  ;;  %v15538_v35 = vld [vmem:[#allocation2 + $0x40] sm:$0xff]  }
 0x130   : > { %2214 = vmatprep.mubr.bf16.mxu1 %v15477_v43  ;;  %v15546_v43 = vld [vmem:[#allocation6 + $0x240] sm:$0xff]  }
 0x135   : > { %2118 = vmatmul.mubr.bf16.gmra.mrb[24].mxu0 %v15479_v38  ;;  %v15541_v38 = vld [vmem:[#allocation2 + $0x68] sm:$0xff]  }
 0x136   : > { %2125 = vmatprep.mubr.bf16.mxu0 %v15486_v46  ;;  %v15549_v46 = vld [vmem:[#allocation6 + $0x290] sm:$0xff]  }
 0x137   : > { %2215 = vmatmul.mubr.bf16.gmra.mrb[24].mxu1 %v15480_v44  ;;  %v15547_v44 = vld [vmem:[#allocation6 + $0x288] sm:$0xff]  }
 0x138   : > { %2222 = vmatprep.mubr.bf16.mxu1 %v15487_v55  ;;  %v15558_v55 = vld [vmem:[#allocation6 + $0x2c0] sm:$0xff]  }
 0x13d   : > { %2126 = vmatmul.mubr.bf16.gmra.mrb[28].mxu0 %v15489_v49  ;;  %v15552_v49 = vld [vmem:[#allocation6 + $0x258] sm:$0xff]  }
 0x13e   : > { %2263 = vmatprep.mubr.bf16.mxu0 %v15496_v57 }
 0x13f   : > { %2223 = vmatmul.mubr.bf16.gmra.mrb[28].mxu1 %v15490_v52  ;;  %v15555_v52 = vld [vmem:[#allocation6 + $0x2a8] sm:$0xff]  }
 0x140   : > { %2360 = vmatprep.mubr.bf16.mxu1 %v15500_v61  ;;  %v15562_v61 = vld [vmem:[#allocation6 + $0x2c8] sm:$0xff]  }
 0x145   : > { %2264 = vmatmul.mubr.bf16.vlgmr.msra.gmra.mrb[32].mxu0 %v15498_v59  ;;  %v15561_v59 = vld [vmem:[#allocation6 + $0x308] sm:$0xff]  }
 0x146   : > { %14859 = vmatpush3.bf16.msra.mxu0 %v15499_v60  ;;  %2271 = vmatprep.mubr.bf16.mxu0 %v15502_v63 }
 0x147   : > { %2361 = vmatmul.mubr.bf16.vlgmr.msra.gmra.mrb[32].mxu1 %v15501_v62  ;;  %14860 = vmatprep.subr.bf16.mxu0 %v15504_v1 }
 0x148   : > { %2368 = vmatprep.mubr.bf16.mxu1 %v15505_v2  ;;  %13672 = vmatpush3.bf16.msra.mxu1 %v15546_v43  ;;  %v15563_v2 = vld [vmem:[#allocation6 + $0x310] sm:$0xff]  }
 0x149   : > { %13673 = vmatprep.subr.bf16.mxu1 %v15547_v44  ;;  %v15579_v43 = vld [vmem:[#allocation6 + $0x330] sm:$0xff]  }
 0x14a   : > { %14861 = vmatpush3.bf16.msra.mxu0 %v15504_v1  ;;  %v15580_v44 = vld [vmem:[#allocation6 + $0x2f0] sm:$0xff]  }
 0x14b   : > { %14862 = vmatprep.subr.bf16.mxu0 %v15509_v4 }
 0x14c   : > { %13674 = vmatpush3.bf16.msra.mxu1 %v15548_v45 }
 0x14d   : > { %2272 = vmatmul.mubr.bf16.gmra.mrb[36].mxu0 %v15503_v0  ;;  %13675 = vmatprep.subr.bf16.mxu1 %v15549_v46  ;;  %v15573_v46 = vld [vmem:[#allocation6 + $0x380] sm:$0xff]  }
 0x14e   : > { %2279 = vmatprep.mubr.bf16.mxu0 %v15507_v3  ;;  %14863 = vmatpush3.bf16.msra.mxu0 %v15509_v4  ;;  %v15564_v3 = vld [vmem:[#allocation6 + $0x2d0] sm:$0xff]   ;;  %v15565_v4 = vld [vmem:[#allocation6 + $0x2b8] sm:$0xff]  }
 0x14f   : > { %2369 = vmatmul.mubr.bf16.gmra.mrb[36].mxu1 %v15506_v5  ;;  %14864 = vmatprep.subr.bf16.mxu0 %v15514_v9 }
 0x150   : > { %2376 = vmatprep.mubr.bf16.mxu1 %v15510_v6  ;;  %13676 = vmatpush3.bf16.msra.mxu1 %v15550_v47  ;;  %v15574_v47 = vld [vmem:[#allocation6 + $0x340] sm:$0xff]  }
 0x151   : > { %13677 = vmatprep.subr.bf16.mxu1 %v15551_v48 }
 0x152   : > { %14865 = vmatpush3.bf16.msra.mxu0 %v15514_v9 }
 0x153   : > { %14866 = vmatprep.subr.bf16.mxu0 %v15519_v12 }
 0x154   : > { %13678 = vmatpush3.bf16.msra.mxu1 %v15552_v49 }
 0x155   : > { %2280 = vmatmul.mubr.bf16.gmra.mrb[40].mxu0 %v15508_v7  ;;  %13679 = vmatprep.subr.bf16.mxu1 %v15553_v50  ;;  %v15566_v7 = vld [vmem:[#allocation6 + $0x278] sm:$0xff]  }
 0x156   : > { %2287 = vmatprep.mubr.bf16.mxu0 %v15512_v8  ;;  %14867 = vmatpush3.bf16.msra.mxu0 %v15519_v12  ;;  %v15567_v8 = vld [vmem:[#allocation6 + $0x318] sm:$0xff]  }
 0x157   : > { %2377 = vmatmul.mubr.bf16.gmra.mrb[40].mxu1 %v15511_v10  ;;  %14868 = vmatprep.subr.bf16.mxu0 %v15524_v15  ;;  %v15583_v50 = vld [vmem:[#allocation6 + $0x338] sm:$0xff]  }
 0x158   : > { %2384 = vmatprep.mubr.bf16.mxu1 %v15515_v11  ;;  %13680 = vmatpush3.bf16.msra.mxu1 %v15554_v51  ;;  %v15568_v11 = vld [vmem:[#allocation6 + $0x2d8] sm:$0xff]  }
 0x159   : > { %13681 = vmatprep.subr.bf16.mxu1 %v15555_v52 }
 0x15a   : > { %14869 = vmatpush3.bf16.msra.mxu0 %v15524_v15 }
 0x15b   : > { %14870 = vmatprep.subr.bf16.mxu0 %v15529_v20 }
 0x15c   : > { %13682 = vmatpush3.bf16.msra.mxu1 %v15556_v53  ;;  %v15584_v53 = vld [vmem:[#allocation6 + $0x2f8] sm:$0xff]  }
 0x15d   : > { %2288 = vmatmul.mubr.bf16.gmra.mrb[44].mxu0 %v15513_v13  ;;  %13683 = vmatprep.subr.bf16.mxu1 %v15559_v56 }
 0x15e   : > { %2295 = vmatprep.mubr.bf16.mxu0 %v15517_v14  ;;  %14871 = vmatpush3.bf16.msra.mxu0 %v15529_v20 }
 0x15f   : > { %2385 = vmatmul.mubr.bf16.gmra.mrb[44].mxu1 %v15516_v16  ;;  %14872 = vmatprep.subr.bf16.mxu0 %v15534_v22  ;;  %v15569_v16 = vld [vmem:[#allocation2 + $0x4] sm:$0xff]  }
 0x160   : > { %2392 = vmatprep.mubr.bf16.mxu1 %v15520_v18  ;;  %13684 = vmatpush3.bf16.msra.mxu1 %v15560_v58 }
 0x161   : > { %13685 = vmatprep.subr.bf16.mxu1 %v15565_v4 }
 0x162   : > { %14873 = vmatpush3.bf16.msra.mxu0 %v15534_v22 }
 0x163   : > { %13735 = vmatprep.subr.bf16.mxu0 %v15557_v54 }
 0x164   : > { %13686 = vmatpush3.bf16.msra.mxu1 %v15566_v7 }
 0x165   : > { %2296 = vmatmul.mubr.bf16.gmra.mrb[48].mxu0 %v15518_v17  ;;  %13799 = vmatprep.subr.bf16.mxu1 %v15573_v46 }
 0x166   : > { %2303 = vmatprep.mubr.bf16.mxu0 %v15522_v19  ;;  %v15570_v19 = vld [vmem:[#allocation2] sm:$0xff]  }
 0x167   : > { %2393 = vmatmul.mubr.bf16.gmra.mrb[48].mxu1 %v15521_v21 }
 0x168   : > { %2400 = vmatprep.mubr.bf16.mxu1 %v15525_v23  ;;  %v15571_v23 = vld [vmem:[#allocation6 + $0x320] sm:$0xff]  }
 0x16d   : > { %2304 = vmatmul.mubr.bf16.gmra.mrb[52].mxu0 %v15523_v24  ;;  %v15572_v24 = vld [vmem:[#allocation6 + $0x2e0] sm:$0xff]  }
 0x16e   : > { %2311 = vmatprep.mubr.bf16.mxu0 %v15527_v25 }
 0x16f   : > { %2401 = vmatmul.mubr.bf16.gmra.mrb[52].mxu1 %v15526_v26 }
 0x170   : > { %2408 = vmatprep.mubr.bf16.mxu1 %v15530_v28  ;;  %v15575_v28 = vld [vmem:[#allocation6 + $0x328] sm:$0xff]  }
 0x175   : > { %2312 = vmatmul.mubr.bf16.gmra.mrb[56].mxu0 %v15528_v27 }
 0x176   : > { %2319 = vmatprep.mubr.bf16.mxu0 %v15532_v29 }
 0x177   : > { %2409 = vmatmul.mubr.bf16.gmra.mrb[56].mxu1 %v15531_v30 }
 0x178   : > { %2416 = vmatprep.mubr.bf16.mxu1 %v15535_v31  ;;  %v15576_v31 = vld [vmem:[#allocation6 + $0x2e8] sm:$0xff]  }
 0x17d   : > { %2320 = vmatmul.mubr.bf16.gmra.mrb[60].mxu0 %v15533_v32 }
 0x17e   : > { %14874 = vmatprep.mubr.bf16.mxu0 %v15537_v33 }
 0x17f   : > { %2417 = vmatmul.mubr.bf16.gmra.mrb[60].mxu1 %v15536_v34 }
 0x180   : > { %3945 = vmatprep.mubr.bf16.mxu1 %v15569_v16  ;;  %v15590_v16 = vld [vmem:[#allocation6 + $0x390] sm:$0xff]  }
 0x185   : > { %14875 = vmatmul.mubr.bf16.vlgmr.msra.gmra.mrb[64].mxu0 %v15538_v35 }
 0x186   : > { %14878 = vmatprep.mubr.bf16.mxu0 %v15539_v36  ;;  %13736 = vmatpush3.bf16.msra.mxu0 %v15558_v55  ;;  %v15577_v36 = vld [vmem:[#allocation2 + $0xc] sm:$0xff]  }
 0x187   : > { %13737 = vmatprep.subr.bf16.mxu0 %v15561_v59  ;;  %3946 = vmatmul.mubr.bf16.vlgmr.msra.gmra.mrb[64].mxu1 %v15570_v19 }
 0x188   : > { %3953 = vmatprep.mubr.bf16.mxu1 %v15577_v36  ;;  %13800 = vmatpush3.bf16.msra.mxu1 %v15574_v47 }
 0x18a   : > { %13738 = vmatpush3.bf16.msra.mxu0 %v15562_v61 }
 0x18b   : > { %13739 = vmatprep.subr.bf16.mxu0 %v15563_v2 }
 0x18d   : > { %14879 = vmatmul.mubr.bf16.gmra.mrb[68].mxu0 %v15540_v37 }
 0x18e   : > { %14882 = vmatprep.mubr.bf16.mxu0 %v15541_v38  ;;  %13740 = vmatpush3.bf16.msra.mxu0 %v15564_v3 }
 0x18f   : > { %13741 = vmatprep.subr.bf16.mxu0 %v15567_v8 }
 0x192   : > { %13742 = vmatpush3.bf16.msra.mxu0 %v15568_v11 }
 0x193   : > { %13743 = vmatprep.subr.bf16.mxu0 %v15571_v23 }
 0x195   : > { %14883 = vmatmul.mubr.bf16.gmra.mrb[72].mxu0 %v15542_v39  ;;  %v15578_v39 = vld [vmem:[#allocation2 + $0x8] sm:$0xff]  }
 0x196   : > { %14886 = vmatprep.mubr.bf16.mxu0 %v15543_v40  ;;  %13744 = vmatpush3.bf16.msra.mxu0 %v15572_v24 }
 0x197   : > { %13745 = vmatprep.subr.bf16.mxu0 %v15575_v28  ;;  %3954 = vmatmul.mubr.bf16.gmra.mrb[68].mxu1 %v15578_v39 }
 0x19a   : > { %13746 = vmatpush3.bf16.msra.mxu0 %v15576_v31 }
 0x19b   : > { %13747 = vmatprep.subr.bf16.mxu0 %v15579_v43 }
 0x19d   : > { %14887 = vmatmul.mubr.bf16.gmra.mrb[76].mxu0 %v15544_v41 }
 0x19e   : > { %13748 = vmatpush3.bf16.msra.mxu0 %v15580_v44 }
 0x19f   : > { %13749 = vmatprep.subr.bf16.mxu0 %v15583_v50 }
 0x1a2   : > { %13750 = vmatpush3.bf16.msra.mxu0 %v15584_v53 }
 0x1d8   : > { %v13415_v57 = vpop.f32.mrb[0].mxu0 }
 0x1d9   : > { %v13416_v60 = vpop.f32.mrb[1].mxu0 }
 0x1da   : > { %v13417_v62 = vadd.f32 %v13416_v60, %v13415_v57  ;;  %v13418_v63 = vpop.f32.mrb[2].mxu0  ;;  %v13479_v5 = vpop.f32.mrb[0].mxu1 }
 0x1db   : > { %v13419_v0 = vpop.f32.mrb[3].mxu0  ;;  %v13480_v9 = vpop.f32.mrb[1].mxu1 }
 0x1dc   : > { %v13420_v1 = vadd.f32 %v13419_v0, %v13418_v63  ;;  %v13481_v12 = vadd.f32 %v13480_v9, %v13479_v5  ;;  %v13482_v13 = vpop.f32.mrb[2].mxu1  ;;  %v15581_v0 = vld [vmem:[#allocation6 + $0x388] sm:$0xff]  }
 0x1dd   : > { %v13483_v17 = vpop.f32.mrb[3].mxu1  ;;  %13801 = vmatprep.subr.bf16.mxu1 %v15581_v0 }
 0x1de   : > { %v16832_v20 = vadd.f32 %v13481_v12, %v13417_v62  ;;  %v13484_v21 = vadd.f32 %v13483_v17, %v13482_v13  ;;  %v15592_v17 = vld [vmem:[#allocation6 + $0x350] sm:$0xff]  }
 0x1e0   : > { %v13421_v6 = vpop.f32.mrb[4].mxu0  ;;  %v16834_v25 = vadd.f32 %v13484_v21, %v13420_v1  ;;  %v15582_v1 = vld [vmem:[#allocation6 + $0x348] sm:$0xff]   ;;  %v15596_v21 = vld [vmem:[#allocation6 + $0x398] sm:$0xff]  }
 0x1e1   : > { %v13422_v10 = vpop.f32.mrb[5].mxu0  ;;  %13802 = vmatpush3.bf16.msra.mxu1 %v15582_v1 }
 0x1e2   : > { %v13423_v14 = vadd.f32 %v13422_v10, %v13421_v6  ;;  %v13424_v15 = vpop.f32.mrb[6].mxu0  ;;  %v13485_v26 = vpop.f32.mrb[4].mxu1  ;;  %13803 = vmatprep.subr.bf16.mxu1 %v15590_v16 }
 0x1e3   : > { %v13425_v18 = vpop.f32.mrb[7].mxu0  ;;  %v13486_v29 = vpop.f32.mrb[5].mxu1 }
 0x1e4   : > { %v13426_v22 = vadd.f32 %v13425_v18, %v13424_v15  ;;  %v13487_v32 = vadd.f32 %v13486_v29, %v13485_v26  ;;  %v13488_v33 = vpop.f32.mrb[6].mxu1 }
 0x1e5   : > { %v13489_v37 = vpop.f32.mrb[7].mxu1  ;;  %13804 = vmatpush3.bf16.msra.mxu1 %v15592_v17 }
 0x1e6   : > { %v16836_v40 = vadd.f32 %v13487_v32, %v13423_v14  ;;  %v13490_v41 = vadd.f32 %v13489_v37, %v13488_v33  ;;  %13805 = vmatprep.subr.bf16.mxu1 %v15596_v21  ;;  %v15604_v33 = vld [vmem:[#allocation6 + $0x360] sm:$0xff]  }
 0x1e8   : > { %v13427_v27 = vpop.f32.mrb[8].mxu0  ;;  %v16838_v45 = vadd.f32 %v13490_v41, %v13426_v22  ;;  %v15598_v22 = vld [vmem:[#allocation6 + $0x358] sm:$0xff]  }
 0x1e9   : > { %v13428_v30 = vpop.f32.mrb[9].mxu0  ;;  %13806 = vmatpush3.bf16.msra.mxu1 %v15598_v22 }
 0x1ea   : > { %v13429_v34 = vadd.f32 %v13428_v30, %v13427_v27  ;;  %v13430_v35 = vpop.f32.mrb[10].mxu0  ;;  %v13491_v48 = vpop.f32.mrb[8].mxu1  ;;  %v15602_v30 = vld [vmem:[#allocation6 + $0x3a0] sm:$0xff]  }
 0x1eb   : > { %v13431_v38 = vpop.f32.mrb[11].mxu0  ;;  %v13492_v51 = vpop.f32.mrb[9].mxu1  ;;  %13807 = vmatprep.subr.bf16.mxu1 %v15602_v30 }
 0x1ec   : > { %v13432_v42 = vadd.f32 %v13431_v38, %v13430_v35  ;;  %v13493_v54 = vadd.f32 %v13492_v51, %v13491_v48  ;;  %v13494_v55 = vpop.f32.mrb[10].mxu1  ;;  %v15608_v48 = vld [vmem:[#allocation6 + $0x3a8] sm:$0xff]  }
 0x1ed   : > { %v13495_v58 = vpop.f32.mrb[11].mxu1  ;;  %13808 = vmatpush3.bf16.msra.mxu1 %v15604_v33  ;;  %v15610_v51 = vld [vmem:[#allocation6 + $0x368] sm:$0xff]  }
 0x1ee   : > { %v16840_v60 = vadd.f32 %v13493_v54, %v13429_v34  ;;  %v13496_v61 = vadd.f32 %v13495_v58, %v13494_v55  ;;  %13809 = vmatprep.subr.bf16.mxu1 %v15608_v48  ;;  %v15612_v58 = vld [vmem:[#allocation6 + $0x400] sm:$0xff]  }
 0x1ef   : > { %13863 = vmatprep.subr.bf16.mxu0 %v15612_v58 }
 0x1f0   : > { %v13433_v49 = vpop.f32.mrb[12].mxu0  ;;  %v16842_v63 = vadd.f32 %v13496_v61, %v13432_v42 }
 0x1f1   : > { %v13434_v52 = vpop.f32.mrb[13].mxu0  ;;  %13810 = vmatpush3.bf16.msra.mxu1 %v15610_v51 }
 0x1f2   : > { %v13435_v56 = vadd.f32 %v13434_v52, %v13433_v49  ;;  %v13436_v57 = vpop.f32.mrb[14].mxu0  ;;  %v13497_v2 = vpop.f32.mrb[12].mxu1 }
 0x1f3   : > { %v13437_v59 = vpop.f32.mrb[15].mxu0  ;;  %v13498_v4 = vpop.f32.mrb[13].mxu1 }
 0x1f4   : > { %v13438_v62 = vadd.f32 %v13437_v59, %v13436_v57  ;;  %v13499_v6 = vadd.f32 %v13498_v4, %v13497_v2  ;;  %v13500_v7 = vpop.f32.mrb[14].mxu1 }
 0x1f5   : > { %v13501_v10 = vpop.f32.mrb[15].mxu1 }
 0x1f6   : > { %v16844_v12 = vadd.f32 %v13499_v6, %v13435_v56  ;;  %v13502_v13 = vadd.f32 %v13501_v10, %v13500_v7  ;;  %v15618_v6 = vld [vmem:[#allocation6 + $0x370] sm:$0xff]  }
 0x1f8   : > { %v13439_v3 = vpop.f32.mrb[16].mxu0  ;;  %v16846_v15 = vadd.f32 %v13502_v13, %v13438_v62 }
 0x1f9   : > { %v13440_v5 = vpop.f32.mrb[17].mxu0 }
 0x1fa   : > { %v13441_v8 = vadd.f32 %v13440_v5, %v13439_v3  ;;  %v13442_v9 = vpop.f32.mrb[18].mxu0  ;;  %v13503_v18 = vpop.f32.mrb[16].mxu1  ;;  %v15616_v3 = vld [vmem:[#allocation6 + $0x3b0] sm:$0xff]  }
 0x1fb   : > { %v13443_v11 = vpop.f32.mrb[19].mxu0  ;;  %v13504_v23 = vpop.f32.mrb[17].mxu1  ;;  %13811 = vmatprep.subr.bf16.mxu1 %v15616_v3 }
 0x1fc   : > { %v13444_v14 = vadd.f32 %v13443_v11, %v13442_v9  ;;  %v13505_v26 = vadd.f32 %v13504_v23, %v13503_v18  ;;  %v13506_v27 = vpop.f32.mrb[18].mxu1  ;;  %13812 = vmatpush3.bf16.msra.mxu1 %v15618_v6  ;;  %v15626_v18 = vld [vmem:[#allocation6 + $0x3b8] sm:$0xff]  }
 0x1fd   : > { %v13507_v31 = vpop.f32.mrb[19].mxu1  ;;  %13813 = vmatprep.subr.bf16.mxu1 %v15626_v18 }
 0x1fe   : > { %v16848_v34 = vadd.f32 %v13505_v26, %v13441_v8  ;;  %v13508_v35 = vadd.f32 %v13507_v31, %v13506_v27 }
 0x200   : > { %v13445_v19 = vpop.f32.mrb[20].mxu0  ;;  %v16850_v37 = vadd.f32 %v13508_v35, %v13444_v14 }
 0x201   : > { %v13446_v24 = vpop.f32.mrb[21].mxu0 }
 0x202   : > { %v13447_v28 = vadd.f32 %v13446_v24, %v13445_v19  ;;  %v13448_v29 = vpop.f32.mrb[22].mxu0  ;;  %v13509_v38 = vpop.f32.mrb[20].mxu1  ;;  %v15627_v19 = vld [vmem:[#allocation6 + $0x378] sm:$0xff]  }
 0x203   : > { %v13449_v32 = vpop.f32.mrb[23].mxu0  ;;  %v13510_v41 = vpop.f32.mrb[21].mxu1  ;;  %13814 = vmatpush3.bf16.msra.mxu1 %v15627_v19 }
 0x204   : > { %v13450_v36 = vadd.f32 %v13449_v32, %v13448_v29  ;;  %v13511_v43 = vadd.f32 %v13510_v41, %v13509_v38  ;;  %v13512_v44 = vpop.f32.mrb[22].mxu1  ;;  %v15636_v41 = vld [vmem:[#allocation6 + $0x440] sm:$0xff]  }
 0x205   : > { %v13513_v49 = vpop.f32.mrb[23].mxu1  ;;  %14890 = vmatprep.subr.bf16.mxu1 %v15636_v41 }
 0x206   : > { %v16852_v52 = vadd.f32 %v13511_v43, %v13447_v28  ;;  %v13514_v53 = vadd.f32 %v13513_v49, %v13512_v44 }
 0x208   : > { %v13451_v39 = vpop.f32.mrb[24].mxu0  ;;  %v16854_v55 = vadd.f32 %v13514_v53, %v13450_v36 }
 0x209   : > { %v13452_v42 = vpop.f32.mrb[25].mxu0 }
 0x20a   : > { %v13453_v46 = vadd.f32 %v13452_v42, %v13451_v39  ;;  %v13454_v47 = vpop.f32.mrb[26].mxu0  ;;  %v13515_v56 = vpop.f32.mrb[24].mxu1 }
 0x20b   : > { %v13455_v50 = vpop.f32.mrb[27].mxu0  ;;  %v13516_v59 = vpop.f32.mrb[25].mxu1 }
 0x20c   : > { %v13456_v54 = vadd.f32 %v13455_v50, %v13454_v47  ;;  %v13517_v62 = vadd.f32 %v13516_v59, %v13515_v56  ;;  %v13518_v0 = vpop.f32.mrb[26].mxu1 }
 0x20d   : > { %v13519_v4 = vpop.f32.mrb[27].mxu1 }
 0x20e   : > { %v16856_v7 = vadd.f32 %v13517_v62, %v13453_v46  ;;  %v13520_v8 = vadd.f32 %v13519_v4, %v13518_v0 }
 0x210   : > { %v13457_v57 = vpop.f32.mrb[28].mxu0  ;;  %v16858_v10 = vadd.f32 %v13520_v8, %v13456_v54 }
 0x211   : > { %v13458_v61 = vpop.f32.mrb[29].mxu0 }
 0x212   : > { %v13459_v1 = vadd.f32 %v13458_v61, %v13457_v57  ;;  %v13460_v2 = vpop.f32.mrb[30].mxu0  ;;  %v13521_v11 = vpop.f32.mrb[28].mxu1 }
 0x213   : > { %v13461_v5 = vpop.f32.mrb[31].mxu0  ;;  %v13522_v13 = vpop.f32.mrb[29].mxu1 }
 0x214   : > { %v13462_v9 = vadd.f32 %v13461_v5, %v13460_v2  ;;  %v13523_v14 = vadd.f32 %v13522_v13, %v13521_v11  ;;  %v13524_v16 = vpop.f32.mrb[30].mxu1 }
 0x215   : > { %v13525_v21 = vpop.f32.mrb[31].mxu1 }
 0x216   : > { %v16860_v23 = vadd.f32 %v13523_v14, %v13459_v1  ;;  %v13526_v24 = vadd.f32 %v13525_v21, %v13524_v16 }
 0x218   : > { %v13543_v17 = vpop.f32.mrb[32].mxu0  ;;  %v16862_v29 = vadd.f32 %v13526_v24, %v13462_v9 }
 0x219   : > { %v13544_v22 = vpop.f32.mrb[33].mxu0 }
 0x21a   : > { %v13545_v26 = vadd.f32 %v13544_v22, %v13543_v17  ;;  %v13546_v27 = vpop.f32.mrb[34].mxu0  ;;  %v13607_v32 = vpop.f32.mrb[32].mxu1 }
 0x21b   : > { %v13547_v28 = vpop.f32.mrb[35].mxu0  ;;  %v13608_v35 = vpop.f32.mrb[33].mxu1 }
 0x21c   : > { %v2266_v30 = vadd.f32 %v13545_v26, %v16832_v20  ;;  %v13548_v31 = vadd.f32 %v13547_v28, %v13546_v27  ;;  %v13609_v36 = vadd.f32 %v13608_v35, %v13607_v32  ;;  %v13610_v38 = vpop.f32.mrb[34].mxu1 }
 0x21d   : > { %v13611_v42 = vpop.f32.mrb[35].mxu1 }
 0x21e   : > { %v2269_v33 = vadd.f32 %v13548_v31, %v16834_v25  ;;  %v13612_v44 = vadd.f32 %v13611_v42, %v13610_v38  ;;  %v16866_v48 = vadd.f32 %v13609_v36, %v2266_v30 }
 0x220   : > { %v13549_v39 = vpop.f32.mrb[36].mxu0  ;;  %v16869_v51 = vadd.f32 %v13612_v44, %v2269_v33 }
 0x221   : > { %v13550_v43 = vpop.f32.mrb[37].mxu0 }
 0x222   : > { %v13551_v46 = vadd.f32 %v13550_v43, %v13549_v39  ;;  %v13552_v47 = vpop.f32.mrb[38].mxu0  ;;  %v13613_v25 = vpop.f32.mrb[36].mxu1 }
 0x223   : > { %v13553_v49 = vpop.f32.mrb[39].mxu0  ;;  %v13614_v54 = vpop.f32.mrb[37].mxu1 }
 0x224   : > { %v2274_v20 = vadd.f32 %v13551_v46, %v16836_v40  ;;  %v13554_v50 = vadd.f32 %v13553_v49, %v13552_v47  ;;  %v13615_v56 = vadd.f32 %v13614_v54, %v13613_v25  ;;  %v13616_v57 = vpop.f32.mrb[38].mxu1 }
 0x225   : > { %v13617_v59 = vpop.f32.mrb[39].mxu1 }
 0x226   : > { %v2277_v53 = vadd.f32 %v13554_v50, %v16838_v45  ;;  %v13618_v62 = vadd.f32 %v13617_v59, %v13616_v57  ;;  %v16872_v2 = vadd.f32 %v13615_v56, %v2274_v20 }
 0x228   : > { %v13555_v58 = vpop.f32.mrb[40].mxu0  ;;  %v16875_v5 = vadd.f32 %v13618_v62, %v2277_v53 }
 0x229   : > { %v13556_v61 = vpop.f32.mrb[41].mxu0 }
 0x22a   : > { %v13557_v0 = vadd.f32 %v13556_v61, %v13555_v58  ;;  %v13558_v1 = vpop.f32.mrb[42].mxu0  ;;  %v13619_v6 = vpop.f32.mrb[40].mxu1 }
 0x22b   : > { %v13559_v3 = vpop.f32.mrb[43].mxu0  ;;  %v13620_v8 = vpop.f32.mrb[41].mxu1 }
 0x22c   : > { %v2282_v40 = vadd.f32 %v13557_v0, %v16840_v60  ;;  %v13560_v4 = vadd.f32 %v13559_v3, %v13558_v1  ;;  %v13621_v9 = vadd.f32 %v13620_v8, %v13619_v6  ;;  %v13622_v11 = vpop.f32.mrb[42].mxu1 }
 0x22d   : > { %v13623_v14 = vpop.f32.mrb[43].mxu1 }
 0x22e   : > { %v2285_v45 = vadd.f32 %v13560_v4, %v16842_v63  ;;  %v13624_v17 = vadd.f32 %v13623_v14, %v13622_v11  ;;  %v16878_v21 = vadd.f32 %v13621_v9, %v2282_v40 }
 0x230   : > { %v13561_v13 = vpop.f32.mrb[44].mxu0  ;;  %v16881_v26 = vadd.f32 %v13624_v17, %v2285_v45 }
 0x231   : > { %v13562_v16 = vpop.f32.mrb[45].mxu0 }
 0x232   : > { %v13563_v18 = vadd.f32 %v13562_v16, %v13561_v13  ;;  %v13564_v19 = vpop.f32.mrb[46].mxu0  ;;  %v13625_v27 = vpop.f32.mrb[44].mxu1 }
 0x233   : > { %v13565_v22 = vpop.f32.mrb[47].mxu0  ;;  %v13626_v28 = vpop.f32.mrb[45].mxu1 }
 0x234   : > { %v2290_v60 = vadd.f32 %v13563_v18, %v16844_v12  ;;  %v13566_v24 = vadd.f32 %v13565_v22, %v13564_v19  ;;  %v13627_v30 = vadd.f32 %v13626_v28, %v13625_v27  ;;  %v13628_v31 = vpop.f32.mrb[46].mxu1 }
 0x235   : > { %v13629_v33 = vpop.f32.mrb[47].mxu1 }
 0x236   : > { %v2293_v63 = vadd.f32 %v13566_v24, %v16846_v15  ;;  %v13630_v36 = vadd.f32 %v13629_v33, %v13628_v31  ;;  %v16884_v41 = vadd.f32 %v13627_v30, %v2290_v60 }
 0x238   : > { %v13567_v32 = vpop.f32.mrb[48].mxu0  ;;  %v16887_v44 = vadd.f32 %v13630_v36, %v2293_v63 }
 0x239   : > { %v13568_v35 = vpop.f32.mrb[49].mxu0 }
 0x23a   : > { %v13569_v38 = vadd.f32 %v13568_v35, %v13567_v32  ;;  %v13570_v39 = vpop.f32.mrb[50].mxu0  ;;  %v13631_v46 = vpop.f32.mrb[48].mxu1 }
 0x23b   : > { %v13571_v42 = vpop.f32.mrb[51].mxu0  ;;  %v13632_v47 = vpop.f32.mrb[49].mxu1 }
 0x23c   : > { %v2298_v12 = vadd.f32 %v13569_v38, %v16848_v34  ;;  %v13572_v43 = vadd.f32 %v13571_v42, %v13570_v39  ;;  %v13633_v49 = vadd.f32 %v13632_v47, %v13631_v46  ;;  %v13634_v20 = vpop.f32.mrb[50].mxu1  ;;  %v16908_v46 = vld [vmem:[#allocation9] ss:$0 sm:$0xff] }
 0x23d   : > { %v13635_v25 = vpop.f32.mrb[51].mxu1 }
 0x23e   : > { %v2301_v15 = vadd.f32 %v13572_v43, %v16850_v37  ;;  %v13636_v54 = vadd.f32 %v13635_v25, %v13634_v20  ;;  %v16890_v58 = vadd.f32 %v13633_v49, %v2298_v12  ;;  %v16911_v49 = vld [vmem:[#allocation11] ss:$0 sm:$0xff] }
 0x240   : > { %v13573_v50 = vpop.f32.mrb[52].mxu0  ;;  %v16893_v62 = vadd.f32 %v13636_v54, %v2301_v15 }
 0x241   : > { %v13574_v53 = vpop.f32.mrb[53].mxu0 }
 0x242   : > { %v13575_v56 = vadd.f32 %v13574_v53, %v13573_v50  ;;  %v13576_v57 = vpop.f32.mrb[54].mxu0  ;;  %v13637_v0 = vpop.f32.mrb[52].mxu1 }
 0x243   : > { %v13577_v59 = vpop.f32.mrb[55].mxu0  ;;  %v13638_v1 = vpop.f32.mrb[53].mxu1 }
 0x244   : > { %v2306_v34 = vadd.f32 %v13575_v56, %v16852_v52  ;;  %v13578_v61 = vadd.f32 %v13577_v59, %v13576_v57  ;;  %v13639_v3 = vadd.f32 %v13638_v1, %v13637_v0  ;;  %v13640_v40 = vpop.f32.mrb[54].mxu1 }
 0x245   : > { %v13641_v6 = vpop.f32.mrb[55].mxu1 }
 0x246   : > { %v2309_v37 = vadd.f32 %v13578_v61, %v16854_v55  ;;  %v13642_v8 = vadd.f32 %v13641_v6, %v13640_v40  ;;  %v16896_v13 = vadd.f32 %v13639_v3, %v2306_v34 }
 0x248   : > { %v13579_v4 = vpop.f32.mrb[56].mxu0  ;;  %v16899_v17 = vadd.f32 %v13642_v8, %v2309_v37 }
 0x249   : > { %v13580_v45 = vpop.f32.mrb[57].mxu0 }
 0x24a   : > { %v13581_v9 = vadd.f32 %v13580_v45, %v13579_v4  ;;  %v13582_v11 = vpop.f32.mrb[58].mxu0  ;;  %v13643_v18 = vpop.f32.mrb[56].mxu1 }
 0x24b   : > { %v13583_v14 = vpop.f32.mrb[59].mxu0  ;;  %v13644_v19 = vpop.f32.mrb[57].mxu1 }
 0x24c   : > { %v2314_v52 = vadd.f32 %v13581_v9, %v16856_v7  ;;  %v13584_v16 = vadd.f32 %v13583_v14, %v13582_v11  ;;  %v13645_v22 = vadd.f32 %v13644_v19, %v13643_v18  ;;  %v13646_v60 = vpop.f32.mrb[58].mxu1 }
 0x24d   : > { %v13647_v27 = vpop.f32.mrb[59].mxu1 }
 0x24e   : > { %v2317_v55 = vadd.f32 %v13584_v16, %v16858_v10  ;;  %v13648_v28 = vadd.f32 %v13647_v27, %v13646_v60  ;;  %v16902_v32 = vadd.f32 %v13645_v22, %v2314_v52 }
 0x250   : > { %v13585_v24 = vpop.f32.mrb[60].mxu0  ;;  %v16905_v36 = vadd.f32 %v13648_v28, %v2317_v55 }
 0x251   : > { %v13586_v63 = vpop.f32.mrb[61].mxu0 }
 0x252   : > { %v13587_v30 = vadd.f32 %v13586_v63, %v13585_v24  ;;  %v13588_v31 = vpop.f32.mrb[62].mxu0  ;;  %v13649_v38 = vpop.f32.mrb[60].mxu1 }
 0x253   : > { %v13589_v33 = vpop.f32.mrb[63].mxu0  ;;  %v13650_v39 = vpop.f32.mrb[61].mxu1 }
 0x254   : > { %v2322_v7 = vadd.f32 %v13587_v30, %v16860_v23  ;;  %v13590_v35 = vadd.f32 %v13589_v33, %v13588_v31  ;;  %v13651_v42 = vadd.f32 %v13650_v39, %v13649_v38  ;;  %v13652_v12 = vpop.f32.mrb[62].mxu1  ;;  %v15586_v30 = vld [vmem:[#allocation2 + $0x8] sm:$0xff]  }
 0x255   : > { %v13653_v15 = vpop.f32.mrb[63].mxu1 }
 0x256   : > { %v2325_v10 = vadd.f32 %v13590_v35, %v16862_v29  ;;  %v13654_v50 = vadd.f32 %v13653_v15, %v13652_v12  ;;  %v16914_v53 = vadd.f32 %v13651_v42, %v2322_v7  ;;  %v15614_v35 = vld [vmem:[#allocation6 + $0x3c0] sm:$0xff]  }
 0x258   : > { %v14876_v43 = vpop.f32.mrb[64].mxu0  ;;  %v16920_v34 = vadd.f32 %v13654_v50, %v2325_v10 }
 0x259   : > { %v2468_v47 = vadd.f32 %v14876_v43, %v16872_v2  ;;  %v2459_v20 = vpop.f32.mrb[65].mxu0 }
 0x25a   : > { %v2460_v23 = vadd.f32 %v2459_v20, %v16866_v48  ;;  %v14877_v25 = vpop.f32.mrb[66].mxu0 }
 0x25b   : > { %v2531_v29 = vmul.f32 %v16908_v46, %v2468_v47  ;;  %v2471_v54 = vadd.f32 %v14877_v25, %v16875_v5  ;;  %v2462_v56 = vpop.f32.mrb[67].mxu0 }
 0x25c   : > { %v2529_v57 = vmul.f32 %v16908_v46, %v2460_v23  ;;  %v2463_v59 = vadd.f32 %v2462_v56, %v16869_v51 }
 0x25d   : > { %v16923_v2 = vadd.f32 %v16911_v49, %v2531_v29  ;;  %v2532_v61 = vmul.f32 %v16908_v46, %v2471_v54 }
 0x25e   : > { %v2552_v48 = vadd.f32 %v16911_v49, %v2529_v57  ;;  %v2530_v0 = vmul.f32 %v16908_v46, %v2463_v59 }
 0x25f   : > { %v2555_v37 = vadd.f32 %v16911_v49, %v2532_v61  ;;  %v2570_v51 = vmax.f32 %v16923_v2, 0.0 }
 0x260   : > { %v16929_v1 = vmax.f32 %v2552_v48, 0.0  ;;  %v16932_v5 = vadd.f32 %v16911_v49, %v2530_v0  ;;  %v14880_v3 = vpop.f32.mrb[68].mxu0 }
 0x261   : > { %v16935_v40 = vmax.f32 %v2555_v37, 0.0  ;;  %v2484_v4 = vadd.f32 %v14880_v3, %v16884_v41  ;;  %v2475_v6 = vpop.f32.mrb[69].mxu0 }
 0x262   : > { %v2584_v45 = vpack.c.bf16 %v16929_v1, %v16929_v1  ;;  %v2569_v8 = vmax.f32 %v16932_v5, 0.0  ;;  %v2476_v9 = vadd.f32 %v2475_v6, %v16878_v21  ;;  %v14881_v11 = vpop.f32.mrb[70].mxu0 }
 0x263   : > { %v2587_v14 = vpack.c.bf16 %v16935_v40, %v16935_v40  ;;  %v2535_v52 = vmul.f32 %v16908_v46, %v2484_v4  ;;  %v2487_v16 = vadd.f32 %v14881_v11, %v16887_v44  ;;  %v2478_v18 = vpop.f32.mrb[71].mxu0  ;;  %v15622_v4 = vld [vmem:[#allocation6 + $0x410] sm:$0xff]  }
 0x264   : > { %2600 = vst [vmem:[#allocation2 + $0x1c] sm:$0xf] %v2584_v45  ;;  %v13306_v41 = vpack.c.bf16 %v2570_v51, %v2569_v8  ;;  %v2533_v55 = vmul.f32 %v16908_v46, %v2476_v9  ;;  %v2479_v19 = vadd.f32 %v2478_v18, %v16881_v26 }
 0x265   : > { %2603 = vst [vmem:[#allocation2 + $0x28] sm:$0xf] %v2587_v14  ;;  %v16953_v21 = vadd.f32 %v16911_v49, %v2535_v52  ;;  %v2536_v22 = vmul.f32 %v16908_v46, %v2487_v16 }
 0x266   : > { %13383 = vst [vmem:[#allocation2 + $0x20] sm:$0xff] %v13306_v41   ;;  %v2556_v44 = vadd.f32 %v16911_v49, %v2533_v55  ;;  %v2534_v60 = vmul.f32 %v16908_v46, %v2479_v19  ;;  %v15593_v41 = vld [vmem:[#allocation2 + $0x10] sm:$0xff]  }
 0x267   : > { %v2574_v24 = vmax.f32 %v16953_v21, 0.0  ;;  %v2559_v27 = vadd.f32 %v16911_v49, %v2536_v22 }
 0x268   : > { %v16960_v63 = vmax.f32 %v2556_v44, 0.0  ;;  %v16963_v28 = vadd.f32 %v16911_v49, %v2534_v60  ;;  %v14884_v26 = vpop.f32.mrb[72].mxu0  ;;  %v15624_v44 = vld [vmem:[#allocation6 + $0x3d0] sm:$0xff]  }
 0x269   : > { %v16965_v31 = vmax.f32 %v2559_v27, 0.0  ;;  %v2500_v33 = vadd.f32 %v14884_v26, %v16896_v13  ;;  %v2491_v7 = vpop.f32.mrb[73].mxu0  ;;  %v15619_v13 = vld [vmem:[#allocation6 + $0x408] sm:$0xff]   ;;  %v15629_v26 = vld [vmem:[#allocation6 + $0x418] sm:$0xff]  }
 0x26a   : > { %v2588_v38 = vpack.c.bf16 %v16960_v63, %v16960_v63  ;;  %v2573_v10 = vmax.f32 %v16963_v28, 0.0  ;;  %v2492_v39 = vadd.f32 %v2491_v7, %v16890_v58  ;;  %v14885_v42 = vpop.f32.mrb[74].mxu0 }
 0x26b   : > { %v2591_v12 = vpack.c.bf16 %v16965_v31, %v16965_v31  ;;  %v2539_v43 = vmul.f32 %v16908_v46, %v2500_v33  ;;  %v2503_v15 = vadd.f32 %v14885_v42, %v16899_v17  ;;  %v2494_v47 = vpop.f32.mrb[75].mxu0  ;;  %v15585_v20 = vld [vmem:[#allocation2 + $0x18] sm:$0xff]  }
 0x26c   : > { %2604 = vst [vmem:[#allocation2 + $0x34] sm:$0xf] %v2588_v38  ;;  %v13311_v50 = vpack.c.bf16 %v2574_v24, %v2573_v10  ;;  %v2537_v23 = vmul.f32 %v16908_v46, %v2492_v39  ;;  %v2495_v58 = vadd.f32 %v2494_v47, %v16893_v62  ;;  %v15589_v25 = vld [vmem:[#allocation2 + $0x18] sm:$0xff]   ;;  %4042 = vmatprep.mubr.bf16.mxu0 %v15585_v20 }
 0x26d   : > { %2607 = vst [vmem:[#allocation2 + $0x40] sm:$0xf] %v2591_v12  ;;  %v2540_v29 = vmul.f32 %v16908_v46, %v2503_v15  ;;  %v15587_v54 = vld [vmem:[#allocation2 + $0x1c] sm:$0xff]   ;;  %v16984_v56 = vadd.f32 %v16911_v49, %v2539_v43  ;;  %4043 = vmatmul.mubr.bf16.vlgmr.msra.gmra.mrb[80].mxu0 %v15586_v30  ;;  %v15591_v62 = vld [vmem:[#allocation2 + $0x24] sm:$0xff]   ;;  %v15632_v15 = vld [vmem:[#allocation6 + $0x420] sm:$0xff]  }
 0x26e   : > { %v15620_v17 = vld [vmem:[#allocation6 + $0x3c8] sm:$0xff]   ;;  %13384 = vst [vmem:[#allocation2 + $0x38] sm:$0xff] %v13311_v50   ;;  %v2560_v57 = vadd.f32 %v16911_v49, %v2537_v23  ;;  %v2538_v59 = vmul.f32 %v16908_v46, %v2495_v58  ;;  %3961 = vmatprep.mubr.bf16.mxu1 %v15587_v54  ;;  %13864 = vmatpush3.bf16.msra.mxu0 %v15614_v35  ;;  %v15634_v20 = vld [vmem:[#allocation6 + $0x3e0] sm:$0xff]  }
 0x26f   : > { %v15588_v61 = vld [vmem:[#allocation2 + $0x20] sm:$0xff]   ;;  %v2563_v48 = vadd.f32 %v16911_v49, %v2540_v29  ;;  %3962 = vmatmul.mubr.bf16.gmra.mrb[72].mxu1 %v15589_v25  ;;  %13865 = vmatprep.subr.bf16.mxu0 %v15619_v13  ;;  %v2578_v11 = vmax.f32 %v16984_v56, 0.0 }
 0x270   : > { %v16989_v0 = vmax.f32 %v2560_v57, 0.0  ;;  %v16992_v37 = vadd.f32 %v16911_v49, %v2538_v59  ;;  %v14888_v3 = vpop.f32.mrb[76].mxu0  ;;  %4050 = vmatprep.mubr.bf16.mxu0 %v15588_v61  ;;  %3969 = vmatprep.mubr.bf16.mxu1 %v15591_v62  ;;  %v15595_v39 = vld [vmem:[#allocation2 + $0x20] sm:$0xff]   ;;  %v15605_v62 = vld [vmem:[#allocation2 + $0x28] sm:$0xff]  }
 0x271   : > { %v16994_v6 = vmax.f32 %v2563_v48, 0.0  ;;  %v2516_v45 = vadd.f32 %v14888_v3, %v16914_v53  ;;  %v2507_v9 = vpop.f32.mrb[77].mxu0  ;;  %v15599_v25 = vld [vmem:[#allocation2 + $0x20] sm:$0xff]   ;;  %v15647_v48 = vld [vmem:[#allocation6 + $0x438] sm:$0xff]  }
 0x272   : > { %v2592_v14 = vpack.c.bf16 %v16989_v0, %v16989_v0  ;;  %v2577_v52 = vmax.f32 %v16992_v37, 0.0  ;;  %v2508_v16 = vadd.f32 %v2507_v9, %v16902_v32  ;;  %v14889_v18 = vpop.f32.mrb[78].mxu0  ;;  %13866 = vmatpush3.bf16.msra.mxu0 %v15620_v17  ;;  %v15639_v54 = vld [vmem:[#allocation6 + $0x3e8] sm:$0xff]   ;;  %v15641_v59 = vld [vmem:[#allocation6 + $0x430] sm:$0xff]  }
 0x273   : > { %v2595_v55 = vpack.c.bf16 %v16994_v6, %v16994_v6  ;;  %v2543_v19 = vmul.f32 %v16908_v46, %v2516_v45  ;;  %v2519_v53 = vadd.f32 %v14889_v18, %v16920_v34  ;;  %v2510_v22 = vpop.f32.mrb[79].mxu0  ;;  %13867 = vmatprep.subr.bf16.mxu0 %v15622_v4  ;;  %v15594_v33 = vld [vmem:[#allocation2 + $0x30] sm:$0xff]   ;;  %v15642_v61 = vld [vmem:[#allocation6 + $0x3f0] sm:$0xff]  }
 0x274   : > { %2608 = vst [vmem:[#allocation2 + $0x4c] sm:$0xf] %v2592_v14  ;;  %v13316_v60 = vpack.c.bf16 %v2578_v11, %v2577_v52  ;;  %v2541_v32 = vmul.f32 %v16908_v46, %v2508_v16  ;;  %v2511_v27 = vadd.f32 %v2510_v22, %v16905_v36  ;;  %v15630_v34 = vld [vmem:[#allocation6 + $0x3d8] sm:$0xff]   ;;  %v15628_v22 = vld [vmem:[#allocation2 + $0x20] sm:$0xff]  }
 0x275   : > { %2611 = vst [vmem:[#allocation2 + $0x58] sm:$0xf] %v2595_v55  ;;  %v2544_v30 = vmul.f32 %v16908_v46, %v2519_v53  ;;  %v17014_v7 = vadd.f32 %v16911_v49, %v2543_v19  ;;  %4051 = vmatmul.mubr.bf16.gmra.mrb[84].mxu0 %v15593_v41  ;;  %v15597_v36 = vld [vmem:[#allocation2 + $0x34] sm:$0xff]   ;;  %v15603_v57 = vld [vmem:[#allocation2 + $0x3c] sm:$0xff]   ;;  %v15648_v4 = vld [vmem:[#allocation6 + $0x3f8] sm:$0xff]  }
 0x276   : > { %13385 = vst [vmem:[#allocation2 + $0x50] sm:$0xff] %v13316_v60   ;;  %v2564_v35 = vadd.f32 %v16911_v49, %v2541_v32  ;;  %v2542_v38 = vmul.f32 %v16908_v46, %v2511_v27  ;;  %4058 = vmatprep.mubr.bf16.mxu0 %v15594_v33  ;;  %13868 = vmatpush3.bf16.msra.mxu0 %v15624_v44  ;;  %v15600_v29 = vld [vmem:[#allocation2 + $0x38] sm:$0xff]   ;;  %v15601_v17 = vld [vmem:[#allocation2 + $0x30] sm:$0xff]   ;;  %v15621_v55 = vld [vmem:[#allocation2 + $0x40] sm:$0xff]  }
 0x277   : > { %v2567_v42 = vadd.f32 %v16911_v49, %v2544_v30  ;;  %3970 = vmatmul.mubr.bf16.gmra.mrb[76].mxu1 %v15595_v39  ;;  %13869 = vmatprep.subr.bf16.mxu0 %v15629_v26  ;;  %v2582_v46 = vmax.f32 %v17014_v7, 0.0  ;;  %v15607_v45 = vld [vmem:[#allocation2 + $0x38] sm:$0xff]   ;;  %v15637_v26 = vld [vmem:[#allocation2 + $0x28] sm:$0xff]  }
 0x278   : > { %v17019_v12 = vmax.f32 %v2564_v35, 0.0  ;;  %v17022_v43 = vadd.f32 %v16911_v49, %v2542_v38  ;;  %3977 = vmatprep.mubr.bf16.mxu1 %v15597_v36  ;;  %v15638_v49 = vld [vmem:[#allocation6 + $0x428] sm:$0xff]   ;;  %v16169_v30 = vld [vmem:[#allocation6 + $0x440] sm:$0xff]   ;;  %v15652_v33 = vld [vmem:[#allocation6 + $0x450] sm:$0xff]  }
 0x279   : > { %v17024_v47 = vmax.f32 %v2567_v42, 0.0  ;;  %v15611_v14 = vld [vmem:[#allocation2 + $0x38] sm:$0xff]   ;;  %v15644_v38 = vld [vmem:[#allocation2 + $0x24] sm:$0xff]  }
 0x27a   : > { %v2596_v13 = vpack.c.bf16 %v17019_v12, %v17019_v12  ;;  %v2581_v50 = vmax.f32 %v17022_v43, 0.0  ;;  %13870 = vmatpush3.bf16.msra.mxu0 %v15630_v34  ;;  %v15635_v32 = vld [vmem:[#allocation2 + $0x1c] sm:$0xff]   ;;  %v15643_v35 = vld [vmem:[#allocation2 + $0x34] sm:$0xff]   ;;  %v15657_v39 = vld [vmem:[#allocation6 + $0x458] sm:$0xff]  }
 0x27b   : > { %v2599_v23 = vpack.c.bf16 %v17024_v47, %v17024_v47  ;;  %13871 = vmatprep.subr.bf16.mxu0 %v15632_v15  ;;  %v15606_v3 = vld [vmem:[#allocation2 + $0x48] sm:$0xff]   ;;  %v15645_v27 = vld [vmem:[#allocation6 + $0x448] sm:$0xff]   ;;  %v15662_v36 = vld [vmem:[#allocation6 + $0x460] sm:$0xff]  }
 0x27c   : > { %2612 = vst [vmem:[#allocation2 + $0x64] sm:$0xf] %v2596_v13  ;;  %v13321_v58 = vpack.c.bf16 %v2582_v46, %v2581_v50  ;;  %v15615_v18 = vld [vmem:[#allocation2 + $0x48] sm:$0xff]   ;;  %v15640_v34 = vld [vmem:[#allocation2 + $0x58] sm:$0xff]   ;;  %v15649_v15 = vld [vmem:[#allocation2 + $0x30] sm:$0xff]  }
 0x27d   : > { %2615 = vst [vmem:[#allocation2 + $0x70] sm:$0xf] %v2599_v23  ;;  %4059 = vmatmul.mubr.bf16.gmra.mrb[88].mxu0 %v15599_v25  ;;  %v15609_v9 = vld [vmem:[#allocation2 + $0x4c] sm:$0xff]   ;;  %v15617_v41 = vld [vmem:[#allocation2 + $0x54] sm:$0xff]  }
 0x27e   : > { %13386 = vst [vmem:[#allocation2 + $0x68] sm:$0xff] %v13321_v58   ;;  %4066 = vmatprep.mubr.bf16.mxu0 %v15600_v29  ;;  %13872 = vmatpush3.bf16.msra.mxu0 %v15634_v20  ;;  %v15613_v16 = vld [vmem:[#allocation2 + $0x50] sm:$0xff]   ;;  %v15646_v42 = vld [vmem:[#allocation2 + $0x38] sm:$0xff]   ;;  %v15672_v58 = vld [vmem:[#allocation6 + $0x470] sm:$0xff]  }
 0x27f   : > { %3978 = vmatmul.mubr.bf16.gmra.mrb[80].mxu1 %v15601_v17  ;;  %13873 = vmatprep.subr.bf16.mxu0 %v15638_v49  ;;  %v15625_v53 = vld [vmem:[#allocation2 + $0x50] sm:$0xff]   ;;  %v15650_v20 = vld [vmem:[#allocation2 + $0x3c] sm:$0xff]  }
 0x280   : > { %3985 = vmatprep.mubr.bf16.mxu1 %v15603_v57  ;;  %v15631_v44 = vld [vmem:[#allocation2 + $0x50] sm:$0xff]   ;;  %v15667_v23 = vld [vmem:[#allocation6 + $0x468] sm:$0xff]   ;;  %v13687_v57 = vpop.f32.mrb[64].mxu1 }
 0x281   : > { %v15651_v13 = vld [vmem:[#allocation2 + $0x34] sm:$0xff]   ;;  %v15653_v49 = vld [vmem:[#allocation2 + $0x40] sm:$0xff]   ;;  %v15655_v29 = vld [vmem:[#allocation2 + $0x4c] sm:$0xff]  }
 0x282   : > { %13874 = vmatpush3.bf16.msra.mxu0 %v15639_v54  ;;  %v15654_v25 = vld [vmem:[#allocation2 + $0x38] sm:$0xff]   ;;  %v15676_v54 = vld [vmem:[#allocation6 + $0x478] sm:$0xff]  }
 0x283   : > { %13875 = vmatprep.subr.bf16.mxu0 %v15641_v59  ;;  %v15623_v19 = vld [vmem:[#allocation2 + $0x60] sm:$0xff]   ;;  %v15658_v59 = vld [vmem:[#allocation2 + $0x50] sm:$0xff]  }
 0x284   : > { %v15656_v17 = vld [vmem:[#allocation2 + $0x3c] sm:$0xff]   ;;  %v15920_v7 = vld [vmem:[#allocation6 + $0x8a0] sm:$0xff]  }
 0x285   : > { %4067 = vmatmul.mubr.bf16.gmra.mrb[92].mxu0 %v15605_v62  ;;  %v15633_v60 = vld [vmem:[#allocation2 + $0x68] sm:$0xff]   ;;  %v15926_v43 = vld [vmem:[#allocation6 + $0x8a8] sm:$0xff]  }
 0x286   : > { %4074 = vmatprep.mubr.bf16.mxu0 %v15606_v3  ;;  %13876 = vmatpush3.bf16.msra.mxu0 %v15642_v61  ;;  %v13688_v61 = vpop.f32.mrb[65].mxu1 }
 0x287   : > { %3986 = vmatmul.mubr.bf16.gmra.mrb[84].mxu1 %v15607_v45  ;;  %13877 = vmatprep.subr.bf16.mxu0 %v15647_v48  ;;  %v17036_v48 = vadd.f32 %v13688_v61, %v13687_v57  ;;  %v13690_v62 = vpop.f32.mrb[66].mxu1  ;;  %v15690_v57 = vld [vmem:[#allocation6 + $0x480] sm:$0xff]   ;;  %v15692_v61 = vld [vmem:[#allocation6 + $0x488] sm:$0xff]  }
 0x288   : > { %3993 = vmatprep.mubr.bf16.mxu1 %v15609_v9  ;;  %v13691_v3 = vpop.f32.mrb[67].mxu1  ;;  %v15660_v9 = vld [vmem:[#allocation2 + $0x54] sm:$0xff]  }
 0x289   : > { %v17038_v45 = vadd.f32 %v13691_v3, %v13690_v62  ;;  %v15693_v62 = vld [vmem:[#allocation6 + $0x4d0] sm:$0xff]  }
 0x28a   : > { %13878 = vmatpush3.bf16.msra.mxu0 %v15648_v4  ;;  %v15659_v4 = vld [vmem:[#allocation2 + $0x48] sm:$0xff]  }
 0x28b   : > { %v15694_v3 = vld [vmem:[#allocation6 + $0x490] sm:$0xff]  }
 0x28d   : > { %4075 = vmatmul.mubr.bf16.gmra.mrb[96].mxu0 %v15611_v14  ;;  %v15661_v14 = vld [vmem:[#allocation2 + $0x4c] sm:$0xff]  }
 0x28e   : > { %4082 = vmatprep.mubr.bf16.mxu0 %v15613_v16  ;;  %v13693_v16 = vpop.f32.mrb[68].mxu1 }
 0x28f   : > { %3994 = vmatmul.mubr.bf16.gmra.mrb[88].mxu1 %v15615_v18  ;;  %v15663_v18 = vld [vmem:[#allocation2 + $0x58] sm:$0xff]  }
 0x290   : > { %4001 = vmatprep.mubr.bf16.mxu1 %v15617_v41  ;;  %v13694_v41 = vpop.f32.mrb[69].mxu1 }
 0x295   : > { %4083 = vmatmul.mubr.bf16.gmra.mrb[100].mxu0 %v15621_v55  ;;  %v17040_v55 = vadd.f32 %v13694_v41, %v13693_v16  ;;  %v15698_v16 = vld [vmem:[#allocation6 + $0x4a0] sm:$0xff]   ;;  %v15700_v41 = vld [vmem:[#allocation6 + $0x4a8] sm:$0xff]  }
 0x296   : > { %4090 = vmatprep.mubr.bf16.mxu0 %v15623_v19  ;;  %v13696_v19 = vpop.f32.mrb[70].mxu1 }
 0x297   : > { %4002 = vmatmul.mubr.bf16.gmra.mrb[92].mxu1 %v15625_v53  ;;  %v13697_v53 = vpop.f32.mrb[71].mxu1 }
 0x298   : > { %4139 = vmatprep.mubr.bf16.mxu1 %v15628_v22  ;;  %v15664_v22 = vld [vmem:[#allocation2 + $0x50] sm:$0xff]  }
 0x29d   : > { %4091 = vmatmul.mubr.bf16.gmra.mrb[104].mxu0 %v15631_v44  ;;  %v17042_v44 = vadd.f32 %v13697_v53, %v13696_v19  ;;  %v15701_v19 = vld [vmem:[#allocation6 + $0x540] sm:$0xff]  }
 0x29e   : > { %4098 = vmatprep.mubr.bf16.mxu0 %v15633_v60  ;;  %v15665_v60 = vld [vmem:[#allocation2 + $0x64] sm:$0xff]   ;;  %v15702_v53 = vld [vmem:[#allocation6 + $0x500] sm:$0xff]  }
 0x29f   : > { %4140 = vmatmul.mubr.bf16.vlgmr.msra.gmra.mrb[96].mxu1 %v15635_v32  ;;  %v15666_v32 = vld [vmem:[#allocation2 + $0x54] sm:$0xff]  }
 0x2a0   : > { %4147 = vmatprep.mubr.bf16.mxu1 %v15637_v26  ;;  %14891 = vmatpush3.bf16.msra.mxu1 %v16169_v30  ;;  %v15669_v26 = vld [vmem:[#allocation2 + $0x60] sm:$0xff]   ;;  %v15670_v30 = vld [vmem:[#allocation2 + $0x6c] sm:$0xff]  }
 0x2a1   : > { %14892 = vmatprep.subr.bf16.mxu1 %v15645_v27 }
 0x2a4   : > { %14893 = vmatpush3.bf16.msra.mxu1 %v15645_v27  ;;  %v15668_v27 = vld [vmem:[#allocation2 + $0x68] sm:$0xff]  }
 0x2a5   : > { %4099 = vmatmul.mubr.bf16.gmra.mrb[108].mxu0 %v15640_v34  ;;  %14894 = vmatprep.subr.bf16.mxu1 %v15652_v33  ;;  %v15673_v34 = vld [vmem:[#allocation2 + $0x70] sm:$0xff]  }
 0x2a6   : > { %4236 = vmatprep.mubr.bf16.mxu0 %v15643_v35  ;;  %v15678_v35 = vld [vmem:[#allocation2 + $0x7c] sm:$0xff]  }
 0x2a7   : > { %4148 = vmatmul.mubr.bf16.gmra.mrb[100].mxu1 %v15644_v38  ;;  %v15674_v38 = vld [vmem:[#allocation2 + $0x68] sm:$0xff]  }
 0x2a8   : > { %4155 = vmatprep.mubr.bf16.mxu1 %v15646_v42  ;;  %14895 = vmatpush3.bf16.msra.mxu1 %v15652_v33  ;;  %v15671_v33 = vld [vmem:[#allocation2 + $0x64] sm:$0xff]   ;;  %v15677_v42 = vld [vmem:[#allocation2 + $0x38] sm:$0xff]  }
 0x2a9   : > { %14896 = vmatprep.subr.bf16.mxu1 %v15657_v39 }
 0x2ac   : > { %14897 = vmatpush3.bf16.msra.mxu1 %v15657_v39  ;;  %v15675_v39 = vld [vmem:[#allocation2 + $0x6c] sm:$0xff]  }
 0x2ad   : > { %4237 = vmatmul.mubr.bf16.vlgmr.msra.gmra.mrb[112].mxu0 %v15649_v15  ;;  %14898 = vmatprep.subr.bf16.mxu1 %v15662_v36  ;;  %v15682_v15 = vld [vmem:[#allocation2 + $0x84] sm:$0xff]  }
 0x2ae   : > { %4244 = vmatprep.mubr.bf16.mxu0 %v15650_v20  ;;  %v15680_v20 = vld [vmem:[#allocation2 + $0x40] sm:$0xff]  }
 0x2af   : > { %4156 = vmatmul.mubr.bf16.gmra.mrb[104].mxu1 %v15651_v13  ;;  %v15681_v13 = vld [vmem:[#allocation2 + $0x50] sm:$0xff]  }
 0x2b0   : > { %4163 = vmatprep.mubr.bf16.mxu1 %v15653_v49  ;;  %14899 = vmatpush3.bf16.msra.mxu1 %v15662_v36  ;;  %v15679_v36 = vld [vmem:[#allocation2 + $0x78] sm:$0xff]  }
 0x2b1   : > { %14900 = vmatprep.subr.bf16.mxu1 %v15667_v23  ;;  %v15684_v49 = vld [vmem:[#allocation2 + $0x58] sm:$0xff]  }
 0x2b4   : > { %14901 = vmatpush3.bf16.msra.mxu1 %v15667_v23  ;;  %v15683_v23 = vld [vmem:[#allocation2 + $0x80] sm:$0xff]  }
 0x2b5   : > { %4245 = vmatmul.mubr.bf16.gmra.mrb[116].mxu0 %v15654_v25  ;;  %14902 = vmatprep.subr.bf16.mxu1 %v15672_v58  ;;  %v15687_v25 = vld [vmem:[#allocation2 + $0x80] sm:$0xff]  }
 0x2b6   : > { %4252 = vmatprep.mubr.bf16.mxu0 %v15655_v29  ;;  %v15686_v29 = vld [vmem:[#allocation2 + $0x70] sm:$0xff]  }
 0x2b7   : > { %4164 = vmatmul.mubr.bf16.gmra.mrb[108].mxu1 %v15656_v17  ;;  %v15689_v17 = vld [vmem:[#allocation6 + $0x4c0] sm:$0xff]  }
 0x2b8   : > { %4171 = vmatprep.mubr.bf16.mxu1 %v15658_v59  ;;  %14903 = vmatpush3.bf16.msra.mxu1 %v15672_v58  ;;  %v15685_v58 = vld [vmem:[#allocation2 + $0x68] sm:$0xff]   ;;  %v15691_v59 = vld [vmem:[#allocation6 + $0x4c8] sm:$0xff]  }
 0x2b9   : > { %14904 = vmatprep.subr.bf16.mxu1 %v15676_v54  ;;  %13943 = vmatprep.subr.bf16.mxu0 %v15689_v17 }
 0x2ba   : > { %13944 = vmatpush3.bf16.msra.mxu0 %v15690_v57 }
 0x2bb   : > { %13945 = vmatprep.subr.bf16.mxu0 %v15691_v59 }
 0x2bc   : > { %14905 = vmatpush3.bf16.msra.mxu1 %v15676_v54  ;;  %v15688_v54 = vld [vmem:[#allocation2 + $0x88] sm:$0xff]  }
 0x2bd   : > { %4253 = vmatmul.mubr.bf16.gmra.mrb[120].mxu0 %v15659_v4  ;;  %v15695_v4 = vld [vmem:[#allocation6 + $0x4d8] sm:$0xff]   ;;  %14007 = vmatprep.subr.bf16.mxu1 %v15701_v19 }
 0x2be   : > { %4260 = vmatprep.mubr.bf16.mxu0 %v15660_v9  ;;  %13946 = vmatpush3.bf16.msra.mxu0 %v15692_v61  ;;  %v15696_v9 = vld [vmem:[#allocation6 + $0x498] sm:$0xff]  }
 0x2bf   : > { %4172 = vmatmul.mubr.bf16.gmra.mrb[112].mxu1 %v15661_v14  ;;  %13947 = vmatprep.subr.bf16.mxu0 %v15693_v62  ;;  %v15697_v14 = vld [vmem:[#allocation6 + $0x4e0] sm:$0xff]   ;;  %v15722_v19 = vld [vmem:[#allocation2 + $0x8] sm:$0xff]  }
 0x2c0   : > { %4179 = vmatprep.mubr.bf16.mxu1 %v15663_v18  ;;  %v15699_v18 = vld [vmem:[#allocation6 + $0x4e8] sm:$0xff]  }
 0x2c2   : > { %13948 = vmatpush3.bf16.msra.mxu0 %v15694_v3 }
 0x2c3   : > { %13949 = vmatprep.subr.bf16.mxu0 %v15695_v4  ;;  %v15717_v4 = vld [vmem:[#allocation6 + $0x5c0] sm:$0xff]  }
 0x2c5   : > { %4261 = vmatmul.mubr.bf16.gmra.mrb[124].mxu0 %v15664_v22  ;;  %v15703_v22 = vld [vmem:[#allocation6 + $0x4f0] sm:$0xff]  }
 0x2c6   : > { %4268 = vmatprep.mubr.bf16.mxu0 %v15665_v60  ;;  %13950 = vmatpush3.bf16.msra.mxu0 %v15696_v9  ;;  %v15704_v60 = vld [vmem:[#allocation6 + $0x4b0] sm:$0xff]   ;;  %v15718_v9 = vld [vmem:[#allocation6 + $0x580] sm:$0xff]  }
 0x2c7   : > { %4180 = vmatmul.mubr.bf16.gmra.mrb[116].mxu1 %v15666_v32  ;;  %13951 = vmatprep.subr.bf16.mxu0 %v15697_v14  ;;  %v15705_v32 = vld [vmem:[#allocation6 + $0x548] sm:$0xff]  }
 0x2c8   : > { %4187 = vmatprep.mubr.bf16.mxu1 %v15668_v27  ;;  %v15706_v27 = vld [vmem:[#allocation6 + $0x508] sm:$0xff]  }
 0x2ca   : > { %13952 = vmatpush3.bf16.msra.mxu0 %v15698_v16  ;;  %v15719_v16 = vld [vmem:[#allocation6 + $0x568] sm:$0xff]  }
 0x2cb   : > { %13953 = vmatprep.subr.bf16.mxu0 %v15699_v18  ;;  %v15720_v18 = vld [vmem:[#allocation6 + $0x528] sm:$0xff]  }
 0x2cd   : > { %4269 = vmatmul.mubr.bf16.gmra.mrb[128].mxu0 %v15669_v26  ;;  %v15707_v26 = vld [vmem:[#allocation6 + $0x550] sm:$0xff]  }
 0x2ce   : > { %4276 = vmatprep.mubr.bf16.mxu0 %v15670_v30  ;;  %13954 = vmatpush3.bf16.msra.mxu0 %v15700_v41  ;;  %v15708_v30 = vld [vmem:[#allocation6 + $0x510] sm:$0xff]   ;;  %v15721_v41 = vld [vmem:[#allocation2 + $0xc] sm:$0xff]  }
 0x2cf   : > { %4188 = vmatmul.mubr.bf16.gmra.mrb[120].mxu1 %v15671_v33  ;;  %13955 = vmatprep.subr.bf16.mxu0 %v15703_v22  ;;  %v15709_v33 = vld [vmem:[#allocation6 + $0x4f8] sm:$0xff]  }
 0x2d0   : > { %4195 = vmatprep.mubr.bf16.mxu1 %v15673_v34  ;;  %v15710_v34 = vld [vmem:[#allocation6 + $0x4b8] sm:$0xff]  }
 0x2d2   : > { %13956 = vmatpush3.bf16.msra.mxu0 %v15704_v60 }
 0x2d3   : > { %13957 = vmatprep.subr.bf16.mxu0 %v15709_v33 }
 0x2d5   : > { %4277 = vmatmul.mubr.bf16.gmra.mrb[132].mxu0 %v15674_v38  ;;  %v15711_v38 = vld [vmem:[#allocation6 + $0x558] sm:$0xff]  }
 0x2d6   : > { %4284 = vmatprep.mubr.bf16.mxu0 %v15678_v35  ;;  %13958 = vmatpush3.bf16.msra.mxu0 %v15710_v34 }
 0x2d7   : > { %4196 = vmatmul.mubr.bf16.gmra.mrb[124].mxu1 %v15675_v39  ;;  %v15712_v39 = vld [vmem:[#allocation6 + $0x518] sm:$0xff]   ;;  %14071 = vmatprep.subr.bf16.mxu0 %v15717_v4 }
 0x2d8   : > { %14906 = vmatprep.mubr.bf16.mxu1 %v15677_v42  ;;  %v15713_v42 = vld [vmem:[#allocation2 + $0x4] sm:$0xff]  }
 0x2dd   : > { %4285 = vmatmul.mubr.bf16.gmra.mrb[136].mxu0 %v15679_v36 }
 0x2de   : > { %4292 = vmatprep.mubr.bf16.mxu0 %v15682_v15  ;;  %v15714_v15 = vld [vmem:[#allocation2] sm:$0xff]  }
 0x2df   : > { %14907 = vmatmul.mubr.bf16.vlgmr.msra.gmra.mrb[128].mxu1 %v15680_v20  ;;  %v15715_v20 = vld [vmem:[#allocation6 + $0x560] sm:$0xff]  }
 0x2e0   : > { %14910 = vmatprep.mubr.bf16.mxu1 %v15681_v13  ;;  %14008 = vmatpush3.bf16.msra.mxu1 %v15702_v53  ;;  %v15723_v53 = vld [vmem:[#allocation6 + $0x570] sm:$0xff]  }
 0x2e1   : > { %14009 = vmatprep.subr.bf16.mxu1 %v15705_v32 }
 0x2e4   : > { %14010 = vmatpush3.bf16.msra.mxu1 %v15706_v27 }
 0x2e5   : > { %4293 = vmatmul.mubr.bf16.gmra.mrb[140].mxu0 %v15683_v23  ;;  %14011 = vmatprep.subr.bf16.mxu1 %v15707_v26  ;;  %v15724_v26 = vld [vmem:[#allocation6 + $0x530] sm:$0xff]  }
 0x2e6   : > { %5823 = vmatprep.mubr.bf16.mxu0 %v15713_v42 }
 0x2e7   : > { %14911 = vmatmul.mubr.bf16.gmra.mrb[132].mxu1 %v15684_v49 }
 0x2e8   : > { %14914 = vmatprep.mubr.bf16.mxu1 %v15685_v58  ;;  %14012 = vmatpush3.bf16.msra.mxu1 %v15708_v30 }
 0x2e9   : > { %14013 = vmatprep.subr.bf16.mxu1 %v15711_v38 }
 0x2ec   : > { %14014 = vmatpush3.bf16.msra.mxu1 %v15712_v39 }
 0x2ed   : > { %5824 = vmatmul.mubr.bf16.vlgmr.msra.gmra.mrb[144].mxu0 %v15714_v15  ;;  %14015 = vmatprep.subr.bf16.mxu1 %v15715_v20  ;;  %v15726_v15 = vld [vmem:[#allocation6 + $0x588] sm:$0xff]  }
 0x2ee   : > { %14072 = vmatpush3.bf16.msra.mxu0 %v15718_v9  ;;  %5831 = vmatprep.mubr.bf16.mxu0 %v15721_v41  ;;  %v15736_v41 = vld [vmem:[#allocation6 + $0x590] sm:$0xff]  }
 0x2ef   : > { %14915 = vmatmul.mubr.bf16.gmra.mrb[136].mxu1 %v15686_v29  ;;  %v15716_v29 = vld [vmem:[#allocation6 + $0x520] sm:$0xff]  }
 0x2f0   : > { %14918 = vmatprep.mubr.bf16.mxu1 %v15687_v25  ;;  %14016 = vmatpush3.bf16.msra.mxu1 %v15716_v29 }
 0x2f1   : > { %14017 = vmatprep.subr.bf16.mxu1 %v15719_v16 }
 0x2f4   : > { %14018 = vmatpush3.bf16.msra.mxu1 %v15720_v18  ;;  %v15734_v18 = vld [vmem:[#allocation6 + $0x5d0] sm:$0xff]  }
 0x2f5   : > { %5832 = vmatmul.mubr.bf16.gmra.mrb[148].mxu0 %v15722_v19  ;;  %14019 = vmatprep.subr.bf16.mxu1 %v15723_v53  ;;  %v15740_v19 = vld [vmem:[#allocation6 + $0x5d8] sm:$0xff]  }
 0x2f7   : > { %14919 = vmatmul.mubr.bf16.gmra.mrb[140].mxu1 %v15688_v54 }
 0x2f8   : > { %14020 = vmatpush3.bf16.msra.mxu1 %v15724_v26 }
 0x340   : > { %v13751_v35 = vpop.f32.mrb[80].mxu0 }
 0x341   : > { %v13752_v36 = vpop.f32.mrb[81].mxu0 }
 0x342   : > { %v13753_v13 = vadd.f32 %v13752_v36, %v13751_v35  ;;  %v13699_v23 = vpop.f32.mrb[72].mxu1  ;;  %v13754_v49 = vpop.f32.mrb[82].mxu0  ;;  %v15725_v36 = vld [vmem:[#allocation6 + $0x5c8] sm:$0xff]  }
 0x343   : > { %v13700_v58 = vpop.f32.mrb[73].mxu1  ;;  %v13755_v25 = vpop.f32.mrb[83].mxu0  ;;  %14073 = vmatprep.subr.bf16.mxu0 %v15725_v36 }
 0x344   : > { %v17045_v54 = vadd.f32 %v13753_v13, %v17036_v48  ;;  %v13701_v17 = vadd.f32 %v13700_v58, %v13699_v23  ;;  %v13756_v57 = vadd.f32 %v13755_v25, %v13754_v49  ;;  %v13702_v59 = vpop.f32.mrb[74].mxu1  ;;  %v15727_v13 = vld [vmem:[#allocation6 + $0x578] sm:$0xff]   ;;  %14074 = vmatpush3.bf16.msra.mxu0 %v15726_v15  ;;  %v15748_v15 = vld [vmem:[#allocation6 + $0x5a0] sm:$0xff]  }
 0x345   : > { %v13703_v61 = vpop.f32.mrb[75].mxu1  ;;  %v15728_v23 = vld [vmem:[#allocation6 + $0x538] sm:$0xff]   ;;  %14021 = vmatprep.subr.bf16.mxu1 %v15727_v13  ;;  %14075 = vmatprep.subr.bf16.mxu0 %v15734_v18 }
 0x346   : > { %v17048_v62 = vadd.f32 %v13756_v57, %v17038_v45  ;;  %v13704_v3 = vadd.f32 %v13703_v61, %v13702_v59  ;;  %14022 = vmatpush3.bf16.msra.mxu1 %v15728_v23 }
 0x348   : > { %v13757_v14 = vpop.f32.mrb[84].mxu0  ;;  %14076 = vmatpush3.bf16.msra.mxu0 %v15736_v41 }
 0x349   : > { %v13758_v48 = vpop.f32.mrb[85].mxu0  ;;  %14077 = vmatprep.subr.bf16.mxu0 %v15740_v19 }
 0x34a   : > { %v13759_v22 = vadd.f32 %v13758_v48, %v13757_v14  ;;  %v13705_v60 = vpop.f32.mrb[76].mxu1  ;;  %v13760_v32 = vpop.f32.mrb[86].mxu0 }
 0x34b   : > { %v13706_v45 = vpop.f32.mrb[77].mxu1  ;;  %v13761_v27 = vpop.f32.mrb[87].mxu0 }
 0x34c   : > { %v17051_v30 = vadd.f32 %v13759_v22, %v17040_v55  ;;  %v13707_v33 = vadd.f32 %v13706_v45, %v13705_v60  ;;  %v13762_v34 = vadd.f32 %v13761_v27, %v13760_v32  ;;  %v13708_v35 = vpop.f32.mrb[78].mxu1  ;;  %v15742_v22 = vld [vmem:[#allocation6 + $0x598] sm:$0xff]  }
 0x34d   : > { %v13709_v38 = vpop.f32.mrb[79].mxu1  ;;  %14078 = vmatpush3.bf16.msra.mxu0 %v15742_v22  ;;  %v15756_v22 = vld [vmem:[#allocation6 + $0x640] sm:$0xff]  }
 0x34e   : > { %v17054_v39 = vadd.f32 %v13762_v34, %v17042_v44  ;;  %v13710_v42 = vadd.f32 %v13709_v38, %v13708_v35  ;;  %14135 = vmatprep.subr.bf16.mxu1 %v15756_v22 }
 0x350   : > { %v13763_v20 = vpop.f32.mrb[88].mxu0 }
 0x351   : > { %v13764_v49 = vpop.f32.mrb[89].mxu0 }
 0x352   : > { %v13765_v55 = vadd.f32 %v13764_v49, %v13763_v20  ;;  %v13711_v58 = vpop.f32.mrb[80].mxu1  ;;  %v13766_v25 = vpop.f32.mrb[90].mxu0 }
 0x353   : > { %v13712_v29 = vpop.f32.mrb[81].mxu1  ;;  %v13767_v57 = vpop.f32.mrb[91].mxu0 }
 0x354   : > { %v17056_v59 = vadd.f32 %v13765_v55, %v13701_v17  ;;  %v13713_v44 = vadd.f32 %v13712_v29, %v13711_v58  ;;  %v13768_v61 = vadd.f32 %v13767_v57, %v13766_v25  ;;  %v13714_v4 = vpop.f32.mrb[82].mxu1  ;;  %v15746_v17 = vld [vmem:[#allocation6 + $0x5e0] sm:$0xff]   ;;  %v15752_v29 = vld [vmem:[#allocation6 + $0x5e8] sm:$0xff]  }
 0x355   : > { %v13715_v9 = vpop.f32.mrb[83].mxu1  ;;  %14079 = vmatprep.subr.bf16.mxu0 %v15746_v17 }
 0x356   : > { %v17058_v14 = vadd.f32 %v13768_v61, %v13704_v3  ;;  %v13716_v16 = vadd.f32 %v13715_v9, %v13714_v4  ;;  %14080 = vmatpush3.bf16.msra.mxu0 %v15748_v15  ;;  %v15754_v61 = vld [vmem:[#allocation6 + $0x5a8] sm:$0xff]  }
 0x357   : > { %14081 = vmatprep.subr.bf16.mxu0 %v15752_v29 }
 0x358   : > { %v13769_v48 = vpop.f32.mrb[92].mxu0 }
 0x359   : > { %v13770_v53 = vpop.f32.mrb[93].mxu0 }
 0x35a   : > { %v13771_v60 = vadd.f32 %v13770_v53, %v13769_v48  ;;  %v13717_v32 = vpop.f32.mrb[84].mxu1  ;;  %v13772_v45 = vpop.f32.mrb[94].mxu0  ;;  %14082 = vmatpush3.bf16.msra.mxu0 %v15754_v61  ;;  %v15770_v61 = vld [vmem:[#allocation6 + $0x5f8] sm:$0xff]  }
 0x35b   : > { %v13718_v27 = vpop.f32.mrb[85].mxu1  ;;  %v13773_v26 = vpop.f32.mrb[95].mxu0 }
 0x35c   : > { %v17060_v34 = vadd.f32 %v13771_v60, %v13707_v33  ;;  %v13719_v3 = vadd.f32 %v13718_v27, %v13717_v32  ;;  %v13774_v35 = vadd.f32 %v13773_v26, %v13772_v45  ;;  %v13720_v38 = vpop.f32.mrb[86].mxu1  ;;  %v15760_v27 = vld [vmem:[#allocation6 + $0x5f0] sm:$0xff]  }
 0x35d   : > { %v13721_v36 = vpop.f32.mrb[87].mxu1  ;;  %14083 = vmatprep.subr.bf16.mxu0 %v15760_v27 }
 0x35e   : > { %v17062_v20 = vadd.f32 %v13774_v35, %v13710_v42  ;;  %v13722_v13 = vadd.f32 %v13721_v36, %v13720_v38  ;;  %v15762_v35 = vld [vmem:[#allocation6 + $0x5b0] sm:$0xff]  }
 0x35f   : > { %14084 = vmatpush3.bf16.msra.mxu0 %v15762_v35 }
 0x360   : > { %v13775_v23 = vpop.f32.mrb[96].mxu0  ;;  %14085 = vmatprep.subr.bf16.mxu0 %v15770_v61 }
 0x361   : > { %v13776_v49 = vpop.f32.mrb[97].mxu0 }
 0x362   : > { %v13777_v55 = vadd.f32 %v13776_v49, %v13775_v23  ;;  %v13723_v58 = vpop.f32.mrb[88].mxu1  ;;  %v13778_v25 = vpop.f32.mrb[98].mxu0 }
 0x363   : > { %v13724_v57 = vpop.f32.mrb[89].mxu1  ;;  %v13779_v33 = vpop.f32.mrb[99].mxu0 }
 0x364   : > { %v17064_v4 = vadd.f32 %v13777_v55, %v13713_v44  ;;  %v13725_v9 = vadd.f32 %v13724_v57, %v13723_v58  ;;  %v13780_v18 = vadd.f32 %v13779_v33, %v13778_v25  ;;  %v13726_v41 = vpop.f32.mrb[90].mxu1 }
 0x365   : > { %v13727_v42 = vpop.f32.mrb[91].mxu1 }
 0x366   : > { %v17066_v48 = vadd.f32 %v13780_v18, %v13716_v16  ;;  %v13728_v19 = vadd.f32 %v13727_v42, %v13726_v41  ;;  %v15771_v18 = vld [vmem:[#allocation6 + $0x5b8] sm:$0xff]  }
 0x367   : > { %14086 = vmatpush3.bf16.msra.mxu0 %v15771_v18 }
 0x368   : > { %v13781_v53 = vpop.f32.mrb[100].mxu0 }
 0x369   : > { %v13782_v60 = vpop.f32.mrb[101].mxu0 }
 0x36a   : > { %v13783_v32 = vadd.f32 %v13782_v60, %v13781_v53  ;;  %v13729_v45 = vpop.f32.mrb[92].mxu1  ;;  %v13784_v17 = vpop.f32.mrb[102].mxu0 }
 0x36b   : > { %v13730_v26 = vpop.f32.mrb[93].mxu1  ;;  %v13785_v44 = vpop.f32.mrb[103].mxu0 }
 0x36c   : > { %v17068_v38 = vadd.f32 %v13783_v32, %v13719_v3  ;;  %v13731_v36 = vadd.f32 %v13730_v26, %v13729_v45  ;;  %v13786_v15 = vadd.f32 %v13785_v44, %v13784_v17  ;;  %v13732_v23 = vpop.f32.mrb[94].mxu1 }
 0x36d   : > { %v13733_v16 = vpop.f32.mrb[95].mxu1 }
 0x36e   : > { %v17070_v49 = vadd.f32 %v13786_v15, %v13722_v13  ;;  %v13734_v55 = vadd.f32 %v13733_v16, %v13732_v23 }
 0x370   : > { %v13787_v58 = vpop.f32.mrb[104].mxu0 }
 0x371   : > { %v13788_v25 = vpop.f32.mrb[105].mxu0 }
 0x372   : > { %v13789_v29 = vadd.f32 %v13788_v25, %v13787_v58  ;;  %v13790_v57 = vpop.f32.mrb[106].mxu0  ;;  %v13815_v33 = vpop.f32.mrb[96].mxu1 }
 0x373   : > { %v13791_v41 = vpop.f32.mrb[107].mxu0  ;;  %v13816_v42 = vpop.f32.mrb[97].mxu1 }
 0x374   : > { %v17072_v3 = vadd.f32 %v13789_v29, %v13725_v9  ;;  %v13792_v53 = vadd.f32 %v13791_v41, %v13790_v57  ;;  %v13817_v22 = vadd.f32 %v13816_v42, %v13815_v33  ;;  %v13818_v60 = vpop.f32.mrb[98].mxu1  ;;  %v17078_v9 = vld [vmem:[#allocation6 + $0x680] sm:$0xff]  }
 0x375   : > { %v13819_v32 = vpop.f32.mrb[99].mxu1  ;;  %14922 = vmatprep.subr.bf16.mxu0 %v17078_v9 }
 0x376   : > { %v17074_v13 = vadd.f32 %v13792_v53, %v13728_v19  ;;  %v4142_v45 = vadd.f32 %v13817_v22, %v17045_v54  ;;  %v13820_v17 = vadd.f32 %v13819_v32, %v13818_v60 }
 0x378   : > { %v4145_v27 = vadd.f32 %v13820_v17, %v17048_v62  ;;  %v13793_v26 = vpop.f32.mrb[108].mxu0 }
 0x379   : > { %v13794_v44 = vpop.f32.mrb[109].mxu0 }
 0x37a   : > { %v13795_v35 = vadd.f32 %v13794_v44, %v13793_v26  ;;  %v13796_v15 = vpop.f32.mrb[110].mxu0  ;;  %v13821_v23 = vpop.f32.mrb[100].mxu1 }
 0x37b   : > { %v13797_v16 = vpop.f32.mrb[111].mxu0  ;;  %v13822_v58 = vpop.f32.mrb[101].mxu1 }
 0x37c   : > { %v17080_v25 = vadd.f32 %v13795_v35, %v13731_v36  ;;  %v13798_v29 = vadd.f32 %v13797_v16, %v13796_v15  ;;  %v13823_v57 = vadd.f32 %v13822_v58, %v13821_v23  ;;  %v13824_v19 = vpop.f32.mrb[102].mxu1 }
 0x37d   : > { %v13825_v54 = vpop.f32.mrb[103].mxu1 }
 0x37e   : > { %v17083_v33 = vadd.f32 %v13798_v29, %v13734_v55  ;;  %v4150_v62 = vadd.f32 %v13823_v57, %v17051_v30  ;;  %v13826_v61 = vadd.f32 %v13825_v54, %v13824_v19 }
 0x380   : > { %v4153_v18 = vadd.f32 %v13826_v61, %v17054_v39  ;;  %v13879_v41 = vpop.f32.mrb[112].mxu0 }
 0x381   : > { %v13880_v42 = vpop.f32.mrb[113].mxu0 }
 0x382   : > { %v13881_v53 = vadd.f32 %v13880_v42, %v13879_v41  ;;  %v13827_v22 = vpop.f32.mrb[104].mxu1  ;;  %v13882_v60 = vpop.f32.mrb[114].mxu0 }
 0x383   : > { %v13828_v36 = vpop.f32.mrb[105].mxu1  ;;  %v13883_v32 = vpop.f32.mrb[115].mxu0 }
 0x384   : > { %v13829_v17 = vadd.f32 %v13828_v36, %v13827_v22  ;;  %v13884_v26 = vadd.f32 %v13883_v32, %v13882_v60  ;;  %v13830_v44 = vpop.f32.mrb[106].mxu1  ;;  %v17087_v35 = vadd.f32 %v13881_v53, %v4142_v45 }
 0x385   : > { %v13831_v15 = vpop.f32.mrb[107].mxu1 }
 0x386   : > { %v4158_v55 = vadd.f32 %v13829_v17, %v17056_v59  ;;  %v13832_v23 = vadd.f32 %v13831_v15, %v13830_v44  ;;  %v17090_v30 = vadd.f32 %v13884_v26, %v4145_v27 }
 0x388   : > { %v4161_v39 = vadd.f32 %v13832_v23, %v17058_v14  ;;  %v13885_v16 = vpop.f32.mrb[116].mxu0 }
 0x389   : > { %v13886_v58 = vpop.f32.mrb[117].mxu0 }
 0x38a   : > { %v13887_v29 = vadd.f32 %v13886_v58, %v13885_v16  ;;  %v13833_v57 = vpop.f32.mrb[108].mxu1  ;;  %v13888_v19 = vpop.f32.mrb[118].mxu0 }
 0x38b   : > { %v13834_v54 = vpop.f32.mrb[109].mxu1  ;;  %v13889_v61 = vpop.f32.mrb[119].mxu0 }
 0x38c   : > { %v13835_v41 = vadd.f32 %v13834_v54, %v13833_v57  ;;  %v13890_v42 = vadd.f32 %v13889_v61, %v13888_v19  ;;  %v13836_v22 = vpop.f32.mrb[110].mxu1  ;;  %v17093_v45 = vadd.f32 %v13887_v29, %v4150_v62 }
 0x38d   : > { %v13837_v53 = vpop.f32.mrb[111].mxu1 }
 0x38e   : > { %v4166_v59 = vadd.f32 %v13835_v41, %v17060_v34  ;;  %v13838_v60 = vadd.f32 %v13837_v53, %v13836_v22  ;;  %v17096_v27 = vadd.f32 %v13890_v42, %v4153_v18 }
 0x390   : > { %v4169_v14 = vadd.f32 %v13838_v60, %v17062_v20  ;;  %v13891_v36 = vpop.f32.mrb[120].mxu0 }
 0x391   : > { %v13892_v32 = vpop.f32.mrb[121].mxu0 }
 0x392   : > { %v13893_v17 = vadd.f32 %v13892_v32, %v13891_v36  ;;  %v13839_v26 = vpop.f32.mrb[112].mxu1  ;;  %v13894_v44 = vpop.f32.mrb[122].mxu0 }
 0x393   : > { %v13840_v15 = vpop.f32.mrb[113].mxu1  ;;  %v13895_v23 = vpop.f32.mrb[123].mxu0 }
 0x394   : > { %v13841_v16 = vadd.f32 %v13840_v15, %v13839_v26  ;;  %v13896_v58 = vadd.f32 %v13895_v23, %v13894_v44  ;;  %v13842_v57 = vpop.f32.mrb[114].mxu1  ;;  %v17099_v62 = vadd.f32 %v13893_v17, %v4158_v55 }
 0x395   : > { %v13843_v29 = vpop.f32.mrb[115].mxu1 }
 0x396   : > { %v4174_v34 = vadd.f32 %v13841_v16, %v17064_v4  ;;  %v13844_v19 = vadd.f32 %v13843_v29, %v13842_v57  ;;  %v17102_v18 = vadd.f32 %v13896_v58, %v4161_v39 }
 0x398   : > { %v4177_v20 = vadd.f32 %v13844_v19, %v17066_v48  ;;  %v13897_v54 = vpop.f32.mrb[124].mxu0 }
 0x399   : > { %v13898_v61 = vpop.f32.mrb[125].mxu0 }
 0x39a   : > { %v13899_v41 = vadd.f32 %v13898_v61, %v13897_v54  ;;  %v13845_v42 = vpop.f32.mrb[116].mxu1  ;;  %v13900_v22 = vpop.f32.mrb[126].mxu0 }
 0x39b   : > { %v13846_v53 = vpop.f32.mrb[117].mxu1  ;;  %v13901_v60 = vpop.f32.mrb[127].mxu0 }
 0x39c   : > { %v13847_v36 = vadd.f32 %v13846_v53, %v13845_v42  ;;  %v13902_v32 = vadd.f32 %v13901_v60, %v13900_v22  ;;  %v13848_v26 = vpop.f32.mrb[118].mxu1  ;;  %v17105_v55 = vadd.f32 %v13899_v41, %v4166_v59 }
 0x39d   : > { %v13849_v17 = vpop.f32.mrb[119].mxu1 }
 0x39e   : > { %v4182_v4 = vadd.f32 %v13847_v36, %v17068_v38  ;;  %v13850_v44 = vadd.f32 %v13849_v17, %v13848_v26  ;;  %v17108_v39 = vadd.f32 %v13902_v32, %v4169_v14 }
 0x3a0   : > { %v4185_v48 = vadd.f32 %v13850_v44, %v17070_v49  ;;  %v13903_v15 = vpop.f32.mrb[128].mxu0 }
 0x3a1   : > { %v13904_v23 = vpop.f32.mrb[129].mxu0 }
 0x3a2   : > { %v13905_v16 = vadd.f32 %v13904_v23, %v13903_v15  ;;  %v13851_v58 = vpop.f32.mrb[120].mxu1  ;;  %v13906_v57 = vpop.f32.mrb[130].mxu0 }
 0x3a3   : > { %v13852_v29 = vpop.f32.mrb[121].mxu1  ;;  %v13907_v19 = vpop.f32.mrb[131].mxu0 }
 0x3a4   : > { %v13853_v54 = vadd.f32 %v13852_v29, %v13851_v58  ;;  %v13908_v61 = vadd.f32 %v13907_v19, %v13906_v57  ;;  %v13854_v42 = vpop.f32.mrb[122].mxu1  ;;  %v17111_v59 = vadd.f32 %v13905_v16, %v4174_v34 }
 0x3a5   : > { %v13855_v41 = vpop.f32.mrb[123].mxu1 }
 0x3a6   : > { %v4190_v38 = vadd.f32 %v13853_v54, %v17072_v3  ;;  %v13856_v22 = vadd.f32 %v13855_v41, %v13854_v42  ;;  %v17114_v14 = vadd.f32 %v13908_v61, %v4177_v20  ;;  %v17123_v41 = vld [vmem:[#allocation9 + $0x1] ss:$0 sm:$0xff] }
 0x3a8   : > { %v4193_v49 = vadd.f32 %v13856_v22, %v17074_v13  ;;  %v13909_v53 = vpop.f32.mrb[132].mxu0 }
 0x3a9   : > { %v13910_v60 = vpop.f32.mrb[133].mxu0 }
 0x3aa   : > { %v13911_v36 = vadd.f32 %v13910_v60, %v13909_v53  ;;  %v13857_v32 = vpop.f32.mrb[124].mxu1  ;;  %v13912_v26 = vpop.f32.mrb[134].mxu0  ;;  %v17126_v60 = vld [vmem:[#allocation11 + $0x1] ss:$0 sm:$0xff] }
 0x3ab   : > { %v13858_v17 = vpop.f32.mrb[125].mxu1  ;;  %v13913_v44 = vpop.f32.mrb[135].mxu0 }
 0x3ac   : > { %v13859_v15 = vadd.f32 %v13858_v17, %v13857_v32  ;;  %v13914_v23 = vadd.f32 %v13913_v44, %v13912_v26  ;;  %v13860_v58 = vpop.f32.mrb[126].mxu1  ;;  %v17117_v34 = vadd.f32 %v13911_v36, %v4182_v4 }
 0x3ad   : > { %v13861_v16 = vpop.f32.mrb[127].mxu1 }
 0x3ae   : > { %v4198_v3 = vadd.f32 %v13859_v15, %v17080_v25  ;;  %v13862_v57 = vadd.f32 %v13861_v16, %v13860_v58  ;;  %v17120_v20 = vadd.f32 %v13914_v23, %v4185_v48 }
 0x3b0   : > { %v4201_v13 = vadd.f32 %v13862_v57, %v17083_v33  ;;  %v13915_v29 = vpop.f32.mrb[136].mxu0 }
 0x3b1   : > { %v13916_v19 = vpop.f32.mrb[137].mxu0 }
 0x3b2   : > { %v13917_v54 = vadd.f32 %v13916_v19, %v13915_v29  ;;  %v13918_v61 = vpop.f32.mrb[138].mxu0  ;;  %v14908_v42 = vpop.f32.mrb[128].mxu1 }
 0x3b3   : > { %v4344_v22 = vadd.f32 %v14908_v42, %v17093_v45  ;;  %v13919_v53 = vpop.f32.mrb[139].mxu0  ;;  %v4335_v4 = vpop.f32.mrb[129].mxu1 }
 0x3b4   : > { %v13920_v36 = vadd.f32 %v13919_v53, %v13918_v61  ;;  %v4336_v25 = vadd.f32 %v4335_v4, %v17087_v35  ;;  %v14909_v48 = vpop.f32.mrb[130].mxu1  ;;  %v17129_v32 = vadd.f32 %v13917_v54, %v4190_v38 }
 0x3b5   : > { %v4408_v33 = vmul.f32 %v17123_v41, %v4344_v22  ;;  %v4347_v26 = vadd.f32 %v14909_v48, %v17096_v27  ;;  %v4338_v17 = vpop.f32.mrb[131].mxu1 }
 0x3b6   : > { %v4406_v44 = vmul.f32 %v17123_v41, %v4336_v25  ;;  %v4339_v15 = vadd.f32 %v4338_v17, %v17090_v30  ;;  %v17135_v45 = vadd.f32 %v13920_v36, %v4193_v49 }
 0x3b7   : > { %v4432_v23 = vadd.f32 %v17126_v60, %v4408_v33  ;;  %v4409_v58 = vmul.f32 %v17123_v41, %v4347_v26 }
 0x3b8   : > { %v4430_v35 = vadd.f32 %v17126_v60, %v4406_v44  ;;  %v4407_v38 = vmul.f32 %v17123_v41, %v4339_v15  ;;  %v13921_v16 = vpop.f32.mrb[140].mxu0 }
 0x3b9   : > { %v4433_v57 = vadd.f32 %v17126_v60, %v4409_v58  ;;  %v13922_v29 = vpop.f32.mrb[141].mxu0  ;;  %v4448_v49 = vmax.f32 %v4432_v23, 0.0 }
 0x3ba   : > { %v4446_v27 = vmax.f32 %v4430_v35, 0.0  ;;  %v4431_v19 = vadd.f32 %v17126_v60, %v4407_v38  ;;  %v13923_v54 = vadd.f32 %v13922_v29, %v13921_v16  ;;  %v13924_v61 = vpop.f32.mrb[142].mxu0  ;;  %v14912_v30 = vpop.f32.mrb[132].mxu1 }
 0x3bb   : > { %v4449_v42 = vmax.f32 %v4433_v57, 0.0  ;;  %v4360_v22 = vadd.f32 %v14912_v30, %v17105_v55  ;;  %v13925_v53 = vpop.f32.mrb[143].mxu0  ;;  %v4351_v4 = vpop.f32.mrb[133].mxu1 }
 0x3bc   : > { %v4462_v36 = vpack.c.bf16 %v4446_v27, %v4446_v27  ;;  %v4447_v25 = vmax.f32 %v4431_v19, 0.0  ;;  %v13926_v48 = vadd.f32 %v13925_v53, %v13924_v61  ;;  %v4352_v33 = vadd.f32 %v4351_v4, %v17099_v62  ;;  %v14913_v26 = vpop.f32.mrb[134].mxu1  ;;  %v15730_v4 = vld [vmem:[#allocation2 + $0x8] sm:$0xff]  }
 0x3bd   : > { %v4465_v17 = vpack.c.bf16 %v4449_v42, %v4449_v42  ;;  %v4412_v44 = vmul.f32 %v17123_v41, %v4360_v22  ;;  %v4363_v15 = vadd.f32 %v14913_v26, %v17108_v39  ;;  %v4354_v58 = vpop.f32.mrb[135].mxu1  ;;  %v4295_v35 = vadd.f32 %v13923_v54, %v4198_v3 }
 0x3be   : > { %4478 = vst [vmem:[#allocation2 + $0x1c] sm:$0xf] %v4462_v36  ;;  %v13326_v23 = vpack.c.bf16 %v4448_v49, %v4447_v25  ;;  %v4410_v38 = vmul.f32 %v17123_v41, %v4352_v33  ;;  %v4355_v55 = vadd.f32 %v4354_v58, %v17102_v18  ;;  %v17149_v16 = vadd.f32 %v13926_v48, %v4201_v13  ;;  %v15758_v36 = vld [vmem:[#allocation6 + $0x600] sm:$0xff]  }
 0x3bf   : > { %4481 = vst [vmem:[#allocation2 + $0x28] sm:$0xf] %v4465_v17  ;;  %v4413_v57 = vmul.f32 %v17123_v41, %v4363_v15  ;;  %v4436_v62 = vadd.f32 %v17126_v60, %v4412_v44  ;;  %v15763_v44 = vld [vmem:[#allocation6 + $0x648] sm:$0xff]  }
 0x3c0   : > { %13387 = vst [vmem:[#allocation2 + $0x20] sm:$0xff] %v13326_v23   ;;  %v4434_v29 = vadd.f32 %v17126_v60, %v4410_v38  ;;  %v4411_v39 = vmul.f32 %v17123_v41, %v4355_v55  ;;  %v15764_v55 = vld [vmem:[#allocation6 + $0x608] sm:$0xff]  }
 0x3c1   : > { %v4437_v3 = vadd.f32 %v17126_v60, %v4413_v57  ;;  %v4452_v30 = vmax.f32 %v4436_v62, 0.0 }
 0x3c2   : > { %v4450_v27 = vmax.f32 %v4434_v29, 0.0  ;;  %v4435_v19 = vadd.f32 %v17126_v60, %v4411_v39  ;;  %v14916_v54 = vpop.f32.mrb[136].mxu1 }
 0x3c3   : > { %v4453_v61 = vmax.f32 %v4437_v3, 0.0  ;;  %v4376_v18 = vadd.f32 %v14916_v54, %v17117_v34  ;;  %v4367_v13 = vpop.f32.mrb[137].mxu1  ;;  %v15766_v54 = vld [vmem:[#allocation6 + $0x650] sm:$0xff]  }
 0x3c4   : > { %v4466_v49 = vpack.c.bf16 %v4450_v27, %v4450_v27  ;;  %v4451_v42 = vmax.f32 %v4435_v19, 0.0  ;;  %v4368_v22 = vadd.f32 %v4367_v13, %v17111_v59  ;;  %v14917_v53 = vpop.f32.mrb[138].mxu1 }
 0x3c5   : > { %v4469_v25 = vpack.c.bf16 %v4453_v61, %v4453_v61  ;;  %v4416_v48 = vmul.f32 %v17123_v41, %v4376_v18  ;;  %v4379_v33 = vadd.f32 %v14917_v53, %v17120_v20  ;;  %v4370_v26 = vpop.f32.mrb[139].mxu1  ;;  %v15729_v17 = vld [vmem:[#allocation2 + $0x18] sm:$0xff]  }
 0x3c6   : > { %4482 = vst [vmem:[#allocation2 + $0x34] sm:$0xf] %v4466_v49  ;;  %v13331_v15 = vpack.c.bf16 %v4452_v30, %v4451_v42  ;;  %v4414_v34 = vmul.f32 %v17123_v41, %v4368_v22  ;;  %v4371_v58 = vadd.f32 %v4370_v26, %v17114_v14  ;;  %v15733_v23 = vld [vmem:[#allocation2 + $0x18] sm:$0xff]   ;;  %5920 = vmatprep.mubr.bf16.mxu1 %v15729_v17  ;;  %v15768_v26 = vld [vmem:[#allocation6 + $0x610] sm:$0xff]  }
 0x3c7   : > { %4485 = vst [vmem:[#allocation2 + $0x40] sm:$0xf] %v4469_v25  ;;  %v4417_v59 = vmul.f32 %v17123_v41, %v4379_v33  ;;  %v15731_v38 = vld [vmem:[#allocation2 + $0x1c] sm:$0xff]   ;;  %v4440_v57 = vadd.f32 %v17126_v60, %v4416_v48  ;;  %5921 = vmatmul.mubr.bf16.vlgmr.msra.gmra.mrb[144].mxu1 %v15730_v4  ;;  %v15735_v14 = vld [vmem:[#allocation2 + $0x24] sm:$0xff]   ;;  %v15737_v4 = vld [vmem:[#allocation2 + $0x10] sm:$0xff]  }
 0x3c8   : > { %13388 = vst [vmem:[#allocation2 + $0x38] sm:$0xff] %v13331_v15   ;;  %v4438_v20 = vadd.f32 %v17126_v60, %v4414_v34  ;;  %v4415_v62 = vmul.f32 %v17123_v41, %v4371_v58  ;;  %v15732_v29 = vld [vmem:[#allocation2 + $0x20] sm:$0xff]   ;;  %5839 = vmatprep.mubr.bf16.mxu0 %v15731_v38  ;;  %14136 = vmatpush3.bf16.msra.mxu1 %v15758_v36  ;;  %v15773_v15 = vld [vmem:[#allocation6 + $0x658] sm:$0xff]  }
 0x3c9   : > { %v4441_v39 = vadd.f32 %v17126_v60, %v4417_v59  ;;  %5928 = vmatprep.mubr.bf16.mxu1 %v15732_v29  ;;  %5840 = vmatmul.mubr.bf16.gmra.mrb[152].mxu0 %v15733_v23  ;;  %v4456_v30 = vmax.f32 %v4440_v57, 0.0  ;;  %v15774_v58 = vld [vmem:[#allocation6 + $0x618] sm:$0xff]   ;;  %v15739_v38 = vld [vmem:[#allocation2 + $0x20] sm:$0xff]  }
 0x3ca   : > { %v4454_v3 = vmax.f32 %v4438_v20, 0.0  ;;  %v4439_v27 = vadd.f32 %v17126_v60, %v4415_v62  ;;  %v14920_v19 = vpop.f32.mrb[140].mxu1  ;;  %5847 = vmatprep.mubr.bf16.mxu0 %v15735_v14  ;;  %14137 = vmatprep.subr.bf16.mxu1 %v15763_v44  ;;  %v15776_v62 = vld [vmem:[#allocation6 + $0x660] sm:$0xff]  }
 0x3cb   : > { %v4457_v61 = vmax.f32 %v4441_v39, 0.0  ;;  %v4392_v18 = vadd.f32 %v14920_v19, %v4295_v35  ;;  %v4383_v13 = vpop.f32.mrb[141].mxu1  ;;  %v15778_v39 = vld [vmem:[#allocation6 + $0x620] sm:$0xff]   ;;  %v15782_v19 = vld [vmem:[#allocation6 + $0x668] sm:$0xff]  }
 0x3cc   : > { %v4470_v49 = vpack.c.bf16 %v4454_v3, %v4454_v3  ;;  %v4455_v42 = vmax.f32 %v4439_v27, 0.0  ;;  %v4384_v22 = vadd.f32 %v4383_v13, %v17129_v32  ;;  %v14921_v53 = vpop.f32.mrb[142].mxu1  ;;  %14138 = vmatpush3.bf16.msra.mxu1 %v15764_v55  ;;  %v15783_v13 = vld [vmem:[#allocation6 + $0x628] sm:$0xff]  }
 0x3cd   : > { %v4473_v36 = vpack.c.bf16 %v4457_v61, %v4457_v61  ;;  %v4420_v25 = vmul.f32 %v17123_v41, %v4392_v18  ;;  %v4395_v48 = vadd.f32 %v14921_v53, %v17149_v16  ;;  %v4386_v33 = vpop.f32.mrb[143].mxu1  ;;  %14139 = vmatprep.subr.bf16.mxu1 %v15766_v54  ;;  %v15738_v34 = vld [vmem:[#allocation2 + $0x30] sm:$0xff]   ;;  %v15743_v61 = vld [vmem:[#allocation2 + $0x20] sm:$0xff]   ;;  %v15749_v53 = vld [vmem:[#allocation2 + $0x28] sm:$0xff]  }
 0x3ce   : > { %4486 = vst [vmem:[#allocation2 + $0x4c] sm:$0xf] %v4470_v49  ;;  %v13336_v35 = vpack.c.bf16 %v4456_v30, %v4455_v42  ;;  %v4418_v17 = vmul.f32 %v17123_v41, %v4384_v22  ;;  %v4387_v44 = vadd.f32 %v4386_v33, %v17135_v45  ;;  %v15785_v49 = vld [vmem:[#allocation6 + $0x670] sm:$0xff]   ;;  %v15791_v22 = vld [vmem:[#allocation6 + $0x678] sm:$0xff]  }
 0x3cf   : > { %4489 = vst [vmem:[#allocation2 + $0x58] sm:$0xf] %v4473_v36  ;;  %v4421_v32 = vmul.f32 %v17123_v41, %v4395_v48  ;;  %v4444_v23 = vadd.f32 %v17126_v60, %v4420_v25  ;;  %5929 = vmatmul.mubr.bf16.gmra.mrb[148].mxu1 %v15737_v4  ;;  %v15741_v45 = vld [vmem:[#allocation2 + $0x34] sm:$0xff]   ;;  %v15747_v30 = vld [vmem:[#allocation2 + $0x3c] sm:$0xff]   ;;  %v15792_v36 = vld [vmem:[#allocation6 + $0x638] sm:$0xff]  }
 0x3d0   : > { %13389 = vst [vmem:[#allocation2 + $0x50] sm:$0xff] %v13336_v35   ;;  %v4442_v16 = vadd.f32 %v17126_v60, %v4418_v17  ;;  %v4419_v59 = vmul.f32 %v17123_v41, %v4387_v44  ;;  %5936 = vmatprep.mubr.bf16.mxu1 %v15738_v34  ;;  %14140 = vmatpush3.bf16.msra.mxu1 %v15768_v26  ;;  %v15744_v18 = vld [vmem:[#allocation2 + $0x38] sm:$0xff]   ;;  %v15786_v42 = vld [vmem:[#allocation6 + $0x630] sm:$0xff]  }
 0x3d1   : > { %v4445_v55 = vadd.f32 %v17126_v60, %v4421_v32  ;;  %5848 = vmatmul.mubr.bf16.gmra.mrb[156].mxu0 %v15739_v38  ;;  %14141 = vmatprep.subr.bf16.mxu1 %v15773_v15  ;;  %v4460_v14 = vmax.f32 %v4444_v23, 0.0  ;;  %v15751_v25 = vld [vmem:[#allocation2 + $0x38] sm:$0xff]   ;;  %v15765_v44 = vld [vmem:[#allocation2 + $0x40] sm:$0xff]   ;;  %v15781_v38 = vld [vmem:[#allocation2 + $0x28] sm:$0xff]  }
 0x3d2   : > { %v4458_v57 = vmax.f32 %v4442_v16, 0.0  ;;  %v4443_v20 = vadd.f32 %v17126_v60, %v4419_v59  ;;  %5855 = vmatprep.mubr.bf16.mxu0 %v15741_v45  ;;  %v15745_v60 = vld [vmem:[#allocation2 + $0x30] sm:$0xff]   ;;  %v15755_v33 = vld [vmem:[#allocation2 + $0x38] sm:$0xff]   ;;  %v15772_v34 = vld [vmem:[#allocation2 + $0x20] sm:$0xff]  }
 0x3d3   : > { %v4461_v29 = vmax.f32 %v4445_v55, 0.0  ;;  %v15779_v16 = vld [vmem:[#allocation2 + $0x1c] sm:$0xff]  }
 0x3d4   : > { %v4474_v3 = vpack.c.bf16 %v4458_v57, %v4458_v57  ;;  %v4459_v27 = vmax.f32 %v4443_v20, 0.0  ;;  %14142 = vmatpush3.bf16.msra.mxu1 %v15774_v58  ;;  %v15789_v59 = vld [vmem:[#allocation6 + $0x688] sm:$0xff]   ;;  %v15796_v55 = vld [vmem:[#allocation6 + $0x690] sm:$0xff]  }
 0x3d5   : > { %v4477_v41 = vpack.c.bf16 %v4461_v29, %v4461_v29  ;;  %14143 = vmatprep.subr.bf16.mxu1 %v15776_v62  ;;  %v15750_v4 = vld [vmem:[#allocation2 + $0x48] sm:$0xff]   ;;  %v15787_v57 = vld [vmem:[#allocation2 + $0x34] sm:$0xff]  }
 0x3d6   : > { %4490 = vst [vmem:[#allocation2 + $0x64] sm:$0xf] %v4474_v3  ;;  %v13341_v54 = vpack.c.bf16 %v4460_v14, %v4459_v27  ;;  %v15759_v35 = vld [vmem:[#allocation2 + $0x48] sm:$0xff]   ;;  %v15784_v45 = vld [vmem:[#allocation2 + $0x58] sm:$0xff]   ;;  %v15793_v14 = vld [vmem:[#allocation2 + $0x30] sm:$0xff]  }
 0x3d7   : > { %4493 = vst [vmem:[#allocation2 + $0x70] sm:$0xf] %v4477_v41  ;;  %5937 = vmatmul.mubr.bf16.gmra.mrb[152].mxu1 %v15743_v61  ;;  %v15753_v48 = vld [vmem:[#allocation2 + $0x4c] sm:$0xff]   ;;  %v15761_v17 = vld [vmem:[#allocation2 + $0x54] sm:$0xff]   ;;  %v15788_v20 = vld [vmem:[#allocation2 + $0x24] sm:$0xff]  }
 0x3d8   : > { %13390 = vst [vmem:[#allocation2 + $0x68] sm:$0xff] %v13341_v54   ;;  %5944 = vmatprep.mubr.bf16.mxu1 %v15744_v18  ;;  %14144 = vmatpush3.bf16.msra.mxu1 %v15778_v39  ;;  %v15757_v26 = vld [vmem:[#allocation2 + $0x50] sm:$0xff]   ;;  %v15790_v29 = vld [vmem:[#allocation2 + $0x38] sm:$0xff]   ;;  %v15797_v41 = vld [vmem:[#allocation2 + $0x40] sm:$0xff]  }
 0x3d9   : > { %5856 = vmatmul.mubr.bf16.gmra.mrb[160].mxu0 %v15745_v60  ;;  %14145 = vmatprep.subr.bf16.mxu1 %v15782_v19  ;;  %v15769_v32 = vld [vmem:[#allocation2 + $0x50] sm:$0xff]   ;;  %v15794_v3 = vld [vmem:[#allocation2 + $0x3c] sm:$0xff]  }
 0x3da   : > { %5863 = vmatprep.mubr.bf16.mxu0 %v15747_v30  ;;  %v15775_v58 = vld [vmem:[#allocation2 + $0x50] sm:$0xff]   ;;  %v15811_v27 = vld [vmem:[#allocation6 + $0x6a8] sm:$0xff]   ;;  %v15816_v19 = vld [vmem:[#allocation6 + $0x6b0] sm:$0xff]  }
 0x3db   : > { %v15801_v62 = vld [vmem:[#allocation6 + $0x698] sm:$0xff]   ;;  %v15806_v39 = vld [vmem:[#allocation6 + $0x6a0] sm:$0xff]   ;;  %v15800_v18 = vld [vmem:[#allocation2 + $0x3c] sm:$0xff]  }
 0x3dc   : > { %14146 = vmatpush3.bf16.msra.mxu1 %v15783_v13  ;;  %v15798_v54 = vld [vmem:[#allocation2 + $0x38] sm:$0xff]   ;;  %v15799_v61 = vld [vmem:[#allocation2 + $0x4c] sm:$0xff]  }
 0x3dd   : > { %14147 = vmatprep.subr.bf16.mxu1 %v15785_v49  ;;  %v15767_v15 = vld [vmem:[#allocation2 + $0x60] sm:$0xff]   ;;  %v15820_v13 = vld [vmem:[#allocation6 + $0x6b8] sm:$0xff]   ;;  %v15804_v49 = vld [vmem:[#allocation2 + $0x54] sm:$0xff]  }
 0x3de   : > { %v15802_v60 = vld [vmem:[#allocation2 + $0x50] sm:$0xff]   ;;  %v15803_v30 = vld [vmem:[#allocation2 + $0x48] sm:$0xff]  }
 0x3df   : > { %5945 = vmatmul.mubr.bf16.gmra.mrb[156].mxu1 %v15749_v53  ;;  %v15777_v23 = vld [vmem:[#allocation2 + $0x68] sm:$0xff]  }
 0x3e0   : > { %5952 = vmatprep.mubr.bf16.mxu1 %v15750_v4  ;;  %14148 = vmatpush3.bf16.msra.mxu1 %v15786_v42  ;;  %v13959_v42 = vpop.f32.mrb[144].mxu0  ;;  %v15807_v4 = vld [vmem:[#allocation2 + $0x58] sm:$0xff]  }
 0x3e1   : > { %5864 = vmatmul.mubr.bf16.gmra.mrb[164].mxu0 %v15751_v25  ;;  %14149 = vmatprep.subr.bf16.mxu1 %v15791_v22  ;;  %v15805_v22 = vld [vmem:[#allocation2 + $0x4c] sm:$0xff]   ;;  %v13960_v53 = vpop.f32.mrb[145].mxu0 }
 0x3e2   : > { %5871 = vmatprep.mubr.bf16.mxu0 %v15753_v48  ;;  %v13962_v25 = vpop.f32.mrb[146].mxu0 }
 0x3e3   : > { %v13963_v48 = vpop.f32.mrb[147].mxu0 }
 0x3e4   : > { %14150 = vmatpush3.bf16.msra.mxu1 %v15792_v36  ;;  %v17181_v36 = vadd.f32 %v13960_v53, %v13959_v42  ;;  %v15837_v42 = vld [vmem:[#allocation6 + $0x710] sm:$0xff]   ;;  %v15839_v53 = vld [vmem:[#allocation6 + $0x718] sm:$0xff]  }
 0x3e7   : > { %5953 = vmatmul.mubr.bf16.gmra.mrb[160].mxu1 %v15755_v33  ;;  %v17183_v33 = vadd.f32 %v13963_v48, %v13962_v25  ;;  %v15841_v25 = vld [vmem:[#allocation6 + $0x720] sm:$0xff]  }
 0x3e8   : > { %5960 = vmatprep.mubr.bf16.mxu1 %v15757_v26  ;;  %v15808_v26 = vld [vmem:[#allocation2 + $0x50] sm:$0xff]  }
 0x3e9   : > { %5872 = vmatmul.mubr.bf16.gmra.mrb[168].mxu0 %v15759_v35  ;;  %v15809_v35 = vld [vmem:[#allocation2 + $0x64] sm:$0xff]   ;;  %v15842_v48 = vld [vmem:[#allocation6 + $0x6e0] sm:$0xff]  }
 0x3ea   : > { %5879 = vmatprep.mubr.bf16.mxu0 %v15761_v17  ;;  %v13965_v17 = vpop.f32.mrb[148].mxu0 }
 0x3ef   : > { %5961 = vmatmul.mubr.bf16.gmra.mrb[164].mxu1 %v15765_v44  ;;  %v15810_v44 = vld [vmem:[#allocation2 + $0x54] sm:$0xff]  }
 0x3f0   : > { %5968 = vmatprep.mubr.bf16.mxu1 %v15767_v15  ;;  %v13966_v15 = vpop.f32.mrb[149].mxu0 }
 0x3f1   : > { %5880 = vmatmul.mubr.bf16.gmra.mrb[172].mxu0 %v15769_v32  ;;  %v15812_v32 = vld [vmem:[#allocation2 + $0x68] sm:$0xff]  }
 0x3f2   : > { %6017 = vmatprep.mubr.bf16.mxu0 %v15772_v34  ;;  %v17185_v34 = vadd.f32 %v13966_v15, %v13965_v17  ;;  %v15845_v17 = vld [vmem:[#allocation6 + $0x780] sm:$0xff]   ;;  %v15847_v15 = vld [vmem:[#allocation6 + $0x730] sm:$0xff]  }
 0x3f7   : > { %5969 = vmatmul.mubr.bf16.gmra.mrb[168].mxu1 %v15775_v58  ;;  %v13968_v58 = vpop.f32.mrb[150].mxu0 }
 0x3f8   : > { %5976 = vmatprep.mubr.bf16.mxu1 %v15777_v23  ;;  %v13969_v23 = vpop.f32.mrb[151].mxu0 }
 0x3f9   : > { %6018 = vmatmul.mubr.bf16.vlgmr.msra.gmra.mrb[176].mxu0 %v15779_v16  ;;  %v17187_v16 = vadd.f32 %v13969_v23, %v13968_v58  ;;  %v15849_v58 = vld [vmem:[#allocation6 + $0x788] sm:$0xff]  }
 0x3fa   : > { %6025 = vmatprep.mubr.bf16.mxu0 %v15781_v38  ;;  %14923 = vmatpush3.bf16.msra.mxu0 %v17078_v9  ;;  %v15795_v9 = vld [vmem:[#allocation2 + $0x34] sm:$0xff]   ;;  %v15814_v38 = vld [vmem:[#allocation2 + $0x6c] sm:$0xff]  }
 0x3fb   : > { %14924 = vmatprep.subr.bf16.mxu0 %v15789_v59  ;;  %v15850_v23 = vld [vmem:[#allocation6 + $0x748] sm:$0xff]  }
 0x3fe   : > { %14925 = vmatpush3.bf16.msra.mxu0 %v15789_v59  ;;  %v15813_v59 = vld [vmem:[#allocation2 + $0x60] sm:$0xff]  }
 0x3ff   : > { %5977 = vmatmul.mubr.bf16.gmra.mrb[172].mxu1 %v15784_v45  ;;  %14926 = vmatprep.subr.bf16.mxu0 %v15796_v55  ;;  %v15817_v45 = vld [vmem:[#allocation2 + $0x70] sm:$0xff]  }
 0x400   : > { %6114 = vmatprep.mubr.bf16.mxu1 %v15787_v57  ;;  %v15822_v57 = vld [vmem:[#allocation2 + $0x7c] sm:$0xff]  }
 0x401   : > { %6026 = vmatmul.mubr.bf16.gmra.mrb[180].mxu0 %v15788_v20  ;;  %v15818_v20 = vld [vmem:[#allocation2 + $0x68] sm:$0xff]  }
 0x402   : > { %6033 = vmatprep.mubr.bf16.mxu0 %v15790_v29  ;;  %14927 = vmatpush3.bf16.msra.mxu0 %v15796_v55  ;;  %v15815_v55 = vld [vmem:[#allocation2 + $0x64] sm:$0xff]   ;;  %v15821_v29 = vld [vmem:[#allocation2 + $0x38] sm:$0xff]  }
 0x403   : > { %14928 = vmatprep.subr.bf16.mxu0 %v15801_v62 }
 0x406   : > { %14929 = vmatpush3.bf16.msra.mxu0 %v15801_v62  ;;  %v15819_v62 = vld [vmem:[#allocation2 + $0x6c] sm:$0xff]  }
 0x407   : > { %6115 = vmatmul.mubr.bf16.vlgmr.msra.gmra.mrb[176].mxu1 %v15793_v14  ;;  %14930 = vmatprep.subr.bf16.mxu0 %v15806_v39  ;;  %v15826_v14 = vld [vmem:[#allocation2 + $0x84] sm:$0xff]  }
 0x408   : > { %6122 = vmatprep.mubr.bf16.mxu1 %v15794_v3  ;;  %v15824_v3 = vld [vmem:[#allocation2 + $0x40] sm:$0xff]  }
 0x409   : > { %6034 = vmatmul.mubr.bf16.gmra.mrb[184].mxu0 %v15795_v9  ;;  %v15825_v9 = vld [vmem:[#allocation2 + $0x50] sm:$0xff]  }
 0x40a   : > { %6041 = vmatprep.mubr.bf16.mxu0 %v15797_v41  ;;  %14931 = vmatpush3.bf16.msra.mxu0 %v15806_v39  ;;  %v15823_v39 = vld [vmem:[#allocation2 + $0x78] sm:$0xff]  }
 0x40b   : > { %14932 = vmatprep.subr.bf16.mxu0 %v15811_v27  ;;  %v15828_v41 = vld [vmem:[#allocation2 + $0x58] sm:$0xff]  }
 0x40e   : > { %14933 = vmatpush3.bf16.msra.mxu0 %v15811_v27  ;;  %v15827_v27 = vld [vmem:[#allocation2 + $0x80] sm:$0xff]  }
 0x40f   : > { %6123 = vmatmul.mubr.bf16.gmra.mrb[180].mxu1 %v15798_v54  ;;  %14934 = vmatprep.subr.bf16.mxu0 %v15816_v19  ;;  %v15831_v54 = vld [vmem:[#allocation2 + $0x80] sm:$0xff]  }
 0x410   : > { %6130 = vmatprep.mubr.bf16.mxu1 %v15799_v61  ;;  %v15830_v61 = vld [vmem:[#allocation2 + $0x70] sm:$0xff]  }
 0x411   : > { %6042 = vmatmul.mubr.bf16.gmra.mrb[188].mxu0 %v15800_v18  ;;  %v15832_v18 = vld [vmem:[#allocation2 + $0x88] sm:$0xff]  }
 0x412   : > { %6049 = vmatprep.mubr.bf16.mxu0 %v15802_v60  ;;  %14935 = vmatpush3.bf16.msra.mxu0 %v15816_v19  ;;  %v15829_v19 = vld [vmem:[#allocation2 + $0x68] sm:$0xff]   ;;  %v15834_v60 = vld [vmem:[#allocation6 + $0x6c0] sm:$0xff]  }
 0x413   : > { %14936 = vmatprep.subr.bf16.mxu0 %v15820_v13 }
 0x416   : > { %14937 = vmatpush3.bf16.msra.mxu0 %v15820_v13  ;;  %v15833_v13 = vld [vmem:[#allocation6 + $0x700] sm:$0xff]  }
 0x417   : > { %6131 = vmatmul.mubr.bf16.gmra.mrb[184].mxu1 %v15803_v30  ;;  %14215 = vmatprep.subr.bf16.mxu1 %v15833_v13  ;;  %v15835_v30 = vld [vmem:[#allocation6 + $0x708] sm:$0xff]  }
 0x418   : > { %6138 = vmatprep.mubr.bf16.mxu1 %v15804_v49  ;;  %14216 = vmatpush3.bf16.msra.mxu1 %v15834_v60  ;;  %v15836_v49 = vld [vmem:[#allocation6 + $0x6c8] sm:$0xff]  }
 0x419   : > { %6050 = vmatmul.mubr.bf16.gmra.mrb[192].mxu0 %v15805_v22  ;;  %14217 = vmatprep.subr.bf16.mxu1 %v15835_v30  ;;  %v15838_v22 = vld [vmem:[#allocation6 + $0x6d0] sm:$0xff]  }
 0x41a   : > { %6057 = vmatprep.mubr.bf16.mxu0 %v15807_v4  ;;  %v15840_v4 = vld [vmem:[#allocation6 + $0x6d8] sm:$0xff]   ;;  %14279 = vmatprep.subr.bf16.mxu0 %v15845_v17  ;;  %v15863_v17 = vld [vmem:[#allocation6 + $0x7a8] sm:$0xff]  }
 0x41c   : > { %14218 = vmatpush3.bf16.msra.mxu1 %v15836_v49 }
 0x41d   : > { %14219 = vmatprep.subr.bf16.mxu1 %v15837_v42  ;;  %v15858_v42 = vld [vmem:[#allocation2] sm:$0xff]  }
 0x41f   : > { %6139 = vmatmul.mubr.bf16.gmra.mrb[188].mxu1 %v15808_v26  ;;  %v15843_v26 = vld [vmem:[#allocation6 + $0x728] sm:$0xff]  }
 0x420   : > { %6146 = vmatprep.mubr.bf16.mxu1 %v15809_v35  ;;  %14220 = vmatpush3.bf16.msra.mxu1 %v15838_v22  ;;  %v15844_v35 = vld [vmem:[#allocation6 + $0x6e8] sm:$0xff]   ;;  %v15859_v22 = vld [vmem:[#allocation6 + $0x7a0] sm:$0xff]  }
 0x421   : > { %6058 = vmatmul.mubr.bf16.gmra.mrb[196].mxu0 %v15810_v44  ;;  %14221 = vmatprep.subr.bf16.mxu1 %v15839_v53  ;;  %v15846_v44 = vld [vmem:[#allocation6 + $0x740] sm:$0xff]  }
 0x422   : > { %6065 = vmatprep.mubr.bf16.mxu0 %v15812_v32  ;;  %v15848_v32 = vld [vmem:[#allocation6 + $0x6f0] sm:$0xff]  }
 0x424   : > { %14222 = vmatpush3.bf16.msra.mxu1 %v15840_v4  ;;  %v15860_v4 = vld [vmem:[#allocation6 + $0x760] sm:$0xff]  }
 0x425   : > { %14223 = vmatprep.subr.bf16.mxu1 %v15841_v25 }
 0x427   : > { %6147 = vmatmul.mubr.bf16.gmra.mrb[192].mxu1 %v15813_v59 }
 0x428   : > { %6154 = vmatprep.mubr.bf16.mxu1 %v15814_v38  ;;  %14224 = vmatpush3.bf16.msra.mxu1 %v15842_v48  ;;  %v15851_v38 = vld [vmem:[#allocation6 + $0x790] sm:$0xff]  }
 0x429   : > { %6066 = vmatmul.mubr.bf16.gmra.mrb[200].mxu0 %v15815_v55  ;;  %14225 = vmatprep.subr.bf16.mxu1 %v15843_v26  ;;  %v15861_v26 = vld [vmem:[#allocation6 + $0x800] sm:$0xff]  }
 0x42a   : > { %6073 = vmatprep.mubr.bf16.mxu0 %v15817_v45  ;;  %v15852_v45 = vld [vmem:[#allocation6 + $0x750] sm:$0xff]  }
 0x42c   : > { %14226 = vmatpush3.bf16.msra.mxu1 %v15844_v35  ;;  %v15862_v35 = vld [vmem:[#allocation6 + $0x7c0] sm:$0xff]  }
 0x42d   : > { %14227 = vmatprep.subr.bf16.mxu1 %v15847_v15 }
 0x42f   : > { %6155 = vmatmul.mubr.bf16.gmra.mrb[196].mxu1 %v15818_v20 }
 0x430   : > { %6162 = vmatprep.mubr.bf16.mxu1 %v15822_v57  ;;  %14228 = vmatpush3.bf16.msra.mxu1 %v15848_v32  ;;  %v15865_v32 = vld [vmem:[#allocation2 + $0xc] sm:$0xff]  }
 0x431   : > { %6074 = vmatmul.mubr.bf16.gmra.mrb[204].mxu0 %v15819_v62 }
 0x432   : > { %14938 = vmatprep.mubr.bf16.mxu0 %v15821_v29  ;;  %v15853_v29 = vld [vmem:[#allocation6 + $0x738] sm:$0xff]  }
 0x433   : > { %14229 = vmatprep.subr.bf16.mxu1 %v15853_v29  ;;  %v15867_v29 = vld [vmem:[#allocation6 + $0x7b0] sm:$0xff]  }
 0x437   : > { %6163 = vmatmul.mubr.bf16.gmra.mrb[200].mxu1 %v15823_v39  ;;  %v15854_v39 = vld [vmem:[#allocation6 + $0x6f8] sm:$0xff]  }
 0x438   : > { %6170 = vmatprep.mubr.bf16.mxu1 %v15826_v14  ;;  %v15855_v14 = vld [vmem:[#allocation6 + $0x798] sm:$0xff]   ;;  %14230 = vmatpush3.bf16.msra.mxu1 %v15854_v39 }
 0x439   : > { %14939 = vmatmul.mubr.bf16.vlgmr.msra.gmra.mrb[208].mxu0 %v15824_v3  ;;  %14343 = vmatprep.subr.bf16.mxu1 %v15861_v26 }
 0x43a   : > { %14942 = vmatprep.mubr.bf16.mxu0 %v15825_v9  ;;  %14280 = vmatpush3.bf16.msra.mxu0 %v15846_v44 }
 0x43b   : > { %14281 = vmatprep.subr.bf16.mxu0 %v15849_v58 }
 0x43e   : > { %14282 = vmatpush3.bf16.msra.mxu0 %v15850_v23 }
 0x43f   : > { %6171 = vmatmul.mubr.bf16.gmra.mrb[204].mxu1 %v15827_v27  ;;  %14283 = vmatprep.subr.bf16.mxu0 %v15851_v38  ;;  %v15856_v27 = vld [vmem:[#allocation6 + $0x758] sm:$0xff]  }
 0x441   : > { %14943 = vmatmul.mubr.bf16.gmra.mrb[212].mxu0 %v15828_v41  ;;  %v15857_v41 = vld [vmem:[#allocation2 + $0x4] sm:$0xff]  }
 0x442   : > { %14946 = vmatprep.mubr.bf16.mxu0 %v15829_v19  ;;  %14284 = vmatpush3.bf16.msra.mxu0 %v15852_v45 }
 0x443   : > { %14285 = vmatprep.subr.bf16.mxu0 %v15855_v14  ;;  %7717 = vmatprep.mubr.bf16.mxu1 %v15857_v41  ;;  %v15868_v14 = vld [vmem:[#allocation6 + $0x770] sm:$0xff]   ;;  %v15870_v41 = vld [vmem:[#allocation6 + $0x7c8] sm:$0xff]  }
 0x446   : > { %14286 = vmatpush3.bf16.msra.mxu0 %v15856_v27 }
 0x447   : > { %7718 = vmatmul.mubr.bf16.vlgmr.msra.gmra.mrb[208].mxu1 %v15858_v42  ;;  %14287 = vmatprep.subr.bf16.mxu0 %v15859_v22 }
 0x448   : > { %14344 = vmatpush3.bf16.msra.mxu1 %v15862_v35  ;;  %7725 = vmatprep.mubr.bf16.mxu1 %v15865_v32 }
 0x449   : > { %14947 = vmatmul.mubr.bf16.gmra.mrb[216].mxu0 %v15830_v61 }
 0x44a   : > { %14950 = vmatprep.mubr.bf16.mxu0 %v15831_v54  ;;  %14288 = vmatpush3.bf16.msra.mxu0 %v15860_v4 }
 0x44b   : > { %14289 = vmatprep.subr.bf16.mxu0 %v15863_v17 }
 0x451   : > { %14951 = vmatmul.mubr.bf16.gmra.mrb[220].mxu0 %v15832_v18 }
 0x49a   : > { %v14023_v59 = vpop.f32.mrb[144].mxu1 }
 0x49b   : > { %v14024_v55 = vpop.f32.mrb[145].mxu1 }
 0x49c   : > { %v14025_v57 = vadd.f32 %v14024_v55, %v14023_v59  ;;  %v13971_v20 = vpop.f32.mrb[152].mxu0  ;;  %v14026_v62 = vpop.f32.mrb[146].mxu1 }
 0x49d   : > { %v13972_v3 = vpop.f32.mrb[153].mxu0  ;;  %v14027_v9 = vpop.f32.mrb[147].mxu1 }
 0x49e   : > { %v17190_v19 = vadd.f32 %v14025_v57, %v17181_v36  ;;  %v13973_v54 = vadd.f32 %v13972_v3, %v13971_v20  ;;  %v14028_v61 = vadd.f32 %v14027_v9, %v14026_v62  ;;  %v13974_v18 = vpop.f32.mrb[154].mxu0  ;;  %v15866_v62 = vld [vmem:[#allocation2 + $0x8] sm:$0xff]  }
 0x49f   : > { %v13975_v13 = vpop.f32.mrb[155].mxu0  ;;  %7726 = vmatmul.mubr.bf16.gmra.mrb[212].mxu1 %v15866_v62 }
 0x4a0   : > { %v17193_v60 = vadd.f32 %v14028_v61, %v17183_v33  ;;  %v13976_v30 = vadd.f32 %v13975_v13, %v13974_v18  ;;  %v15864_v33 = vld [vmem:[#allocation6 + $0x768] sm:$0xff]   ;;  %v15871_v61 = vld [vmem:[#allocation6 + $0x7b8] sm:$0xff]  }
 0x4a1   : > { %14290 = vmatpush3.bf16.msra.mxu0 %v15864_v33  ;;  %v15880_v33 = vld [vmem:[#allocation6 + $0x7d0] sm:$0xff]  }
 0x4a2   : > { %v14029_v49 = vpop.f32.mrb[148].mxu1  ;;  %14291 = vmatprep.subr.bf16.mxu0 %v15867_v29 }
 0x4a3   : > { %v14030_v53 = vpop.f32.mrb[149].mxu1 }
 0x4a4   : > { %v14031_v36 = vadd.f32 %v14030_v53, %v14029_v49  ;;  %v13977_v25 = vpop.f32.mrb[156].mxu0  ;;  %v14032_v48 = vpop.f32.mrb[150].mxu1  ;;  %v15872_v49 = vld [vmem:[#allocation6 + $0x778] sm:$0xff]  }
 0x4a5   : > { %v13978_v44 = vpop.f32.mrb[157].mxu0  ;;  %v14033_v15 = vpop.f32.mrb[151].mxu1  ;;  %14292 = vmatpush3.bf16.msra.mxu0 %v15868_v14 }
 0x4a6   : > { %v13979_v58 = vadd.f32 %v13978_v44, %v13977_v25  ;;  %v14034_v23 = vadd.f32 %v14033_v15, %v14032_v48  ;;  %v13980_v59 = vpop.f32.mrb[158].mxu0  ;;  %v17196_v38 = vadd.f32 %v14031_v36, %v17185_v34  ;;  %v15869_v34 = vld [vmem:[#allocation6 + $0x808] sm:$0xff]   ;;  %14293 = vmatprep.subr.bf16.mxu0 %v15871_v61  ;;  %v15878_v15 = vld [vmem:[#allocation6 + $0x810] sm:$0xff]  }
 0x4a7   : > { %v13981_v55 = vpop.f32.mrb[159].mxu0  ;;  %14345 = vmatprep.subr.bf16.mxu1 %v15869_v34  ;;  %v15892_v34 = vld [vmem:[#allocation6 + $0x7e0] sm:$0xff]  }
 0x4a8   : > { %v13982_v45 = vadd.f32 %v13981_v55, %v13980_v59  ;;  %v17199_v57 = vadd.f32 %v14034_v23, %v17187_v16  ;;  %14346 = vmatpush3.bf16.msra.mxu1 %v15870_v41  ;;  %v15884_v59 = vld [vmem:[#allocation6 + $0x818] sm:$0xff]  }
 0x4a9   : > { %14294 = vmatpush3.bf16.msra.mxu0 %v15872_v49  ;;  %14347 = vmatprep.subr.bf16.mxu1 %v15878_v15 }
 0x4aa   : > { %v14035_v20 = vpop.f32.mrb[152].mxu1 }
 0x4ab   : > { %v14036_v39 = vpop.f32.mrb[153].mxu1 }
 0x4ac   : > { %v14037_v3 = vadd.f32 %v14036_v39, %v14035_v20  ;;  %v13983_v9 = vpop.f32.mrb[160].mxu0  ;;  %v14038_v27 = vpop.f32.mrb[154].mxu1  ;;  %14348 = vmatpush3.bf16.msra.mxu1 %v15880_v33 }
 0x4ad   : > { %v13984_v18 = vpop.f32.mrb[161].mxu0  ;;  %v14039_v13 = vpop.f32.mrb[155].mxu1  ;;  %14349 = vmatprep.subr.bf16.mxu1 %v15884_v59  ;;  %v15900_v59 = vld [vmem:[#allocation6 + $0x880] sm:$0xff]  }
 0x4ae   : > { %v13985_v16 = vadd.f32 %v13984_v18, %v13983_v9  ;;  %v14040_v42 = vadd.f32 %v14039_v13, %v14038_v27  ;;  %v13986_v22 = vpop.f32.mrb[162].mxu0  ;;  %v17201_v53 = vadd.f32 %v14037_v3, %v13973_v54  ;;  %v15890_v3 = vld [vmem:[#allocation6 + $0x820] sm:$0xff]   ;;  %14407 = vmatprep.subr.bf16.mxu0 %v15900_v59 }
 0x4af   : > { %v13987_v4 = vpop.f32.mrb[163].mxu0 }
 0x4b0   : > { %v13988_v36 = vadd.f32 %v13987_v4, %v13986_v22  ;;  %v17203_v25 = vadd.f32 %v14040_v42, %v13976_v30  ;;  %v15886_v30 = vld [vmem:[#allocation6 + $0x7d8] sm:$0xff]  }
 0x4b1   : > { %14350 = vmatpush3.bf16.msra.mxu1 %v15886_v30 }
 0x4b2   : > { %v14041_v48 = vpop.f32.mrb[156].mxu1  ;;  %14351 = vmatprep.subr.bf16.mxu1 %v15890_v3 }
 0x4b3   : > { %v14042_v26 = vpop.f32.mrb[157].mxu1 }
 0x4b4   : > { %v14043_v35 = vadd.f32 %v14042_v26, %v14041_v48  ;;  %v13989_v17 = vpop.f32.mrb[164].mxu0  ;;  %v14044_v44 = vpop.f32.mrb[158].mxu1  ;;  %v15896_v48 = vld [vmem:[#allocation6 + $0x828] sm:$0xff]  }
 0x4b5   : > { %v13990_v32 = vpop.f32.mrb[165].mxu0  ;;  %v14045_v23 = vpop.f32.mrb[159].mxu1  ;;  %14352 = vmatpush3.bf16.msra.mxu1 %v15892_v34  ;;  %v15898_v26 = vld [vmem:[#allocation6 + $0x7e8] sm:$0xff]  }
 0x4b6   : > { %v13991_v54 = vadd.f32 %v13990_v32, %v13989_v17  ;;  %v14046_v55 = vadd.f32 %v14045_v23, %v14044_v44  ;;  %v13992_v20 = vpop.f32.mrb[166].mxu0  ;;  %v17205_v62 = vadd.f32 %v14043_v35, %v13979_v58  ;;  %14353 = vmatprep.subr.bf16.mxu1 %v15896_v48 }
 0x4b7   : > { %v13993_v29 = vpop.f32.mrb[167].mxu0 }
 0x4b8   : > { %v13994_v39 = vadd.f32 %v13993_v29, %v13992_v20  ;;  %v17207_v14 = vadd.f32 %v14046_v55, %v13982_v45 }
 0x4b9   : > { %14354 = vmatpush3.bf16.msra.mxu1 %v15898_v26 }
 0x4ba   : > { %v14047_v9 = vpop.f32.mrb[160].mxu1 }
 0x4bb   : > { %v14048_v27 = vpop.f32.mrb[161].mxu1 }
 0x4bc   : > { %v14049_v41 = vadd.f32 %v14048_v27, %v14047_v9  ;;  %v13995_v61 = vpop.f32.mrb[168].mxu0  ;;  %v14050_v18 = vpop.f32.mrb[162].mxu1  ;;  %v15904_v9 = vld [vmem:[#allocation6 + $0x830] sm:$0xff]  }
 0x4bd   : > { %v13996_v13 = vpop.f32.mrb[169].mxu0  ;;  %v14051_v58 = vpop.f32.mrb[163].mxu1  ;;  %14355 = vmatprep.subr.bf16.mxu1 %v15904_v9 }
 0x4be   : > { %v13997_v49 = vadd.f32 %v13996_v13, %v13995_v61  ;;  %v14052_v42 = vadd.f32 %v14051_v58, %v14050_v18  ;;  %v13998_v22 = vpop.f32.mrb[170].mxu0  ;;  %v17209_v4 = vadd.f32 %v14049_v41, %v13985_v16 }
 0x4bf   : > { %v13999_v45 = vpop.f32.mrb[171].mxu0 }
 0x4c0   : > { %v14000_v35 = vadd.f32 %v13999_v45, %v13998_v22  ;;  %v17211_v17 = vadd.f32 %v14052_v42, %v13988_v36  ;;  %v15906_v36 = vld [vmem:[#allocation6 + $0x7f0] sm:$0xff]  }
 0x4c1   : > { %14356 = vmatpush3.bf16.msra.mxu1 %v15906_v36 }
 0x4c2   : > { %v14053_v44 = vpop.f32.mrb[164].mxu1 }
 0x4c3   : > { %v14054_v15 = vpop.f32.mrb[165].mxu1 }
 0x4c4   : > { %v14055_v33 = vadd.f32 %v14054_v15, %v14053_v44  ;;  %v14001_v32 = vpop.f32.mrb[172].mxu0  ;;  %v14056_v23 = vpop.f32.mrb[166].mxu1  ;;  %v15914_v15 = vld [vmem:[#allocation6 + $0x838] sm:$0xff]  }
 0x4c5   : > { %v14002_v55 = vpop.f32.mrb[173].mxu0  ;;  %v14057_v20 = vpop.f32.mrb[167].mxu1  ;;  %14357 = vmatprep.subr.bf16.mxu1 %v15914_v15 }
 0x4c6   : > { %v14003_v29 = vadd.f32 %v14002_v55, %v14001_v32  ;;  %v14058_v16 = vadd.f32 %v14057_v20, %v14056_v23  ;;  %v14004_v30 = vpop.f32.mrb[174].mxu0  ;;  %v17213_v3 = vadd.f32 %v14055_v33, %v13991_v54  ;;  %v15915_v33 = vld [vmem:[#allocation6 + $0x7f8] sm:$0xff]  }
 0x4c7   : > { %v14005_v27 = vpop.f32.mrb[175].mxu0  ;;  %14358 = vmatpush3.bf16.msra.mxu1 %v15915_v33 }
 0x4c8   : > { %v14006_v34 = vadd.f32 %v14005_v27, %v14004_v30  ;;  %v17215_v41 = vadd.f32 %v14058_v16, %v13994_v39 }
 0x4ca   : > { %v14059_v61 = vpop.f32.mrb[168].mxu1 }
 0x4cb   : > { %v14060_v18 = vpop.f32.mrb[169].mxu1 }
 0x4cc   : > { %v14061_v13 = vadd.f32 %v14060_v18, %v14059_v61  ;;  %v14062_v58 = vpop.f32.mrb[170].mxu1  ;;  %v14087_v42 = vpop.f32.mrb[176].mxu0 }
 0x4cd   : > { %v14063_v22 = vpop.f32.mrb[171].mxu1  ;;  %v14088_v48 = vpop.f32.mrb[177].mxu0 }
 0x4ce   : > { %v14064_v45 = vadd.f32 %v14063_v22, %v14062_v58  ;;  %v14089_v26 = vadd.f32 %v14088_v48, %v14087_v42  ;;  %v14090_v54 = vpop.f32.mrb[178].mxu0  ;;  %v17217_v44 = vadd.f32 %v14061_v13, %v13997_v49 }
 0x4cf   : > { %v14091_v32 = vpop.f32.mrb[179].mxu0 }
 0x4d0   : > { %v14092_v23 = vadd.f32 %v14091_v32, %v14090_v54  ;;  %v17219_v39 = vadd.f32 %v14064_v45, %v14000_v35  ;;  %v6020_v59 = vadd.f32 %v14089_v26, %v17190_v19  ;;  %v17225_v35 = vld [vmem:[#allocation6 + $0x8c0] sm:$0xff]  }
 0x4d1   : > { %14954 = vmatprep.subr.bf16.mxu1 %v17225_v35 }
 0x4d2   : > { %v14065_v55 = vpop.f32.mrb[172].mxu1  ;;  %v6023_v20 = vadd.f32 %v14092_v23, %v17193_v60 }
 0x4d3   : > { %v14066_v16 = vpop.f32.mrb[173].mxu1 }
 0x4d4   : > { %v14067_v30 = vadd.f32 %v14066_v16, %v14065_v55  ;;  %v14068_v9 = vpop.f32.mrb[174].mxu1  ;;  %v14093_v27 = vpop.f32.mrb[180].mxu0 }
 0x4d5   : > { %v14069_v36 = vpop.f32.mrb[175].mxu1  ;;  %v14094_v49 = vpop.f32.mrb[181].mxu0 }
 0x4d6   : > { %v14070_v61 = vadd.f32 %v14069_v36, %v14068_v9  ;;  %v14095_v18 = vadd.f32 %v14094_v49, %v14093_v27  ;;  %v14096_v13 = vpop.f32.mrb[182].mxu0  ;;  %v17223_v58 = vadd.f32 %v14067_v30, %v14003_v29 }
 0x4d7   : > { %v14097_v42 = vpop.f32.mrb[183].mxu0 }
 0x4d8   : > { %v6028_v19 = vadd.f32 %v14095_v18, %v17196_v38  ;;  %v14098_v22 = vadd.f32 %v14097_v42, %v14096_v13  ;;  %v17228_v48 = vadd.f32 %v14070_v61, %v14006_v34 }
 0x4da   : > { %v6031_v60 = vadd.f32 %v14098_v22, %v17199_v57  ;;  %v14151_v45 = vpop.f32.mrb[176].mxu1 }
 0x4db   : > { %v14152_v26 = vpop.f32.mrb[177].mxu1 }
 0x4dc   : > { %v14153_v54 = vadd.f32 %v14152_v26, %v14151_v45  ;;  %v14099_v15 = vpop.f32.mrb[184].mxu0  ;;  %v14154_v33 = vpop.f32.mrb[178].mxu1 }
 0x4dd   : > { %v14100_v32 = vpop.f32.mrb[185].mxu0  ;;  %v14155_v29 = vpop.f32.mrb[179].mxu1 }
 0x4de   : > { %v14101_v23 = vadd.f32 %v14100_v32, %v14099_v15  ;;  %v14156_v55 = vadd.f32 %v14155_v29, %v14154_v33  ;;  %v14102_v16 = vpop.f32.mrb[186].mxu0  ;;  %v17232_v30 = vadd.f32 %v14153_v54, %v6020_v59 }
 0x4df   : > { %v14103_v38 = vpop.f32.mrb[187].mxu0 }
 0x4e0   : > { %v6036_v34 = vadd.f32 %v14101_v23, %v17201_v53  ;;  %v14104_v9 = vadd.f32 %v14103_v38, %v14102_v16  ;;  %v17235_v27 = vadd.f32 %v14156_v55, %v6023_v20 }
 0x4e2   : > { %v6039_v57 = vadd.f32 %v14104_v9, %v17203_v25  ;;  %v14157_v36 = vpop.f32.mrb[180].mxu1 }
 0x4e3   : > { %v14158_v49 = vpop.f32.mrb[181].mxu1 }
 0x4e4   : > { %v14159_v61 = vadd.f32 %v14158_v49, %v14157_v36  ;;  %v14105_v18 = vpop.f32.mrb[188].mxu0  ;;  %v14160_v13 = vpop.f32.mrb[182].mxu1 }
 0x4e5   : > { %v14106_v42 = vpop.f32.mrb[189].mxu0  ;;  %v14161_v22 = vpop.f32.mrb[183].mxu1 }
 0x4e6   : > { %v14107_v45 = vadd.f32 %v14106_v42, %v14105_v18  ;;  %v14162_v26 = vadd.f32 %v14161_v22, %v14160_v13  ;;  %v14108_v15 = vpop.f32.mrb[190].mxu0  ;;  %v17238_v59 = vadd.f32 %v14159_v61, %v6028_v19 }
 0x4e7   : > { %v14109_v54 = vpop.f32.mrb[191].mxu0 }
 0x4e8   : > { %v6044_v53 = vadd.f32 %v14107_v45, %v17205_v62  ;;  %v14110_v33 = vadd.f32 %v14109_v54, %v14108_v15  ;;  %v17241_v20 = vadd.f32 %v14162_v26, %v6031_v60 }
 0x4ea   : > { %v6047_v25 = vadd.f32 %v14110_v33, %v17207_v14  ;;  %v14163_v32 = vpop.f32.mrb[184].mxu1 }
 0x4eb   : > { %v14164_v29 = vpop.f32.mrb[185].mxu1 }
 0x4ec   : > { %v14165_v23 = vadd.f32 %v14164_v29, %v14163_v32  ;;  %v14111_v55 = vpop.f32.mrb[192].mxu0  ;;  %v14166_v16 = vpop.f32.mrb[186].mxu1 }
 0x4ed   : > { %v14112_v38 = vpop.f32.mrb[193].mxu0  ;;  %v14167_v9 = vpop.f32.mrb[187].mxu1 }
 0x4ee   : > { %v14113_v36 = vadd.f32 %v14112_v38, %v14111_v55  ;;  %v14168_v49 = vadd.f32 %v14167_v9, %v14166_v16  ;;  %v14114_v18 = vpop.f32.mrb[194].mxu0  ;;  %v17244_v19 = vadd.f32 %v14165_v23, %v6036_v34 }
 0x4ef   : > { %v14115_v61 = vpop.f32.mrb[195].mxu0 }
 0x4f0   : > { %v6052_v62 = vadd.f32 %v14113_v36, %v17209_v4  ;;  %v14116_v13 = vadd.f32 %v14115_v61, %v14114_v18  ;;  %v17247_v60 = vadd.f32 %v14168_v49, %v6039_v57 }
 0x4f2   : > { %v6055_v14 = vadd.f32 %v14116_v13, %v17211_v17  ;;  %v14169_v42 = vpop.f32.mrb[188].mxu1 }
 0x4f3   : > { %v14170_v22 = vpop.f32.mrb[189].mxu1 }
 0x4f4   : > { %v14171_v45 = vadd.f32 %v14170_v22, %v14169_v42  ;;  %v14117_v26 = vpop.f32.mrb[196].mxu0  ;;  %v14172_v15 = vpop.f32.mrb[190].mxu1 }
 0x4f5   : > { %v14118_v54 = vpop.f32.mrb[197].mxu0  ;;  %v14173_v33 = vpop.f32.mrb[191].mxu1 }
 0x4f6   : > { %v14119_v32 = vadd.f32 %v14118_v54, %v14117_v26  ;;  %v14174_v29 = vadd.f32 %v14173_v33, %v14172_v15  ;;  %v14120_v55 = vpop.f32.mrb[198].mxu0  ;;  %v17250_v34 = vadd.f32 %v14171_v45, %v6044_v53 }
 0x4f7   : > { %v14121_v23 = vpop.f32.mrb[199].mxu0 }
 0x4f8   : > { %v6060_v4 = vadd.f32 %v14119_v32, %v17213_v3  ;;  %v14122_v16 = vadd.f32 %v14121_v23, %v14120_v55  ;;  %v17253_v57 = vadd.f32 %v14174_v29, %v6047_v25 }
 0x4fa   : > { %v6063_v17 = vadd.f32 %v14122_v16, %v17215_v41  ;;  %v14175_v38 = vpop.f32.mrb[192].mxu1 }
 0x4fb   : > { %v14176_v9 = vpop.f32.mrb[193].mxu1 }
 0x4fc   : > { %v14177_v36 = vadd.f32 %v14176_v9, %v14175_v38  ;;  %v14123_v49 = vpop.f32.mrb[200].mxu0  ;;  %v14178_v18 = vpop.f32.mrb[194].mxu1 }
 0x4fd   : > { %v14124_v61 = vpop.f32.mrb[201].mxu0  ;;  %v14179_v13 = vpop.f32.mrb[195].mxu1 }
 0x4fe   : > { %v14125_v42 = vadd.f32 %v14124_v61, %v14123_v49  ;;  %v14180_v22 = vadd.f32 %v14179_v13, %v14178_v18  ;;  %v14126_v26 = vpop.f32.mrb[202].mxu0  ;;  %v17256_v53 = vadd.f32 %v14177_v36, %v6052_v62 }
 0x4ff   : > { %v14127_v45 = vpop.f32.mrb[203].mxu0 }
 0x500   : > { %v6068_v3 = vadd.f32 %v14125_v42, %v17217_v44  ;;  %v14128_v15 = vadd.f32 %v14127_v45, %v14126_v26  ;;  %v17259_v25 = vadd.f32 %v14180_v22, %v6055_v14  ;;  %v17268_v45 = vld [vmem:[#allocation9 + $0x2] ss:$0 sm:$0xff] }
 0x502   : > { %v6071_v41 = vadd.f32 %v14128_v15, %v17219_v39  ;;  %v14181_v54 = vpop.f32.mrb[196].mxu1 }
 0x503   : > { %v14182_v33 = vpop.f32.mrb[197].mxu1 }
 0x504   : > { %v14183_v32 = vadd.f32 %v14182_v33, %v14181_v54  ;;  %v14129_v29 = vpop.f32.mrb[204].mxu0  ;;  %v14184_v55 = vpop.f32.mrb[198].mxu1  ;;  %v17271_v33 = vld [vmem:[#allocation11 + $0x2] ss:$0 sm:$0xff] }
 0x505   : > { %v14130_v23 = vpop.f32.mrb[205].mxu0  ;;  %v14185_v16 = vpop.f32.mrb[199].mxu1 }
 0x506   : > { %v14131_v38 = vadd.f32 %v14130_v23, %v14129_v29  ;;  %v14186_v9 = vadd.f32 %v14185_v16, %v14184_v55  ;;  %v14132_v49 = vpop.f32.mrb[206].mxu0  ;;  %v17262_v62 = vadd.f32 %v14183_v32, %v6060_v4 }
 0x507   : > { %v14133_v36 = vpop.f32.mrb[207].mxu0 }
 0x508   : > { %v6076_v44 = vadd.f32 %v14131_v38, %v17223_v58  ;;  %v14134_v18 = vadd.f32 %v14133_v36, %v14132_v49  ;;  %v17265_v14 = vadd.f32 %v14186_v9, %v6063_v17 }
 0x50a   : > { %v6079_v39 = vadd.f32 %v14134_v18, %v17228_v48  ;;  %v14187_v61 = vpop.f32.mrb[200].mxu1 }
 0x50b   : > { %v14188_v13 = vpop.f32.mrb[201].mxu1 }
 0x50c   : > { %v14189_v42 = vadd.f32 %v14188_v13, %v14187_v61  ;;  %v14190_v22 = vpop.f32.mrb[202].mxu1  ;;  %v14940_v26 = vpop.f32.mrb[208].mxu0 }
 0x50d   : > { %v6222_v15 = vadd.f32 %v14940_v26, %v17238_v59  ;;  %v14191_v54 = vpop.f32.mrb[203].mxu1  ;;  %v6213_v4 = vpop.f32.mrb[209].mxu0 }
 0x50e   : > { %v14192_v32 = vadd.f32 %v14191_v54, %v14190_v22  ;;  %v6214_v58 = vadd.f32 %v6213_v4, %v17232_v30  ;;  %v14941_v17 = vpop.f32.mrb[210].mxu0  ;;  %v17274_v29 = vadd.f32 %v14189_v42, %v6068_v3 }
 0x50f   : > { %v6286_v48 = vmul.f32 %v17268_v45, %v6222_v15  ;;  %v6225_v55 = vadd.f32 %v14941_v17, %v17241_v20  ;;  %v6216_v23 = vpop.f32.mrb[211].mxu0 }
 0x510   : > { %v6284_v16 = vmul.f32 %v17268_v45, %v6214_v58  ;;  %v6217_v38 = vadd.f32 %v6216_v23, %v17235_v27  ;;  %v17280_v59 = vadd.f32 %v14192_v32, %v6071_v41 }
 0x511   : > { %v6310_v9 = vadd.f32 %v17271_v33, %v6286_v48  ;;  %v6287_v49 = vmul.f32 %v17268_v45, %v6225_v55 }
 0x512   : > { %v6308_v30 = vadd.f32 %v17271_v33, %v6284_v16  ;;  %v6285_v3 = vmul.f32 %v17268_v45, %v6217_v38  ;;  %v14193_v36 = vpop.f32.mrb[204].mxu1 }
 0x513   : > { %v17288_v18 = vadd.f32 %v6310_v9, %v2570_v51  ;;  %v6311_v20 = vadd.f32 %v17271_v33, %v6287_v49  ;;  %v14194_v61 = vpop.f32.mrb[205].mxu1 }
 0x514   : > { %v6324_v27 = vadd.f32 %v6308_v30, %v16929_v1  ;;  %v6309_v41 = vadd.f32 %v17271_v33, %v6285_v3  ;;  %v14195_v13 = vadd.f32 %v14194_v61, %v14193_v36  ;;  %v14196_v42 = vpop.f32.mrb[206].mxu1  ;;  %v14944_v22 = vpop.f32.mrb[212].mxu0 }
 0x515   : > { %v6342_v26 = vmax.f32 %v17288_v18, 0.0  ;;  %v6327_v15 = vadd.f32 %v6311_v20, %v16935_v40  ;;  %v6238_v54 = vadd.f32 %v14944_v22, %v17250_v34  ;;  %v14197_v4 = vpop.f32.mrb[207].mxu1  ;;  %v6229_v2 = vpop.f32.mrb[213].mxu0 }
 0x516   : > { %v17296_v51 = vmax.f32 %v6324_v27, 0.0  ;;  %v17300_v32 = vadd.f32 %v6309_v41, %v2569_v8  ;;  %v14198_v1 = vadd.f32 %v14197_v4, %v14196_v42  ;;  %v6230_v58 = vadd.f32 %v6229_v2, %v17244_v19  ;;  %v14945_v17 = vpop.f32.mrb[214].mxu0 }
 0x517   : > { %v17303_v48 = vmax.f32 %v6327_v15, 0.0  ;;  %v6290_v55 = vmul.f32 %v17268_v45, %v6238_v54  ;;  %v6241_v40 = vadd.f32 %v14945_v17, %v17253_v57  ;;  %v6232_v23 = vpop.f32.mrb[215].mxu0  ;;  %v6173_v34 = vadd.f32 %v14195_v13, %v6076_v44 }
 0x518   : > { %v6356_v16 = vpack.c.bf16 %v17296_v51, %v17296_v51  ;;  %v6341_v38 = vmax.f32 %v17300_v32, 0.0  ;;  %v6288_v5 = vmul.f32 %v17268_v45, %v6230_v58  ;;  %v6233_v8 = vadd.f32 %v6232_v23, %v17247_v60 }
 0x519   : > { %v6359_v19 = vpack.c.bf16 %v17303_v48, %v17303_v48  ;;  %v6314_v9 = vadd.f32 %v17271_v33, %v6290_v55  ;;  %v6291_v49 = vmul.f32 %v17268_v45, %v6241_v40  ;;  %v17316_v30 = vadd.f32 %v14198_v1, %v6079_v39  ;;  %v15902_v1 = vld [vmem:[#allocation6 + $0x840] sm:$0xff]   ;;  %v15907_v40 = vld [vmem:[#allocation6 + $0x888] sm:$0xff]  }
 0x51a   : > { %6372 = vst [vmem:[#allocation2 + $0x1c] sm:$0xf] %v6356_v16  ;;  %v13346_v57 = vpack.c.bf16 %v6342_v26, %v6341_v38  ;;  %v6312_v44 = vadd.f32 %v17271_v33, %v6288_v5  ;;  %v6289_v3 = vmul.f32 %v17268_v45, %v6233_v8 }
 0x51b   : > { %6375 = vst [vmem:[#allocation2 + $0x28] sm:$0xf] %v6359_v19  ;;  %v17326_v60 = vadd.f32 %v6314_v9, %v2574_v24  ;;  %v6315_v36 = vadd.f32 %v17271_v33, %v6291_v49  ;;  %v15908_v49 = vld [vmem:[#allocation6 + $0x848] sm:$0xff]  }
 0x51c   : > { %13391 = vst [vmem:[#allocation2 + $0x20] sm:$0xff] %v13346_v57   ;;  %v6328_v39 = vadd.f32 %v6312_v44, %v16960_v63  ;;  %v6313_v20 = vadd.f32 %v17271_v33, %v6289_v3  ;;  %v14948_v61 = vpop.f32.mrb[216].mxu0 }
 0x51d   : > { %v6331_v27 = vadd.f32 %v6315_v36, %v16965_v31  ;;  %v6254_v41 = vadd.f32 %v14948_v61, %v17262_v62  ;;  %v6245_v13 = vpop.f32.mrb[217].mxu0  ;;  %v6346_v15 = vmax.f32 %v17326_v60, 0.0 }
 0x51e   : > { %v17333_v42 = vmax.f32 %v6328_v39, 0.0  ;;  %v17337_v21 = vadd.f32 %v6313_v20, %v2573_v10  ;;  %v6246_v24 = vadd.f32 %v6245_v13, %v17256_v53  ;;  %v14949_v22 = vpop.f32.mrb[218].mxu0  ;;  %v15874_v53 = vld [vmem:[#allocation2 + $0x8] sm:$0xff]  }
 0x51f   : > { %v17341_v63 = vmax.f32 %v6331_v27, 0.0  ;;  %v6294_v54 = vmul.f32 %v17268_v45, %v6254_v41  ;;  %v6257_v31 = vadd.f32 %v14949_v22, %v17265_v14  ;;  %v6248_v4 = vpop.f32.mrb[219].mxu0 }
 0x520   : > { %v6360_v62 = vpack.c.bf16 %v17333_v42, %v17333_v42  ;;  %v6345_v2 = vmax.f32 %v17337_v21, 0.0  ;;  %v6292_v28 = vmul.f32 %v17268_v45, %v6246_v24  ;;  %v6249_v10 = vadd.f32 %v6248_v4, %v17259_v25  ;;  %v15881_v4 = vld [vmem:[#allocation2 + $0x10] sm:$0xff]  }
 0x521   : > { %v6363_v58 = vpack.c.bf16 %v17341_v63, %v17341_v63  ;;  %v6318_v17 = vadd.f32 %v17271_v33, %v6294_v54  ;;  %v6295_v55 = vmul.f32 %v17268_v45, %v6257_v31  ;;  %v15873_v14 = vld [vmem:[#allocation2 + $0x18] sm:$0xff]  }
 0x522   : > { %6376 = vst [vmem:[#allocation2 + $0x34] sm:$0xf] %v6360_v62  ;;  %v13351_v23 = vpack.c.bf16 %v6346_v15, %v6345_v2  ;;  %v6316_v16 = vadd.f32 %v17271_v33, %v6292_v28  ;;  %v6293_v25 = vmul.f32 %v17268_v45, %v6249_v10  ;;  %v15877_v5 = vld [vmem:[#allocation2 + $0x18] sm:$0xff]   ;;  %7814 = vmatprep.mubr.bf16.mxu0 %v15873_v14  ;;  %v15912_v10 = vld [vmem:[#allocation6 + $0x850] sm:$0xff]   ;;  %v15918_v14 = vld [vmem:[#allocation6 + $0x858] sm:$0xff]  }
 0x523   : > { %6379 = vst [vmem:[#allocation2 + $0x40] sm:$0xf] %v6363_v58  ;;  %v17362_v8 = vadd.f32 %v6318_v17, %v2578_v11  ;;  %v6319_v19 = vadd.f32 %v17271_v33, %v6295_v55  ;;  %v15875_v9 = vld [vmem:[#allocation2 + $0x1c] sm:$0xff]   ;;  %7815 = vmatmul.mubr.bf16.vlgmr.msra.gmra.mrb[224].mxu0 %v15874_v53  ;;  %v15879_v56 = vld [vmem:[#allocation2 + $0x24] sm:$0xff]  }
 0x524   : > { %13392 = vst [vmem:[#allocation2 + $0x38] sm:$0xff] %v13351_v23   ;;  %v6332_v57 = vadd.f32 %v6316_v16, %v16989_v0  ;;  %v6317_v44 = vadd.f32 %v17271_v33, %v6293_v25  ;;  %v14952_v3 = vpop.f32.mrb[220].mxu0  ;;  %v15876_v36 = vld [vmem:[#allocation2 + $0x20] sm:$0xff]   ;;  %7733 = vmatprep.mubr.bf16.mxu1 %v15875_v9  ;;  %14408 = vmatpush3.bf16.msra.mxu0 %v15902_v1  ;;  %v15917_v58 = vld [vmem:[#allocation6 + $0x898] sm:$0xff]  }
 0x525   : > { %v6335_v39 = vadd.f32 %v6319_v19, %v16994_v6  ;;  %v6270_v20 = vadd.f32 %v14952_v3, %v6173_v34  ;;  %v6261_v61 = vpop.f32.mrb[221].mxu0  ;;  %v15910_v11 = vld [vmem:[#allocation6 + $0x890] sm:$0xff]   ;;  %7822 = vmatprep.mubr.bf16.mxu0 %v15876_v36  ;;  %7734 = vmatmul.mubr.bf16.gmra.mrb[216].mxu1 %v15877_v5  ;;  %v6350_v24 = vmax.f32 %v17362_v8, 0.0  ;;  %v15927_v36 = vld [vmem:[#allocation6 + $0x868] sm:$0xff]  }
 0x526   : > { %v17368_v27 = vmax.f32 %v6332_v57, 0.0  ;;  %v17372_v41 = vadd.f32 %v6317_v44, %v2577_v52  ;;  %v6262_v0 = vadd.f32 %v6261_v61, %v17274_v29  ;;  %v14953_v13 = vpop.f32.mrb[222].mxu0  ;;  %7741 = vmatprep.mubr.bf16.mxu1 %v15879_v56  ;;  %14409 = vmatprep.subr.bf16.mxu0 %v15907_v40  ;;  %v15883_v25 = vld [vmem:[#allocation2 + $0x20] sm:$0xff]  }
 0x527   : > { %v17376_v6 = vmax.f32 %v6335_v39, 0.0  ;;  %v6298_v34 = vmul.f32 %v17268_v45, %v6270_v20  ;;  %v6273_v22 = vadd.f32 %v14953_v13, %v17316_v30  ;;  %v6264_v54 = vpop.f32.mrb[223].mxu0  ;;  %v15887_v44 = vld [vmem:[#allocation2 + $0x20] sm:$0xff]  }
 0x528   : > { %v6364_v37 = vpack.c.bf16 %v17368_v27, %v17368_v27  ;;  %v6349_v52 = vmax.f32 %v17372_v41, 0.0  ;;  %v6296_v29 = vmul.f32 %v17268_v45, %v6262_v0  ;;  %v6265_v31 = vadd.f32 %v6264_v54, %v17280_v59  ;;  %14410 = vmatpush3.bf16.msra.mxu0 %v15908_v49  ;;  %v15929_v61 = vld [vmem:[#allocation6 + $0x8b0] sm:$0xff]  }
 0x529   : > { %v6367_v62 = vpack.c.bf16 %v17376_v6, %v17376_v6  ;;  %v6322_v28 = vadd.f32 %v17271_v33, %v6298_v34  ;;  %v6299_v30 = vmul.f32 %v17268_v45, %v6273_v22  ;;  %14411 = vmatprep.subr.bf16.mxu0 %v15910_v11  ;;  %v15882_v55 = vld [vmem:[#allocation2 + $0x30] sm:$0xff]   ;;  %v15930_v56 = vld [vmem:[#allocation6 + $0x870] sm:$0xff]  }
 0x52a   : > { %6380 = vst [vmem:[#allocation2 + $0x4c] sm:$0xf] %v6364_v37  ;;  %v13356_v53 = vpack.c.bf16 %v6350_v24, %v6349_v52  ;;  %v6320_v1 = vadd.f32 %v17271_v33, %v6296_v29  ;;  %v6297_v59 = vmul.f32 %v17268_v45, %v6265_v31  ;;  %v15889_v39 = vld [vmem:[#allocation2 + $0x30] sm:$0xff]   ;;  %v15893_v0 = vld [vmem:[#allocation2 + $0x28] sm:$0xff]  }
 0x52b   : > { %6383 = vst [vmem:[#allocation2 + $0x58] sm:$0xf] %v6367_v62  ;;  %v6323_v17 = vadd.f32 %v17271_v33, %v6299_v30  ;;  %v17398_v40 = vadd.f32 %v6322_v28, %v2582_v46  ;;  %7823 = vmatmul.mubr.bf16.gmra.mrb[228].mxu0 %v15881_v4  ;;  %v15885_v5 = vld [vmem:[#allocation2 + $0x34] sm:$0xff]   ;;  %v15891_v20 = vld [vmem:[#allocation2 + $0x3c] sm:$0xff]   ;;  %v15935_v11 = vld [vmem:[#allocation6 + $0x8b8] sm:$0xff]  }
 0x52c   : > { %13393 = vst [vmem:[#allocation2 + $0x50] sm:$0xff] %v13356_v53   ;;  %v6336_v23 = vadd.f32 %v6320_v1, %v17019_v12  ;;  %v6321_v16 = vadd.f32 %v17271_v33, %v6297_v59  ;;  %7830 = vmatprep.mubr.bf16.mxu0 %v15882_v55  ;;  %14412 = vmatpush3.bf16.msra.mxu0 %v15912_v10  ;;  %v15922_v12 = vld [vmem:[#allocation6 + $0x860] sm:$0xff]   ;;  %v15936_v34 = vld [vmem:[#allocation6 + $0x878] sm:$0xff]   ;;  %v15909_v62 = vld [vmem:[#allocation2 + $0x40] sm:$0xff]  }
 0x52d   : > { %v6339_v45 = vadd.f32 %v6323_v17, %v17024_v47  ;;  %7742 = vmatmul.mubr.bf16.gmra.mrb[220].mxu1 %v15883_v25  ;;  %14413 = vmatprep.subr.bf16.mxu0 %v15917_v58  ;;  %v6354_v33 = vmax.f32 %v17398_v40, 0.0  ;;  %v15888_v3 = vld [vmem:[#allocation2 + $0x38] sm:$0xff]   ;;  %v15916_v10 = vld [vmem:[#allocation2 + $0x20] sm:$0xff]   ;;  %v15925_v17 = vld [vmem:[#allocation2 + $0x28] sm:$0xff]  }
 0x52e   : > { %v17403_v19 = vmax.f32 %v6336_v23, 0.0  ;;  %v17407_v9 = vadd.f32 %v6321_v16, %v2581_v50  ;;  %7749 = vmatprep.mubr.bf16.mxu1 %v15885_v5  ;;  %v15895_v22 = vld [vmem:[#allocation2 + $0x38] sm:$0xff]   ;;  %v15940_v55 = vld [vmem:[#allocation6 + $0x8d0] sm:$0xff]   ;;  %v15945_v25 = vld [vmem:[#allocation6 + $0x8d8] sm:$0xff]  }
 0x52f   : > { %v17409_v46 = vmax.f32 %v6339_v45, 0.0  ;;  %v15899_v37 = vld [vmem:[#allocation2 + $0x38] sm:$0xff]   ;;  %v15932_v16 = vld [vmem:[#allocation2 + $0x24] sm:$0xff]  }
 0x530   : > { %v6368_v47 = vpack.c.bf16 %v17403_v19, %v17403_v19  ;;  %v6353_v49 = vmax.f32 %v17407_v9, 0.0  ;;  %14414 = vmatpush3.bf16.msra.mxu0 %v15918_v14  ;;  %v15923_v59 = vld [vmem:[#allocation2 + $0x1c] sm:$0xff]   ;;  %v15931_v23 = vld [vmem:[#allocation2 + $0x34] sm:$0xff]  }
 0x531   : > { %v6371_v57 = vpack.c.bf16 %v17409_v46, %v17409_v46  ;;  %14415 = vmatprep.subr.bf16.mxu0 %v15920_v7  ;;  %v15894_v13 = vld [vmem:[#allocation2 + $0x48] sm:$0xff]   ;;  %v15933_v58 = vld [vmem:[#allocation6 + $0x8c8] sm:$0xff]   ;;  %v15950_v5 = vld [vmem:[#allocation6 + $0x8e0] sm:$0xff]  }
 0x532   : > { %6384 = vst [vmem:[#allocation2 + $0x64] sm:$0xf] %v6368_v47  ;;  %v13361_v50 = vpack.c.bf16 %v6354_v33, %v6353_v49  ;;  %v15903_v31 = vld [vmem:[#allocation2 + $0x48] sm:$0xff]   ;;  %v15928_v14 = vld [vmem:[#allocation2 + $0x58] sm:$0xff]   ;;  %v15937_v7 = vld [vmem:[#allocation2 + $0x30] sm:$0xff]  }
 0x533   : > { %6387 = vst [vmem:[#allocation2 + $0x70] sm:$0xf] %v6371_v57  ;;  %7831 = vmatmul.mubr.bf16.gmra.mrb[232].mxu0 %v15887_v44  ;;  %v15897_v54 = vld [vmem:[#allocation2 + $0x4c] sm:$0xff]   ;;  %v15905_v4 = vld [vmem:[#allocation2 + $0x54] sm:$0xff]   ;;  %v15941_v57 = vld [vmem:[#allocation2 + $0x40] sm:$0xff]  }
 0x534   : > { %13394 = vst [vmem:[#allocation2 + $0x68] sm:$0xff] %v13361_v50   ;;  %7838 = vmatprep.mubr.bf16.mxu0 %v15888_v3  ;;  %14416 = vmatpush3.bf16.msra.mxu0 %v15922_v12  ;;  %v15901_v29 = vld [vmem:[#allocation2 + $0x50] sm:$0xff]   ;;  %v15934_v45 = vld [vmem:[#allocation2 + $0x38] sm:$0xff]  }
 0x535   : > { %7750 = vmatmul.mubr.bf16.gmra.mrb[224].mxu1 %v15889_v39  ;;  %14417 = vmatprep.subr.bf16.mxu0 %v15926_v43  ;;  %v15913_v30 = vld [vmem:[#allocation2 + $0x50] sm:$0xff]   ;;  %v15938_v12 = vld [vmem:[#allocation2 + $0x3c] sm:$0xff]  }
 0x536   : > { %7757 = vmatprep.mubr.bf16.mxu1 %v15891_v20  ;;  %v15919_v53 = vld [vmem:[#allocation2 + $0x50] sm:$0xff]   ;;  %v15955_v47 = vld [vmem:[#allocation6 + $0x8e8] sm:$0xff]   ;;  %v15960_v43 = vld [vmem:[#allocation6 + $0x8f0] sm:$0xff]  }
 0x537   : > { %v15942_v50 = vld [vmem:[#allocation2 + $0x38] sm:$0xff]   ;;  %v15943_v44 = vld [vmem:[#allocation2 + $0x4c] sm:$0xff]  }
 0x538   : > { %14418 = vmatpush3.bf16.msra.mxu0 %v15927_v36  ;;  %v15944_v3 = vld [vmem:[#allocation2 + $0x3c] sm:$0xff]   ;;  %v15964_v36 = vld [vmem:[#allocation6 + $0x8f8] sm:$0xff]  }
 0x539   : > { %14419 = vmatprep.subr.bf16.mxu0 %v15929_v61  ;;  %v15911_v28 = vld [vmem:[#allocation2 + $0x60] sm:$0xff]   ;;  %v15946_v39 = vld [vmem:[#allocation2 + $0x50] sm:$0xff]   ;;  %v15947_v20 = vld [vmem:[#allocation2 + $0x48] sm:$0xff]  }
 0x53a   : > { %v15948_v61 = vld [vmem:[#allocation2 + $0x54] sm:$0xff]   ;;  %v17773_v9 = vld [vmem:[#allocation14] ss:$0 sm:$0xff] }
 0x53b   : > { %7839 = vmatmul.mubr.bf16.gmra.mrb[236].mxu0 %v15893_v0  ;;  %v15921_v1 = vld [vmem:[#allocation2 + $0x68] sm:$0xff]   ;;  %v14231_v0 = vpop.f32.mrb[208].mxu1 }
 0x53c   : > { %7846 = vmatprep.mubr.bf16.mxu0 %v15894_v13  ;;  %14420 = vmatpush3.bf16.msra.mxu0 %v15930_v56  ;;  %v15949_v56 = vld [vmem:[#allocation2 + $0x4c] sm:$0xff]   ;;  %v14232_v13 = vpop.f32.mrb[209].mxu1 }
 0x53d   : > { %7758 = vmatmul.mubr.bf16.gmra.mrb[228].mxu1 %v15895_v22  ;;  %14421 = vmatprep.subr.bf16.mxu0 %v15935_v11  ;;  %v15951_v11 = vld [vmem:[#allocation2 + $0x58] sm:$0xff]   ;;  %v14234_v22 = vpop.f32.mrb[210].mxu1 }
 0x53e   : > { %7765 = vmatprep.mubr.bf16.mxu1 %v15897_v54  ;;  %v15952_v54 = vld [vmem:[#allocation2 + $0x50] sm:$0xff]  }
 0x540   : > { %14422 = vmatpush3.bf16.msra.mxu0 %v15936_v34  ;;  %v17422_v34 = vadd.f32 %v14232_v13, %v14231_v0  ;;  %v15983_v0 = vld [vmem:[#allocation6 + $0x958] sm:$0xff]  }
 0x541   : > { %v15984_v13 = vld [vmem:[#allocation6 + $0x918] sm:$0xff]  }
 0x543   : > { %7847 = vmatmul.mubr.bf16.gmra.mrb[240].mxu0 %v15899_v37  ;;  %v14235_v37 = vpop.f32.mrb[211].mxu1 }
 0x544   : > { %7854 = vmatprep.mubr.bf16.mxu0 %v15901_v29  ;;  %v15953_v29 = vld [vmem:[#allocation2 + $0x64] sm:$0xff]  }
 0x545   : > { %7766 = vmatmul.mubr.bf16.gmra.mrb[232].mxu1 %v15903_v31  ;;  %v17424_v31 = vadd.f32 %v14235_v37, %v14234_v22  ;;  %v15985_v22 = vld [vmem:[#allocation6 + $0x960] sm:$0xff]   ;;  %v15987_v37 = vld [vmem:[#allocation6 + $0x968] sm:$0xff]  }
 0x546   : > { %7773 = vmatprep.mubr.bf16.mxu1 %v15905_v4  ;;  %v15954_v4 = vld [vmem:[#allocation2 + $0x54] sm:$0xff]  }
 0x54b   : > { %7855 = vmatmul.mubr.bf16.gmra.mrb[244].mxu0 %v15909_v62  ;;  %v15956_v62 = vld [vmem:[#allocation2 + $0x68] sm:$0xff]  }
 0x54c   : > { %7862 = vmatprep.mubr.bf16.mxu0 %v15911_v28 }
 0x54d   : > { %7774 = vmatmul.mubr.bf16.gmra.mrb[236].mxu1 %v15913_v30 }
 0x54e   : > { %7911 = vmatprep.mubr.bf16.mxu1 %v15916_v10 }
 0x553   : > { %7863 = vmatmul.mubr.bf16.gmra.mrb[248].mxu0 %v15919_v53 }
 0x554   : > { %7870 = vmatprep.mubr.bf16.mxu0 %v15921_v1  ;;  %v15957_v1 = vld [vmem:[#allocation2 + $0x60] sm:$0xff]  }
 0x555   : > { %7912 = vmatmul.mubr.bf16.vlgmr.msra.gmra.mrb[240].mxu1 %v15923_v59 }
 0x556   : > { %7919 = vmatprep.mubr.bf16.mxu1 %v15925_v17  ;;  %14955 = vmatpush3.bf16.msra.mxu1 %v17225_v35  ;;  %v15939_v35 = vld [vmem:[#allocation2 + $0x34] sm:$0xff]  }
 0x557   : > { %14956 = vmatprep.subr.bf16.mxu1 %v15933_v58 }
 0x55a   : > { %14957 = vmatpush3.bf16.msra.mxu1 %v15933_v58  ;;  %v15958_v58 = vld [vmem:[#allocation2 + $0x6c] sm:$0xff]  }
 0x55b   : > { %7871 = vmatmul.mubr.bf16.gmra.mrb[252].mxu0 %v15928_v14  ;;  %14958 = vmatprep.subr.bf16.mxu1 %v15940_v55  ;;  %v15961_v14 = vld [vmem:[#allocation2 + $0x70] sm:$0xff]  }
 0x55c   : > { %8008 = vmatprep.mubr.bf16.mxu0 %v15931_v23  ;;  %v15966_v23 = vld [vmem:[#allocation2 + $0x7c] sm:$0xff]  }
 0x55d   : > { %7920 = vmatmul.mubr.bf16.gmra.mrb[244].mxu1 %v15932_v16  ;;  %v15962_v16 = vld [vmem:[#allocation2 + $0x68] sm:$0xff]  }
 0x55e   : > { %7927 = vmatprep.mubr.bf16.mxu1 %v15934_v45  ;;  %14959 = vmatpush3.bf16.msra.mxu1 %v15940_v55  ;;  %v15959_v55 = vld [vmem:[#allocation2 + $0x64] sm:$0xff]   ;;  %v15965_v45 = vld [vmem:[#allocation2 + $0x38] sm:$0xff]  }
 0x55f   : > { %14960 = vmatprep.subr.bf16.mxu1 %v15945_v25 }
 0x562   : > { %14961 = vmatpush3.bf16.msra.mxu1 %v15945_v25  ;;  %v15963_v25 = vld [vmem:[#allocation2 + $0x6c] sm:$0xff]  }
 0x563   : > { %8009 = vmatmul.mubr.bf16.vlgmr.msra.gmra.mrb[0].mxu0 %v15937_v7  ;;  %14962 = vmatprep.subr.bf16.mxu1 %v15950_v5  ;;  %v15970_v7 = vld [vmem:[#allocation2 + $0x84] sm:$0xff]  }
 0x564   : > { %8016 = vmatprep.mubr.bf16.mxu0 %v15938_v12  ;;  %v15968_v12 = vld [vmem:[#allocation2 + $0x40] sm:$0xff]  }
 0x565   : > { %7928 = vmatmul.mubr.bf16.gmra.mrb[248].mxu1 %v15939_v35  ;;  %v15969_v35 = vld [vmem:[#allocation2 + $0x50] sm:$0xff]  }
 0x566   : > { %7935 = vmatprep.mubr.bf16.mxu1 %v15941_v57  ;;  %14963 = vmatpush3.bf16.msra.mxu1 %v15950_v5  ;;  %v15967_v5 = vld [vmem:[#allocation2 + $0x78] sm:$0xff]  }
 0x567   : > { %14964 = vmatprep.subr.bf16.mxu1 %v15955_v47  ;;  %v15972_v57 = vld [vmem:[#allocation2 + $0x58] sm:$0xff]  }
 0x56a   : > { %14965 = vmatpush3.bf16.msra.mxu1 %v15955_v47  ;;  %v15971_v47 = vld [vmem:[#allocation2 + $0x80] sm:$0xff]  }
 0x56b   : > { %8017 = vmatmul.mubr.bf16.gmra.mrb[4].mxu0 %v15942_v50  ;;  %14966 = vmatprep.subr.bf16.mxu1 %v15960_v43  ;;  %v15975_v50 = vld [vmem:[#allocation2 + $0x80] sm:$0xff]  }
 0x56c   : > { %8024 = vmatprep.mubr.bf16.mxu0 %v15943_v44  ;;  %v15974_v44 = vld [vmem:[#allocation2 + $0x70] sm:$0xff]  }
 0x56d   : > { %7936 = vmatmul.mubr.bf16.gmra.mrb[252].mxu1 %v15944_v3  ;;  %v15976_v3 = vld [vmem:[#allocation2 + $0x88] sm:$0xff]  }
 0x56e   : > { %7943 = vmatprep.mubr.bf16.mxu1 %v15946_v39  ;;  %14967 = vmatpush3.bf16.msra.mxu1 %v15960_v43  ;;  %v15973_v43 = vld [vmem:[#allocation2 + $0x68] sm:$0xff]   ;;  %v15978_v39 = vld [vmem:[#allocation6 + $0x900] sm:$0xff]  }
 0x56f   : > { %14968 = vmatprep.subr.bf16.mxu1 %v15964_v36 }
 0x572   : > { %14969 = vmatpush3.bf16.msra.mxu1 %v15964_v36  ;;  %v14237_v28 = vpop.f32.mrb[212].mxu1  ;;  %v15977_v36 = vld [vmem:[#allocation6 + $0x940] sm:$0xff]  }
 0x573   : > { %8025 = vmatmul.mubr.bf16.gmra.mrb[8].mxu0 %v15947_v20  ;;  %v14238_v30 = vpop.f32.mrb[213].mxu1  ;;  %14487 = vmatprep.subr.bf16.mxu0 %v15977_v36  ;;  %v15979_v20 = vld [vmem:[#allocation6 + $0x948] sm:$0xff]  }
 0x574   : > { %8032 = vmatprep.mubr.bf16.mxu0 %v15948_v61  ;;  %v17426_v10 = vadd.f32 %v14238_v30, %v14237_v28  ;;  %v14240_v53 = vpop.f32.mrb[214].mxu1  ;;  %14488 = vmatpush3.bf16.msra.mxu0 %v15978_v39  ;;  %v15980_v61 = vld [vmem:[#allocation6 + $0x908] sm:$0xff]   ;;  %v15991_v28 = vld [vmem:[#allocation6 + $0x970] sm:$0xff]  }
 0x575   : > { %7944 = vmatmul.mubr.bf16.gmra.mrb[0].mxu1 %v15949_v56  ;;  %v14241_v59 = vpop.f32.mrb[215].mxu1  ;;  %14489 = vmatprep.subr.bf16.mxu0 %v15979_v20  ;;  %v15981_v56 = vld [vmem:[#allocation6 + $0x950] sm:$0xff]  }
 0x576   : > { %7951 = vmatprep.mubr.bf16.mxu1 %v15951_v11  ;;  %v17428_v17 = vadd.f32 %v14241_v59, %v14240_v53  ;;  %v15982_v11 = vld [vmem:[#allocation6 + $0x910] sm:$0xff]   ;;  %v15993_v53 = vld [vmem:[#allocation6 + $0x9c8] sm:$0xff]  }
 0x577   : > { %v15992_v30 = vld [vmem:[#allocation6 + $0x930] sm:$0xff]  }
 0x578   : > { %14490 = vmatpush3.bf16.msra.mxu0 %v15980_v61  ;;  %v15995_v59 = vld [vmem:[#allocation6 + $0x9d0] sm:$0xff]  }
 0x579   : > { %14491 = vmatprep.subr.bf16.mxu0 %v15981_v56 }
 0x57b   : > { %8033 = vmatmul.mubr.bf16.gmra.mrb[12].mxu0 %v15952_v54  ;;  %v15986_v54 = vld [vmem:[#allocation6 + $0x920] sm:$0xff]  }
 0x57c   : > { %8040 = vmatprep.mubr.bf16.mxu0 %v15953_v29  ;;  %14492 = vmatpush3.bf16.msra.mxu0 %v15982_v11  ;;  %v15988_v29 = vld [vmem:[#allocation6 + $0x928] sm:$0xff]  }
 0x57d   : > { %7952 = vmatmul.mubr.bf16.gmra.mrb[4].mxu1 %v15954_v4  ;;  %14493 = vmatprep.subr.bf16.mxu0 %v15983_v0  ;;  %v15989_v4 = vld [vmem:[#allocation6 + $0x9c0] sm:$0xff]  }
 0x57e   : > { %7959 = vmatprep.mubr.bf16.mxu1 %v15956_v62  ;;  %v15990_v62 = vld [vmem:[#allocation6 + $0x980] sm:$0xff]   ;;  %14551 = vmatprep.subr.bf16.mxu1 %v15989_v4  ;;  %v16010_v4 = vld [vmem:[#allocation2 + $0x8] sm:$0xff]  }
 0x57f   : > { %v16005_v0 = vld [vmem:[#allocation6 + $0xa40] sm:$0xff]  }
 0x580   : > { %14494 = vmatpush3.bf16.msra.mxu0 %v15984_v13  ;;  %v16006_v13 = vld [vmem:[#allocation6 + $0xa00] sm:$0xff]  }
 0x581   : > { %14495 = vmatprep.subr.bf16.mxu0 %v15985_v22 }
 0x583   : > { %8041 = vmatmul.mubr.bf16.gmra.mrb[16].mxu0 %v15957_v1  ;;  %v15994_v1 = vld [vmem:[#allocation6 + $0x988] sm:$0xff]  }
 0x584   : > { %8048 = vmatprep.mubr.bf16.mxu0 %v15958_v58  ;;  %14496 = vmatpush3.bf16.msra.mxu0 %v15986_v54  ;;  %v15996_v58 = vld [vmem:[#allocation6 + $0x990] sm:$0xff]   ;;  %v16007_v54 = vld [vmem:[#allocation6 + $0x9e8] sm:$0xff]  }
 0x585   : > { %7960 = vmatmul.mubr.bf16.gmra.mrb[8].mxu1 %v15959_v55  ;;  %14497 = vmatprep.subr.bf16.mxu0 %v15987_v37  ;;  %v15997_v55 = vld [vmem:[#allocation6 + $0x978] sm:$0xff]   ;;  %v16008_v37 = vld [vmem:[#allocation6 + $0x9a8] sm:$0xff]  }
 0x586   : > { %7967 = vmatprep.mubr.bf16.mxu1 %v15961_v14  ;;  %v15998_v14 = vld [vmem:[#allocation6 + $0x938] sm:$0xff]  }
 0x588   : > { %14498 = vmatpush3.bf16.msra.mxu0 %v15988_v29  ;;  %v16009_v29 = vld [vmem:[#allocation2 + $0xc] sm:$0xff]  }
 0x589   : > { %14499 = vmatprep.subr.bf16.mxu0 %v15991_v28 }
 0x58b   : > { %8049 = vmatmul.mubr.bf16.gmra.mrb[20].mxu0 %v15962_v16  ;;  %v15999_v16 = vld [vmem:[#allocation6 + $0x9d8] sm:$0xff]  }
 0x58c   : > { %8056 = vmatprep.mubr.bf16.mxu0 %v15966_v23  ;;  %14500 = vmatpush3.bf16.msra.mxu0 %v15992_v30 }
 0x58d   : > { %7968 = vmatmul.mubr.bf16.gmra.mrb[12].mxu1 %v15963_v25  ;;  %14501 = vmatprep.subr.bf16.mxu0 %v15997_v55  ;;  %v16000_v25 = vld [vmem:[#allocation6 + $0x998] sm:$0xff]  }
 0x58e   : > { %14970 = vmatprep.mubr.bf16.mxu1 %v15965_v45  ;;  %v16001_v45 = vld [vmem:[#allocation2 + $0x4] sm:$0xff]  }
 0x590   : > { %14502 = vmatpush3.bf16.msra.mxu0 %v15998_v14 }
 0x591   : > { %14615 = vmatprep.subr.bf16.mxu0 %v16005_v0 }
 0x593   : > { %8057 = vmatmul.mubr.bf16.gmra.mrb[24].mxu0 %v15967_v5 }
 0x594   : > { %8064 = vmatprep.mubr.bf16.mxu0 %v15970_v7  ;;  %v16002_v7 = vld [vmem:[#allocation2] sm:$0xff]  }
 0x595   : > { %14971 = vmatmul.mubr.bf16.vlgmr.msra.gmra.mrb[16].mxu1 %v15968_v12  ;;  %v16003_v12 = vld [vmem:[#allocation6 + $0x9e0] sm:$0xff]  }
 0x596   : > { %14974 = vmatprep.mubr.bf16.mxu1 %v15969_v35  ;;  %14552 = vmatpush3.bf16.msra.mxu1 %v15990_v62  ;;  %v16011_v62 = vld [vmem:[#allocation6 + $0x9f0] sm:$0xff]  }
 0x597   : > { %14553 = vmatprep.subr.bf16.mxu1 %v15993_v53 }
 0x59a   : > { %14554 = vmatpush3.bf16.msra.mxu1 %v15994_v1 }
 0x59b   : > { %8065 = vmatmul.mubr.bf16.gmra.mrb[28].mxu0 %v15971_v47  ;;  %14555 = vmatprep.subr.bf16.mxu1 %v15995_v59  ;;  %v16012_v59 = vld [vmem:[#allocation6 + $0x9b0] sm:$0xff]  }
 0x59c   : > { %9595 = vmatprep.mubr.bf16.mxu0 %v16001_v45 }
 0x59d   : > { %14975 = vmatmul.mubr.bf16.gmra.mrb[20].mxu1 %v15972_v57 }
 0x59e   : > { %14978 = vmatprep.mubr.bf16.mxu1 %v15973_v43  ;;  %14556 = vmatpush3.bf16.msra.mxu1 %v15996_v58 }
 0x59f   : > { %14557 = vmatprep.subr.bf16.mxu1 %v15999_v16 }
 0x5a2   : > { %14558 = vmatpush3.bf16.msra.mxu1 %v16000_v25 }
 0x5a3   : > { %9596 = vmatmul.mubr.bf16.vlgmr.msra.gmra.mrb[32].mxu0 %v16002_v7  ;;  %14559 = vmatprep.subr.bf16.mxu1 %v16003_v12  ;;  %v16014_v7 = vld [vmem:[#allocation6 + $0xa08] sm:$0xff]  }
 0x5a4   : > { %14616 = vmatpush3.bf16.msra.mxu0 %v16006_v13  ;;  %9603 = vmatprep.mubr.bf16.mxu0 %v16009_v29  ;;  %v16024_v29 = vld [vmem:[#allocation6 + $0xa10] sm:$0xff]  }
 0x5a5   : > { %14979 = vmatmul.mubr.bf16.gmra.mrb[24].mxu1 %v15974_v44  ;;  %v16004_v44 = vld [vmem:[#allocation6 + $0x9a0] sm:$0xff]  }
 0x5a6   : > { %14982 = vmatprep.mubr.bf16.mxu1 %v15975_v50  ;;  %14560 = vmatpush3.bf16.msra.mxu1 %v16004_v44 }
 0x5a7   : > { %14561 = vmatprep.subr.bf16.mxu1 %v16007_v54 }
 0x5aa   : > { %14562 = vmatpush3.bf16.msra.mxu1 %v16008_v37  ;;  %v16022_v37 = vld [vmem:[#allocation6 + $0xa50] sm:$0xff]  }
 0x5ab   : > { %9604 = vmatmul.mubr.bf16.gmra.mrb[36].mxu0 %v16010_v4  ;;  %14563 = vmatprep.subr.bf16.mxu1 %v16011_v62  ;;  %v16028_v4 = vld [vmem:[#allocation6 + $0xa58] sm:$0xff]  }
 0x5ad   : > { %14983 = vmatmul.mubr.bf16.gmra.mrb[28].mxu1 %v15976_v3 }
 0x5ae   : > { %14564 = vmatpush3.bf16.msra.mxu1 %v16012_v59 }
 0x5f6   : > { %v14295_v23 = vpop.f32.mrb[224].mxu0 }
 0x5f7   : > { %v14296_v5 = vpop.f32.mrb[225].mxu0 }
 0x5f8   : > { %v14297_v35 = vadd.f32 %v14296_v5, %v14295_v23  ;;  %v14243_v47 = vpop.f32.mrb[216].mxu1  ;;  %v14298_v57 = vpop.f32.mrb[226].mxu0  ;;  %v16013_v5 = vld [vmem:[#allocation6 + $0xa48] sm:$0xff]  }
 0x5f9   : > { %v14244_v43 = vpop.f32.mrb[217].mxu1  ;;  %v14299_v50 = vpop.f32.mrb[227].mxu0  ;;  %14617 = vmatprep.subr.bf16.mxu0 %v16013_v5 }
 0x5fa   : > { %v17431_v3 = vadd.f32 %v14297_v35, %v17422_v34  ;;  %v14245_v36 = vadd.f32 %v14244_v43, %v14243_v47  ;;  %v14300_v39 = vadd.f32 %v14299_v50, %v14298_v57  ;;  %v14246_v20 = vpop.f32.mrb[218].mxu1  ;;  %v16015_v35 = vld [vmem:[#allocation6 + $0x9f8] sm:$0xff]   ;;  %14618 = vmatpush3.bf16.msra.mxu0 %v16014_v7  ;;  %v16036_v7 = vld [vmem:[#allocation6 + $0xa20] sm:$0xff]  }
 0x5fb   : > { %v14247_v61 = vpop.f32.mrb[219].mxu1  ;;  %v16016_v47 = vld [vmem:[#allocation6 + $0x9b8] sm:$0xff]   ;;  %14565 = vmatprep.subr.bf16.mxu1 %v16015_v35  ;;  %14619 = vmatprep.subr.bf16.mxu0 %v16022_v37 }
 0x5fc   : > { %v17434_v56 = vadd.f32 %v14300_v39, %v17424_v31  ;;  %v14248_v11 = vadd.f32 %v14247_v61, %v14246_v20  ;;  %14566 = vmatpush3.bf16.msra.mxu1 %v16016_v47 }
 0x5fe   : > { %v14301_v22 = vpop.f32.mrb[228].mxu0  ;;  %14620 = vmatpush3.bf16.msra.mxu0 %v16024_v29 }
 0x5ff   : > { %v14302_v34 = vpop.f32.mrb[229].mxu0  ;;  %14621 = vmatprep.subr.bf16.mxu0 %v16028_v4 }
 0x600   : > { %v14303_v28 = vadd.f32 %v14302_v34, %v14301_v22  ;;  %v14249_v30 = vpop.f32.mrb[220].mxu1  ;;  %v14304_v53 = vpop.f32.mrb[230].mxu0 }
 0x601   : > { %v14250_v31 = vpop.f32.mrb[221].mxu1  ;;  %v14305_v1 = vpop.f32.mrb[231].mxu0 }
 0x602   : > { %v17437_v58 = vadd.f32 %v14303_v28, %v17426_v10  ;;  %v14251_v55 = vadd.f32 %v14250_v31, %v14249_v30  ;;  %v14306_v14 = vadd.f32 %v14305_v1, %v14304_v53  ;;  %v14252_v23 = vpop.f32.mrb[222].mxu1  ;;  %v16030_v28 = vld [vmem:[#allocation6 + $0xa18] sm:$0xff]  }
 0x603   : > { %v14253_v16 = vpop.f32.mrb[223].mxu1  ;;  %14622 = vmatpush3.bf16.msra.mxu0 %v16030_v28  ;;  %v16044_v28 = vld [vmem:[#allocation6 + $0xac0] sm:$0xff]  }
 0x604   : > { %v17440_v25 = vadd.f32 %v14306_v14, %v17428_v17  ;;  %v14254_v45 = vadd.f32 %v14253_v16, %v14252_v23  ;;  %14679 = vmatprep.subr.bf16.mxu1 %v16044_v28 }
 0x606   : > { %v14307_v12 = vpop.f32.mrb[232].mxu0 }
 0x607   : > { %v14308_v57 = vpop.f32.mrb[233].mxu0 }
 0x608   : > { %v14309_v10 = vadd.f32 %v14308_v57, %v14307_v12  ;;  %v14255_v43 = vpop.f32.mrb[224].mxu1  ;;  %v14310_v50 = vpop.f32.mrb[234].mxu0 }
 0x609   : > { %v14256_v44 = vpop.f32.mrb[225].mxu1  ;;  %v14311_v39 = vpop.f32.mrb[235].mxu0 }
 0x60a   : > { %v17442_v20 = vadd.f32 %v14309_v10, %v14245_v36  ;;  %v14257_v17 = vadd.f32 %v14256_v44, %v14255_v43  ;;  %v14312_v61 = vadd.f32 %v14311_v39, %v14310_v50  ;;  %v14258_v0 = vpop.f32.mrb[226].mxu1  ;;  %v16034_v36 = vld [vmem:[#allocation6 + $0xa60] sm:$0xff]   ;;  %v16040_v44 = vld [vmem:[#allocation6 + $0xa68] sm:$0xff]  }
 0x60b   : > { %v14259_v13 = vpop.f32.mrb[227].mxu1  ;;  %14623 = vmatprep.subr.bf16.mxu0 %v16034_v36 }
 0x60c   : > { %v17444_v22 = vadd.f32 %v14312_v61, %v14248_v11  ;;  %v14260_v54 = vadd.f32 %v14259_v13, %v14258_v0  ;;  %14624 = vmatpush3.bf16.msra.mxu0 %v16036_v7  ;;  %v16042_v61 = vld [vmem:[#allocation6 + $0xa28] sm:$0xff]  }
 0x60d   : > { %14625 = vmatprep.subr.bf16.mxu0 %v16040_v44 }
 0x60e   : > { %v14313_v34 = vpop.f32.mrb[236].mxu0 }
 0x60f   : > { %v14314_v62 = vpop.f32.mrb[237].mxu0 }
 0x610   : > { %v14315_v30 = vadd.f32 %v14314_v62, %v14313_v34  ;;  %v14261_v53 = vpop.f32.mrb[228].mxu1  ;;  %v14316_v31 = vpop.f32.mrb[238].mxu0  ;;  %14626 = vmatpush3.bf16.msra.mxu0 %v16042_v61  ;;  %v16058_v61 = vld [vmem:[#allocation6 + $0xa78] sm:$0xff]  }
 0x611   : > { %v14262_v1 = vpop.f32.mrb[229].mxu1  ;;  %v14317_v59 = vpop.f32.mrb[239].mxu0 }
 0x612   : > { %v17446_v14 = vadd.f32 %v14315_v30, %v14251_v55  ;;  %v14263_v11 = vadd.f32 %v14262_v1, %v14261_v53  ;;  %v14318_v23 = vadd.f32 %v14317_v59, %v14316_v31  ;;  %v14264_v16 = vpop.f32.mrb[230].mxu1  ;;  %v16048_v1 = vld [vmem:[#allocation6 + $0xa70] sm:$0xff]  }
 0x613   : > { %v14265_v5 = vpop.f32.mrb[231].mxu1  ;;  %14627 = vmatprep.subr.bf16.mxu0 %v16048_v1 }
 0x614   : > { %v17448_v12 = vadd.f32 %v14318_v23, %v14254_v45  ;;  %v14266_v35 = vadd.f32 %v14265_v5, %v14264_v16  ;;  %v16050_v23 = vld [vmem:[#allocation6 + $0xa30] sm:$0xff]  }
 0x615   : > { %14628 = vmatpush3.bf16.msra.mxu0 %v16050_v23 }
 0x616   : > { %v14319_v47 = vpop.f32.mrb[240].mxu0  ;;  %14629 = vmatprep.subr.bf16.mxu0 %v16058_v61 }
 0x617   : > { %v14320_v57 = vpop.f32.mrb[241].mxu0 }
 0x618   : > { %v14321_v10 = vadd.f32 %v14320_v57, %v14319_v47  ;;  %v14267_v43 = vpop.f32.mrb[232].mxu1  ;;  %v14322_v50 = vpop.f32.mrb[242].mxu0 }
 0x619   : > { %v14268_v39 = vpop.f32.mrb[233].mxu1  ;;  %v14323_v55 = vpop.f32.mrb[243].mxu0 }
 0x61a   : > { %v17450_v0 = vadd.f32 %v14321_v10, %v14257_v17  ;;  %v14269_v13 = vadd.f32 %v14268_v39, %v14267_v43  ;;  %v14324_v37 = vadd.f32 %v14323_v55, %v14322_v50  ;;  %v14270_v29 = vpop.f32.mrb[234].mxu1 }
 0x61b   : > { %v14271_v45 = vpop.f32.mrb[235].mxu1 }
 0x61c   : > { %v17452_v34 = vadd.f32 %v14324_v37, %v14260_v54  ;;  %v14272_v4 = vadd.f32 %v14271_v45, %v14270_v29  ;;  %v16059_v37 = vld [vmem:[#allocation6 + $0xa38] sm:$0xff]  }
 0x61d   : > { %14630 = vmatpush3.bf16.msra.mxu0 %v16059_v37 }
 0x61e   : > { %v14325_v62 = vpop.f32.mrb[244].mxu0 }
 0x61f   : > { %v14326_v30 = vpop.f32.mrb[245].mxu0 }
 0x620   : > { %v14327_v53 = vadd.f32 %v14326_v30, %v14325_v62  ;;  %v14273_v31 = vpop.f32.mrb[236].mxu1  ;;  %v14328_v36 = vpop.f32.mrb[246].mxu0 }
 0x621   : > { %v14274_v59 = vpop.f32.mrb[237].mxu1  ;;  %v14329_v17 = vpop.f32.mrb[247].mxu0 }
 0x622   : > { %v17454_v16 = vadd.f32 %v14327_v53, %v14263_v11  ;;  %v14275_v5 = vadd.f32 %v14274_v59, %v14273_v31  ;;  %v14330_v7 = vadd.f32 %v14329_v17, %v14328_v36  ;;  %v14276_v47 = vpop.f32.mrb[238].mxu1 }
 0x623   : > { %v14277_v54 = vpop.f32.mrb[239].mxu1 }
 0x624   : > { %v17456_v57 = vadd.f32 %v14330_v7, %v14266_v35  ;;  %v14278_v10 = vadd.f32 %v14277_v54, %v14276_v47 }
 0x626   : > { %v14331_v43 = vpop.f32.mrb[248].mxu0 }
 0x627   : > { %v14332_v50 = vpop.f32.mrb[249].mxu0 }
 0x628   : > { %v14333_v44 = vadd.f32 %v14332_v50, %v14331_v43  ;;  %v14334_v39 = vpop.f32.mrb[250].mxu0  ;;  %v14359_v55 = vpop.f32.mrb[240].mxu1 }
 0x629   : > { %v14335_v29 = vpop.f32.mrb[251].mxu0  ;;  %v14360_v45 = vpop.f32.mrb[241].mxu1 }
 0x62a   : > { %v17458_v11 = vadd.f32 %v14333_v44, %v14269_v13  ;;  %v14336_v62 = vadd.f32 %v14335_v29, %v14334_v39  ;;  %v14361_v28 = vadd.f32 %v14360_v45, %v14359_v55  ;;  %v14362_v30 = vpop.f32.mrb[242].mxu1  ;;  %v17464_v13 = vld [vmem:[#allocation6 + $0xb00] sm:$0xff]  }
 0x62b   : > { %v14363_v53 = vpop.f32.mrb[243].mxu1  ;;  %14986 = vmatprep.subr.bf16.mxu0 %v17464_v13 }
 0x62c   : > { %v17460_v35 = vadd.f32 %v14336_v62, %v14272_v4  ;;  %v7914_v31 = vadd.f32 %v14361_v28, %v17431_v3  ;;  %v14364_v36 = vadd.f32 %v14363_v53, %v14362_v30 }
 0x62e   : > { %v7917_v1 = vadd.f32 %v14364_v36, %v17434_v56  ;;  %v14337_v59 = vpop.f32.mrb[252].mxu0 }
 0x62f   : > { %v14338_v17 = vpop.f32.mrb[253].mxu0 }
 0x630   : > { %v14339_v23 = vadd.f32 %v14338_v17, %v14337_v59  ;;  %v14340_v7 = vpop.f32.mrb[254].mxu0  ;;  %v14365_v47 = vpop.f32.mrb[244].mxu1 }
 0x631   : > { %v14341_v54 = vpop.f32.mrb[255].mxu0  ;;  %v14366_v43 = vpop.f32.mrb[245].mxu1 }
 0x632   : > { %v17466_v50 = vadd.f32 %v14339_v23, %v14275_v5  ;;  %v14342_v44 = vadd.f32 %v14341_v54, %v14340_v7  ;;  %v14367_v39 = vadd.f32 %v14366_v43, %v14365_v47  ;;  %v14368_v4 = vpop.f32.mrb[246].mxu1 }
 0x633   : > { %v14369_v3 = vpop.f32.mrb[247].mxu1 }
 0x634   : > { %v17469_v55 = vadd.f32 %v14342_v44, %v14278_v10  ;;  %v7922_v56 = vadd.f32 %v14367_v39, %v17437_v58  ;;  %v14370_v61 = vadd.f32 %v14369_v3, %v14368_v4 }
 0x636   : > { %v7925_v37 = vadd.f32 %v14370_v61, %v17440_v25  ;;  %v14423_v29 = vpop.f32.mrb[0].mxu0 }
 0x637   : > { %v14424_v45 = vpop.f32.mrb[1].mxu0 }
 0x638   : > { %v14425_v62 = vadd.f32 %v14424_v45, %v14423_v29  ;;  %v14371_v28 = vpop.f32.mrb[248].mxu1  ;;  %v14426_v30 = vpop.f32.mrb[2].mxu0 }
 0x639   : > { %v14372_v5 = vpop.f32.mrb[249].mxu1  ;;  %v14427_v53 = vpop.f32.mrb[3].mxu0 }
 0x63a   : > { %v14373_v36 = vadd.f32 %v14372_v5, %v14371_v28  ;;  %v14428_v59 = vadd.f32 %v14427_v53, %v14426_v30  ;;  %v14374_v17 = vpop.f32.mrb[250].mxu1  ;;  %v17473_v23 = vadd.f32 %v14425_v62, %v7914_v31 }
 0x63b   : > { %v14375_v7 = vpop.f32.mrb[251].mxu1 }
 0x63c   : > { %v7930_v10 = vadd.f32 %v14373_v36, %v17442_v20  ;;  %v14376_v47 = vadd.f32 %v14375_v7, %v14374_v17  ;;  %v17476_v58 = vadd.f32 %v14428_v59, %v7917_v1 }
 0x63e   : > { %v7933_v25 = vadd.f32 %v14376_v47, %v17444_v22  ;;  %v14429_v54 = vpop.f32.mrb[4].mxu0 }
 0x63f   : > { %v14430_v43 = vpop.f32.mrb[5].mxu0 }
 0x640   : > { %v14431_v44 = vadd.f32 %v14430_v43, %v14429_v54  ;;  %v14377_v39 = vpop.f32.mrb[252].mxu1  ;;  %v14432_v4 = vpop.f32.mrb[6].mxu0 }
 0x641   : > { %v14378_v3 = vpop.f32.mrb[253].mxu1  ;;  %v14433_v61 = vpop.f32.mrb[7].mxu0 }
 0x642   : > { %v14379_v29 = vadd.f32 %v14378_v3, %v14377_v39  ;;  %v14434_v45 = vadd.f32 %v14433_v61, %v14432_v4  ;;  %v14380_v28 = vpop.f32.mrb[254].mxu1  ;;  %v17479_v31 = vadd.f32 %v14431_v44, %v7922_v56 }
 0x643   : > { %v14381_v62 = vpop.f32.mrb[255].mxu1 }
 0x644   : > { %v7938_v20 = vadd.f32 %v14379_v29, %v17446_v14  ;;  %v14382_v30 = vadd.f32 %v14381_v62, %v14380_v28  ;;  %v17482_v1 = vadd.f32 %v14434_v45, %v7925_v37 }
 0x646   : > { %v7941_v22 = vadd.f32 %v14382_v30, %v17448_v12  ;;  %v14435_v5 = vpop.f32.mrb[8].mxu0 }
 0x647   : > { %v14436_v53 = vpop.f32.mrb[9].mxu0 }
 0x648   : > { %v14437_v36 = vadd.f32 %v14436_v53, %v14435_v5  ;;  %v14383_v59 = vpop.f32.mrb[0].mxu1  ;;  %v14438_v17 = vpop.f32.mrb[10].mxu0 }
 0x649   : > { %v14384_v7 = vpop.f32.mrb[1].mxu1  ;;  %v14439_v47 = vpop.f32.mrb[11].mxu0 }
 0x64a   : > { %v14385_v54 = vadd.f32 %v14384_v7, %v14383_v59  ;;  %v14440_v43 = vadd.f32 %v14439_v47, %v14438_v17  ;;  %v14386_v39 = vpop.f32.mrb[2].mxu1  ;;  %v17485_v56 = vadd.f32 %v14437_v36, %v7930_v10 }
 0x64b   : > { %v14387_v44 = vpop.f32.mrb[3].mxu1 }
 0x64c   : > { %v7946_v14 = vadd.f32 %v14385_v54, %v17450_v0  ;;  %v14388_v4 = vadd.f32 %v14387_v44, %v14386_v39  ;;  %v17488_v37 = vadd.f32 %v14440_v43, %v7933_v25 }
 0x64e   : > { %v7949_v12 = vadd.f32 %v14388_v4, %v17452_v34  ;;  %v14441_v3 = vpop.f32.mrb[12].mxu0 }
 0x64f   : > { %v14442_v61 = vpop.f32.mrb[13].mxu0 }
 0x650   : > { %v14443_v29 = vadd.f32 %v14442_v61, %v14441_v3  ;;  %v14389_v45 = vpop.f32.mrb[4].mxu1  ;;  %v14444_v28 = vpop.f32.mrb[14].mxu0 }
 0x651   : > { %v14390_v62 = vpop.f32.mrb[5].mxu1  ;;  %v14445_v30 = vpop.f32.mrb[15].mxu0 }
 0x652   : > { %v14391_v5 = vadd.f32 %v14390_v62, %v14389_v45  ;;  %v14446_v53 = vadd.f32 %v14445_v30, %v14444_v28  ;;  %v14392_v59 = vpop.f32.mrb[6].mxu1  ;;  %v17491_v10 = vadd.f32 %v14443_v29, %v7938_v20 }
 0x653   : > { %v14393_v36 = vpop.f32.mrb[7].mxu1 }
 0x654   : > { %v7954_v0 = vadd.f32 %v14391_v5, %v17454_v16  ;;  %v14394_v17 = vadd.f32 %v14393_v36, %v14392_v59  ;;  %v17494_v25 = vadd.f32 %v14446_v53, %v7941_v22 }
 0x656   : > { %v7957_v34 = vadd.f32 %v14394_v17, %v17456_v57  ;;  %v14447_v7 = vpop.f32.mrb[16].mxu0 }
 0x657   : > { %v14448_v47 = vpop.f32.mrb[17].mxu0 }
 0x658   : > { %v14449_v54 = vadd.f32 %v14448_v47, %v14447_v7  ;;  %v14395_v43 = vpop.f32.mrb[8].mxu1  ;;  %v14450_v39 = vpop.f32.mrb[18].mxu0 }
 0x659   : > { %v14396_v44 = vpop.f32.mrb[9].mxu1  ;;  %v14451_v4 = vpop.f32.mrb[19].mxu0 }
 0x65a   : > { %v14397_v3 = vadd.f32 %v14396_v44, %v14395_v43  ;;  %v14452_v61 = vadd.f32 %v14451_v4, %v14450_v39  ;;  %v14398_v45 = vpop.f32.mrb[10].mxu1  ;;  %v17497_v20 = vadd.f32 %v14449_v54, %v7946_v14 }
 0x65b   : > { %v14399_v29 = vpop.f32.mrb[11].mxu1 }
 0x65c   : > { %v7962_v16 = vadd.f32 %v14397_v3, %v17458_v11  ;;  %v14400_v28 = vadd.f32 %v14399_v29, %v14398_v45  ;;  %v17500_v22 = vadd.f32 %v14452_v61, %v7949_v12  ;;  %v17509_v29 = vld [vmem:[#allocation9 + $0x3] ss:$0 sm:$0xff] }
 0x65e   : > { %v7965_v57 = vadd.f32 %v14400_v28, %v17460_v35  ;;  %v14453_v62 = vpop.f32.mrb[20].mxu0 }
 0x65f   : > { %v14454_v30 = vpop.f32.mrb[21].mxu0 }
 0x660   : > { %v14455_v5 = vadd.f32 %v14454_v30, %v14453_v62  ;;  %v14401_v53 = vpop.f32.mrb[12].mxu1  ;;  %v14456_v59 = vpop.f32.mrb[22].mxu0  ;;  %v17512_v30 = vld [vmem:[#allocation11 + $0x3] ss:$0 sm:$0xff] }
 0x661   : > { %v14402_v36 = vpop.f32.mrb[13].mxu1  ;;  %v14457_v17 = vpop.f32.mrb[23].mxu0 }
 0x662   : > { %v14403_v7 = vadd.f32 %v14402_v36, %v14401_v53  ;;  %v14458_v47 = vadd.f32 %v14457_v17, %v14456_v59  ;;  %v14404_v43 = vpop.f32.mrb[14].mxu1  ;;  %v17503_v14 = vadd.f32 %v14455_v5, %v7954_v0 }
 0x663   : > { %v14405_v54 = vpop.f32.mrb[15].mxu1 }
 0x664   : > { %v7970_v11 = vadd.f32 %v14403_v7, %v17466_v50  ;;  %v14406_v39 = vadd.f32 %v14405_v54, %v14404_v43  ;;  %v17506_v12 = vadd.f32 %v14458_v47, %v7957_v34 }
 0x666   : > { %v7973_v35 = vadd.f32 %v14406_v39, %v17469_v55  ;;  %v14459_v44 = vpop.f32.mrb[24].mxu0 }
 0x667   : > { %v14460_v4 = vpop.f32.mrb[25].mxu0 }
 0x668   : > { %v14461_v3 = vadd.f32 %v14460_v4, %v14459_v44  ;;  %v14462_v61 = vpop.f32.mrb[26].mxu0  ;;  %v14972_v45 = vpop.f32.mrb[16].mxu1 }
 0x669   : > { %v8116_v28 = vadd.f32 %v14972_v45, %v17479_v31  ;;  %v14463_v62 = vpop.f32.mrb[27].mxu0  ;;  %v8107_v0 = vpop.f32.mrb[17].mxu1 }
 0x66a   : > { %v14464_v5 = vadd.f32 %v14463_v62, %v14462_v61  ;;  %v8108_v50 = vadd.f32 %v8107_v0, %v17473_v23  ;;  %v14973_v34 = vpop.f32.mrb[18].mxu1  ;;  %v17515_v53 = vadd.f32 %v14461_v3, %v7962_v16 }
 0x66b   : > { %v8180_v55 = vmul.f32 %v17509_v29, %v8116_v28  ;;  %v8119_v59 = vadd.f32 %v14973_v34, %v17482_v1  ;;  %v8110_v36 = vpop.f32.mrb[19].mxu1 }
 0x66c   : > { %v8178_v17 = vmul.f32 %v17509_v29, %v8108_v50  ;;  %v8111_v7 = vadd.f32 %v8110_v36, %v17476_v58  ;;  %v17521_v31 = vadd.f32 %v14464_v5, %v7965_v57 }
 0x66d   : > { %v8204_v47 = vadd.f32 %v17512_v30, %v8180_v55  ;;  %v8181_v43 = vmul.f32 %v17509_v29, %v8119_v59 }
 0x66e   : > { %v8202_v23 = vadd.f32 %v17512_v30, %v8178_v17  ;;  %v8179_v16 = vmul.f32 %v17509_v29, %v8111_v7  ;;  %v14465_v54 = vpop.f32.mrb[28].mxu0 }
 0x66f   : > { %v8205_v39 = vadd.f32 %v17512_v30, %v8181_v43  ;;  %v14466_v44 = vpop.f32.mrb[29].mxu0  ;;  %v8220_v57 = vmax.f32 %v8204_v47, 0.0 }
 0x670   : > { %v8218_v1 = vmax.f32 %v8202_v23, 0.0  ;;  %v8203_v4 = vadd.f32 %v17512_v30, %v8179_v16  ;;  %v14467_v3 = vadd.f32 %v14466_v44, %v14465_v54  ;;  %v14468_v61 = vpop.f32.mrb[30].mxu0  ;;  %v14976_v58 = vpop.f32.mrb[20].mxu1 }
 0x671   : > { %v8221_v45 = vmax.f32 %v8205_v39, 0.0  ;;  %v8132_v28 = vadd.f32 %v14976_v58, %v17491_v10  ;;  %v14469_v62 = vpop.f32.mrb[31].mxu0  ;;  %v8123_v0 = vpop.f32.mrb[21].mxu1 }
 0x672   : > { %v8234_v5 = vpack.c.bf16 %v8218_v1, %v8218_v1  ;;  %v8219_v50 = vmax.f32 %v8203_v4, 0.0  ;;  %v14470_v34 = vadd.f32 %v14469_v62, %v14468_v61  ;;  %v8124_v55 = vadd.f32 %v8123_v0, %v17485_v56  ;;  %v14977_v59 = vpop.f32.mrb[22].mxu1  ;;  %v16018_v0 = vld [vmem:[#allocation2 + $0x8] sm:$0xff]  }
 0x673   : > { %v8237_v36 = vpack.c.bf16 %v8221_v45, %v8221_v45  ;;  %v8184_v17 = vmul.f32 %v17509_v29, %v8132_v28  ;;  %v8135_v7 = vadd.f32 %v14977_v59, %v17494_v25  ;;  %v8126_v43 = vpop.f32.mrb[23].mxu1  ;;  %v8067_v23 = vadd.f32 %v14467_v3, %v7970_v11 }
 0x674   : > { %8250 = vst [vmem:[#allocation2 + $0x1c] sm:$0xf] %v8234_v5  ;;  %v13366_v47 = vpack.c.bf16 %v8220_v57, %v8219_v50  ;;  %v8182_v16 = vmul.f32 %v17509_v29, %v8124_v55  ;;  %v8127_v10 = vadd.f32 %v8126_v43, %v17488_v37  ;;  %v17535_v54 = vadd.f32 %v14470_v34, %v7973_v35  ;;  %v16046_v5 = vld [vmem:[#allocation6 + $0xa80] sm:$0xff]  }
 0x675   : > { %8253 = vst [vmem:[#allocation2 + $0x28] sm:$0xf] %v8237_v36  ;;  %v8185_v39 = vmul.f32 %v17509_v29, %v8135_v7  ;;  %v8208_v56 = vadd.f32 %v17512_v30, %v8184_v17  ;;  %v16051_v17 = vld [vmem:[#allocation6 + $0xac8] sm:$0xff]  }
 0x676   : > { %13395 = vst [vmem:[#allocation2 + $0x20] sm:$0xff] %v13366_v47   ;;  %v8206_v44 = vadd.f32 %v17512_v30, %v8182_v16  ;;  %v8183_v25 = vmul.f32 %v17509_v29, %v8127_v10  ;;  %v16052_v10 = vld [vmem:[#allocation6 + $0xa88] sm:$0xff]  }
 0x677   : > { %v8209_v11 = vadd.f32 %v17512_v30, %v8185_v39  ;;  %v8224_v58 = vmax.f32 %v8208_v56, 0.0 }
 0x678   : > { %v8222_v1 = vmax.f32 %v8206_v44, 0.0  ;;  %v8207_v4 = vadd.f32 %v17512_v30, %v8183_v25  ;;  %v14980_v3 = vpop.f32.mrb[24].mxu1 }
 0x679   : > { %v8225_v61 = vmax.f32 %v8209_v11, 0.0  ;;  %v8148_v37 = vadd.f32 %v14980_v3, %v17503_v14  ;;  %v8139_v35 = vpop.f32.mrb[25].mxu1  ;;  %v16054_v3 = vld [vmem:[#allocation6 + $0xad0] sm:$0xff]  }
 0x67a   : > { %v8238_v57 = vpack.c.bf16 %v8222_v1, %v8222_v1  ;;  %v8223_v45 = vmax.f32 %v8207_v4, 0.0  ;;  %v8140_v28 = vadd.f32 %v8139_v35, %v17497_v20  ;;  %v14981_v62 = vpop.f32.mrb[26].mxu1 }
 0x67b   : > { %v8241_v50 = vpack.c.bf16 %v8225_v61, %v8225_v61  ;;  %v8188_v34 = vmul.f32 %v17509_v29, %v8148_v37  ;;  %v8151_v55 = vadd.f32 %v14981_v62, %v17506_v12  ;;  %v8142_v59 = vpop.f32.mrb[27].mxu1  ;;  %v16017_v36 = vld [vmem:[#allocation2 + $0x18] sm:$0xff]  }
 0x67c   : > { %8254 = vst [vmem:[#allocation2 + $0x34] sm:$0xf] %v8238_v57  ;;  %v13371_v7 = vpack.c.bf16 %v8224_v58, %v8223_v45  ;;  %v8186_v14 = vmul.f32 %v17509_v29, %v8140_v28  ;;  %v8143_v43 = vadd.f32 %v8142_v59, %v17500_v22  ;;  %v16021_v47 = vld [vmem:[#allocation2 + $0x18] sm:$0xff]   ;;  %9692 = vmatprep.mubr.bf16.mxu1 %v16017_v36  ;;  %v16056_v59 = vld [vmem:[#allocation6 + $0xa90] sm:$0xff]  }
 0x67d   : > { %8257 = vst [vmem:[#allocation2 + $0x40] sm:$0xf] %v8241_v50  ;;  %v8189_v20 = vmul.f32 %v17509_v29, %v8151_v55  ;;  %v16019_v16 = vld [vmem:[#allocation2 + $0x1c] sm:$0xff]   ;;  %v8212_v39 = vadd.f32 %v17512_v30, %v8188_v34  ;;  %9693 = vmatmul.mubr.bf16.vlgmr.msra.gmra.mrb[32].mxu1 %v16018_v0  ;;  %v16023_v22 = vld [vmem:[#allocation2 + $0x24] sm:$0xff]   ;;  %v16025_v0 = vld [vmem:[#allocation2 + $0x10] sm:$0xff]  }
 0x67e   : > { %13396 = vst [vmem:[#allocation2 + $0x38] sm:$0xff] %v13371_v7   ;;  %v8210_v12 = vadd.f32 %v17512_v30, %v8186_v14  ;;  %v8187_v56 = vmul.f32 %v17509_v29, %v8143_v43  ;;  %v16020_v44 = vld [vmem:[#allocation2 + $0x20] sm:$0xff]   ;;  %9611 = vmatprep.mubr.bf16.mxu0 %v16019_v16  ;;  %14680 = vmatpush3.bf16.msra.mxu1 %v16046_v5  ;;  %v16061_v7 = vld [vmem:[#allocation6 + $0xad8] sm:$0xff]  }
 0x67f   : > { %v8213_v25 = vadd.f32 %v17512_v30, %v8189_v20  ;;  %9700 = vmatprep.mubr.bf16.mxu1 %v16020_v44  ;;  %9612 = vmatmul.mubr.bf16.gmra.mrb[40].mxu0 %v16021_v47  ;;  %v8228_v58 = vmax.f32 %v8212_v39, 0.0  ;;  %v16062_v43 = vld [vmem:[#allocation6 + $0xa98] sm:$0xff]   ;;  %v16027_v16 = vld [vmem:[#allocation2 + $0x20] sm:$0xff]  }
 0x680   : > { %v8226_v11 = vmax.f32 %v8210_v12, 0.0  ;;  %v8211_v1 = vadd.f32 %v17512_v30, %v8187_v56  ;;  %v14984_v4 = vpop.f32.mrb[28].mxu1  ;;  %9619 = vmatprep.mubr.bf16.mxu0 %v16023_v22  ;;  %14681 = vmatprep.subr.bf16.mxu1 %v16051_v17  ;;  %v16064_v56 = vld [vmem:[#allocation6 + $0xae0] sm:$0xff]  }
 0x681   : > { %v8229_v61 = vmax.f32 %v8213_v25, 0.0  ;;  %v8164_v37 = vadd.f32 %v14984_v4, %v8067_v23  ;;  %v8155_v35 = vpop.f32.mrb[29].mxu1  ;;  %v16066_v25 = vld [vmem:[#allocation6 + $0xaa0] sm:$0xff]   ;;  %v16070_v4 = vld [vmem:[#allocation6 + $0xae8] sm:$0xff]  }
 0x682   : > { %v8242_v57 = vpack.c.bf16 %v8226_v11, %v8226_v11  ;;  %v8227_v45 = vmax.f32 %v8211_v1, 0.0  ;;  %v8156_v28 = vadd.f32 %v8155_v35, %v17515_v53  ;;  %v14985_v62 = vpop.f32.mrb[30].mxu1  ;;  %14682 = vmatpush3.bf16.msra.mxu1 %v16052_v10  ;;  %v16071_v35 = vld [vmem:[#allocation6 + $0xaa8] sm:$0xff]  }
 0x683   : > { %v8245_v5 = vpack.c.bf16 %v8229_v61, %v8229_v61  ;;  %v8192_v50 = vmul.f32 %v17509_v29, %v8164_v37  ;;  %v8167_v34 = vadd.f32 %v14985_v62, %v17535_v54  ;;  %v8158_v55 = vpop.f32.mrb[31].mxu1  ;;  %14683 = vmatprep.subr.bf16.mxu1 %v16054_v3  ;;  %v16026_v14 = vld [vmem:[#allocation2 + $0x30] sm:$0xff]   ;;  %v16031_v61 = vld [vmem:[#allocation2 + $0x20] sm:$0xff]   ;;  %v16037_v62 = vld [vmem:[#allocation2 + $0x28] sm:$0xff]  }
 0x684   : > { %8258 = vst [vmem:[#allocation2 + $0x4c] sm:$0xf] %v8242_v57  ;;  %v13376_v23 = vpack.c.bf16 %v8228_v58, %v8227_v45  ;;  %v8190_v36 = vmul.f32 %v17509_v29, %v8156_v28  ;;  %v8159_v17 = vadd.f32 %v8158_v55, %v17521_v31  ;;  %v16073_v57 = vld [vmem:[#allocation6 + $0xaf0] sm:$0xff]   ;;  %v16079_v28 = vld [vmem:[#allocation6 + $0xaf8] sm:$0xff]  }
 0x685   : > { %8261 = vst [vmem:[#allocation2 + $0x58] sm:$0xf] %v8245_v5  ;;  %v8193_v53 = vmul.f32 %v17509_v29, %v8167_v34  ;;  %v8216_v47 = vadd.f32 %v17512_v30, %v8192_v50  ;;  %9701 = vmatmul.mubr.bf16.gmra.mrb[36].mxu1 %v16025_v0  ;;  %v16029_v31 = vld [vmem:[#allocation2 + $0x34] sm:$0xff]   ;;  %v16035_v58 = vld [vmem:[#allocation2 + $0x3c] sm:$0xff]   ;;  %v16080_v5 = vld [vmem:[#allocation6 + $0xab8] sm:$0xff]  }
 0x686   : > { %13397 = vst [vmem:[#allocation2 + $0x50] sm:$0xff] %v13376_v23   ;;  %v8214_v54 = vadd.f32 %v17512_v30, %v8190_v36  ;;  %v8191_v20 = vmul.f32 %v17509_v29, %v8159_v17  ;;  %9708 = vmatprep.mubr.bf16.mxu1 %v16026_v14  ;;  %14684 = vmatpush3.bf16.msra.mxu1 %v16056_v59  ;;  %v16032_v37 = vld [vmem:[#allocation2 + $0x38] sm:$0xff]   ;;  %v16074_v45 = vld [vmem:[#allocation6 + $0xab0] sm:$0xff]  }
 0x687   : > { %v8217_v10 = vadd.f32 %v17512_v30, %v8193_v53  ;;  %9620 = vmatmul.mubr.bf16.gmra.mrb[44].mxu0 %v16027_v16  ;;  %14685 = vmatprep.subr.bf16.mxu1 %v16061_v7  ;;  %v8232_v22 = vmax.f32 %v8216_v47, 0.0  ;;  %v16039_v50 = vld [vmem:[#allocation2 + $0x38] sm:$0xff]   ;;  %v16053_v17 = vld [vmem:[#allocation2 + $0x40] sm:$0xff]   ;;  %v16069_v16 = vld [vmem:[#allocation2 + $0x28] sm:$0xff]  }
 0x688   : > { %v8230_v39 = vmax.f32 %v8214_v54, 0.0  ;;  %v8215_v12 = vadd.f32 %v17512_v30, %v8191_v20  ;;  %9627 = vmatprep.mubr.bf16.mxu0 %v16029_v31  ;;  %v16033_v30 = vld [vmem:[#allocation2 + $0x30] sm:$0xff]   ;;  %v16043_v55 = vld [vmem:[#allocation2 + $0x38] sm:$0xff]   ;;  %v16060_v14 = vld [vmem:[#allocation2 + $0x20] sm:$0xff]  }
 0x689   : > { %v8233_v44 = vmax.f32 %v8217_v10, 0.0  ;;  %v16067_v54 = vld [vmem:[#allocation2 + $0x1c] sm:$0xff]  }
 0x68a   : > { %v8246_v11 = vpack.c.bf16 %v8230_v39, %v8230_v39  ;;  %v8231_v1 = vmax.f32 %v8215_v12, 0.0  ;;  %14686 = vmatpush3.bf16.msra.mxu1 %v16062_v43  ;;  %v16077_v20 = vld [vmem:[#allocation6 + $0xb08] sm:$0xff]   ;;  %v16084_v10 = vld [vmem:[#allocation6 + $0xb10] sm:$0xff]  }
 0x68b   : > { %v8249_v29 = vpack.c.bf16 %v8233_v44, %v8233_v44  ;;  %14687 = vmatprep.subr.bf16.mxu1 %v16064_v56  ;;  %v16038_v0 = vld [vmem:[#allocation2 + $0x48] sm:$0xff]   ;;  %v16075_v39 = vld [vmem:[#allocation2 + $0x34] sm:$0xff]  }
 0x68c   : > { %8262 = vst [vmem:[#allocation2 + $0x64] sm:$0xf] %v8246_v11  ;;  %v13381_v3 = vpack.c.bf16 %v8232_v22, %v8231_v1  ;;  %v16047_v23 = vld [vmem:[#allocation2 + $0x48] sm:$0xff]   ;;  %v16072_v31 = vld [vmem:[#allocation2 + $0x58] sm:$0xff]   ;;  %v16081_v22 = vld [vmem:[#allocation2 + $0x30] sm:$0xff]  }
 0x68d   : > { %8265 = vst [vmem:[#allocation2 + $0x70] sm:$0xf] %v8249_v29  ;;  %9709 = vmatmul.mubr.bf16.gmra.mrb[40].mxu1 %v16031_v61  ;;  %v16041_v34 = vld [vmem:[#allocation2 + $0x4c] sm:$0xff]   ;;  %v16049_v36 = vld [vmem:[#allocation2 + $0x54] sm:$0xff]   ;;  %v16076_v12 = vld [vmem:[#allocation2 + $0x24] sm:$0xff]  }
 0x68e   : > { %13398 = vst [vmem:[#allocation2 + $0x68] sm:$0xff] %v13381_v3   ;;  %9716 = vmatprep.mubr.bf16.mxu1 %v16032_v37  ;;  %14688 = vmatpush3.bf16.msra.mxu1 %v16066_v25  ;;  %v16045_v59 = vld [vmem:[#allocation2 + $0x50] sm:$0xff]   ;;  %v16078_v44 = vld [vmem:[#allocation2 + $0x38] sm:$0xff]   ;;  %v16085_v29 = vld [vmem:[#allocation2 + $0x40] sm:$0xff]  }
 0x68f   : > { %9628 = vmatmul.mubr.bf16.gmra.mrb[48].mxu0 %v16033_v30  ;;  %14689 = vmatprep.subr.bf16.mxu1 %v16070_v4  ;;  %v16057_v53 = vld [vmem:[#allocation2 + $0x50] sm:$0xff]   ;;  %v16082_v11 = vld [vmem:[#allocation2 + $0x3c] sm:$0xff]  }
 0x690   : > { %9635 = vmatprep.mubr.bf16.mxu0 %v16035_v58  ;;  %v16063_v43 = vld [vmem:[#allocation2 + $0x50] sm:$0xff]   ;;  %v16099_v1 = vld [vmem:[#allocation6 + $0xb28] sm:$0xff]   ;;  %v16104_v4 = vld [vmem:[#allocation6 + $0xb30] sm:$0xff]  }
 0x691   : > { %v16089_v56 = vld [vmem:[#allocation6 + $0xb18] sm:$0xff]   ;;  %v16094_v25 = vld [vmem:[#allocation6 + $0xb20] sm:$0xff]   ;;  %v16088_v37 = vld [vmem:[#allocation2 + $0x3c] sm:$0xff]  }
 0x692   : > { %14690 = vmatpush3.bf16.msra.mxu1 %v16071_v35  ;;  %v16086_v3 = vld [vmem:[#allocation2 + $0x38] sm:$0xff]   ;;  %v16087_v61 = vld [vmem:[#allocation2 + $0x4c] sm:$0xff]  }
 0x693   : > { %14691 = vmatprep.subr.bf16.mxu1 %v16073_v57  ;;  %v16055_v7 = vld [vmem:[#allocation2 + $0x60] sm:$0xff]   ;;  %v16108_v35 = vld [vmem:[#allocation6 + $0xb38] sm:$0xff]   ;;  %v16092_v57 = vld [vmem:[#allocation2 + $0x54] sm:$0xff]  }
 0x694   : > { %v16090_v30 = vld [vmem:[#allocation2 + $0x50] sm:$0xff]   ;;  %v16091_v58 = vld [vmem:[#allocation2 + $0x48] sm:$0xff]  }
 0x695   : > { %9717 = vmatmul.mubr.bf16.gmra.mrb[44].mxu1 %v16037_v62  ;;  %v16065_v47 = vld [vmem:[#allocation2 + $0x68] sm:$0xff]  }
 0x696   : > { %9724 = vmatprep.mubr.bf16.mxu1 %v16038_v0  ;;  %14692 = vmatpush3.bf16.msra.mxu1 %v16074_v45  ;;  %v14503_v45 = vpop.f32.mrb[32].mxu0  ;;  %v16095_v0 = vld [vmem:[#allocation2 + $0x58] sm:$0xff]  }
 0x697   : > { %9636 = vmatmul.mubr.bf16.gmra.mrb[52].mxu0 %v16039_v50  ;;  %14693 = vmatprep.subr.bf16.mxu1 %v16079_v28  ;;  %v16093_v28 = vld [vmem:[#allocation2 + $0x4c] sm:$0xff]   ;;  %v14504_v62 = vpop.f32.mrb[33].mxu0 }
 0x698   : > { %9643 = vmatprep.mubr.bf16.mxu0 %v16041_v34  ;;  %v14506_v50 = vpop.f32.mrb[34].mxu0 }
 0x699   : > { %v14507_v34 = vpop.f32.mrb[35].mxu0 }
 0x69a   : > { %14694 = vmatpush3.bf16.msra.mxu1 %v16080_v5  ;;  %v17567_v5 = vadd.f32 %v14504_v62, %v14503_v45  ;;  %v16125_v45 = vld [vmem:[%s18227_s4 + $0x20] sm:$0xff]   ;;  %v16127_v62 = vld [vmem:[%s18227_s4 + $0x30] sm:$0xff]  }
 0x69d   : > { %9725 = vmatmul.mubr.bf16.gmra.mrb[48].mxu1 %v16043_v55  ;;  %v17569_v55 = vadd.f32 %v14507_v34, %v14506_v50 }
 0x69e   : > { %9732 = vmatprep.mubr.bf16.mxu1 %v16045_v59  ;;  %v16096_v59 = vld [vmem:[#allocation2 + $0x50] sm:$0xff]  }
 0x69f   : > { %9644 = vmatmul.mubr.bf16.gmra.mrb[56].mxu0 %v16047_v23  ;;  %v16097_v23 = vld [vmem:[#allocation2 + $0x64] sm:$0xff]  }
 0x6a0   : > { %9651 = vmatprep.mubr.bf16.mxu0 %v16049_v36  ;;  %v14509_v36 = vpop.f32.mrb[36].mxu0 }
 0x6a5   : > { %9733 = vmatmul.mubr.bf16.gmra.mrb[52].mxu1 %v16053_v17  ;;  %v16098_v17 = vld [vmem:[#allocation2 + $0x54] sm:$0xff]  }
 0x6a6   : > { %9740 = vmatprep.mubr.bf16.mxu1 %v16055_v7  ;;  %v14510_v7 = vpop.f32.mrb[37].mxu0 }
 0x6a7   : > { %9652 = vmatmul.mubr.bf16.gmra.mrb[60].mxu0 %v16057_v53  ;;  %v16100_v53 = vld [vmem:[#allocation2 + $0x68] sm:$0xff]  }
 0x6a8   : > { %9789 = vmatprep.mubr.bf16.mxu0 %v16060_v14  ;;  %v17571_v14 = vadd.f32 %v14510_v7, %v14509_v36  ;;  %v16128_v7 = vld [vmem:[%s18227_s4 + $0x38] sm:$0xff]  }
 0x6ad   : > { %9741 = vmatmul.mubr.bf16.gmra.mrb[56].mxu1 %v16063_v43  ;;  %v14512_v43 = vpop.f32.mrb[38].mxu0 }
 0x6ae   : > { %9748 = vmatprep.mubr.bf16.mxu1 %v16065_v47  ;;  %v14513_v47 = vpop.f32.mrb[39].mxu0 }
 0x6af   : > { %9790 = vmatmul.mubr.bf16.vlgmr.msra.gmra.mrb[64].mxu0 %v16067_v54  ;;  %v17573_v54 = vadd.f32 %v14513_v47, %v14512_v43 }
 0x6b0   : > { %9797 = vmatprep.mubr.bf16.mxu0 %v16069_v16  ;;  %14987 = vmatpush3.bf16.msra.mxu0 %v17464_v13  ;;  %v16083_v13 = vld [vmem:[#allocation2 + $0x34] sm:$0xff]   ;;  %v16102_v16 = vld [vmem:[#allocation2 + $0x6c] sm:$0xff]  }
 0x6b1   : > { %14988 = vmatprep.subr.bf16.mxu0 %v16077_v20 }
 0x6b4   : > { %14989 = vmatpush3.bf16.msra.mxu0 %v16077_v20  ;;  %v16101_v20 = vld [vmem:[#allocation2 + $0x60] sm:$0xff]  }
 0x6b5   : > { %9749 = vmatmul.mubr.bf16.gmra.mrb[60].mxu1 %v16072_v31  ;;  %14990 = vmatprep.subr.bf16.mxu0 %v16084_v10  ;;  %v16105_v31 = vld [vmem:[#allocation2 + $0x70] sm:$0xff]  }
 0x6b6   : > { %9886 = vmatprep.mubr.bf16.mxu1 %v16075_v39  ;;  %v16110_v39 = vld [vmem:[#allocation2 + $0x7c] sm:$0xff]  }
 0x6b7   : > { %9798 = vmatmul.mubr.bf16.gmra.mrb[68].mxu0 %v16076_v12  ;;  %v16106_v12 = vld [vmem:[#allocation2 + $0x68] sm:$0xff]  }
 0x6b8   : > { %9805 = vmatprep.mubr.bf16.mxu0 %v16078_v44  ;;  %14991 = vmatpush3.bf16.msra.mxu0 %v16084_v10  ;;  %v16103_v10 = vld [vmem:[#allocation2 + $0x64] sm:$0xff]   ;;  %v16109_v44 = vld [vmem:[#allocation2 + $0x38] sm:$0xff]  }
 0x6b9   : > { %14992 = vmatprep.subr.bf16.mxu0 %v16089_v56 }
 0x6bc   : > { %14993 = vmatpush3.bf16.msra.mxu0 %v16089_v56  ;;  %v16107_v56 = vld [vmem:[#allocation2 + $0x6c] sm:$0xff]  }
 0x6bd   : > { %9887 = vmatmul.mubr.bf16.vlgmr.msra.gmra.mrb[64].mxu1 %v16081_v22  ;;  %14994 = vmatprep.subr.bf16.mxu0 %v16094_v25  ;;  %v16114_v22 = vld [vmem:[#allocation2 + $0x84] sm:$0xff]  }
 0x6be   : > { %9894 = vmatprep.mubr.bf16.mxu1 %v16082_v11  ;;  %v16112_v11 = vld [vmem:[#allocation2 + $0x40] sm:$0xff]  }
 0x6bf   : > { %9806 = vmatmul.mubr.bf16.gmra.mrb[72].mxu0 %v16083_v13  ;;  %v16113_v13 = vld [vmem:[#allocation2 + $0x50] sm:$0xff]  }
 0x6c0   : > { %9813 = vmatprep.mubr.bf16.mxu0 %v16085_v29  ;;  %14995 = vmatpush3.bf16.msra.mxu0 %v16094_v25  ;;  %v16111_v25 = vld [vmem:[#allocation2 + $0x78] sm:$0xff]  }
 0x6c1   : > { %14996 = vmatprep.subr.bf16.mxu0 %v16099_v1  ;;  %v16116_v29 = vld [vmem:[#allocation2 + $0x58] sm:$0xff]  }
 0x6c4   : > { %14997 = vmatpush3.bf16.msra.mxu0 %v16099_v1  ;;  %v16115_v1 = vld [vmem:[#allocation2 + $0x80] sm:$0xff]  }
 0x6c5   : > { %9895 = vmatmul.mubr.bf16.gmra.mrb[68].mxu1 %v16086_v3  ;;  %14998 = vmatprep.subr.bf16.mxu0 %v16104_v4  ;;  %v16119_v3 = vld [vmem:[#allocation2 + $0x80] sm:$0xff]  }
 0x6c6   : > { %9902 = vmatprep.mubr.bf16.mxu1 %v16087_v61  ;;  %v16118_v61 = vld [vmem:[#allocation2 + $0x70] sm:$0xff]  }
 0x6c7   : > { %9814 = vmatmul.mubr.bf16.gmra.mrb[76].mxu0 %v16088_v37  ;;  %v16120_v37 = vld [vmem:[#allocation2 + $0x88] sm:$0xff]  }
 0x6c8   : > { %9821 = vmatprep.mubr.bf16.mxu0 %v16090_v30  ;;  %14999 = vmatpush3.bf16.msra.mxu0 %v16104_v4  ;;  %v16117_v4 = vld [vmem:[#allocation2 + $0x68] sm:$0xff]  }
 0x6c9   : > { %15000 = vmatprep.subr.bf16.mxu0 %v16108_v35  ;;  %v16122_v30 = vld [vmem:[%s18227_s4 + $0x8] sm:$0xff]  }
 0x6cc   : > { %15001 = vmatpush3.bf16.msra.mxu0 %v16108_v35  ;;  %v16121_v35 = vld [vmem:[%s18227_s4] sm:$0xff]  }
 0x6cd   : > { %9903 = vmatmul.mubr.bf16.gmra.mrb[72].mxu1 %v16091_v58  ;;  %15018 = vmatprep.subr.bf16.mxu1 %v16121_v35  ;;  %v16123_v58 = vld [vmem:[%s18227_s4 + $0x10] sm:$0xff]  }
 0x6ce   : > { %9910 = vmatprep.mubr.bf16.mxu1 %v16092_v57  ;;  %15019 = vmatpush3.bf16.msra.mxu1 %v16121_v35  ;;  %v16124_v57 = vld [vmem:[%s18227_s4 + $0x18] sm:$0xff]  }
 0x6cf   : > { %9822 = vmatmul.mubr.bf16.gmra.mrb[80].mxu0 %v16093_v28  ;;  %15020 = vmatprep.subr.bf16.mxu1 %v16122_v30  ;;  %v16126_v28 = vld [vmem:[%s18227_s4 + $0x28] sm:$0xff]  }
 0x6d0   : > { %9829 = vmatprep.mubr.bf16.mxu0 %v16095_v0 }
 0x6d2   : > { %15021 = vmatpush3.bf16.msra.mxu1 %v16122_v30 }
 0x6d3   : > { %15022 = vmatprep.subr.bf16.mxu1 %v16123_v58 }
 0x6d5   : > { %9911 = vmatmul.mubr.bf16.gmra.mrb[76].mxu1 %v16096_v59 }
 0x6d6   : > { %9918 = vmatprep.mubr.bf16.mxu1 %v16097_v23  ;;  %15023 = vmatpush3.bf16.msra.mxu1 %v16123_v58 }
 0x6d7   : > { %9830 = vmatmul.mubr.bf16.gmra.mrb[84].mxu0 %v16098_v17  ;;  %15024 = vmatprep.subr.bf16.mxu1 %v16124_v57 }
 0x6d8   : > { %9837 = vmatprep.mubr.bf16.mxu0 %v16100_v53 }
 0x6da   : > { %15025 = vmatpush3.bf16.msra.mxu1 %v16124_v57 }
 0x6db   : > { %15026 = vmatprep.subr.bf16.mxu1 %v16125_v45 }
 0x6dd   : > { %9919 = vmatmul.mubr.bf16.gmra.mrb[80].mxu1 %v16101_v20 }
 0x6de   : > { %9926 = vmatprep.mubr.bf16.mxu1 %v16102_v16  ;;  %15027 = vmatpush3.bf16.msra.mxu1 %v16125_v45 }
 0x6df   : > { %9838 = vmatmul.mubr.bf16.gmra.mrb[88].mxu0 %v16103_v10  ;;  %15028 = vmatprep.subr.bf16.mxu1 %v16126_v28 }
 0x6e0   : > { %9845 = vmatprep.mubr.bf16.mxu0 %v16105_v31 }
 0x6e2   : > { %15029 = vmatpush3.bf16.msra.mxu1 %v16126_v28 }
 0x6e3   : > { %15030 = vmatprep.subr.bf16.mxu1 %v16127_v62 }
 0x6e5   : > { %9927 = vmatmul.mubr.bf16.gmra.mrb[84].mxu1 %v16106_v12 }
 0x6e6   : > { %9934 = vmatprep.mubr.bf16.mxu1 %v16110_v39  ;;  %15031 = vmatpush3.bf16.msra.mxu1 %v16127_v62 }
 0x6e7   : > { %9846 = vmatmul.mubr.bf16.gmra.mrb[92].mxu0 %v16107_v56  ;;  %15032 = vmatprep.subr.bf16.mxu1 %v16128_v7 }
 0x6e8   : > { %15002 = vmatprep.mubr.bf16.mxu0 %v16109_v44 }
 0x6ea   : > { %15033 = vmatpush3.bf16.msra.mxu1 %v16128_v7 }
 0x6ed   : > { %9935 = vmatmul.mubr.bf16.gmra.mrb[88].mxu1 %v16111_v25 }
 0x6ee   : > { %9942 = vmatprep.mubr.bf16.mxu1 %v16114_v22 }
 0x6ef   : > { %15003 = vmatmul.mubr.bf16.vlgmr.msra.gmra.mrb[96].mxu0 %v16112_v11 }
 0x6f0   : > { %15006 = vmatprep.mubr.bf16.mxu0 %v16113_v13 }
 0x6f5   : > { %9943 = vmatmul.mubr.bf16.gmra.mrb[92].mxu1 %v16115_v1 }
 0x6f7   : > { %15007 = vmatmul.mubr.bf16.gmra.mrb[100].mxu0 %v16116_v29 }
 0x6f8   : > { %15010 = vmatprep.mubr.bf16.mxu0 %v16117_v4 }
 0x6ff   : > { %15011 = vmatmul.mubr.bf16.gmra.mrb[104].mxu0 %v16118_v61 }
 0x700   : > { %15014 = vmatprep.mubr.bf16.mxu0 %v16119_v3 }
 0x707   : > { %15015 = vmatmul.mubr.bf16.gmra.mrb[108].mxu0 %v16120_v37 }
 0x750   : > { %v14567_v0 = vpop.f32.mrb[32].mxu1 }
 0x751   : > { %v14568_v50 = vpop.f32.mrb[33].mxu1 }
 0x752   : > { %v14569_v34 = vadd.f32 %v14568_v50, %v14567_v0  ;;  %v14515_v59 = vpop.f32.mrb[40].mxu0  ;;  %v14570_v23 = vpop.f32.mrb[34].mxu1 }
 0x753   : > { %v14516_v36 = vpop.f32.mrb[41].mxu0  ;;  %v14571_v17 = vpop.f32.mrb[35].mxu1 }
 0x754   : > { %v17600_v53 = vadd.f32 %v14569_v34, %v17567_v5  ;;  %v14517_v43 = vadd.f32 %v14516_v36, %v14515_v59  ;;  %v14572_v47 = vadd.f32 %v14571_v17, %v14570_v23  ;;  %v14518_v20 = vpop.f32.mrb[42].mxu0 }
 0x755   : > { %v14519_v16 = vpop.f32.mrb[43].mxu0 }
 0x756   : > { %v17603_v10 = vadd.f32 %v14572_v47, %v17569_v55  ;;  %v14520_v31 = vadd.f32 %v14519_v16, %v14518_v20 }
 0x758   : > { %v14573_v39 = vpop.f32.mrb[36].mxu1 }
 0x759   : > { %v14574_v12 = vpop.f32.mrb[37].mxu1 }
 0x75a   : > { %v14575_v56 = vadd.f32 %v14574_v12, %v14573_v39  ;;  %v14521_v44 = vpop.f32.mrb[44].mxu0  ;;  %v14576_v25 = vpop.f32.mrb[38].mxu1 }
 0x75b   : > { %v14522_v22 = vpop.f32.mrb[45].mxu0  ;;  %v14577_v11 = vpop.f32.mrb[39].mxu1 }
 0x75c   : > { %v17606_v5 = vadd.f32 %v14575_v56, %v17571_v14  ;;  %v14523_v13 = vadd.f32 %v14522_v22, %v14521_v44  ;;  %v14578_v1 = vadd.f32 %v14577_v11, %v14576_v25  ;;  %v14524_v29 = vpop.f32.mrb[46].mxu0  ;;  %v16458_v56 = vmov 0.0   ;;  %v10375_v44 = vld [vmem:[%s18281_s29] sm:$0x3] }
 0x75d   : > { %v14525_v4 = vpop.f32.mrb[47].mxu0  ;;  %15050 = vmatprep.subr.bf16.mxu0 %v16458_v56  ;;  %15056 = vmatprep.subr.bf16.mxu1 %v16458_v56  ;;  %v16459_v11 = vmov 65535  }
 0x75e   : > { %v17609_v3 = vadd.f32 %v14578_v1, %v17573_v54  ;;  %v14526_v55 = vadd.f32 %v14525_v4, %v14524_v29  ;;  %15052 = vmatprep.mubr.msk.bf16.mxu0 %vm16460_vm2, %v16458_v56 }
 0x760   : > { %v14579_v61 = vpop.f32.mrb[40].mxu1 }
 0x761   : > { %v14580_v37 = vpop.f32.mrb[41].mxu1 }
 0x762   : > { %v14581_v35 = vadd.f32 %v14580_v37, %v14579_v61  ;;  %v14527_v30 = vpop.f32.mrb[48].mxu0  ;;  %v14582_v58 = vpop.f32.mrb[42].mxu1 }
 0x763   : > { %v14528_v57 = vpop.f32.mrb[49].mxu0  ;;  %v14583_v45 = vpop.f32.mrb[43].mxu1 }
 0x764   : > { %v17611_v28 = vadd.f32 %v14581_v35, %v14517_v43  ;;  %v14529_v62 = vadd.f32 %v14528_v57, %v14527_v30  ;;  %v14584_v14 = vadd.f32 %v14583_v45, %v14582_v58  ;;  %v14530_v0 = vpop.f32.mrb[50].mxu0 }
 0x765   : > { %v14531_v50 = vpop.f32.mrb[51].mxu0 }
 0x766   : > { %v17613_v34 = vadd.f32 %v14584_v14, %v14520_v31  ;;  %v14532_v59 = vadd.f32 %v14531_v50, %v14530_v0 }
 0x768   : > { %v14585_v23 = vpop.f32.mrb[44].mxu1 }
 0x769   : > { %v14586_v54 = vpop.f32.mrb[45].mxu1 }
 0x76a   : > { %v14587_v36 = vadd.f32 %v14586_v54, %v14585_v23  ;;  %v14533_v17 = vpop.f32.mrb[52].mxu0  ;;  %v14588_v7 = vpop.f32.mrb[46].mxu1 }
 0x76b   : > { %v14534_v47 = vpop.f32.mrb[53].mxu0  ;;  %v14589_v20 = vpop.f32.mrb[47].mxu1 }
 0x76c   : > { %v17615_v16 = vadd.f32 %v14587_v36, %v14523_v13  ;;  %v14535_v39 = vadd.f32 %v14534_v47, %v14533_v17  ;;  %v14590_v43 = vadd.f32 %v14589_v20, %v14588_v7  ;;  %v14536_v12 = vpop.f32.mrb[54].mxu0  ;;  %v10397_v13 = vsel %vm10395_vm0, 4294967295, %v16459_v11 }
 0x76d   : > { %v14537_v31 = vpop.f32.mrb[55].mxu0  ;;  %v17624_v1 = vsel %vm10396_vm1, %v10397_v13, 0 }
 0x76e   : > { %v17622_v25 = vadd.f32 %v14590_v43, %v14526_v55  ;;  %v14538_v22 = vadd.f32 %v14537_v31, %v14536_v12  ;;  %v10400_v4 = vand.u32 %v17624_v1, %v10375_v44 }
 0x770   : > { %v14591_v29 = vpop.f32.mrb[48].mxu1  ;;  %15051 = vmatpush3.bf16.msra.mxu0 %v10400_v4 }
 0x771   : > { %v14592_v61 = vpop.f32.mrb[49].mxu1  ;;  %15062 = vmatprep.subr.bf16.mxu0 %v16458_v56 }
 0x772   : > { %v14593_v37 = vadd.f32 %v14592_v61, %v14591_v29  ;;  %v14539_v35 = vpop.f32.mrb[56].mxu0  ;;  %v14594_v30 = vpop.f32.mrb[50].mxu1 }
 0x773   : > { %v14540_v58 = vpop.f32.mrb[57].mxu0  ;;  %v14595_v57 = vpop.f32.mrb[51].mxu1 }
 0x774   : > { %v17628_v45 = vadd.f32 %v14593_v37, %v14529_v62  ;;  %v14541_v55 = vadd.f32 %v14540_v58, %v14539_v35  ;;  %v14596_v14 = vadd.f32 %v14595_v57, %v14594_v30  ;;  %v14542_v0 = vpop.f32.mrb[58].mxu0 }
 0x775   : > { %v14543_v50 = vpop.f32.mrb[59].mxu0 }
 0x776   : > { %v17630_v23 = vadd.f32 %v14596_v14, %v14532_v59  ;;  %v14544_v54 = vadd.f32 %v14543_v50, %v14542_v0 }
 0x778   : > { %v14597_v36 = vpop.f32.mrb[52].mxu1 }
 0x779   : > { %v14598_v17 = vpop.f32.mrb[53].mxu1 }
 0x77a   : > { %v14599_v7 = vadd.f32 %v14598_v17, %v14597_v36  ;;  %v14545_v47 = vpop.f32.mrb[60].mxu0  ;;  %v14600_v20 = vpop.f32.mrb[54].mxu1 }
 0x77b   : > { %v14546_v43 = vpop.f32.mrb[61].mxu0  ;;  %v14601_v12 = vpop.f32.mrb[55].mxu1 }
 0x77c   : > { %v17632_v31 = vadd.f32 %v14599_v7, %v14535_v39  ;;  %v14547_v44 = vadd.f32 %v14546_v43, %v14545_v47  ;;  %v14602_v11 = vadd.f32 %v14601_v12, %v14600_v20  ;;  %v14548_v62 = vpop.f32.mrb[62].mxu0 }
 0x77d   : > { %v14549_v13 = vpop.f32.mrb[63].mxu0 }
 0x77e   : > { %v17634_v29 = vadd.f32 %v14602_v11, %v14538_v22  ;;  %v14550_v4 = vadd.f32 %v14549_v13, %v14548_v62 }
 0x780   : > { %v14603_v61 = vpop.f32.mrb[56].mxu1 }
 0x781   : > { %v14604_v59 = vpop.f32.mrb[57].mxu1 }
 0x782   : > { %v14605_v37 = vadd.f32 %v14604_v59, %v14603_v61  ;;  %v14606_v35 = vpop.f32.mrb[58].mxu1  ;;  %v14631_v30 = vpop.f32.mrb[64].mxu0 }
 0x783   : > { %v14607_v58 = vpop.f32.mrb[59].mxu1  ;;  %v14632_v57 = vpop.f32.mrb[65].mxu0 }
 0x784   : > { %v17636_v14 = vadd.f32 %v14605_v37, %v14541_v55  ;;  %v14608_v0 = vadd.f32 %v14607_v58, %v14606_v35  ;;  %v14633_v50 = vadd.f32 %v14632_v57, %v14631_v30  ;;  %v14634_v39 = vpop.f32.mrb[66].mxu0 }
 0x785   : > { %v14635_v36 = vpop.f32.mrb[67].mxu0 }
 0x786   : > { %v17638_v17 = vadd.f32 %v14608_v0, %v14544_v54  ;;  %v9792_v7 = vadd.f32 %v14633_v50, %v17600_v53  ;;  %v14636_v22 = vadd.f32 %v14635_v36, %v14634_v39 }
 0x788   : > { %v9795_v47 = vadd.f32 %v14636_v22, %v17603_v10  ;;  %v14609_v20 = vpop.f32.mrb[60].mxu1 }
 0x789   : > { %v14610_v43 = vpop.f32.mrb[61].mxu1 }
 0x78a   : > { %v14611_v12 = vadd.f32 %v14610_v43, %v14609_v20  ;;  %v14612_v11 = vpop.f32.mrb[62].mxu1  ;;  %v14637_v62 = vpop.f32.mrb[68].mxu0 }
 0x78b   : > { %v14613_v13 = vpop.f32.mrb[63].mxu1  ;;  %v14638_v61 = vpop.f32.mrb[69].mxu0 }
 0x78c   : > { %v17642_v55 = vadd.f32 %v14611_v12, %v14547_v44  ;;  %v14614_v59 = vadd.f32 %v14613_v13, %v14612_v11  ;;  %v14639_v37 = vadd.f32 %v14638_v61, %v14637_v62  ;;  %v14640_v35 = vpop.f32.mrb[70].mxu0 }
 0x78d   : > { %v14641_v30 = vpop.f32.mrb[71].mxu0 }
 0x78e   : > { %v17644_v54 = vadd.f32 %v14614_v59, %v14550_v4  ;;  %v9800_v53 = vadd.f32 %v14639_v37, %v17606_v5  ;;  %v14642_v58 = vadd.f32 %v14641_v30, %v14640_v35 }
 0x790   : > { %v9803_v10 = vadd.f32 %v14642_v58, %v17609_v3  ;;  %v14695_v57 = vpop.f32.mrb[64].mxu1 }
 0x791   : > { %v14696_v0 = vpop.f32.mrb[65].mxu1 }
 0x792   : > { %v14697_v50 = vadd.f32 %v14696_v0, %v14695_v57  ;;  %v14643_v39 = vpop.f32.mrb[72].mxu0  ;;  %v14698_v36 = vpop.f32.mrb[66].mxu1 }
 0x793   : > { %v14644_v22 = vpop.f32.mrb[73].mxu0  ;;  %v14699_v20 = vpop.f32.mrb[67].mxu1 }
 0x794   : > { %v14645_v44 = vadd.f32 %v14644_v22, %v14643_v39  ;;  %v14700_v43 = vadd.f32 %v14699_v20, %v14698_v36  ;;  %v14646_v12 = vpop.f32.mrb[74].mxu0  ;;  %v17648_v11 = vadd.f32 %v14697_v50, %v9792_v7 }
 0x795   : > { %v14647_v62 = vpop.f32.mrb[75].mxu0 }
 0x796   : > { %v9808_v4 = vadd.f32 %v14645_v44, %v17611_v28  ;;  %v14648_v13 = vadd.f32 %v14647_v62, %v14646_v12  ;;  %v17651_v5 = vadd.f32 %v14700_v43, %v9795_v47 }
 0x798   : > { %v9811_v3 = vadd.f32 %v14648_v13, %v17613_v34  ;;  %v14701_v61 = vpop.f32.mrb[68].mxu1 }
 0x799   : > { %v14702_v59 = vpop.f32.mrb[69].mxu1 }
 0x79a   : > { %v14703_v37 = vadd.f32 %v14702_v59, %v14701_v61  ;;  %v14649_v35 = vpop.f32.mrb[76].mxu0  ;;  %v14704_v30 = vpop.f32.mrb[70].mxu1 }
 0x79b   : > { %v14650_v58 = vpop.f32.mrb[77].mxu0  ;;  %v14705_v57 = vpop.f32.mrb[71].mxu1 }
 0x79c   : > { %v14651_v0 = vadd.f32 %v14650_v58, %v14649_v35  ;;  %v14706_v39 = vadd.f32 %v14705_v57, %v14704_v30  ;;  %v14652_v36 = vpop.f32.mrb[78].mxu0  ;;  %v17654_v7 = vadd.f32 %v14703_v37, %v9800_v53 }
 0x79d   : > { %v14653_v50 = vpop.f32.mrb[79].mxu0 }
 0x79e   : > { %v9816_v28 = vadd.f32 %v14651_v0, %v17615_v16  ;;  %v14654_v22 = vadd.f32 %v14653_v50, %v14652_v36  ;;  %v17657_v47 = vadd.f32 %v14706_v39, %v9803_v10 }
 0x7a0   : > { %v9819_v34 = vadd.f32 %v14654_v22, %v17622_v25  ;;  %v14707_v20 = vpop.f32.mrb[72].mxu1 }
 0x7a1   : > { %v14708_v44 = vpop.f32.mrb[73].mxu1 }
 0x7a2   : > { %v14709_v43 = vadd.f32 %v14708_v44, %v14707_v20  ;;  %v14655_v12 = vpop.f32.mrb[80].mxu0  ;;  %v14710_v62 = vpop.f32.mrb[74].mxu1 }
 0x7a3   : > { %v14656_v13 = vpop.f32.mrb[81].mxu0  ;;  %v14711_v61 = vpop.f32.mrb[75].mxu1 }
 0x7a4   : > { %v14657_v59 = vadd.f32 %v14656_v13, %v14655_v12  ;;  %v14712_v35 = vadd.f32 %v14711_v61, %v14710_v62  ;;  %v14658_v30 = vpop.f32.mrb[82].mxu0  ;;  %v17660_v53 = vadd.f32 %v14709_v43, %v9808_v4 }
 0x7a5   : > { %v14659_v37 = vpop.f32.mrb[83].mxu0 }
 0x7a6   : > { %v9824_v16 = vadd.f32 %v14657_v59, %v17628_v45  ;;  %v14660_v58 = vadd.f32 %v14659_v37, %v14658_v30  ;;  %v17663_v10 = vadd.f32 %v14712_v35, %v9811_v3 }
 0x7a8   : > { %v9827_v25 = vadd.f32 %v14660_v58, %v17630_v23  ;;  %v14713_v57 = vpop.f32.mrb[76].mxu1 }
 0x7a9   : > { %v14714_v0 = vpop.f32.mrb[77].mxu1 }
 0x7aa   : > { %v14715_v39 = vadd.f32 %v14714_v0, %v14713_v57  ;;  %v14661_v36 = vpop.f32.mrb[84].mxu0  ;;  %v14716_v50 = vpop.f32.mrb[78].mxu1 }
 0x7ab   : > { %v14662_v22 = vpop.f32.mrb[85].mxu0  ;;  %v14717_v20 = vpop.f32.mrb[79].mxu1 }
 0x7ac   : > { %v14663_v44 = vadd.f32 %v14662_v22, %v14661_v36  ;;  %v14718_v12 = vadd.f32 %v14717_v20, %v14716_v50  ;;  %v14664_v62 = vpop.f32.mrb[86].mxu0  ;;  %v17666_v4 = vadd.f32 %v14715_v39, %v9816_v28 }
 0x7ad   : > { %v14665_v43 = vpop.f32.mrb[87].mxu0 }
 0x7ae   : > { %v9832_v45 = vadd.f32 %v14663_v44, %v17632_v31  ;;  %v14666_v13 = vadd.f32 %v14665_v43, %v14664_v62  ;;  %v17669_v3 = vadd.f32 %v14718_v12, %v9819_v34 }
 0x7b0   : > { %v9835_v23 = vadd.f32 %v14666_v13, %v17634_v29  ;;  %v14719_v61 = vpop.f32.mrb[80].mxu1 }
 0x7b1   : > { %v14720_v59 = vpop.f32.mrb[81].mxu1 }
 0x7b2   : > { %v14721_v35 = vadd.f32 %v14720_v59, %v14719_v61  ;;  %v14667_v30 = vpop.f32.mrb[88].mxu0  ;;  %v14722_v37 = vpop.f32.mrb[82].mxu1 }
 0x7b3   : > { %v14668_v58 = vpop.f32.mrb[89].mxu0  ;;  %v14723_v57 = vpop.f32.mrb[83].mxu1 }
 0x7b4   : > { %v14669_v0 = vadd.f32 %v14668_v58, %v14667_v30  ;;  %v14724_v36 = vadd.f32 %v14723_v57, %v14722_v37  ;;  %v14670_v50 = vpop.f32.mrb[90].mxu0  ;;  %v17672_v28 = vadd.f32 %v14721_v35, %v9824_v16 }
 0x7b5   : > { %v14671_v39 = vpop.f32.mrb[91].mxu0 }
 0x7b6   : > { %v9840_v31 = vadd.f32 %v14669_v0, %v17636_v14  ;;  %v14672_v22 = vadd.f32 %v14671_v39, %v14670_v50  ;;  %v17675_v34 = vadd.f32 %v14724_v36, %v9827_v25 }
 0x7b8   : > { %v9843_v29 = vadd.f32 %v14672_v22, %v17638_v17  ;;  %v14725_v20 = vpop.f32.mrb[84].mxu1  ;;  %v17684_v22 = vld [vmem:[#allocation9 + $0x4] ss:$0 sm:$0xff] }
 0x7b9   : > { %v14726_v44 = vpop.f32.mrb[85].mxu1 }
 0x7ba   : > { %v14727_v12 = vadd.f32 %v14726_v44, %v14725_v20  ;;  %v14673_v62 = vpop.f32.mrb[92].mxu0  ;;  %v14728_v43 = vpop.f32.mrb[86].mxu1 }
 0x7bb   : > { %v14674_v13 = vpop.f32.mrb[93].mxu0  ;;  %v14729_v61 = vpop.f32.mrb[87].mxu1 }
 0x7bc   : > { %v14675_v59 = vadd.f32 %v14674_v13, %v14673_v62  ;;  %v14730_v30 = vadd.f32 %v14729_v61, %v14728_v43  ;;  %v14676_v37 = vpop.f32.mrb[94].mxu0  ;;  %v17678_v16 = vadd.f32 %v14727_v12, %v9832_v45  ;;  %v17687_v12 = vld [vmem:[#allocation11 + $0x4] ss:$0 sm:$0xff] }
 0x7bd   : > { %v14677_v35 = vpop.f32.mrb[95].mxu0 }
 0x7be   : > { %v9848_v14 = vadd.f32 %v14675_v59, %v17642_v55  ;;  %v14678_v58 = vadd.f32 %v14677_v35, %v14676_v37  ;;  %v17681_v25 = vadd.f32 %v14730_v30, %v9835_v23 }
 0x7c0   : > { %v9851_v17 = vadd.f32 %v14678_v58, %v17644_v54  ;;  %v14731_v57 = vpop.f32.mrb[88].mxu1 }
 0x7c1   : > { %v14732_v0 = vpop.f32.mrb[89].mxu1 }
 0x7c2   : > { %v14733_v36 = vadd.f32 %v14732_v0, %v14731_v57  ;;  %v14734_v50 = vpop.f32.mrb[90].mxu1  ;;  %v15004_v39 = vpop.f32.mrb[96].mxu0 }
 0x7c3   : > { %v9994_v20 = vadd.f32 %v15004_v39, %v17654_v7  ;;  %v14735_v44 = vpop.f32.mrb[91].mxu1  ;;  %v9985_v45 = vpop.f32.mrb[97].mxu0 }
 0x7c4   : > { %v14736_v62 = vadd.f32 %v14735_v44, %v14734_v50  ;;  %v9986_v55 = vadd.f32 %v9985_v45, %v17648_v11  ;;  %v15005_v23 = vpop.f32.mrb[98].mxu0  ;;  %v17690_v43 = vadd.f32 %v14733_v36, %v9840_v31 }
 0x7c5   : > { %v10058_v54 = vmul.f32 %v17684_v22, %v9994_v20  ;;  %v9997_v13 = vadd.f32 %v15005_v23, %v17657_v47  ;;  %v9988_v61 = vpop.f32.mrb[99].mxu0 }
 0x7c6   : > { %v10056_v59 = vmul.f32 %v17684_v22, %v9986_v55  ;;  %v9989_v30 = vadd.f32 %v9988_v61, %v17651_v5  ;;  %v17696_v7 = vadd.f32 %v14736_v62, %v9843_v29 }
 0x7c7   : > { %v10082_v37 = vadd.f32 %v17687_v12, %v10058_v54  ;;  %v10059_v35 = vmul.f32 %v17684_v22, %v9997_v13 }
 0x7c8   : > { %v10080_v11 = vadd.f32 %v17687_v12, %v10056_v59  ;;  %v10057_v31 = vmul.f32 %v17684_v22, %v9989_v30  ;;  %v14737_v58 = vpop.f32.mrb[92].mxu1 }
 0x7c9   : > { %v10098_v57 = vadd.f32 %v10082_v37, %v6342_v26  ;;  %v10083_v47 = vadd.f32 %v17687_v12, %v10059_v35  ;;  %v14738_v0 = vpop.f32.mrb[93].mxu1 }
 0x7ca   : > { %v10081_v36 = vadd.f32 %v17687_v12, %v10057_v31  ;;  %v14739_v5 = vadd.f32 %v14738_v0, %v14737_v58  ;;  %v14740_v29 = vpop.f32.mrb[94].mxu1  ;;  %v15008_v50 = vpop.f32.mrb[100].mxu0  ;;  %v10096_v39 = vadd.f32 %v10080_v11, %v17296_v51 }
 0x7cb   : > { %v10114_v20 = vmax.f32 %v10098_v57, 0.0  ;;  %v10099_v44 = vadd.f32 %v10083_v47, %v17303_v48  ;;  %v10010_v45 = vadd.f32 %v15008_v50, %v17666_v4  ;;  %v14741_v62 = vpop.f32.mrb[95].mxu1  ;;  %v10001_v55 = vpop.f32.mrb[101].mxu0  ;;  %v10376_v48 = vld [vmem:[%s18281_s29 + $0x2] sm:$0x3] }
 0x7cc   : > { %v14742_v23 = vadd.f32 %v14741_v62, %v14740_v29  ;;  %v10002_v18 = vadd.f32 %v10001_v55, %v17660_v53  ;;  %v15009_v26 = vpop.f32.mrb[102].mxu0  ;;  %v10097_v54 = vadd.f32 %v10081_v36, %v6341_v38  ;;  %v10112_v13 = vmax.f32 %v10096_v39, 0.0 }
 0x7cd   : > { %v10115_v61 = vmax.f32 %v10099_v44, 0.0  ;;  %v10062_v59 = vmul.f32 %v17684_v22, %v10010_v45  ;;  %v10013_v51 = vadd.f32 %v15009_v26, %v17669_v3  ;;  %v10004_v30 = vpop.f32.mrb[103].mxu0  ;;  %v9945_v37 = vadd.f32 %v14739_v5, %v9848_v14 }
 0x7ce   : > { %v10060_v4 = vmul.f32 %v17684_v22, %v10002_v18  ;;  %v10005_v53 = vadd.f32 %v10004_v30, %v17663_v10  ;;  %v10113_v35 = vmax.f32 %v10097_v54, 0.0  ;;  %v9948_v11 = vadd.f32 %v14742_v23, %v9851_v17 }
 0x7cf   : > { %v10129_v32 = vpack.c.bf16 %v10115_v61, %v10114_v20  ;;  %v10086_v38 = vadd.f32 %v17687_v12, %v10062_v59  ;;  %v10063_v31 = vmul.f32 %v17684_v22, %v10013_v51  ;;  %v10446_v57 = vand.u32 %v17624_v1, %v10376_v48 }
 0x7d0   : > { %v10084_v58 = vadd.f32 %v17687_v12, %v10060_v4  ;;  %v10061_v3 = vmul.f32 %v17684_v22, %v10005_v53  ;;  %v10128_v14 = vpack.c.bf16 %v10113_v35, %v10112_v13 }
 0x7d1   : > { %v10102_v47 = vadd.f32 %v10086_v38, %v6346_v15  ;;  %v10087_v0 = vadd.f32 %v17687_v12, %v10063_v31 }
 0x7d2   : > { %v10085_v10 = vadd.f32 %v17687_v12, %v10061_v3  ;;  %v15012_v17 = vpop.f32.mrb[104].mxu0  ;;  %15034 = vmatprep.mubr.bf16.mxu1 %v10128_v14  ;;  %v10100_v36 = vadd.f32 %v10084_v58, %v17333_v42 }
 0x7d3   : > { %v10103_v5 = vadd.f32 %v10087_v0, %v17341_v63  ;;  %v10026_v29 = vadd.f32 %v15012_v17, %v17678_v16  ;;  %v10017_v50 = vpop.f32.mrb[105].mxu0  ;;  %15035 = vmatmul.mubr.bf16.vlgmr.msra.gmra.mrb[96].mxu1 %v10129_v32  ;;  %v10118_v15 = vmax.f32 %v10102_v47, 0.0 }
 0x7d4   : > { %v10018_v39 = vadd.f32 %v10017_v50, %v17672_v28  ;;  %v15013_v20 = vpop.f32.mrb[106].mxu0  ;;  %v10101_v60 = vadd.f32 %v10085_v10, %v6345_v2  ;;  %15057 = vmatpush3.bf16.msra.mxu1 %v10446_v57  ;;  %v10116_v55 = vmax.f32 %v10100_v36, 0.0 }
 0x7d5   : > { %v10119_v44 = vmax.f32 %v10103_v5, 0.0  ;;  %v10066_v45 = vmul.f32 %v17684_v22, %v10026_v29  ;;  %v10029_v62 = vadd.f32 %v15013_v20, %v17681_v25  ;;  %v10020_v42 = vpop.f32.mrb[107].mxu0  ;;  %15068 = vmatprep.subr.bf16.mxu1 %v16458_v56 }
 0x7d6   : > { %v10064_v63 = vmul.f32 %v17684_v22, %v10018_v39  ;;  %v10021_v16 = vadd.f32 %v10020_v42, %v17675_v34  ;;  %v10117_v28 = vmax.f32 %v10101_v60, 0.0 }
 0x7d7   : > { %v10131_v23 = vpack.c.bf16 %v10119_v44, %v10118_v15  ;;  %v10090_v21 = vadd.f32 %v17687_v12, %v10066_v45  ;;  %v10067_v2 = vmul.f32 %v17684_v22, %v10029_v62  ;;  %v10377_v62 = vld [vmem:[%s18281_s29 + $0x4] sm:$0x3] }
 0x7d8   : > { %v10088_v18 = vadd.f32 %v17687_v12, %v10064_v63  ;;  %v10065_v26 = vmul.f32 %v17684_v22, %v10021_v16  ;;  %v10130_v54 = vpack.c.bf16 %v10117_v28, %v10116_v55  ;;  %v10378_v28 = vld [vmem:[%s18281_s29 + $0x6] sm:$0x3] }
 0x7d9   : > { %v10106_v25 = vadd.f32 %v10090_v21, %v6350_v24  ;;  %v10091_v13 = vadd.f32 %v17687_v12, %v10067_v2  ;;  %v10492_v2 = vand.u32 %v17624_v1, %v10377_v62 }
 0x7da   : > { %v10089_v61 = vadd.f32 %v17687_v12, %v10065_v26  ;;  %v15016_v34 = vpop.f32.mrb[108].mxu0  ;;  %15038 = vmatprep.mubr.bf16.mxu1 %v10130_v54  ;;  %v10104_v59 = vadd.f32 %v10088_v18, %v17368_v27 }
 0x7db   : > { %v10107_v51 = vadd.f32 %v10091_v13, %v17376_v6  ;;  %v10042_v30 = vadd.f32 %v15016_v34, %v9945_v37  ;;  %v10033_v48 = vpop.f32.mrb[109].mxu0  ;;  %15039 = vmatmul.mubr.bf16.gmra.mrb[100].mxu1 %v10131_v23  ;;  %v10122_v24 = vmax.f32 %v10106_v25, 0.0 }
 0x7dc   : > { %v10034_v4 = vadd.f32 %v10033_v48, %v17690_v43  ;;  %v15017_v53 = vpop.f32.mrb[110].mxu0  ;;  %v10105_v8 = vadd.f32 %v10089_v61, %v6349_v52  ;;  %v10120_v6 = vmax.f32 %v10104_v59, 0.0  ;;  %v10538_v61 = vand.u32 %v17624_v1, %v10378_v28 }
 0x7dd   : > { %v10123_v35 = vmax.f32 %v10107_v51, 0.0  ;;  %v10070_v32 = vmul.f32 %v17684_v22, %v10042_v30  ;;  %v10045_v38 = vadd.f32 %v15017_v53, %v9948_v11  ;;  %v10036_v31 = vpop.f32.mrb[111].mxu0 }
 0x7de   : > { %v10068_v58 = vmul.f32 %v17684_v22, %v10034_v4  ;;  %v10037_v27 = vadd.f32 %v10036_v31, %v17696_v7  ;;  %v10121_v37 = vmax.f32 %v10105_v8, 0.0 }
 0x7df   : > { %v10133_v3 = vpack.c.bf16 %v10123_v35, %v10122_v24  ;;  %v10094_v14 = vadd.f32 %v17687_v12, %v10070_v32  ;;  %v10071_v43 = vmul.f32 %v17684_v22, %v10045_v38  ;;  %v10379_v35 = vld [vmem:[%s18281_s29 + $0x8] sm:$0x3] }
 0x7e0   : > { %v10092_v41 = vadd.f32 %v17687_v12, %v10068_v58  ;;  %v10069_v52 = vmul.f32 %v17684_v22, %v10037_v27  ;;  %v10132_v57 = vpack.c.bf16 %v10121_v37, %v10120_v6  ;;  %v10380_v58 = vld [vmem:[%s18281_s29 + $0xa] sm:$0x3]  ;;  %v10584_v27 = vand.u32 %v17624_v1, %v10379_v35 }
 0x7e1   : > { %v10110_v11 = vadd.f32 %v10094_v14, %v6354_v33  ;;  %v10095_v47 = vadd.f32 %v17687_v12, %v10071_v43 }
 0x7e2   : > { %v10093_v0 = vadd.f32 %v17687_v12, %v10069_v52  ;;  %15042 = vmatprep.mubr.bf16.mxu1 %v10132_v57  ;;  %v10108_v7 = vadd.f32 %v10092_v41, %v17403_v19  ;;  %v17771_v19 = vld [vmem:[#allocation12] ss:$0 sm:$0xff]  ;;  %v10630_v52 = vand.u32 %v17624_v1, %v10380_v58  ;;  %v10387_v58 = vld [vmem:[%s18281_s29 + $0x18] sm:$0x3] }
 0x7e3   : > { %v10111_v10 = vadd.f32 %v10095_v47, %v17409_v46  ;;  %15043 = vmatmul.mubr.bf16.gmra.mrb[104].mxu1 %v10133_v3  ;;  %v10126_v36 = vmax.f32 %v10110_v11, 0.0 }
 0x7e4   : > { %v10109_v17 = vadd.f32 %v10093_v0, %v6353_v49  ;;  %v10124_v22 = vmax.f32 %v10108_v7, 0.0 }
 0x7e5   : > { %v10127_v5 = vmax.f32 %v10111_v10, 0.0 }
 0x7e6   : > { %v10125_v29 = vmax.f32 %v10109_v17, 0.0 }
 0x7e7   : > { %v10135_v50 = vpack.c.bf16 %v10127_v5, %v10126_v36 }
 0x7e8   : > { %v10134_v40 = vpack.c.bf16 %v10125_v29, %v10124_v22  ;;  %v10381_v29 = vld [vmem:[%s18281_s29 + $0xc] sm:$0x3] }
 0x7ea   : > { %15046 = vmatprep.mubr.bf16.mxu1 %v10134_v40 }
 0x7eb   : > { %15047 = vmatmul.mubr.bf16.gmra.mrb[108].mxu1 %v10135_v50 }
 0x7ec   : > { %15058 = vmatprep.mubr.msk.bf16.mxu1 %vm16460_vm2, %v16458_v56 }
 0x8a6   : > { %v15036_v46 = vpop.f32.mrb[96].mxu1 }
 0x8a7   : > { %v10306_v33 = vmul.f32 %v15036_v46, %v17771_v19  ;;  %v10234_v49 = vpop.f32.mrb[97].mxu1 }
 0x8a8   : > { %v10304_v12 = vmul.f32 %v17771_v19, %v10234_v49  ;;  %v15037_v39 = vpop.f32.mrb[98].mxu1  ;;  %v10382_v49 = vld [vmem:[%s18281_s29 + $0xe] sm:$0x3] }
 0x8a9   : > { %v10307_v20 = vmul.f32 %v15037_v39, %v17771_v19  ;;  %v10237_v60 = vpop.f32.mrb[99].mxu1  ;;  %v10329_v15 = vadd.f32 %v17773_v9, %v10306_v33  ;;  %v10676_v39 = vand.u32 %v17624_v1, %v10381_v29  ;;  %v10722_v62 = vand.u32 %v17624_v1, %v10382_v49  ;;  %v16137_v29 = vld [vmem:[%s18282_s7 + $0x80] sm:$0xff]   ;;  %v16140_v49 = vld [vmem:[%s18282_s7 + $0xa8] sm:$0xff]  }
 0x8aa   : > { %v10305_v44 = vmul.f32 %v17771_v19, %v10237_v60  ;;  %v10327_v45 = vadd.f32 %v17773_v9, %v10304_v12 }
 0x8ab   : > { %v10330_v42 = vadd.f32 %v17773_v9, %v10307_v20  ;;  %v10345_v63 = vmax.f32 %v10329_v15, 0.0 }
 0x8ac   : > { %v10328_v16 = vadd.f32 %v17773_v9, %v10305_v44  ;;  %v10343_v55 = vmax.f32 %v10327_v45, 0.0 }
 0x8ad   : > { %v10346_v23 = vmax.f32 %v10330_v42, 0.0  ;;  %v10361_v21 = vpack.c.bf16 %v10345_v63, %v10345_v63 }
 0x8ae   : > { %v10344_v18 = vmax.f32 %v10328_v16, 0.0  ;;  %v15040_v26 = vpop.f32.mrb[100].mxu1  ;;  %v10359_v54 = vpack.c.bf16 %v10343_v55, %v10343_v55 }
 0x8af   : > { %v10310_v25 = vmul.f32 %v15040_v26, %v17771_v19  ;;  %11424 = vrot.lane.b32.xlu1 %v10361_v21, %s16461_s25  ;;  %v10250_v13 = vpop.f32.mrb[101].mxu1  ;;  %v10362_v30 = vpack.c.bf16 %v10346_v23, %v10346_v23 }
 0x8b0   : > { %v10360_v34 = vpack.c.bf16 %v10344_v18, %v10344_v18  ;;  %v10308_v59 = vmul.f32 %v17771_v19, %v10250_v13  ;;  %11308 = vrot.lane.b32.xlu0 %v10359_v54, %s16461_s25  ;;  %v15041_v51 = vpop.f32.mrb[102].mxu1  ;;  %15053 = vmatmul.mubr.msk.bf16.vlgmr.msra.gmra.mrb[112].mxu0 %vm10391_vm3, %v10359_v54  ;;  %v10383_v54 = vld [vmem:[%s18281_s29 + $0x10] sm:$0x3] }
 0x8b1   : > { %v10311_v48 = vmul.f32 %v15041_v51, %v17771_v19  ;;  %v10253_v4 = vpop.f32.mrb[103].mxu1  ;;  %15063 = vmatpush3.bf16.msra.mxu0 %v10492_v2  ;;  %15064 = vmatprep.mubr.msk.bf16.mxu0 %vm16460_vm2, %v16458_v56  ;;  %v10333_v53 = vadd.f32 %v17773_v9, %v10310_v25 }
 0x8b2   : > { %v10331_v8 = vadd.f32 %v17773_v9, %v10308_v59  ;;  %v10309_v24 = vmul.f32 %v17771_v19, %v10253_v4  ;;  %15059 = vmatmul.mubr.msk.bf16.vlgmr.msra.gmra.mrb[112].mxu1 %vm10391_vm3, %v10360_v34  ;;  %15074 = vmatprep.subr.bf16.mxu0 %v16458_v56  ;;  %v10768_v59 = vand.u32 %v17624_v1, %v10383_v54 }
 0x8b3   : > { %11482 = vrot.lane.b32.xlu1 %v10362_v30, %s16461_s25  ;;  %15069 = vmatpush3.bf16.msra.mxu1 %v10538_v61  ;;  %v10334_v38 = vadd.f32 %v17773_v9, %v10311_v48  ;;  %v10349_v6 = vmax.f32 %v10333_v53, 0.0 }
 0x8b4   : > { %v10347_v32 = vmax.f32 %v10331_v8, 0.0  ;;  %v10332_v31 = vadd.f32 %v17773_v9, %v10309_v24  ;;  %11366 = vrot.lane.b32.xlu0 %v10360_v34, %s16461_s25  ;;  %15070 = vmatprep.mubr.msk.bf16.mxu1 %vm16460_vm2, %v16458_v56  ;;  %v10385_v24 = vld [vmem:[%s18281_s29 + $0x14] sm:$0x3] }
 0x8b5   : > { %15080 = vmatprep.subr.bf16.mxu1 %v16458_v56  ;;  %v10350_v57 = vmax.f32 %v10334_v38, 0.0  ;;  %v10365_v36 = vpack.c.bf16 %v10349_v6, %v10349_v6  ;;  %v10860_v38 = vand.u32 %v17624_v1, %v10385_v24  ;;  %v10952_v6 = vand.u32 %v17624_v1, %v10387_v58 }
 0x8b6   : > { %v10363_v37 = vpack.c.bf16 %v10347_v32, %v10347_v32  ;;  %v10348_v3 = vmax.f32 %v10332_v31, 0.0  ;;  %v15044_v14 = vpop.f32.mrb[104].mxu1  ;;  %v10386_v32 = vld [vmem:[%s18281_s29 + $0x16] sm:$0x3] }
 0x8b7   : > { %v10314_v43 = vmul.f32 %v15044_v14, %v17771_v19  ;;  %v10266_v41 = vpop.f32.mrb[105].mxu1  ;;  %v10366_v50 = vpack.c.bf16 %v10350_v57, %v10350_v57  ;;  %v10906_v31 = vand.u32 %v17624_v1, %v10386_v32  ;;  %v10390_v14 = vld [vmem:[%s18281_s29 + $0x1e] sm:$0x3]  ;;  %v16131_v57 = vld [vmem:[%s18282_s7 + $0x20] sm:$0xff]  }
 0x8b8   : > { %v10364_v11 = vpack.c.bf16 %v10348_v3, %v10348_v3  ;;  %v10312_v47 = vmul.f32 %v17771_v19, %v10266_v41  ;;  %15065 = vmatmul.mubr.msk.bf16.vlgmr.msra.gmra.mrb[116].mxu0 %vm10391_vm3, %v10361_v21  ;;  %11540 = vrot.lane.b32.xlu0 %v10363_v37, %s16461_s25  ;;  %v15045_v0 = vpop.f32.mrb[106].mxu1  ;;  %v10389_v3 = vld [vmem:[%s18281_s29 + $0x1c] sm:$0x3]  ;;  %v11090_v41 = vand.u32 %v17624_v1, %v10390_v14 }
 0x8b9   : > { %v10337_v7 = vadd.f32 %v17773_v9, %v10314_v43  ;;  %v10315_v10 = vmul.f32 %v15045_v0, %v17771_v19  ;;  %v10269_v17 = vpop.f32.mrb[107].mxu1  ;;  %15075 = vmatpush3.bf16.msra.mxu0 %v10584_v27  ;;  %15076 = vmatprep.mubr.msk.bf16.mxu0 %vm16460_vm2, %v16458_v56  ;;  %v10388_v27 = vld [vmem:[%s18281_s29 + $0x1a] sm:$0x3]  ;;  %v11044_v43 = vand.u32 %v17624_v1, %v10389_v3  ;;  %v16133_v0 = vld [vmem:[%s18282_s7 + $0x40] sm:$0xff]  }
 0x8ba   : > { %v10335_v5 = vadd.f32 %v17773_v9, %v10312_v47  ;;  %v10313_v22 = vmul.f32 %v17771_v19, %v10269_v17  ;;  %11598 = vrot.lane.b32.xlu1 %v10364_v11, %s16461_s25  ;;  %15071 = vmatmul.mubr.msk.bf16.vlgmr.msra.gmra.mrb[116].mxu1 %vm10391_vm3, %v10362_v30  ;;  %v16132_v47 = vld [vmem:[%s18282_s7 + $0x28] sm:$0xff]  }
 0x8bb   : > { %15081 = vmatpush3.bf16.msra.mxu1 %v10630_v52  ;;  %15086 = vmatprep.subr.bf16.mxu0 %v16458_v56  ;;  %v10338_v46 = vadd.f32 %v17773_v9, %v10315_v10  ;;  %v10353_v12 = vmax.f32 %v10337_v7, 0.0  ;;  %v16130_v52 = vld [vmem:[%s18282_s7 + $0x8] sm:$0xff]  }
 0x8bc   : > { %v10351_v40 = vmax.f32 %v10335_v5, 0.0  ;;  %v10336_v33 = vadd.f32 %v17773_v9, %v10313_v22  ;;  %11656 = vrot.lane.b32.xlu0 %v10365_v36, %s16461_s25  ;;  %15082 = vmatprep.mubr.msk.bf16.mxu1 %vm16460_vm2, %v16458_v56  ;;  %v16134_v17 = vld [vmem:[%s18282_s7 + $0x48] sm:$0xff]  }
 0x8bd   : > { %15092 = vmatprep.subr.bf16.mxu1 %v16458_v56  ;;  %v10354_v42 = vmax.f32 %v10338_v46, 0.0  ;;  %v10369_v28 = vpack.c.bf16 %v10353_v12, %v10353_v12  ;;  %v16136_v22 = vld [vmem:[%s18282_s7 + $0x68] sm:$0xff]   ;;  %v16139_v46 = vld [vmem:[%s18282_s7 + $0xa0] sm:$0xff]  }
 0x8be   : > { %v10367_v20 = vpack.c.bf16 %v10351_v40, %v10351_v40  ;;  %v10352_v60 = vmax.f32 %v10336_v33, 0.0  ;;  %11714 = vrot.lane.b32.xlu1 %v10366_v50, %s16461_s25  ;;  %v15048_v15 = vpop.f32.mrb[108].mxu1  ;;  %v16138_v40 = vld [vmem:[%s18282_s7 + $0x88] sm:$0xff]   ;;  %v16145_v12 = vld [vmem:[%s18283_s30] sm:$0xff]  }
 0x8bf   : > { %v10318_v44 = vmul.f32 %v15048_v15, %v17771_v19  ;;  %v10282_v45 = vpop.f32.mrb[109].mxu1  ;;  %v10370_v25 = vpack.c.bf16 %v10354_v42, %v10354_v42  ;;  %v16142_v15 = vld [vmem:[%s18282_s7 + $0xc8] sm:$0xff]  }
 0x8c0   : > { %v10368_v63 = vpack.c.bf16 %v10352_v60, %v10352_v60  ;;  %v10316_v16 = vmul.f32 %v17771_v19, %v10282_v45  ;;  %15077 = vmatmul.mubr.msk.bf16.vlgmr.msra.gmra.mrb[120].mxu0 %vm10391_vm3, %v10363_v37  ;;  %11772 = vrot.lane.b32.xlu0 %v10367_v20, %s16461_s25  ;;  %v15049_v55 = vpop.f32.mrb[110].mxu1  ;;  %v10998_v37 = vand.u32 %v17624_v1, %v10388_v27 }
 0x8c1   : > { %v10319_v23 = vmul.f32 %v15049_v55, %v17771_v19  ;;  %v10285_v21 = vpop.f32.mrb[111].mxu1  ;;  %15087 = vmatpush3.bf16.msra.mxu0 %v10676_v39  ;;  %15088 = vmatprep.mubr.msk.bf16.mxu0 %vm16460_vm2, %v16458_v56  ;;  %v10341_v2 = vadd.f32 %v17773_v9, %v10318_v44  ;;  %v16146_v39 = vld [vmem:[%s18283_s30 + $0x8] sm:$0xff]   ;;  %v16143_v44 = vld [vmem:[%s18282_s7 + $0xe0] sm:$0xff]  }
 0x8c2   : > { %v10339_v18 = vadd.f32 %v17773_v9, %v10316_v16  ;;  %v10317_v26 = vmul.f32 %v17771_v19, %v10285_v21  ;;  %11830 = vrot.lane.b32.xlu1 %v10368_v63, %s16461_s25  ;;  %15083 = vmatmul.mubr.msk.bf16.vlgmr.msra.gmra.mrb[120].mxu1 %vm10391_vm3, %v10364_v11  ;;  %v10384_v19 = vld [vmem:[%s18281_s29 + $0x12] sm:$0x3] }
 0x8c3   : > { %15093 = vmatpush3.bf16.msra.mxu1 %v10722_v62  ;;  %15098 = vmatprep.subr.bf16.mxu0 %v16458_v56  ;;  %v10342_v61 = vadd.f32 %v17773_v9, %v10319_v23  ;;  %v10357_v51 = vmax.f32 %v10341_v2, 0.0  ;;  %v16144_v62 = vld [vmem:[%s18282_s7 + $0xe8] sm:$0xff]  }
 0x8c4   : > { %v10355_v13 = vmax.f32 %v10339_v18, 0.0  ;;  %v10340_v34 = vadd.f32 %v17773_v9, %v10317_v26  ;;  %11888 = vrot.lane.b32.xlu0 %v10369_v28, %s16461_s25  ;;  %15094 = vmatprep.mubr.msk.bf16.mxu1 %vm16460_vm2, %v16458_v56  ;;  %v10814_v9 = vand.u32 %v17624_v1, %v10384_v19  ;;  %v16129_v1 = vld [vmem:[%s18282_s7] sm:$0xff]  }
 0x8c5   : > { %15104 = vmatprep.subr.bf16.mxu1 %v16458_v56  ;;  %v10358_v4 = vmax.f32 %v10342_v61, 0.0  ;;  %v10373_v8 = vpack.c.bf16 %v10357_v51, %v10357_v51 }
 0x8c6   : > { %v10371_v30 = vpack.c.bf16 %v10355_v13, %v10355_v13  ;;  %v10356_v48 = vmax.f32 %v10340_v34, 0.0  ;;  %11946 = vrot.lane.b32.xlu1 %v10370_v25, %s16461_s25 }
 0x8c7   : > { %v10374_v35 = vpack.c.bf16 %v10358_v4, %v10358_v4 }
 0x8c8   : > { %v10372_v53 = vpack.c.bf16 %v10356_v48, %v10356_v48  ;;  %15089 = vmatmul.mubr.msk.bf16.vlgmr.msra.gmra.mrb[124].mxu0 %vm10391_vm3, %v10365_v36  ;;  %12004 = vrot.lane.b32.xlu0 %v10371_v30, %s16461_s25  ;;  %v16135_v36 = vld [vmem:[%s18282_s7 + $0x60] sm:$0xff]  }
 0x8c9   : > { %15099 = vmatpush3.bf16.msra.mxu0 %v10768_v59  ;;  %15100 = vmatprep.mubr.msk.bf16.mxu0 %vm16460_vm2, %v16458_v56 }
 0x8ca   : > { %15095 = vmatmul.mubr.msk.bf16.vlgmr.msra.gmra.mrb[124].mxu1 %vm10391_vm3, %v10366_v50  ;;  %12062 = vrot.lane.b32.xlu1 %v10372_v53, %s16461_s25 }
 0x8cb   : > { %15105 = vmatpush3.bf16.msra.mxu1 %v10814_v9  ;;  %15110 = vmatprep.subr.bf16.mxu0 %v16458_v56 }
 0x8cc   : > { %12120 = vrot.lane.b32.xlu0 %v10373_v8, %s16461_s25  ;;  %15106 = vmatprep.mubr.msk.bf16.mxu1 %vm16460_vm2, %v16458_v56 }
 0x8cd   : > { %15116 = vmatprep.subr.bf16.mxu1 %v16458_v56 }
 0x8ce   : > { %12178 = vrot.lane.b32.xlu1 %v10374_v35, %s16461_s25 }
 0x8d0   : > { %15101 = vmatmul.mubr.msk.bf16.vlgmr.msra.gmra.mrb[128].mxu0 %vm10391_vm3, %v10367_v20  ;;  %v16141_v20 = vld [vmem:[%s18282_s7 + $0xc0] sm:$0xff]  }
 0x8d1   : > { %15111 = vmatpush3.bf16.msra.mxu0 %v10860_v38  ;;  %15112 = vmatprep.mubr.msk.bf16.mxu0 %vm16460_vm2, %v16458_v56 }
 0x8d2   : > { %15107 = vmatmul.mubr.msk.bf16.vlgmr.msra.gmra.mrb[128].mxu1 %vm10391_vm3, %v10368_v63  ;;  %15122 = vmatprep.subr.bf16.mxu0 %v16458_v56 }
 0x8d3   : > { %15117 = vmatpush3.bf16.msra.mxu1 %v10906_v31  ;;  %15118 = vmatprep.mubr.msk.bf16.mxu1 %vm16460_vm2, %v16458_v56 }
 0x8d4   : > { %15128 = vmatprep.subr.bf16.mxu1 %v16458_v56 }
 0x8d8   : > { %15113 = vmatmul.mubr.msk.bf16.vlgmr.msra.gmra.mrb[132].mxu0 %vm10391_vm3, %v10369_v28 }
 0x8d9   : > { %15123 = vmatpush3.bf16.msra.mxu0 %v10952_v6  ;;  %15124 = vmatprep.mubr.msk.bf16.mxu0 %vm16460_vm2, %v16458_v56 }
 0x8da   : > { %15119 = vmatmul.mubr.msk.bf16.vlgmr.msra.gmra.mrb[132].mxu1 %vm10391_vm3, %v10370_v25  ;;  %15134 = vmatprep.subr.bf16.mxu0 %v16458_v56 }
 0x8db   : > { %15129 = vmatpush3.bf16.msra.mxu1 %v10998_v37  ;;  %15130 = vmatprep.mubr.msk.bf16.mxu1 %vm16460_vm2, %v16458_v56 }
 0x8dc   : > { %15140 = vmatprep.subr.bf16.mxu1 %v16458_v56 }
 0x8e0   : > { %15125 = vmatmul.mubr.msk.bf16.vlgmr.msra.gmra.mrb[136].mxu0 %vm10391_vm3, %v10371_v30 }
 0x8e1   : > { %15135 = vmatpush3.bf16.msra.mxu0 %v11044_v43  ;;  %15136 = vmatprep.mubr.msk.bf16.mxu0 %vm16460_vm2, %v16458_v56 }
 0x8e2   : > { %15131 = vmatmul.mubr.msk.bf16.vlgmr.msra.gmra.mrb[136].mxu1 %vm10391_vm3, %v10372_v53  ;;  %15146 = vmatprep.subr.bf16.mxu0 %v16458_v56 }
 0x8e3   : > { %15141 = vmatpush3.bf16.msra.mxu1 %v11090_v41  ;;  %15142 = vmatprep.mubr.msk.bf16.mxu1 %vm16460_vm2, %v16458_v56 }
 0x8e4   : > { %15154 = vmatprep.subr.bf16.mxu1 %v16458_v56 }
 0x8e8   : > { %15137 = vmatmul.mubr.msk.bf16.vlgmr.msra.gmra.mrb[140].mxu0 %vm10391_vm3, %v10373_v8 }
 0x8e9   : > { %15150 = vmatprep.mubr.msk.bf16.mxu0 %vm16460_vm2, %v16458_v56  ;;  %15147 = vmatpush3.bf16.msra.mxu0 %v16145_v12 }
 0x8ea   : > { %15143 = vmatmul.mubr.msk.bf16.vlgmr.msra.gmra.mrb[140].mxu1 %vm10391_vm3, %v10374_v35  ;;  %15148 = vmatprep.subr.bf16.mxu0 %v16458_v56 }
 0x8eb   : > { %15155 = vmatpush3.bf16.msra.mxu1 %v16129_v1  ;;  %15158 = vmatprep.mubr.msk.bf16.mxu1 %vm16460_vm2, %v16458_v56 }
 0x8ec   : > { %15156 = vmatprep.subr.bf16.mxu1 %v16458_v56 }
 0x8ed   : > { %15149 = vmatpush3.bf16.msra.mxu0 %v16146_v39 }
 0x8ee   : > { %15162 = vmatprep.subr.bf16.mxu0 %v16458_v56 }
 0x8ef   : > { %15157 = vmatpush3.bf16.msra.mxu1 %v16130_v52 }
 0x8f0   : > { %15170 = vmatprep.subr.bf16.mxu1 %v16458_v56 }
 0x921   : > { %v11425_v7 = vpop.permute.xlu1 %11424 }
 0x922   : > { %v11309_v11 = vpop.permute.xlu0 %11308 }
 0x923   : > { %15159 = vmatmul.mubr.msk.bf16.vlgmr.msra.gmra.mrb[144].mxu1 %vm11132_vm4, %v11309_v11 }
 0x924   : > { %15171 = vmatpush3.bf16.msra.mxu1 %v16131_v57  ;;  %15174 = vmatprep.mubr.msk.bf16.mxu1 %vm16460_vm2, %v16458_v56 }
 0x925   : > { %15172 = vmatprep.subr.bf16.mxu1 %v16458_v56 }
 0x926   : > { %v17964_v10 = vpop.permute.xlu0 %11366 }
 0x928   : > { %15173 = vmatpush3.bf16.msra.mxu1 %v16132_v47 }
 0x929   : > { %15186 = vmatprep.subr.bf16.mxu1 %v16458_v56 }
 0x92a   : > { %v11541_v5 = vpop.permute.xlu0 %11540 }
 0x92b   : > { %15175 = vmatmul.mubr.msk.bf16.vlgmr.msra.gmra.mrb[148].mxu1 %vm11132_vm4, %v11425_v7 }
 0x92c   : > { %15187 = vmatpush3.bf16.msra.mxu1 %v16133_v0  ;;  %15190 = vmatprep.mubr.msk.bf16.mxu1 %vm16460_vm2, %v16458_v56 }
 0x92d   : > { %15188 = vmatprep.subr.bf16.mxu1 %v16458_v56 }
 0x92e   : > { %v11657_v50 = vpop.permute.xlu0 %11656 }
 0x930   : > { %15189 = vmatpush3.bf16.msra.mxu1 %v16134_v17 }
 0x931   : > { %15202 = vmatprep.subr.bf16.mxu1 %v16458_v56 }
 0x932   : > { %v11773_v33 = vpop.permute.xlu0 %11772 }
 0x933   : > { %15191 = vmatmul.mubr.msk.bf16.vlgmr.msra.gmra.mrb[152].mxu1 %vm11132_vm4, %v11541_v5 }
 0x934   : > { %15203 = vmatpush3.bf16.msra.mxu1 %v16135_v36  ;;  %15206 = vmatprep.mubr.msk.bf16.mxu1 %vm16460_vm2, %v16458_v56 }
 0x935   : > { %15204 = vmatprep.subr.bf16.mxu1 %v16458_v56 }
 0x936   : > { %v11889_v60 = vpop.permute.xlu0 %11888 }
 0x938   : > { %15205 = vmatpush3.bf16.msra.mxu1 %v16136_v22 }
 0x939   : > { %15218 = vmatprep.subr.bf16.mxu1 %v16458_v56 }
 0x93a   : > { %v12005_v45 = vpop.permute.xlu0 %12004 }
 0x93b   : > { %15207 = vmatmul.mubr.msk.bf16.vlgmr.msra.gmra.mrb[156].mxu1 %vm11132_vm4, %v11657_v50 }
 0x93c   : > { %15219 = vmatpush3.bf16.msra.mxu1 %v16137_v29  ;;  %15222 = vmatprep.mubr.msk.bf16.mxu1 %vm16460_vm2, %v16458_v56 }
 0x93d   : > { %15220 = vmatprep.subr.bf16.mxu1 %v16458_v56 }
 0x93e   : > { %v12121_v42 = vpop.permute.xlu0 %12120 }
 0x940   : > { %15221 = vmatpush3.bf16.msra.mxu1 %v16138_v40 }
 0x941   : > { %15234 = vmatprep.subr.bf16.mxu1 %v16458_v56 }
 0x943   : > { %15223 = vmatmul.mubr.msk.bf16.vlgmr.msra.gmra.mrb[160].mxu1 %vm11132_vm4, %v11773_v33 }
 0x944   : > { %15235 = vmatpush3.bf16.msra.mxu1 %v16139_v46  ;;  %15238 = vmatprep.mubr.msk.bf16.mxu1 %vm16460_vm2, %v16458_v56 }
 0x945   : > { %15236 = vmatprep.subr.bf16.mxu1 %v16458_v56 }
 0x948   : > { %15237 = vmatpush3.bf16.msra.mxu1 %v16140_v49 }
 0x949   : > { %15250 = vmatprep.subr.bf16.mxu1 %v16458_v56 }
 0x94b   : > { %15239 = vmatmul.mubr.msk.bf16.vlgmr.msra.gmra.mrb[164].mxu1 %vm11132_vm4, %v11889_v60 }
 0x94c   : > { %15251 = vmatpush3.bf16.msra.mxu1 %v16141_v20  ;;  %15254 = vmatprep.mubr.msk.bf16.mxu1 %vm16460_vm2, %v16458_v56 }
 0x94d   : > { %15252 = vmatprep.subr.bf16.mxu1 %v16458_v56 }
 0x950   : > { %15253 = vmatpush3.bf16.msra.mxu1 %v16142_v15 }
 0x951   : > { %15266 = vmatprep.subr.bf16.mxu1 %v16458_v56 }
 0x953   : > { %15255 = vmatmul.mubr.msk.bf16.vlgmr.msra.gmra.mrb[168].mxu1 %vm11132_vm4, %v12005_v45 }
 0x954   : > { %15267 = vmatpush3.bf16.msra.mxu1 %v16143_v44  ;;  %15270 = vmatprep.mubr.msk.bf16.mxu1 %vm16460_vm2, %v16458_v56 }
 0x955   : > { %15268 = vmatprep.subr.bf16.mxu1 %v16458_v56 }
 0x958   : > { %15269 = vmatpush3.bf16.msra.mxu1 %v16144_v62 }
 0x95b   : > { %15271 = vmatmul.mubr.msk.bf16.vlgmr.msra.gmra.mrb[172].mxu1 %vm11132_vm4, %v12121_v42 }
 0x983   : > { %v10436_v63 = vpop.f32.mrb[112].mxu0 }
 0x984   : > { %v15054_v16 = vpop.f32.mrb[113].mxu0  ;;  %v11133_v23 = vsel %vm11132_vm4, %v10436_v63, 0.0 }
 0x985   : > { %v10439_v55 = vpop.f32.mrb[114].mxu0  ;;  %v10482_v28 = vpop.f32.mrb[112].mxu1 }
 0x986   : > { %v11134_v21 = vsel %vm11132_vm4, %v10482_v28, 0.0  ;;  %v15055_v2 = vpop.f32.mrb[115].mxu0  ;;  %v15060_v18 = vpop.f32.mrb[113].mxu1 }
 0x987   : > { %v11135_v26 = vadd.f32 %v11134_v21, %v11133_v23  ;;  %v10485_v54 = vpop.f32.mrb[114].mxu1 }
 0x988   : > { %v15061_v25 = vpop.f32.mrb[115].mxu1 }
 0x98b   : > { %v10528_v13 = vpop.f32.mrb[116].mxu0 }
 0x98c   : > { %v11136_v61 = vsel %vm11132_vm4, %v10528_v13, 0.0  ;;  %v15066_v34 = vpop.f32.mrb[117].mxu0 }
 0x98d   : > { %v11137_v19 = vadd.f32 %v11136_v61, %v11135_v26  ;;  %v10531_v59 = vpop.f32.mrb[118].mxu0  ;;  %v10574_v51 = vpop.f32.mrb[116].mxu1 }
 0x98e   : > { %v11138_v30 = vsel %vm11132_vm4, %v10574_v51, 0.0  ;;  %v15067_v48 = vpop.f32.mrb[119].mxu0  ;;  %v15072_v9 = vpop.f32.mrb[117].mxu1 }
 0x98f   : > { %v11139_v4 = vadd.f32 %v11138_v30, %v11137_v19  ;;  %v10577_v53 = vpop.f32.mrb[118].mxu1 }
 0x990   : > { %v15073_v8 = vpop.f32.mrb[119].mxu1 }
 0x993   : > { %v10620_v24 = vpop.f32.mrb[120].mxu0 }
 0x994   : > { %v11140_v35 = vsel %vm11132_vm4, %v10620_v24, 0.0  ;;  %v15078_v32 = vpop.f32.mrb[121].mxu0 }
 0x995   : > { %v11141_v38 = vadd.f32 %v11140_v35, %v11139_v4  ;;  %v10623_v31 = vpop.f32.mrb[122].mxu0  ;;  %v10666_v58 = vpop.f32.mrb[120].mxu1 }
 0x996   : > { %v11142_v27 = vsel %vm11132_vm4, %v10666_v58, 0.0  ;;  %v15079_v6 = vpop.f32.mrb[123].mxu0  ;;  %v15084_v37 = vpop.f32.mrb[121].mxu1  ;;  %v13245_v58 = vld [vmem:[#allocation15] ss:$0 sm:$0xff] }
 0x997   : > { %v11143_v3 = vadd.f32 %v11142_v27, %v11141_v38  ;;  %v10669_v14 = vpop.f32.mrb[122].mxu1 }
 0x998   : > { %v15085_v43 = vpop.f32.mrb[123].mxu1 }
 0x99b   : > { %v10712_v41 = vpop.f32.mrb[124].mxu0 }
 0x99c   : > { %v11144_v1 = vsel %vm11132_vm4, %v10712_v41, 0.0  ;;  %v15090_v52 = vpop.f32.mrb[125].mxu0 }
 0x99d   : > { %v11145_v57 = vadd.f32 %v11144_v1, %v11143_v3  ;;  %v10715_v11 = vpop.f32.mrb[126].mxu0  ;;  %v10758_v47 = vpop.f32.mrb[124].mxu1  ;;  %v16147_v1 = vld [vmem:[%s18282_s7 + $0x10] sm:$0xff]  }
 0x99e   : > { %v11146_v0 = vsel %vm11132_vm4, %v10758_v47, 0.0  ;;  %v15091_v7 = vpop.f32.mrb[127].mxu0  ;;  %v15096_v17 = vpop.f32.mrb[125].mxu1  ;;  %v16149_v11 = vld [vmem:[%s18282_s7 + $0x30] sm:$0xff]   ;;  %v16150_v47 = vld [vmem:[%s18282_s7 + $0x38] sm:$0xff]  }
 0x99f   : > { %v11147_v36 = vadd.f32 %v11146_v0, %v11145_v57  ;;  %v10761_v5 = vpop.f32.mrb[126].mxu1  ;;  %v16148_v57 = vld [vmem:[%s18282_s7 + $0x18] sm:$0xff]   ;;  %v16151_v0 = vld [vmem:[%s18282_s7 + $0x50] sm:$0xff]   ;;  %v11483_v7 = vpop.permute.xlu1 %11482 }
 0x9a0   : > { %v15097_v22 = vpop.f32.mrb[127].mxu1  ;;  %v16153_v17 = vld [vmem:[%s18282_s7 + $0x70] sm:$0xff]   ;;  %v16154_v5 = vld [vmem:[%s18282_s7 + $0x78] sm:$0xff]  }
 0x9a1   : > { %v16155_v22 = vld [vmem:[%s18282_s7 + $0x90] sm:$0xff]  }
 0x9a3   : > { %v10804_v29 = vpop.f32.mrb[128].mxu0 }
 0x9a4   : > { %v11148_v50 = vsel %vm11132_vm4, %v10804_v29, 0.0  ;;  %v15102_v40 = vpop.f32.mrb[129].mxu0 }
 0x9a5   : > { %v11149_v46 = vadd.f32 %v11148_v50, %v11147_v36  ;;  %v10807_v33 = vpop.f32.mrb[130].mxu0  ;;  %v10850_v49 = vpop.f32.mrb[128].mxu1  ;;  %v16156_v50 = vld [vmem:[%s18282_s7 + $0x98] sm:$0xff]   ;;  %v16157_v40 = vld [vmem:[%s18282_s7 + $0xb0] sm:$0xff]  }
 0x9a6   : > { %v11150_v12 = vsel %vm11132_vm4, %v10850_v49, 0.0  ;;  %v15103_v39 = vpop.f32.mrb[131].mxu0  ;;  %v15108_v20 = vpop.f32.mrb[129].mxu1  ;;  %v16158_v33 = vld [vmem:[%s18282_s7 + $0xb8] sm:$0xff]   ;;  %v16159_v49 = vld [vmem:[%s18282_s7 + $0xd0] sm:$0xff]  }
 0x9a7   : > { %v11151_v60 = vadd.f32 %v11150_v12, %v11149_v46  ;;  %v10853_v15 = vpop.f32.mrb[130].mxu1  ;;  %v11599_v36 = vpop.permute.xlu1 %11598 }
 0x9a8   : > { %v15109_v44 = vpop.f32.mrb[131].mxu1  ;;  %v16160_v15 = vld [vmem:[%s18282_s7 + $0xd8] sm:$0xff]  }
 0x9ab   : > { %v10896_v45 = vpop.f32.mrb[132].mxu0  ;;  %v11715_v29 = vpop.permute.xlu1 %11714 }
 0x9ac   : > { %v11152_v62 = vsel %vm11132_vm4, %v10896_v45, 0.0  ;;  %v15114_v42 = vpop.f32.mrb[133].mxu0  ;;  %v16161_v45 = vld [vmem:[%s18282_s7 + $0xf0] sm:$0xff]  }
 0x9ad   : > { %v11153_v63 = vadd.f32 %v11152_v62, %v11151_v60  ;;  %v10899_v16 = vpop.f32.mrb[134].mxu0  ;;  %v10942_v55 = vpop.f32.mrb[132].mxu1 }
 0x9ae   : > { %v11154_v28 = vsel %vm11132_vm4, %v10942_v55, 0.0  ;;  %v15115_v23 = vpop.f32.mrb[135].mxu0  ;;  %v15120_v21 = vpop.f32.mrb[133].mxu1  ;;  %v16162_v55 = vld [vmem:[%s18282_s7 + $0xf8] sm:$0xff]  }
 0x9af   : > { %v11155_v2 = vadd.f32 %v11154_v28, %v11153_v63  ;;  %v10945_v18 = vpop.f32.mrb[134].mxu1  ;;  %v11831_v46 = vpop.permute.xlu1 %11830 }
 0x9b0   : > { %v15121_v26 = vpop.f32.mrb[135].mxu1 }
 0x9b3   : > { %v10988_v54 = vpop.f32.mrb[136].mxu0  ;;  %v11947_v12 = vpop.permute.xlu1 %11946 }
 0x9b4   : > { %v11156_v25 = vsel %vm11132_vm4, %v10988_v54, 0.0  ;;  %v15126_v13 = vpop.f32.mrb[137].mxu0 }
 0x9b5   : > { %v11157_v61 = vadd.f32 %v11156_v25, %v11155_v2  ;;  %v10991_v34 = vpop.f32.mrb[138].mxu0  ;;  %v11034_v19 = vpop.f32.mrb[136].mxu1 }
 0x9b6   : > { %v11158_v59 = vsel %vm11132_vm4, %v11034_v19, 0.0  ;;  %v15127_v51 = vpop.f32.mrb[139].mxu0  ;;  %v15132_v30 = vpop.f32.mrb[137].mxu1 }
 0x9b7   : > { %v11159_v48 = vadd.f32 %v11158_v59, %v11157_v61  ;;  %v11037_v9 = vpop.f32.mrb[138].mxu1  ;;  %v12063_v62 = vpop.permute.xlu1 %12062 }
 0x9b8   : > { %v15133_v4 = vpop.f32.mrb[139].mxu1 }
 0x9bb   : > { %v11080_v53 = vpop.f32.mrb[140].mxu0  ;;  %v12179_v23 = vpop.permute.xlu1 %12178 }
 0x9bc   : > { %v11160_v8 = vsel %vm11132_vm4, %v11080_v53, 0.0  ;;  %v15138_v24 = vpop.f32.mrb[141].mxu0 }
 0x9bd   : > { %v11161_v35 = vadd.f32 %v11160_v8, %v11159_v48  ;;  %v11083_v32 = vpop.f32.mrb[142].mxu0  ;;  %v11126_v38 = vpop.f32.mrb[140].mxu1 }
 0x9be   : > { %v11162_v31 = vsel %vm11132_vm4, %v11126_v38, 0.0  ;;  %v15139_v27 = vpop.f32.mrb[143].mxu0  ;;  %v15144_v6 = vpop.f32.mrb[141].mxu1 }
 0x9bf   : > { %v11163_v37 = vadd.f32 %v11162_v31, %v11161_v35  ;;  %v11129_v3 = vpop.f32.mrb[142].mxu1 }
 0x9c0   : > { %v15145_v14 = vpop.f32.mrb[143].mxu1 }
 0x9c1   : > { %v11171_v43 = vadd.f32 %v13245_v58, %v11163_v37  ;;  %v13246_v58 = vld [vmem:[#allocation4] ss:$0 sm:$0xff] }
 0x9c3   : > { %v11172_v41 = vmax.f32 %v11171_v43, 0.0 }
 0x9c5   : > { %v11173_v52 = vpack.c.bf16 %v11172_v41, %v11172_v41 }
 0x9c7   : > { %15151 = vmatmul.mubr.msk.bf16.vlgmr.msra.gmra.mrb[144].mxu0 %vm11132_vm4, %v11173_v52 }
 0x9c8   : > { %15163 = vmatpush3.bf16.msra.mxu0 %v16147_v1  ;;  %15166 = vmatprep.mubr.msk.bf16.mxu0 %vm16460_vm2, %v16458_v56 }
 0x9c9   : > { %15164 = vmatprep.subr.bf16.mxu0 %v16458_v56 }
 0x9cc   : > { %15165 = vmatpush3.bf16.msra.mxu0 %v16148_v57 }
 0x9cd   : > { %15178 = vmatprep.subr.bf16.mxu0 %v16458_v56 }
 0x9cf   : > { %15167 = vmatmul.mubr.msk.bf16.vlgmr.msra.gmra.mrb[148].mxu0 %vm11132_vm4, %v17964_v10  ;;  %v16152_v10 = vld [vmem:[%s18282_s7 + $0x58] sm:$0xff]  }
 0x9d0   : > { %15179 = vmatpush3.bf16.msra.mxu0 %v16149_v11  ;;  %15182 = vmatprep.mubr.msk.bf16.mxu0 %vm16460_vm2, %v16458_v56 }
 0x9d1   : > { %15180 = vmatprep.subr.bf16.mxu0 %v16458_v56 }
 0x9d4   : > { %15181 = vmatpush3.bf16.msra.mxu0 %v16150_v47 }
 0x9d5   : > { %15194 = vmatprep.subr.bf16.mxu0 %v16458_v56 }
 0x9d7   : > { %15183 = vmatmul.mubr.msk.bf16.vlgmr.msra.gmra.mrb[152].mxu0 %vm11132_vm4, %v11483_v7 }
 0x9d8   : > { %15195 = vmatpush3.bf16.msra.mxu0 %v16151_v0  ;;  %15198 = vmatprep.mubr.msk.bf16.mxu0 %vm16460_vm2, %v16458_v56 }
 0x9d9   : > { %15196 = vmatprep.subr.bf16.mxu0 %v16458_v56 }
 0x9dc   : > { %15197 = vmatpush3.bf16.msra.mxu0 %v16152_v10 }
 0x9dd   : > { %15210 = vmatprep.subr.bf16.mxu0 %v16458_v56 }
 0x9df   : > { %15199 = vmatmul.mubr.msk.bf16.vlgmr.msra.gmra.mrb[156].mxu0 %vm11132_vm4, %v11599_v36 }
 0x9e0   : > { %15211 = vmatpush3.bf16.msra.mxu0 %v16153_v17  ;;  %15214 = vmatprep.mubr.msk.bf16.mxu0 %vm16460_vm2, %v16458_v56 }
 0x9e1   : > { %15212 = vmatprep.subr.bf16.mxu0 %v16458_v56 }
 0x9e4   : > { %15213 = vmatpush3.bf16.msra.mxu0 %v16154_v5 }
 0x9e5   : > { %15226 = vmatprep.subr.bf16.mxu0 %v16458_v56 }
 0x9e7   : > { %15215 = vmatmul.mubr.msk.bf16.vlgmr.msra.gmra.mrb[160].mxu0 %vm11132_vm4, %v11715_v29 }
 0x9e8   : > { %15227 = vmatpush3.bf16.msra.mxu0 %v16155_v22  ;;  %15230 = vmatprep.mubr.msk.bf16.mxu0 %vm16460_vm2, %v16458_v56 }
 0x9e9   : > { %15228 = vmatprep.subr.bf16.mxu0 %v16458_v56 }
 0x9ec   : > { %15229 = vmatpush3.bf16.msra.mxu0 %v16156_v50 }
 0x9ed   : > { %15242 = vmatprep.subr.bf16.mxu0 %v16458_v56 }
 0x9ef   : > { %15231 = vmatmul.mubr.msk.bf16.vlgmr.msra.gmra.mrb[164].mxu0 %vm11132_vm4, %v11831_v46 }
 0x9f0   : > { %15243 = vmatpush3.bf16.msra.mxu0 %v16157_v40  ;;  %15246 = vmatprep.mubr.msk.bf16.mxu0 %vm16460_vm2, %v16458_v56 }
 0x9f1   : > { %15244 = vmatprep.subr.bf16.mxu0 %v16458_v56 }
 0x9f4   : > { %15245 = vmatpush3.bf16.msra.mxu0 %v16158_v33 }
 0x9f5   : > { %15258 = vmatprep.subr.bf16.mxu0 %v16458_v56 }
 0x9f6   : > { %v11359_v39 = vpop.f32.mrb[144].mxu1 }
 0x9f7   : > { %v15160_v20 = vpop.f32.mrb[145].mxu1  ;;  %15247 = vmatmul.mubr.msk.bf16.vlgmr.msra.gmra.mrb[168].mxu0 %vm11132_vm4, %v11947_v12  ;;  %v12236_v41 = vsel %vm12235_vm5, %v11359_v39, 0.0 }
 0x9f8   : > { %v11362_v60 = vpop.f32.mrb[146].mxu1  ;;  %15259 = vmatpush3.bf16.msra.mxu0 %v16159_v49  ;;  %15262 = vmatprep.mubr.msk.bf16.mxu0 %vm16460_vm2, %v16458_v56 }
 0x9f9   : > { %v15161_v44 = vpop.f32.mrb[147].mxu1  ;;  %15260 = vmatprep.subr.bf16.mxu0 %v16458_v56 }
 0x9fc   : > { %15261 = vmatpush3.bf16.msra.mxu0 %v16160_v15 }
 0x9fd   : > { %15274 = vmatprep.subr.bf16.mxu0 %v16458_v56 }
 0x9fe   : > { %v11475_v42 = vpop.f32.mrb[148].mxu1 }
 0x9ff   : > { %v15176_v63 = vpop.f32.mrb[149].mxu1  ;;  %15263 = vmatmul.mubr.msk.bf16.vlgmr.msra.gmra.mrb[172].mxu0 %vm11132_vm4, %v12063_v62  ;;  %v12239_v47 = vsel %vm12235_vm5, %v11475_v42, 0.0 }
 0xa00   : > { %v11478_v16 = vpop.f32.mrb[150].mxu1  ;;  %15275 = vmatpush3.bf16.msra.mxu0 %v16161_v45  ;;  %15278 = vmatprep.mubr.msk.bf16.mxu0 %vm16460_vm2, %v16458_v56 }
 0xa01   : > { %v15177_v28 = vpop.f32.mrb[151].mxu1  ;;  %15276 = vmatprep.subr.bf16.mxu0 %v16458_v56 }
 0xa04   : > { %15277 = vmatpush3.bf16.msra.mxu0 %v16162_v55 }
 0xa06   : > { %v11591_v21 = vpop.f32.mrb[152].mxu1 }
 0xa07   : > { %v15192_v2 = vpop.f32.mrb[153].mxu1  ;;  %15279 = vmatmul.mubr.msk.bf16.vlgmr.msra.gmra.mrb[176].mxu0 %vm11132_vm4, %v12179_v23  ;;  %v12243_v50 = vsel %vm12235_vm5, %v11591_v21, 0.0 }
 0xa08   : > { %v11594_v18 = vpop.f32.mrb[154].mxu1 }
 0xa09   : > { %v15193_v26 = vpop.f32.mrb[155].mxu1 }
 0xa0e   : > { %v11707_v54 = vpop.f32.mrb[156].mxu1 }
 0xa0f   : > { %v15208_v25 = vpop.f32.mrb[157].mxu1  ;;  %v12247_v60 = vsel %vm12235_vm5, %v11707_v54, 0.0 }
 0xa10   : > { %v11710_v13 = vpop.f32.mrb[158].mxu1 }
 0xa11   : > { %v15209_v61 = vpop.f32.mrb[159].mxu1 }
 0xa16   : > { %v11823_v34 = vpop.f32.mrb[160].mxu1 }
 0xa17   : > { %v15224_v19 = vpop.f32.mrb[161].mxu1  ;;  %v12251_v55 = vsel %vm12235_vm5, %v11823_v34, 0.0 }
 0xa18   : > { %v11826_v59 = vpop.f32.mrb[162].mxu1 }
 0xa19   : > { %v15225_v51 = vpop.f32.mrb[163].mxu1 }
 0xa1e   : > { %v18141_v30 = vpop.f32.mrb[164].mxu1 }
 0xa1f   : > { %v15240_v56 = vpop.f32.mrb[165].mxu1  ;;  %v12255_v54 = vsel %vm12235_vm5, %v18141_v30, 0.0 }
 0xa20   : > { %v11942_v48 = vpop.f32.mrb[166].mxu1 }
 0xa21   : > { %v15241_v9 = vpop.f32.mrb[167].mxu1 }
 0xa26   : > { %v18143_v4 = vpop.f32.mrb[168].mxu1 }
 0xa27   : > { %v15256_v53 = vpop.f32.mrb[169].mxu1  ;;  %v12259_v34 = vsel %vm12235_vm5, %v18143_v4, 0.0 }
 0xa28   : > { %v12058_v8 = vpop.f32.mrb[170].mxu1 }
 0xa29   : > { %v15257_v24 = vpop.f32.mrb[171].mxu1 }
 0xa2e   : > { %v18145_v35 = vpop.f32.mrb[172].mxu1 }
 0xa2f   : > { %v15272_v32 = vpop.f32.mrb[173].mxu1  ;;  %v12263_v30 = vsel %vm12235_vm5, %v18145_v35, 0.0 }
 0xa30   : > { %v12174_v38 = vpop.f32.mrb[174].mxu1 }
 0xa31   : > { %v15273_v31 = vpop.f32.mrb[175].mxu1 }
 0xa9a   : > { %v11234_v27 = vpop.f32.mrb[144].mxu0 }
 0xa9b   : > { %v11235_v6 = vadd.f32 %v13246_v58, %v11234_v27  ;;  %v15152_v37 = vpop.f32.mrb[145].mxu0 }
 0xa9c   : > { %v11237_v3 = vpop.f32.mrb[146].mxu0 }
 0xa9d   : > { %16163 = vtanh.f32 %v11235_v6  ;;  %v15153_v14 = vpop.f32.mrb[147].mxu0 }
 0xa9e   : > { %v13298_v14 = vld [vmem:[#allocation17] ss:$0 sm:$0xff] }
 0xaa2   : > { %v11417_v43 = vpop.f32.mrb[148].mxu0 }
 0xaa3   : > { %v12237_v1 = vsel %vm12235_vm5, %v11417_v43, 0.0  ;;  %v15168_v52 = vpop.f32.mrb[149].mxu0 }
 0xaa4   : > { %v12238_v57 = vadd.f32 %v12237_v1, %v12236_v41  ;;  %v11420_v11 = vpop.f32.mrb[150].mxu0 }
 0xaa5   : > { %v15169_v0 = vpop.f32.mrb[151].mxu0 }
 0xaa6   : > { %v12240_v7 = vadd.f32 %v12239_v47, %v12238_v57 }
 0xaa7   : > { %v16164_v10 = vpop.eup %16163 }
 0xaa8   : > { %11242 = vst.msk [vmem:[%s673_s14] sm:$0xff] %vm11241_vm6, %v16164_v10 }
 0xaaa   : > { %v11533_v17 = vpop.f32.mrb[152].mxu0 }
 0xaab   : > { %v12241_v36 = vsel %vm12235_vm5, %v11533_v17, 0.0  ;;  %v15184_v5 = vpop.f32.mrb[153].mxu0 }
 0xaac   : > { %v12242_v22 = vadd.f32 %v12241_v36, %v12240_v7  ;;  %v11536_v29 = vpop.f32.mrb[154].mxu0 }
 0xaad   : > { %v15185_v40 = vpop.f32.mrb[155].mxu0 }
 0xaae   : > { %v12244_v46 = vadd.f32 %v12243_v50, %v12242_v22 }
 0xab2   : > { %v11649_v33 = vpop.f32.mrb[156].mxu0 }
 0xab3   : > { %v12245_v49 = vsel %vm12235_vm5, %v11649_v33, 0.0  ;;  %v15200_v12 = vpop.f32.mrb[157].mxu0 }
 0xab4   : > { %v12246_v39 = vadd.f32 %v12245_v49, %v12244_v46  ;;  %v11652_v20 = vpop.f32.mrb[158].mxu0 }
 0xab5   : > { %v15201_v15 = vpop.f32.mrb[159].mxu0 }
 0xab6   : > { %v12248_v44 = vadd.f32 %v12247_v60, %v12246_v39 }
 0xaba   : > { %v11765_v45 = vpop.f32.mrb[160].mxu0 }
 0xabb   : > { %v12249_v62 = vsel %vm12235_vm5, %v11765_v45, 0.0  ;;  %v15216_v42 = vpop.f32.mrb[161].mxu0 }
 0xabc   : > { %v12250_v63 = vadd.f32 %v12249_v62, %v12248_v44  ;;  %v11768_v16 = vpop.f32.mrb[162].mxu0 }
 0xabd   : > { %v15217_v28 = vpop.f32.mrb[163].mxu0 }
 0xabe   : > { %v12252_v23 = vadd.f32 %v12251_v55, %v12250_v63 }
 0xac2   : > { %v11881_v21 = vpop.f32.mrb[164].mxu0 }
 0xac3   : > { %v12253_v2 = vsel %vm12235_vm5, %v11881_v21, 0.0  ;;  %v15232_v18 = vpop.f32.mrb[165].mxu0 }
 0xac4   : > { %v12254_v26 = vadd.f32 %v12253_v2, %v12252_v23  ;;  %v11884_v25 = vpop.f32.mrb[166].mxu0 }
 0xac5   : > { %v15233_v13 = vpop.f32.mrb[167].mxu0 }
 0xac6   : > { %v12256_v61 = vadd.f32 %v12255_v54, %v12254_v26 }
 0xaca   : > { %v11997_v19 = vpop.f32.mrb[168].mxu0 }
 0xacb   : > { %v12257_v59 = vsel %vm12235_vm5, %v11997_v19, 0.0  ;;  %v15248_v51 = vpop.f32.mrb[169].mxu0 }
 0xacc   : > { %v12258_v56 = vadd.f32 %v12257_v59, %v12256_v61  ;;  %v12000_v48 = vpop.f32.mrb[170].mxu0 }
 0xacd   : > { %v15249_v9 = vpop.f32.mrb[171].mxu0 }
 0xace   : > { %v12260_v53 = vadd.f32 %v12259_v34, %v12258_v56 }
 0xad2   : > { %v12113_v8 = vpop.f32.mrb[172].mxu0 }
 0xad3   : > { %v12261_v24 = vsel %vm12235_vm5, %v12113_v8, 0.0  ;;  %v15264_v32 = vpop.f32.mrb[173].mxu0 }
 0xad4   : > { %v12262_v38 = vadd.f32 %v12261_v24, %v12260_v53  ;;  %v12116_v31 = vpop.f32.mrb[174].mxu0 }
 0xad5   : > { %v15265_v58 = vpop.f32.mrb[175].mxu0 }
 0xad6   : > { %v12264_v27 = vadd.f32 %v12263_v30, %v12262_v38 }
 0xada   : > { %v12229_v6 = vpop.f32.mrb[176].mxu0 }
 0xadb   : > { %v12265_v37 = vsel %vm12235_vm5, %v12229_v6, 0.0  ;;  %v15280_v3 = vpop.f32.mrb[177].mxu0 }
 0xadc   : > { %v12266_v4 = vadd.f32 %v12265_v37, %v12264_v27  ;;  %v12232_v43 = vpop.f32.mrb[178].mxu0 }
 0xadd   : > { %v15281_v41 = vpop.f32.mrb[179].mxu0 }
 0xade   : > { %v12274_v1 = vadd.f32 %v13298_v14, %v12266_v4 }
 0xae0   : > { %v12275_v52 = vsel %vm12235_vm5, %v12274_v1, -inf }
 0xae1   : > { %12276 = vmax.xlane.f32.xlu0 %v12275_v52 }
 0xb6e   : > { %v12277_v57 = vpop.xlane.xlu0 %12276 }
 0xb6f   : > { %v12278_v11 = vsub.f32 %v12274_v1, %v12277_v57 }
 0xb71   : > { %v12279_v47 = vmul.f32 1.442695, %v12278_v11 }
 0xb73   : > { %16165 = vpow2.f32 %v12279_v47 }
 0xb7d   : > { %v16166_v35 = vpop.eup %16165 }
 0xb7e   : > { %v12281_v0 = vsel %vm12235_vm5, %v16166_v35, 0.0 }
 0xb7f   : > { %12282 = vadd.xlane.f32.xlu1 %v12281_v0 }
 0xc0c   : > { %v12283_v7 = vpop.xlane.xlu1 %12282 }
 0xc0d   : > { %16167 = vrcp.f32 %v12283_v7 }
 0xc17   : > { %v16168_v10 = vpop.eup %16167 }
 0xc18   : > { %v12285_v17 = vmul.f32 %v16168_v10, %v16166_v35 }
 0xc1a   : > { %12286 = vst.msk [vmem:[%s663_s26] sm:$0xff] %vm12235_vm5, %v12285_v17 }
 0xc1b   : > { %16379 = shalt.err (!%p16376_p7)
}
 0xc1c   : > { %s16380_s22 = scalar_lea.hbm %s18178_s24, 128  ;;  %s16384_s20 = scalar_lea.hbm %s18286_s9, 256 }
 0xc1d   : > { %p16381_p8 = scmp.ne.s32.totalorder %s18178_s24, %s16380_s22  ;;  %p16385_p1 = scmp.lt.u32.totalorder %s18178_s24, %s18286_s9 }
 0xc1e   : > { %p16386_p3 = scmp.lt.u32.totalorder %s16384_s20, %s16380_s22  ;;  %p16388_p2 = scmp.lt.u32.totalorder %s16380_s22, %s18178_s24 }
 0xc1f   : > { %p16382_p9 = pnand %p16381_p8, %p18287_p10 }
 0xc20   : > { %p16387_p6 = por %p16386_p3, %p16385_p1 }
 0xc21   : > { %p16383_p13 = pneg %p16382_p9 }
 0xc22   : > { %p16389_p0 = por %p16388_p2, %p16387_p6 }
 0xc24   : > { %p16390_p5 = pnand %p16389_p0, %p16383_p13 }
 0xc26   : > { %16393 = shalt.err (!%p16390_p5)
}
 0xc27   : > { %15310 = dma.vmem_to_hbm [thread:$0]  (%p18287_p10), %s18180_s19, 128, %s18178_s24, %s12288_s21  }
 0xc28 PF: > { %s18288_s25 = sld [smem:[#allocation24_spill]]  ;;  %s18289_s23 = sld [smem:[#allocation28_spill]] }
 0xc2e   : > { %s12320_s10 = sand.u32 1, %s18288_s25   ;;  %p18290_p12 = scmp.ne.s32.totalorder %s18289_s23, 0 }
 0xc2f   : > { %s12321_s27 = scalar_lea.sflag [#allocation8], %s12320_s10 }
 0xc30   : > { %p15335_p4 = pnand %p12475_p11, %p18290_p12 }
 0xc32   : > { %16427 = dma.done.wait (!%p15335_p4), %s12321_s27, 128  }
 0xc33   : > { %16429 = vsyncadd (!%p15335_p4), %s12321_s27, 4294967168  ;;  %s18291_s18 = sld [smem:[#allocation25_spill]]  ;;  %s18292_s28 = sld [smem:[#allocation26_spill]] }
 0xc34   : > { %s18293_s15 = smov %s16436_s16  ;;  %s18294_s16 = smov %s16440_s17 }
 0xc39   : > { %p31_p7 = scmp.ge.s32.totalorder %s18291_s18, 4   ;;  %s18295_s17 = smov %s18292_s28 }
 0xc3b   :  { %33 = sbr.rel (!%p31_p7) target bundleno = 13 (0xd), region = 216 }
 0xc42   :  { %12333 = vsyncpa [#allocation7], 1 }
 0xc43   :  { %12335 = vsyncpa [#allocation7 + $0x1], 1 }
 0xc44   :  { %12336 = vsyncpa [#allocation10], 1 }
 0xc45   :  { %12337 = vsyncpa [#allocation13], 1 }
 0xc46   :  { %12338 = vsyncpa [#allocation16], 1 }
 0xc47   :  { %12339 = vsyncpa [#allocation8], 1 }
 0xc48   :  { %12341 = vsyncpa [#allocation8 + $0x1], 1 }

</bundles_post_ra>
